<compile_context>
chip_gen: v5e
topology: v5e:2x2
jax: 0.10.0
libtpu: 0.0.40
codegen_flags: <defaults>
</compile_context>

<pallas_src>
import jax
import jax.numpy as jnp
import numpy as np
from jax.experimental import pallas as pl
from jax.experimental.pallas import tpu as pltpu

HIDDEN = 256


def _round_up(x: int, m: int) -> int:
    return ((x + m - 1) // m) * m


def _choose_batch_tile(B: int, requested: int):
    """Pick (batch_tile, B_pad): pad batch only to the next multiple of 128,
    then choose the largest multiple-of-128 divisor of B_pad that is
    <= requested, preferring >= 2 grid steps (v7x megacore) when possible."""
    B_pad = _round_up(max(B, 1), 128)
    cands = [d for d in range(128, B_pad + 1, 128) if B_pad % d == 0]
    if B_pad >= 256:
        multi = [d for d in cands if B_pad // d >= 2]
        if multi:
            cands = multi
    fitting = [d for d in cands if d <= requested]
    tile = max(fitting) if fitting else min(cands)
    return tile, B_pad


# ----------------------------------------------------------------------------
# Kernel
# ----------------------------------------------------------------------------
def _make_kernel(n_resid: int, two_proj: bool, matmul_dtype):
    """Fused MLP kernel body.

    Ref order:
      x, w_proj, b_proj, [w_r, b_r]*n_resid, w_out, b_out, out
    (w_proj is block-diagonal [[w0,0],[0,w1]] when two_proj.)
    """
    dot_kwargs = dict(preferred_element_type=jnp.float32)
    if matmul_dtype == jnp.float32:
        # NOTE: never use this path on v5e (HIGHEST -> 3-6 MXU passes).
        dot_kwargs["precision"] = jax.lax.Precision.HIGHEST

    def mm(x, w_ref):
        # Matmul operands in matmul_dtype, accumulation in f32 on the MXU.
        return jnp.dot(x.astype(matmul_dtype), w_ref[...], **dot_kwargs)

    def kernel(*refs):
        refs = list(refs)
        out_ref = refs.pop()                 # last positional ref = output tile
        x_ref = refs[0]
        rest = refs[1:]

        w_proj_ref, b_proj_ref = rest[:2]
        rest = rest[2:]

        # Single fused first-layer projection (block-diagonal when two_proj).
        h = jnp.maximum(mm(x_ref[...], w_proj_ref) + b_proj_ref[...], 0.0)
        if two_proj:
            x = h[:, :HIDDEN] + h[:, HIDDEN:]     # relu(xl@w0+b0)+relu(xh@w1+b1)
        else:
            x = h

        # Residual blocks: x = x + relu(x @ W + b)  (f32 elementwise)
        for r in range(n_resid):
            w_ref = rest[2 * r]
            b_ref = rest[2 * r + 1]
            x = x + jnp.maximum(mm(x, w_ref) + b_ref[...], 0.0)

        w_out_ref = rest[2 * n_resid]
        b_out_ref = rest[2 * n_resid + 1]
        logits = mm(x, w_out_ref) + b_out_ref[...]
        # f32 sigmoid (v5e-safe), bf16 lane-dense store (halves HBM writeback).
        out_ref[...] = jax.nn.sigmoid(logits).astype(out_ref.dtype)

    return kernel


# ----------------------------------------------------------------------------
# Wrapper
# ----------------------------------------------------------------------------
def nn_residual_forward(feature, params, input_dim, *, batch_tile=1024,
                        matmul_dtype=jnp.bfloat16, out_dtype=jnp.bfloat16):
    """Pallas implementation of NN_residual.forward.

    feature: (B, input_dim) array.
    params : dict of weights laid out as (in, out) + (1, out) biases (f32).
    Returns (B, N_branch) in `out_dtype` (bf16 by default; upcast outside if
    callers need f32).
    """
    feature = jnp.asarray(feature, jnp.float32)
    B, D = feature.shape
    assert D == input_dim

    two_proj = input_dim != 4
    n_resid = 4 if two_proj else 1
    n_branch = params["w_out"].shape[1]
    n_branch_pad = _round_up(n_branch, 128)          # lane-dense output width

    tile, B_pad = _choose_batch_tile(B, batch_tile)
    if B_pad != B:
        feature = jnp.pad(feature, ((0, B_pad - B), (0, 0)))

    wdt = matmul_dtype

    # --- first-layer projection (fused block-diagonal when two_proj) ---------
    if two_proj:
        w0 = params["w0"].astype(wdt)                       # (4, 256)
        w1 = params["w1"].astype(wdt)                       # (D-4, 256)
        w_proj = jnp.zeros((input_dim, 2 * HIDDEN), wdt)
        w_proj = w_proj.at[:4, :HIDDEN].set(w0)
        w_proj = w_proj.at[4:, HIDDEN:].set(w1)
        b_proj = jnp.concatenate(
            [params["b0"], params["b1"]], axis=1).astype(jnp.float32)
    else:
        w_proj = params["w0"].astype(wdt)                   # (4, 256)
        b_proj = params["b0"].astype(jnp.float32)

    weight_list = [w_proj, b_proj]
    for r in range(n_resid):
        weight_list += [params[f"w_fc{r + 1}"].astype(wdt),
                        params[f"b_fc{r + 1}"].astype(jnp.float32)]

    # Pad the output projection to a multiple of 128 lanes (zero columns).
    w_out = params["w_out"].astype(wdt)
    b_out = params["b_out"].astype(jnp.float32)
    if n_branch_pad != n_branch:
        w_out = jnp.pad(w_out, ((0, 0), (0, n_branch_pad - n_branch)))
        b_out = jnp.pad(b_out, ((0, 0), (0, n_branch_pad - n_branch)))
    weight_list += [w_out, b_out]

    act_spec = pl.BlockSpec((tile, input_dim), lambda i: (i, 0))
    # Constant index_map => weights DMA'd once and kept resident in VMEM.
    weight_specs = [pl.BlockSpec(w.shape, lambda i: (0, 0)) for w in weight_list]

    kernel = _make_kernel(n_resid, two_proj, matmul_dtype)

    out = pl.pallas_call(
        kernel,
        out_shape=jax.ShapeDtypeStruct((B_pad, n_branch_pad), out_dtype),
        grid=(B_pad // tile,),
        in_specs=[act_spec] + weight_specs,
        out_specs=pl.BlockSpec((tile, n_branch_pad), lambda i: (i, 0)),
        compiler_params=pltpu.CompilerParams(
            dimension_semantics=("parallel",),        # megacore-shards the batch
            vmem_limit_bytes=48 * 1024 * 1024),       # headroom for 1024-row tiles
    )(feature, *weight_list)

    return out[:B, :n_branch]


# ----------------------------------------------------------------------------
# Deterministic parameter construction (PyTorch nn.Linear-style uniform init)
# ----------------------------------------------------------------------------
def _linear_params(key, fan_in, fan_out):
    kw, kb = jax.random.split(key)
    bound = 1.0 / np.sqrt(fan_in)
    w = jax.random.uniform(kw, (fan_in, fan_out), jnp.float32, -bound, bound)
    b = jax.random.uniform(kb, (1, fan_out), jnp.float32, -bound, bound)
    return w, b


def make_params(key, input_dim, n_branch):
    params = {}
    keys = jax.random.split(key, 8)
    params["w0"], params["b0"] = _linear_params(keys[0], 4, HIDDEN)
    if input_dim == 4:
        params["w_fc1"], params["b_fc1"] = _linear_params(keys[1], HIDDEN, HIDDEN)
        params["w_out"], params["b_out"] = _linear_params(keys[2], HIDDEN, n_branch)
    else:
        params["w1"], params["b1"] = _linear_params(keys[1], input_dim - 4, HIDDEN)
        for r in range(4):
            params[f"w_fc{r + 1}"], params[f"b_fc{r + 1}"] = _linear_params(
                keys[2 + r], HIDDEN, HIDDEN)
        params["w_out"], params["b_out"] = _linear_params(keys[6], HIDDEN, n_branch)
    return params


# ----------------------------------------------------------------------------
# Pure-JAX reference (same matmul dtype policy, unfused layers, f32 output)
# ----------------------------------------------------------------------------
def reference_forward(feature, params, input_dim, matmul_dtype=jnp.bfloat16):
    dot_kwargs = dict(preferred_element_type=jnp.float32)
    if matmul_dtype == jnp.float32:
        dot_kwargs["precision"] = jax.lax.Precision.HIGHEST

    def mm(x, w):
        return jnp.dot(x.astype(matmul_dtype), w.astype(matmul_dtype),
                       **dot_kwargs)

    relu = lambda v: jnp.maximum(v, 0.0)
    x = feature.astype(jnp.float32)
    if input_dim == 4:
        x = relu(mm(x, params["w0"]) + params["b0"])
        x = x + relu(mm(x, params["w_fc1"]) + params["b_fc1"])
        return jax.nn.sigmoid(mm(x, params["w_out"]) + params["b_out"])
    xl = relu(mm(x[:, 0:4], params["w0"]) + params["b0"])
    xh = relu(mm(x[:, 4:input_dim], params["w1"]) + params["b1"])
    x = xl + xh
    for r in range(4):
        x = x + relu(mm(x, params[f"w_fc{r + 1}"]) + params[f"b_fc{r + 1}"])
    return jax.nn.sigmoid(mm(x, params["w_out"]) + params["b_out"])


# ----------------------------------------------------------------------------
if __name__ == "__main__":
    key = jax.random.PRNGKey(0)
    k_feat, k_param, k_feat4, k_param4, k_feat_big = jax.random.split(key, 5)

    mask = np.ones((1036,)).astype(bool)        # default mask from the module
    n_branch = int(mask.sum())

    # Branch 1: input_dim != 4 (two projections + 4 residual blocks)
    input_dim = 10
    params = make_params(k_param, input_dim, n_branch)

    #   (a) tiny batch (pads to one 128-row tile)
    batch = 16
    feature = jax.random.normal(k_feat, (batch, input_dim), jnp.float32)
    out = jax.block_until_ready(nn_residual_forward(feature, params, input_dim))
    ref = reference_forward(feature, params, input_dim)
    np.testing.assert_allclose(np.asarray(out, dtype=np.float32),
                               np.asarray(ref), rtol=1e-2, atol=1e-2)
    assert out.shape == (batch, n_branch)

    #   (b) mid-size batch (exercises multi-step grid + padding trim)
    batch_big = 300
    feature_big = jax.random.normal(k_feat_big, (batch_big, input_dim),
                                    jnp.float32)
    out_big = jax.block_until_ready(
        nn_residual_forward(feature_big, params, input_dim))
    ref_big = reference_forward(feature_big, params, input_dim)
    np.testing.assert_allclose(np.asarray(out_big, dtype=np.float32),
                               np.asarray(ref_big), rtol=1e-2, atol=1e-2)
    assert out_big.shape == (batch_big, n_branch)

    # Branch 2: input_dim == 4 (single projection + 1 residual block)
    feature4 = jax.random.normal(k_feat4, (16, 4), jnp.float32)
    params4 = make_params(k_param4, 4, n_branch)
    out4 = jax.block_until_ready(nn_residual_forward(feature4, params4, 4))
    ref4 = reference_forward(feature4, params4, 4)
    np.testing.assert_allclose(np.asarray(out4, dtype=np.float32),
                               np.asarray(ref4), rtol=1e-2, atol=1e-2)
    assert out4.shape == (16, n_branch)

    print("KERNEL_OK")
</pallas_src>

<mosaic_0001>
module attributes {stable_mosaic.version = 11 : i64} {
  func.func @kernel(%arg0: i32, %arg1: memref<128x10xf32, #tpu.memory_space<vmem>>, %arg2: memref<10x512xbf16, #tpu.memory_space<vmem>>, %arg3: memref<1x512xf32, #tpu.memory_space<vmem>>, %arg4: memref<256x256xbf16, #tpu.memory_space<vmem>>, %arg5: memref<1x256xf32, #tpu.memory_space<vmem>>, %arg6: memref<256x256xbf16, #tpu.memory_space<vmem>>, %arg7: memref<1x256xf32, #tpu.memory_space<vmem>>, %arg8: memref<256x256xbf16, #tpu.memory_space<vmem>>, %arg9: memref<1x256xf32, #tpu.memory_space<vmem>>, %arg10: memref<256x256xbf16, #tpu.memory_space<vmem>>, %arg11: memref<1x256xf32, #tpu.memory_space<vmem>>, %arg12: memref<256x1152xbf16, #tpu.memory_space<vmem>>, %arg13: memref<1x1152xf32, #tpu.memory_space<vmem>>, %arg14: memref<128x1152xbf16, #tpu.memory_space<vmem>>) attributes {dimension_semantics = [#tpu.dimension_semantics<parallel>], iteration_bounds = array<i64: 1>, scalar_prefetch = 0 : i64, scratch_operands = 0 : i64, tpu.core_type = #tpu.core_type<tc>, window_params = [{transform_indices = @transform_0, window_bounds = array<i64: 128, 10>}, {pipeline_mode = #tpu.pipeline_mode<synchronous>, transform_indices = @transform_1, window_bounds = array<i64: 10, 512>}, {pipeline_mode = #tpu.pipeline_mode<synchronous>, transform_indices = @transform_2, window_bounds = array<i64: 1, 512>}, {pipeline_mode = #tpu.pipeline_mode<synchronous>, transform_indices = @transform_3, window_bounds = array<i64: 256, 256>}, {pipeline_mode = #tpu.pipeline_mode<synchronous>, transform_indices = @transform_4, window_bounds = array<i64: 1, 256>}, {pipeline_mode = #tpu.pipeline_mode<synchronous>, transform_indices = @transform_5, window_bounds = array<i64: 256, 256>}, {pipeline_mode = #tpu.pipeline_mode<synchronous>, transform_indices = @transform_6, window_bounds = array<i64: 1, 256>}, {pipeline_mode = #tpu.pipeline_mode<synchronous>, transform_indices = @transform_7, window_bounds = array<i64: 256, 256>}, {pipeline_mode = #tpu.pipeline_mode<synchronous>, transform_indices = @transform_8, window_bounds = array<i64: 1, 256>}, {pipeline_mode = #tpu.pipeline_mode<synchronous>, transform_indices = @transform_9, window_bounds = array<i64: 256, 256>}, {pipeline_mode = #tpu.pipeline_mode<synchronous>, transform_indices = @transform_10, window_bounds = array<i64: 1, 256>}, {pipeline_mode = #tpu.pipeline_mode<synchronous>, transform_indices = @transform_11, window_bounds = array<i64: 256, 1152>}, {pipeline_mode = #tpu.pipeline_mode<synchronous>, transform_indices = @transform_12, window_bounds = array<i64: 1, 1152>}, {transform_indices = @transform_13, window_bounds = array<i64: 128, 1152>}]} {
    %c0 = arith.constant 0 : index
    %c0_0 = arith.constant 0 : index
    %0 = vector.load %arg1[%c0, %c0_0] : memref<128x10xf32, #tpu.memory_space<vmem>>, vector<128x10xf32>
    %1 = arith.truncf %0 : vector<128x10xf32> to vector<128x10xbf16>
    %c0_1 = arith.constant 0 : index
    %c0_2 = arith.constant 0 : index
    %2 = vector.load %arg2[%c0_1, %c0_2] : memref<10x512xbf16, #tpu.memory_space<vmem>>, vector<10x512xbf16>
    %cst = arith.constant dense<0.000000e+00> : vector<128x512xf32>
    %3 = tpu.matmul %1, %2, %cst {dimension_numbers = #tpu.dot_dimension_numbers<[1], [0], [0], [1], [0, 0, 1, 1], [], []>} : vector<128x10xbf16>, vector<10x512xbf16>, vector<128x512xf32> -> vector<128x512xf32>
    %c0_3 = arith.constant 0 : index
    %c0_4 = arith.constant 0 : index
    %4 = vector.load %arg3[%c0_3, %c0_4] : memref<1x512xf32, #tpu.memory_space<vmem>>, vector<1x512xf32>
    %5 = vector.broadcast %4 : vector<1x512xf32> to vector<128x512xf32>
    %6 = arith.addf %3, %5 : vector<128x512xf32>
    %cst_5 = arith.constant 0.000000e+00 : f32
    %7 = vector.broadcast %cst_5 : f32 to vector<128x512xf32>
    %8 = arith.maximumf %6, %7 : vector<128x512xf32>
    %9 = vector.extract_strided_slice %8 {offsets = [0, 0], sizes = [128, 256], strides = [1, 1]} : vector<128x512xf32> to vector<128x256xf32>
    %10 = vector.extract_strided_slice %8 {offsets = [0, 256], sizes = [128, 256], strides = [1, 1]} : vector<128x512xf32> to vector<128x256xf32>
    %11 = arith.addf %9, %10 : vector<128x256xf32>
    %12 = arith.truncf %11 : vector<128x256xf32> to vector<128x256xbf16>
    %c0_6 = arith.constant 0 : index
    %c0_7 = arith.constant 0 : index
    %13 = vector.load %arg4[%c0_6, %c0_7] : memref<256x256xbf16, #tpu.memory_space<vmem>>, vector<256x256xbf16>
    %cst_8 = arith.constant dense<0.000000e+00> : vector<128x256xf32>
    %14 = tpu.matmul %12, %13, %cst_8 {dimension_numbers = #tpu.dot_dimension_numbers<[1], [0], [0], [1], [0, 0, 1, 1], [], []>} : vector<128x256xbf16>, vector<256x256xbf16>, vector<128x256xf32> -> vector<128x256xf32>
    %c0_9 = arith.constant 0 : index
    %c0_10 = arith.constant 0 : index
    %15 = vector.load %arg5[%c0_9, %c0_10] : memref<1x256xf32, #tpu.memory_space<vmem>>, vector<1x256xf32>
    %16 = vector.broadcast %15 : vector<1x256xf32> to vector<128x256xf32>
    %17 = arith.addf %14, %16 : vector<128x256xf32>
    %cst_11 = arith.constant 0.000000e+00 : f32
    %18 = vector.broadcast %cst_11 : f32 to vector<128x256xf32>
    %19 = arith.maximumf %17, %18 : vector<128x256xf32>
    %20 = arith.addf %11, %19 : vector<128x256xf32>
    %21 = arith.truncf %20 : vector<128x256xf32> to vector<128x256xbf16>
    %c0_12 = arith.constant 0 : index
    %c0_13 = arith.constant 0 : index
    %22 = vector.load %arg6[%c0_12, %c0_13] : memref<256x256xbf16, #tpu.memory_space<vmem>>, vector<256x256xbf16>
    %cst_14 = arith.constant dense<0.000000e+00> : vector<128x256xf32>
    %23 = tpu.matmul %21, %22, %cst_14 {dimension_numbers = #tpu.dot_dimension_numbers<[1], [0], [0], [1], [0, 0, 1, 1], [], []>} : vector<128x256xbf16>, vector<256x256xbf16>, vector<128x256xf32> -> vector<128x256xf32>
    %c0_15 = arith.constant 0 : index
    %c0_16 = arith.constant 0 : index
    %24 = vector.load %arg7[%c0_15, %c0_16] : memref<1x256xf32, #tpu.memory_space<vmem>>, vector<1x256xf32>
    %25 = vector.broadcast %24 : vector<1x256xf32> to vector<128x256xf32>
    %26 = arith.addf %23, %25 : vector<128x256xf32>
    %cst_17 = arith.constant 0.000000e+00 : f32
    %27 = vector.broadcast %cst_17 : f32 to vector<128x256xf32>
    %28 = arith.maximumf %26, %27 : vector<128x256xf32>
    %29 = arith.addf %20, %28 : vector<128x256xf32>
    %30 = arith.truncf %29 : vector<128x256xf32> to vector<128x256xbf16>
    %c0_18 = arith.constant 0 : index
    %c0_19 = arith.constant 0 : index
    %31 = vector.load %arg8[%c0_18, %c0_19] : memref<256x256xbf16, #tpu.memory_space<vmem>>, vector<256x256xbf16>
    %cst_20 = arith.constant dense<0.000000e+00> : vector<128x256xf32>
    %32 = tpu.matmul %30, %31, %cst_20 {dimension_numbers = #tpu.dot_dimension_numbers<[1], [0], [0], [1], [0, 0, 1, 1], [], []>} : vector<128x256xbf16>, vector<256x256xbf16>, vector<128x256xf32> -> vector<128x256xf32>
    %c0_21 = arith.constant 0 : index
    %c0_22 = arith.constant 0 : index
    %33 = vector.load %arg9[%c0_21, %c0_22] : memref<1x256xf32, #tpu.memory_space<vmem>>, vector<1x256xf32>
    %34 = vector.broadcast %33 : vector<1x256xf32> to vector<128x256xf32>
    %35 = arith.addf %32, %34 : vector<128x256xf32>
    %cst_23 = arith.constant 0.000000e+00 : f32
    %36 = vector.broadcast %cst_23 : f32 to vector<128x256xf32>
    %37 = arith.maximumf %35, %36 : vector<128x256xf32>
    %38 = arith.addf %29, %37 : vector<128x256xf32>
    %39 = arith.truncf %38 : vector<128x256xf32> to vector<128x256xbf16>
    %c0_24 = arith.constant 0 : index
    %c0_25 = arith.constant 0 : index
    %40 = vector.load %arg10[%c0_24, %c0_25] : memref<256x256xbf16, #tpu.memory_space<vmem>>, vector<256x256xbf16>
    %cst_26 = arith.constant dense<0.000000e+00> : vector<128x256xf32>
    %41 = tpu.matmul %39, %40, %cst_26 {dimension_numbers = #tpu.dot_dimension_numbers<[1], [0], [0], [1], [0, 0, 1, 1], [], []>} : vector<128x256xbf16>, vector<256x256xbf16>, vector<128x256xf32> -> vector<128x256xf32>
    %c0_27 = arith.constant 0 : index
    %c0_28 = arith.constant 0 : index
    %42 = vector.load %arg11[%c0_27, %c0_28] : memref<1x256xf32, #tpu.memory_space<vmem>>, vector<1x256xf32>
    %43 = vector.broadcast %42 : vector<1x256xf32> to vector<128x256xf32>
    %44 = arith.addf %41, %43 : vector<128x256xf32>
    %cst_29 = arith.constant 0.000000e+00 : f32
    %45 = vector.broadcast %cst_29 : f32 to vector<128x256xf32>
    %46 = arith.maximumf %44, %45 : vector<128x256xf32>
    %47 = arith.addf %38, %46 : vector<128x256xf32>
    %48 = arith.truncf %47 : vector<128x256xf32> to vector<128x256xbf16>
    %c0_30 = arith.constant 0 : index
    %c0_31 = arith.constant 0 : index
    %49 = vector.load %arg12[%c0_30, %c0_31] : memref<256x1152xbf16, #tpu.memory_space<vmem>>, vector<256x1152xbf16>
    %cst_32 = arith.constant dense<0.000000e+00> : vector<128x1152xf32>
    %50 = tpu.matmul %48, %49, %cst_32 {dimension_numbers = #tpu.dot_dimension_numbers<[1], [0], [0], [1], [0, 0, 1, 1], [], []>} : vector<128x256xbf16>, vector<256x1152xbf16>, vector<128x1152xf32> -> vector<128x1152xf32>
    %c0_33 = arith.constant 0 : index
    %c0_34 = arith.constant 0 : index
    %51 = vector.load %arg13[%c0_33, %c0_34] : memref<1x1152xf32, #tpu.memory_space<vmem>>, vector<1x1152xf32>
    %52 = vector.broadcast %51 : vector<1x1152xf32> to vector<128x1152xf32>
    %53 = arith.addf %50, %52 : vector<128x1152xf32>
    %54 = arith.negf %53 : vector<128x1152xf32>
    %55 = math.exp %54 : vector<128x1152xf32>
    %cst_35 = arith.constant 1.000000e+00 : f32
    %56 = vector.broadcast %cst_35 : f32 to vector<128x1152xf32>
    %57 = arith.addf %56, %55 : vector<128x1152xf32>
    %58 = arith.divf %56, %57 : vector<128x1152xf32>
    %59 = arith.truncf %58 : vector<128x1152xf32> to vector<128x1152xbf16>
    %c0_36 = arith.constant 0 : index
    %c0_37 = arith.constant 0 : index
    %60 = vector.load %arg14[%c0_36, %c0_37] : memref<128x1152xbf16, #tpu.memory_space<vmem>>, vector<128x1152xbf16>
    tpu.vector_store %arg14[%c0_36, %c0_37], %59 {strides = array<i32>} : memref<128x1152xbf16, #tpu.memory_space<vmem>>, vector<128x1152xbf16>,
    return
  }
  func.func @transform_0(%arg0: i32) -> (i32, i32) {
    %c0_i32 = arith.constant 0 : i32
    %c0_i32_0 = arith.constant 0 : i32
    return %arg0, %c0_i32 : i32, i32
  }
  func.func @transform_1(%arg0: i32) -> (i32, i32) {
    %c0_i32 = arith.constant 0 : i32
    %c0_i32_0 = arith.constant 0 : i32
    %c0_i32_1 = arith.constant 0 : i32
    return %c0_i32, %c0_i32_0 : i32, i32
  }
  func.func @transform_2(%arg0: i32) -> (i32, i32) {
    %c0_i32 = arith.constant 0 : i32
    %c0_i32_0 = arith.constant 0 : i32
    %c0_i32_1 = arith.constant 0 : i32
    return %c0_i32, %c0_i32_0 : i32, i32
  }
  func.func @transform_3(%arg0: i32) -> (i32, i32) {
    %c0_i32 = arith.constant 0 : i32
    %c0_i32_0 = arith.constant 0 : i32
    %c0_i32_1 = arith.constant 0 : i32
    return %c0_i32, %c0_i32_0 : i32, i32
  }
  func.func @transform_4(%arg0: i32) -> (i32, i32) {
    %c0_i32 = arith.constant 0 : i32
    %c0_i32_0 = arith.constant 0 : i32
    %c0_i32_1 = arith.constant 0 : i32
    return %c0_i32, %c0_i32_0 : i32, i32
  }
  func.func @transform_5(%arg0: i32) -> (i32, i32) {
    %c0_i32 = arith.constant 0 : i32
    %c0_i32_0 = arith.constant 0 : i32
    %c0_i32_1 = arith.constant 0 : i32
    return %c0_i32, %c0_i32_0 : i32, i32
  }
  func.func @transform_6(%arg0: i32) -> (i32, i32) {
    %c0_i32 = arith.constant 0 : i32
    %c0_i32_0 = arith.constant 0 : i32
    %c0_i32_1 = arith.constant 0 : i32
    return %c0_i32, %c0_i32_0 : i32, i32
  }
  func.func @transform_7(%arg0: i32) -> (i32, i32) {
    %c0_i32 = arith.constant 0 : i32
    %c0_i32_0 = arith.constant 0 : i32
    %c0_i32_1 = arith.constant 0 : i32
    return %c0_i32, %c0_i32_0 : i32, i32
  }
  func.func @transform_8(%arg0: i32) -> (i32, i32) {
    %c0_i32 = arith.constant 0 : i32
    %c0_i32_0 = arith.constant 0 : i32
    %c0_i32_1 = arith.constant 0 : i32
    return %c0_i32, %c0_i32_0 : i32, i32
  }
  func.func @transform_9(%arg0: i32) -> (i32, i32) {
    %c0_i32 = arith.constant 0 : i32
    %c0_i32_0 = arith.constant 0 : i32
    %c0_i32_1 = arith.constant 0 : i32
    return %c0_i32, %c0_i32_0 : i32, i32
  }
  func.func @transform_10(%arg0: i32) -> (i32, i32) {
    %c0_i32 = arith.constant 0 : i32
    %c0_i32_0 = arith.constant 0 : i32
    %c0_i32_1 = arith.constant 0 : i32
    return %c0_i32, %c0_i32_0 : i32, i32
  }
  func.func @transform_11(%arg0: i32) -> (i32, i32) {
    %c0_i32 = arith.constant 0 : i32
    %c0_i32_0 = arith.constant 0 : i32
    %c0_i32_1 = arith.constant 0 : i32
    return %c0_i32, %c0_i32_0 : i32, i32
  }
  func.func @transform_12(%arg0: i32) -> (i32, i32) {
    %c0_i32 = arith.constant 0 : i32
    %c0_i32_0 = arith.constant 0 : i32
    %c0_i32_1 = arith.constant 0 : i32
    return %c0_i32, %c0_i32_0 : i32, i32
  }
  func.func @transform_13(%arg0: i32) -> (i32, i32) {
    %c0_i32 = arith.constant 0 : i32
    %c0_i32_0 = arith.constant 0 : i32
    return %arg0, %c0_i32 : i32, i32
  }
}

</mosaic_0001>

<bundles_post_ra>
// kernel: tpu_custom_call.1
= control target key start
LH: loop header
LB: loop body
LE: loop exit
PB: predicated region body
PF: predicated region fallthrough
CT: control target
= control target key end

     0   :  { %18 = vsyncpa [#allocation3], 0  ;;  %s14694_s0 = inlined_call_operand.vmem [shape: f32[128,10], index: 0, kind: input, shape index: {}]   ;;  %s14695_s1 = inlined_call_operand.vmem [shape: bf16[10,512], index: 1, kind: input, shape index: {}]   ;;  %s14696_s2 = inlined_call_operand.vmem [shape: f32[1,512], index: 2, kind: input, shape index: {}]   ;;  %s14697_s3 = inlined_call_operand.hbm [shape: bf16[256,256], index: 3, kind: input, shape index: {}]   ;;  %s14698_s4 = inlined_call_operand.vmem [shape: f32[1,256], index: 4, kind: input, shape index: {}]   ;;  %s14699_s5 = inlined_call_operand.hbm [shape: bf16[256,256], index: 5, kind: input, shape index: {}]   ;;  %s14700_s6 = inlined_call_operand.vmem [shape: f32[1,256], index: 6, kind: input, shape index: {}]   ;;  %s14701_s7 = inlined_call_operand.hbm [shape: bf16[256,256], index: 7, kind: input, shape index: {}]   ;;  %s14702_s8 = inlined_call_operand.vmem [shape: f32[1,256], index: 8, kind: input, shape index: {}]   ;;  %s14703_s9 = inlined_call_operand.hbm [shape: bf16[256,256], index: 9, kind: input, shape index: {}]   ;;  %s14704_s10 = inlined_call_operand.vmem [shape: f32[1,256], index: 10, kind: input, shape index: {}]   ;;  %s14705_s11 = inlined_call_operand.hbm [shape: bf16[256,1152], index: 11, kind: input, shape index: {}]   ;;  %s14706_s12 = inlined_call_operand.vmem [shape: f32[1,1152], index: 12, kind: input, shape index: {}]   ;;  %s14707_s13 = inlined_call_operand.hbm [shape: bf16[128,1152], index: 13, kind: output, shape index: {}]  }
   0x1   :  { %19 = vsyncpa [#allocation6], 0 }
   0x2   :  { %20 = vsyncpa [#allocation9], 0 }
   0x3   :  { %21 = vsyncpa [#allocation4], 0  ;;  %s47_s27 = sshll.u32 %s14699_s5, 4  ;;  %s9437_s28 = smov [#allocation5]   ;;  %s48_s27 = int_to_ptr.hbm [resolvable:$true] %s47_s27 }
   0x4   :  { %s49_s29 = sshll.u32 %s9437_s28, 4  ;;  %s77_s15 = sshll.u32 %s14703_s9, 4  ;;  %s50_s29 = int_to_ptr.vmem [resolvable:$true] %s49_s29  ;;  %s78_s15 = int_to_ptr.hbm [resolvable:$true] %s77_s15 }
   0x5   :  { %s9438_s16 = smov 128   ;;  %s9439_s17 = smov 8  }
   0x6   :  { %55 = dma.hbm_to_vmem [thread:$0]  %s48_s27, 4096, %s50_s29, [#allocation6], %s9438_s16, %s9438_s16, %s9439_s17  }
   0x7   :  { %s9440_s18 = smov [#allocation8]   ;;  %s32_s22 = sshll.u32 %s14697_s3, 4  ;;  %s33_s22 = int_to_ptr.hbm [resolvable:$true] %s32_s22 }
   0x8   :  { %s79_s19 = sshll.u32 %s9440_s18, 4  ;;  %s62_s24 = sshll.u32 %s14701_s7, 4  ;;  %s80_s19 = int_to_ptr.vmem [resolvable:$true] %s79_s19  ;;  %s63_s24 = int_to_ptr.hbm [resolvable:$true] %s62_s24 }
   0x9   :  { %85 = dma.hbm_to_vmem [thread:$0]  %s78_s15, 4096, %s80_s19, [#allocation9], %s9438_s16, %s9438_s16, %s9439_s17  }
   0xa   :  { %s9441_s25 = smov [#allocation2]   ;;  %s9442_s9 = smov [#allocation7]  }
   0xb   :  { %s34_s26 = sshll.u32 %s9441_s25, 4  ;;  %s64_s27 = sshll.u32 %s9442_s9, 4  ;;  %s35_s26 = int_to_ptr.vmem [resolvable:$true] %s34_s26  ;;  %s65_s27 = int_to_ptr.vmem [resolvable:$true] %s64_s27 }
   0xc   :  { %40 = dma.hbm_to_vmem [thread:$0]  %s33_s22, 4096, %s35_s26, [#allocation3], %s9438_s16, %s9438_s16, %s9439_s17  }
   0xd   :  { %s92_s30 = sshll.u32 %s14705_s11, 4  ;;  %s9443_s3 = smov [#allocation10]   ;;  %s93_s30 = int_to_ptr.hbm [resolvable:$true] %s92_s30 }
   0xe   :  { %70 = dma.hbm_to_vmem [thread:$0]  %s63_s24, 4096, %s65_s27, [#allocation6], %s9438_s16, %s9438_s16, %s9439_s17  }
   0xf   :  { %s94_s14 = sshll.u32 %s9443_s3, 4  ;;  %s9444_s15 = smov 576   ;;  %s95_s14 = int_to_ptr.vmem [resolvable:$true] %s94_s14 }
  0x10   :  { %s9445_s18 = smov 36  }
  0x11   :  { %100 = dma.hbm_to_vmem [thread:$0]  %s93_s30, 18432, %s95_s14, [#allocation9], %s9444_s15, %s9444_s15, %s9445_s18  }
  0x12   :  { %9429 = dma.done.wait [#allocation3], 4096  }
  0x13   :  { %9430 = vsyncadd [#allocation3], 4294963200 }
  0x14   :  { %9431 = dma.done.wait [#allocation6], 8192  }
  0x15   :  { %9432 = vsyncadd [#allocation6], 4294959104 }
  0x16   :  { %9433 = dma.done.wait [#allocation9], 22528  }
  0x17   :  { %9434 = vsyncadd [#allocation9], 4294944768  ;;  %vm203_vm0 = vcmask 1044480   ;;  %v7139_v0 = vld [vmem:[%s14695_s1] sm:$0xf]  ;;  %v133_v6 = vld [vmem:[%s14694_s0 + $0x48] sm:$0xff] }
  0x18   :  { %v8419_v1 = vld [vmem:[%s14695_s1 + $0xc] sm:$0x10]  ;;  %v8417_v2 = vld [vmem:[%s14695_s1 + $0x4] sm:$0xf]  ;;  %v7141_v4 = vld [vmem:[%s14695_s1 + $0x10] sm:$0x10] }
  0x19   :  { %v7140_v3 = vor.u32 %v8419_v1, %v7139_v0  ;;  %v132_v5 = vld [vmem:[%s14694_s0 + $0x40] sm:$0xff]  ;;  %v7144_v7 = vor.u32 %v8417_v2, %v7141_v4  ;;  %v7147_v8 = vld [vmem:[%s14695_s1 + $0x8] sm:$0xf]  ;;  %v8420_v9 = vld [vmem:[%s14695_s1 + $0x14] sm:$0x10]  ;;  %vm178_vm1 = vcmask 80896  }
  0x1a   :  { %v8418_v10 = vld [vmem:[%s14695_s1 + $0xc] sm:$0xf]  ;;  %v9563_v12 = vpack.c.bf16 %v133_v6, %v132_v5  ;;  %v7148_v13 = vor.u32 %v8420_v9, %v7147_v8  ;;  %v7149_v14 = vld [vmem:[%s14695_s1 + $0x18] sm:$0x10]  ;;  %v134_v19 = vld [vmem:[%s14694_s0 + $0x50] sm:$0xff]  ;;  %s7122_s16 = sshll.u32 %s14707_s13, 4  ;;  %s7123_s16 = int_to_ptr.hbm [resolvable:$true] %s7122_s16 }
  0x1b   :  { %v205_v11 = vsel %vm203_vm0, %v7140_v3, 0  ;;  %v208_v15 = vsel %vm203_vm0, %v7144_v7, 0  ;;  %v7152_v16 = vor.u32 %v8418_v10, %v7149_v14  ;;  %v135_v20 = vld [vmem:[%s14694_s0 + $0x58] sm:$0xff]  ;;  %v124_v22 = vld [vmem:[%s14694_s0] sm:$0xff]  ;;  %v125_v23 = vld [vmem:[%s14694_s0 + $0x8] sm:$0xff] }
  0x1c   :  { %8693 = vmatpush.bf16.msra.mxu2 %v205_v11  ;;  %223 = vmatpush.bf16.msra.mxu0 %v205_v11  ;;  %v211_v17 = vsel %vm203_vm0, %v7148_v13, 0  ;;  %v9581_v21 = vpack.c.bf16 %v135_v20, %v134_v19  ;;  %v140_v24 = vpack.c.bf16 %v125_v23, %v124_v22  ;;  %v136_v25 = vld [vmem:[%s14694_s0 + $0x60] sm:$0xff]  ;;  %v137_v26 = vld [vmem:[%s14694_s0 + $0x68] sm:$0xff]  ;;  %v126_v28 = vld [vmem:[%s14694_s0 + $0x10] sm:$0xff] }
  0x1d   :  { %8694 = vmatpush.bf16.msra.mxu3 %v208_v15  ;;  %272 = vmatpush.bf16.msra.mxu1 %v208_v15  ;;  %v214_v18 = vsel %vm203_vm0, %v7152_v16, 0  ;;  %v9601_v27 = vpack.c.bf16 %v137_v26, %v136_v25  ;;  %v127_v29 = vld [vmem:[%s14694_s0 + $0x18] sm:$0xff]  ;;  %v138_v31 = vld [vmem:[%s14694_s0 + $0x70] sm:$0xff]  ;;  %v128_v39 = vld [vmem:[%s14694_s0 + $0x20] sm:$0xff] }
  0x1e   :  { %v141_v30 = vpack.c.bf16 %v127_v29, %v126_v28  ;;  %v139_v32 = vld [vmem:[%s14694_s0 + $0x78] sm:$0xff]  ;;  %v8435_v34 = vld [vmem:[#allocation2 + $0x74] sm:$0xf]  ;;  %v129_v40 = vld [vmem:[%s14694_s0 + $0x28] sm:$0xff] }
  0x1f   :  { %7157 = vmatmul.msk.bf16.vlgmr.msra.gmra.mxu2 %vm178_vm1, %v9563_v12  ;;  %7153 = vmatmul.msk.bf16.vlgmr.msra.gmra.mxu0 %vm178_vm1, %v140_v24  ;;  %v9621_v33 = vpack.c.bf16 %v139_v32, %v138_v31  ;;  %v7245_v35 = vld [vmem:[#allocation2 + $0x78] sm:$0xf0]  ;;  %v8451_v36 = vld [vmem:[#allocation2 + $0xf4] sm:$0xf]  ;;  %v142_v42 = vpack.c.bf16 %v129_v40, %v128_v39  ;;  %v8433_v43 = vld [vmem:[#allocation2 + $0x64] sm:$0xf] }
  0x20   :  { %321 = vmatpush.bf16.msrb.mxu2 %v211_v17  ;;  %7165 = vmatmul.msk.bf16.vlgmr.msra.gmra.mxu3 %vm178_vm1, %v9563_v12  ;;  %v7248_v37 = vor.u32 %v8435_v34, %v7245_v35  ;;  %v7309_v38 = vld [vmem:[#allocation2 + $0xf8] sm:$0xf0]  ;;  %v7237_v44 = vld [vmem:[#allocation2 + $0x68] sm:$0xf0]  ;;  %v8449_v45 = vld [vmem:[#allocation2 + $0xe4] sm:$0xf] }
  0x21   :  { %370 = vmatpush.bf16.msrb.mxu3 %v214_v18  ;;  %7161 = vmatmul.msk.bf16.vlgmr.msra.gmra.mxu1 %vm178_vm1, %v140_v24  ;;  %v7312_v41 = vor.u32 %v8451_v36, %v7309_v38  ;;  %v7240_v46 = vor.u32 %v8433_v43, %v7237_v44  ;;  %v7301_v47 = vld [vmem:[#allocation2 + $0xe8] sm:$0xf0]  ;;  %v130_v48 = vld [vmem:[%s14694_s0 + $0x30] sm:$0xff]  ;;  %v131_v49 = vld [vmem:[%s14694_s0 + $0x38] sm:$0xff] }
  0x22   :  { %v7304_v50 = vor.u32 %v8449_v45, %v7301_v47  ;;  %v143_v51 = vpack.c.bf16 %v131_v49, %v130_v48  ;;  %v8431_v52 = vld [vmem:[#allocation2 + $0x54] sm:$0xf]  ;;  %v7229_v53 = vld [vmem:[#allocation2 + $0x58] sm:$0xf0]  ;;  %v8429_v58 = vld [vmem:[#allocation2 + $0x44] sm:$0xf] }
  0x23   :  { %v8447_v54 = vld [vmem:[#allocation2 + $0xd4] sm:$0xf]  ;;  %v7232_v55 = vor.u32 %v8431_v52, %v7229_v53  ;;  %v7293_v56 = vld [vmem:[#allocation2 + $0xd8] sm:$0xf0]  ;;  %v7221_v59 = vld [vmem:[#allocation2 + $0x48] sm:$0xf0] }
  0x24   :  { %820 = vmatpush.bf16.msra.mxu2 %v7248_v37  ;;  %v7296_v57 = vor.u32 %v8447_v54, %v7293_v56  ;;  %v8445_v60 = vld [vmem:[#allocation2 + $0xc4] sm:$0xf]  ;;  %v7224_v61 = vor.u32 %v8429_v58, %v7221_v59  ;;  %v7285_v62 = vld [vmem:[#allocation2 + $0xc8] sm:$0xf0]  ;;  %v8427_v0 = vld [vmem:[#allocation2 + $0x34] sm:$0xf] }
  0x25   :  { %869 = vmatpush.bf16.msra.mxu3 %v7312_v41  ;;  %v7288_v63 = vor.u32 %v8445_v60, %v7285_v62  ;;  %v7213_v1 = vld [vmem:[#allocation2 + $0x38] sm:$0xf0]  ;;  %v8443_v2 = vld [vmem:[#allocation2 + $0xb4] sm:$0xf]  ;;  %v7243_v5 = vld [vmem:[#allocation2 + $0x70] sm:$0xf] }
  0x26   :  { %v7216_v3 = vor.u32 %v8427_v0, %v7213_v1  ;;  %v7277_v4 = vld [vmem:[#allocation2 + $0xb8] sm:$0xf0]  ;;  %v8436_v6 = vld [vmem:[#allocation2 + $0x74] sm:$0xf0]  ;;  %v7307_v9 = vld [vmem:[#allocation2 + $0xf0] sm:$0xf] }
  0x27   :  { %v7280_v7 = vor.u32 %v8443_v2, %v7277_v4  ;;  %v7244_v8 = vor.u32 %v8436_v6, %v7243_v5  ;;  %v8452_v10 = vld [vmem:[#allocation2 + $0xf4] sm:$0xf0]  ;;  %v7235_v13 = vld [vmem:[#allocation2 + $0x60] sm:$0xf]  ;;  %v8434_v14 = vld [vmem:[#allocation2 + $0x64] sm:$0xf0] }
  0x28   :  { %821 = vmatpush.bf16.msra.mxu2 %v7240_v46  ;;  %v7308_v11 = vor.u32 %v8452_v10, %v7307_v9  ;;  %v7299_v15 = vld [vmem:[#allocation2 + $0xe0] sm:$0xf]  ;;  %v7236_v16 = vor.u32 %v8434_v14, %v7235_v13  ;;  %v8450_v17 = vld [vmem:[#allocation2 + $0xe4] sm:$0xf0]  ;;  %v8425_v22 = vld [vmem:[#allocation2 + $0x24] sm:$0xf] }
  0x29   :  { %870 = vmatpush.bf16.msra.mxu3 %v7304_v50  ;;  %722 = vmatpush.bf16.msrb.mxu0 %v7244_v8  ;;  %v7300_v19 = vor.u32 %v8450_v17, %v7299_v15  ;;  %v7205_v23 = vld [vmem:[#allocation2 + $0x28] sm:$0xf0]  ;;  %v8441_v25 = vld [vmem:[#allocation2 + $0xa4] sm:$0xf]  ;;  %v7227_v28 = vld [vmem:[#allocation2 + $0x50] sm:$0xf] }
  0x2a   :  { %771 = vmatpush.bf16.msrb.mxu1 %v7308_v11  ;;  %v7269_v26 = vld [vmem:[#allocation2 + $0xa8] sm:$0xf0]  ;;  %v8448_v31 = vld [vmem:[#allocation2 + $0xd4] sm:$0xf0]  ;;  %v7219_v37 = vld [vmem:[#allocation2 + $0x40] sm:$0xf] }
  0x2b   :  { %v7272_v29 = vor.u32 %v8441_v25, %v7269_v26  ;;  %v8430_v38 = vld [vmem:[#allocation2 + $0x44] sm:$0xf0]  ;;  %v7283_v39 = vld [vmem:[#allocation2 + $0xc0] sm:$0xf]  ;;  %v8423_v45 = vld [vmem:[#allocation2 + $0x14] sm:$0xf] }
  0x2c   :  { %822 = vmatpush.bf16.msra.mxu2 %v7232_v55  ;;  %v7220_v40 = vor.u32 %v8430_v38, %v7219_v37  ;;  %v8446_v41 = vld [vmem:[#allocation2 + $0xc4] sm:$0xf0]  ;;  %v7197_v46 = vld [vmem:[#allocation2 + $0x18] sm:$0xf0]  ;;  %v8439_v48 = vld [vmem:[#allocation2 + $0x94] sm:$0xf] }
  0x2d   :  { %871 = vmatpush.bf16.msra.mxu3 %v7296_v57  ;;  %723 = vmatpush.bf16.msrb.mxu0 %v7236_v16  ;;  %v7284_v43 = vor.u32 %v8446_v41, %v7283_v39  ;;  %v7200_v47 = vor.u32 %v8423_v45, %v7197_v46  ;;  %v7261_v49 = vld [vmem:[#allocation2 + $0x98] sm:$0xf0]  ;;  %v7211_v50 = vld [vmem:[#allocation2 + $0x30] sm:$0xf]  ;;  %v8444_v53 = vld [vmem:[#allocation2 + $0xb4] sm:$0xf0] }
  0x2e   :  { %772 = vmatpush.bf16.msrb.mxu1 %v7300_v19  ;;  %v7275_v52 = vld [vmem:[#allocation2 + $0xb0] sm:$0xf]  ;;  %v7203_v58 = vld [vmem:[#allocation2 + $0x20] sm:$0xf]  ;;  %v8426_v59 = vld [vmem:[#allocation2 + $0x24] sm:$0xf0] }
  0x2f   :  { %7158 = vmatmul.msk.bf16.gmra.mxu2 %vm178_vm1, %v9581_v21  ;;  %7154 = vmatmul.msk.bf16.gmra.mxu0 %vm178_vm1, %v141_v30  ;;  %v7276_v55 = vor.u32 %v8444_v53, %v7275_v52  ;;  %v7204_v60 = vor.u32 %v8426_v59, %v7203_v58  ;;  %v8442_v62 = vld [vmem:[#allocation2 + $0xa4] sm:$0xf0]  ;;  %v8421_v2 = vld [vmem:[#allocation2 + $0x4] sm:$0xf]  ;;  %v7253_v6 = vld [vmem:[#allocation2 + $0x88] sm:$0xf0] }
  0x30   :  { %7166 = vmatmul.msk.bf16.gmra.mxu3 %vm178_vm1, %v9581_v21  ;;  %823 = vmatpush.bf16.msra.mxu2 %v7224_v61  ;;  %v7267_v61 = vld [vmem:[#allocation2 + $0xa0] sm:$0xf]  ;;  %v8437_v5 = vld [vmem:[#allocation2 + $0x84] sm:$0xf]  ;;  %v8424_v10 = vld [vmem:[#allocation2 + $0x14] sm:$0xf0] }
  0x31   :  { %7162 = vmatmul.msk.bf16.gmra.mxu1 %vm178_vm1, %v141_v30  ;;  %872 = vmatpush.bf16.msra.mxu3 %v7288_v63  ;;  %v7268_v63 = vor.u32 %v8442_v62, %v7267_v61  ;;  %v7256_v9 = vor.u32 %v8437_v5, %v7253_v6  ;;  %v7259_v11 = vld [vmem:[#allocation2 + $0x90] sm:$0xf]  ;;  %v8440_v13 = vld [vmem:[#allocation2 + $0x94] sm:$0xf0]  ;;  %v7187_v16 = vld [vmem:[#allocation2] sm:$0xf] }
  0x32   :  { %v7260_v15 = vor.u32 %v8440_v13, %v7259_v11  ;;  %v8422_v17 = vld [vmem:[#allocation2 + $0x4] sm:$0xf0]  ;;  %v8483_v53 = vld [vmem:[#allocation5 + $0xf4] sm:$0xf]  ;;  %v7371_v11 = vld [vmem:[#allocation5 + $0x70] sm:$0xf] }
  0x33   :  { %v7188_v19 = vor.u32 %v8422_v17, %v7187_v16  ;;  %v8468_v13 = vld [vmem:[#allocation5 + $0x74] sm:$0xf0] }
  0x34   :  { %824 = vmatpush.bf16.msra.mxu2 %v7216_v3  ;;  %v7189_v3 = vld [vmem:[#allocation2 + $0x8] sm:$0xf0]  ;;  %v7372_v17 = vor.u32 %v8468_v13, %v7371_v11 }
  0x35   :  { %873 = vmatpush.bf16.msra.mxu3 %v7280_v7  ;;  %v7192_v4 = vor.u32 %v8421_v2, %v7189_v3  ;;  %v7195_v7 = vld [vmem:[#allocation2 + $0x10] sm:$0xf] }
  0x36   :  { %v7196_v14 = vor.u32 %v8424_v10, %v7195_v7 }
  0x39   :  { %874 = vmatpush.bf16.msra.mxu3 %v7272_v29 }
  0x3f   :  { %7159 = vmatmul.msk.bf16.gmra.mxu2 %vm178_vm1, %v9601_v27  ;;  %7155 = vmatmul.msk.bf16.gmra.mxu0 %vm178_vm1, %v142_v42 }
  0x40   :  { %7167 = vmatmul.msk.bf16.gmra.mxu3 %vm178_vm1, %v9601_v27 }
  0x41   :  { %7163 = vmatmul.msk.bf16.gmra.mxu1 %vm178_vm1, %v142_v42 }
  0x4f   :  { %7160 = vmatmul.msk.bf16.gmra.mxu2 %vm178_vm1, %v9621_v33  ;;  %7156 = vmatmul.msk.bf16.gmra.mxu0 %vm178_vm1, %v143_v51 }
  0x50   :  { %7168 = vmatmul.msk.bf16.gmra.mxu3 %vm178_vm1, %v9621_v33 }
  0x51   :  { %7164 = vmatmul.msk.bf16.gmra.mxu1 %vm178_vm1, %v143_v51 }
  0x5f   :  { %7169 = vmatmul.msk.bf16.vlgmr.msrb.gmra.mxu2 %vm178_vm1, %v140_v24 }
  0x60   :  { %7177 = vmatmul.msk.bf16.vlgmr.msrb.gmra.mxu3 %vm178_vm1, %v140_v24  ;;  %v7208_v24 = vor.u32 %v8425_v22, %v7205_v23  ;;  %v7251_v22 = vld [vmem:[#allocation2 + $0x80] sm:$0xf]  ;;  %v8438_v23 = vld [vmem:[#allocation2 + $0x84] sm:$0xf0] }
  0x61   :  { %v7252_v25 = vor.u32 %v8438_v23, %v7251_v22  ;;  %v8484_v22 = vld [vmem:[#allocation5 + $0xf4] sm:$0xf0] }
  0x62   :  { %825 = vmatpush.bf16.msra.mxu2 %v7208_v24 }
  0x66   :  { %826 = vmatpush.bf16.msra.mxu2 %v7200_v47 }
  0x6a   :  { %827 = vmatpush.bf16.msra.mxu2 %v7192_v4 }
  0x6f   :  { %7170 = vmatmul.msk.bf16.gmra.mxu2 %vm178_vm1, %v141_v30 }
  0x70   :  { %7178 = vmatmul.msk.bf16.gmra.mxu3 %vm178_vm1, %v141_v30  ;;  %v7291_v30 = vld [vmem:[#allocation2 + $0xd0] sm:$0xf] }
  0x71   :  { %v7292_v34 = vor.u32 %v8448_v31, %v7291_v30 }
  0x73   :  { %773 = vmatpush.bf16.msrb.mxu1 %v7292_v34  ;;  %v152_v34 = vld [vmem:[%s14696_s2] sm:$0xf] }
  0x74   :  { %v9702_v37 = vperm.slane %v152_v34, 2  ;;  %v9704_v39 = vperm.slane %v152_v34, 3  ;;  %v9706_v41 = vperm.slane %v152_v34, 0  ;;  %v9708_v45 = vperm.slane %v152_v34, 1 }
  0x77   :  { %774 = vmatpush.bf16.msrb.mxu1 %v7284_v43 }
  0x7b   :  { %775 = vmatpush.bf16.msrb.mxu1 %v7276_v55 }
  0x7f   :  { %7171 = vmatmul.msk.bf16.gmra.mxu2 %vm178_vm1, %v142_v42  ;;  %776 = vmatpush.bf16.msrb.mxu1 %v7268_v63 }
  0x80   :  { %7179 = vmatmul.msk.bf16.gmra.mxu3 %vm178_vm1, %v142_v42 }
  0x83   :  { %777 = vmatpush.bf16.msrb.mxu1 %v7260_v15 }
  0x87   :  { %778 = vmatpush.bf16.msrb.mxu1 %v7252_v25 }
  0x8f   :  { %7172 = vmatmul.msk.bf16.gmra.mxu2 %vm178_vm1, %v143_v51 }
  0x90   :  { %7180 = vmatmul.msk.bf16.gmra.mxu3 %vm178_vm1, %v143_v51  ;;  %v7264_v51 = vor.u32 %v8439_v48, %v7261_v49 }
  0x92   :  { %875 = vmatpush.bf16.msra.mxu3 %v7264_v51  ;;  %v7373_v51 = vld [vmem:[#allocation5 + $0x78] sm:$0xf0] }
  0x96   :  { %876 = vmatpush.bf16.msra.mxu3 %v7256_v9 }
  0x9c   :  { %v225_v24 = vpop.f32.mrf.mxu0 }
  0x9d   :  { %v226_v46 = vadd.f32 %v225_v24, %v9706_v41 }
  0x9e   :  { %v274_v26 = vpop.f32.mrf.mxu1 }
  0x9f   :  { %7173 = vmatmul.msk.bf16.gmra.mxu2 %vm178_vm1, %v9563_v12  ;;  %v275_v48 = vadd.f32 %v274_v26, %v9708_v45 }
  0xa0   :  { %7181 = vmatmul.msk.bf16.gmra.mxu3 %vm178_vm1, %v9563_v12  ;;  %v8432_v12 = vld [vmem:[#allocation2 + $0x54] sm:$0xf0] }
  0xa1   :  { %v7228_v32 = vor.u32 %v8432_v12, %v7227_v28  ;;  %v413_v2 = vmax.f32 %v275_v48, 0.0 }
  0xa2   :  { %v9655_v18 = vpop.f32.mrf.mxu2 }
  0xa3   :  { %v9657_v20 = vpop.f32.mrf.mxu3  ;;  %724 = vmatpush.bf16.msrb.mxu0 %v7228_v32 }
  0xa4   :  { %v227_v30 = vpop.f32.mrf.mxu0 }
  0xa6   :  { %v276_v32 = vpop.f32.mrf.mxu1 }
  0xa7   :  { %725 = vmatpush.bf16.msrb.mxu0 %v7220_v40  ;;  %v277_v55 = vadd.f32 %v276_v32, %v9708_v45 }
  0xa9   :  { %v417_v7 = vmax.f32 %v277_v55, 0.0 }
  0xaa   :  { %v9659_v35 = vpop.f32.mrf.mxu2 }
  0xab   :  { %v9661_v36 = vpop.f32.mrf.mxu3 }
  0xac   :  { %v230_v40 = vpop.f32.mrf.mxu0 }
  0xae   :  { %v279_v43 = vpop.f32.mrf.mxu1 }
  0xaf   :  { %7174 = vmatmul.msk.bf16.gmra.mxu2 %vm178_vm1, %v9581_v21 }
  0xb0   :  { %7182 = vmatmul.msk.bf16.gmra.mxu3 %vm178_vm1, %v9581_v21  ;;  %v8428_v21 = vld [vmem:[#allocation2 + $0x34] sm:$0xf0] }
  0xb1   :  { %v7212_v54 = vor.u32 %v8428_v21, %v7211_v50  ;;  %v8467_v50 = vld [vmem:[#allocation5 + $0x74] sm:$0xf]  ;;  %v228_v21 = vadd.f32 %v227_v30, %v9706_v41 }
  0xb2   :  { %v9667_v42 = vpop.f32.mrf.mxu2  ;;  %v7376_v52 = vor.u32 %v8467_v50, %v7373_v51  ;;  %v7365_v50 = vld [vmem:[#allocation5 + $0x68] sm:$0xf0] }
  0xb3   :  { %v9669_v44 = vpop.f32.mrf.mxu3  ;;  %726 = vmatpush.bf16.msrb.mxu0 %v7212_v54  ;;  %v7437_v54 = vld [vmem:[#allocation5 + $0xf8] sm:$0xf0]  ;;  %v416_v5 = vmax.f32 %v228_v21, 0.0 }
  0xb4   :  { %v7440_v59 = vor.u32 %v8483_v53, %v7437_v54  ;;  %1294 = vmatpush.bf16.msrb.mxu2 %v7376_v52  ;;  %v232_v10 = vpop.f32.mrf.mxu0  ;;  %v8481_v53 = vld [vmem:[#allocation5 + $0xe4] sm:$0xf]  ;;  %v7429_v54 = vld [vmem:[#allocation5 + $0xe8] sm:$0xf0] }
  0xb5   :  { %v233_v51 = vadd.f32 %v232_v10, %v9706_v41 }
  0xb6   :  { %1343 = vmatpush.bf16.msrb.mxu3 %v7440_v59  ;;  %v281_v16 = vpop.f32.mrf.mxu1  ;;  %v7432_v59 = vor.u32 %v8481_v53, %v7429_v54  ;;  %v8479_v53 = vld [vmem:[#allocation5 + $0xd4] sm:$0xf] }
  0xb7   :  { %727 = vmatpush.bf16.msrb.mxu0 %v7204_v60  ;;  %v412_v60 = vmax.f32 %v226_v46, 0.0  ;;  %v280_v46 = vadd.f32 %v279_v43, %v9708_v45  ;;  %v282_v55 = vadd.f32 %v281_v16, %v9708_v45  ;;  %v7427_v16 = vld [vmem:[#allocation5 + $0xe0] sm:$0xf] }
  0xba   :  { %v9671_v56 = vpop.f32.mrf.mxu2  ;;  %1344 = vmatpush.bf16.msrb.mxu3 %v7432_v59 }
  0xbb   :  { %v9673_v57 = vpop.f32.mrf.mxu3  ;;  %728 = vmatpush.bf16.msrb.mxu0 %v7196_v14 }
  0xbc   :  { %v235_v48 = vpop.f32.mrf.mxu0 }
  0xbe   :  { %v284_v21 = vpop.f32.mrf.mxu1 }
  0xbf   :  { %7175 = vmatmul.msk.bf16.gmra.mxu2 %vm178_vm1, %v9601_v27  ;;  %729 = vmatpush.bf16.msrb.mxu0 %v7188_v19  ;;  %v7435_v19 = vld [vmem:[#allocation5 + $0xf0] sm:$0xf] }
  0xc0   :  { %7183 = vmatmul.msk.bf16.gmra.mxu3 %vm178_vm1, %v9601_v27  ;;  %v7436_v25 = vor.u32 %v8484_v22, %v7435_v19 }
  0xc2   :  { %v9679_v0 = vpop.f32.mrf.mxu2  ;;  %1245 = vmatpush.bf16.msra.mxu1 %v7436_v25 }
  0xc3   :  { %v9681_v1 = vpop.f32.mrf.mxu3  ;;  %1196 = vmatpush.bf16.msra.mxu0 %v7372_v17  ;;  %v8482_v17 = vld [vmem:[#allocation5 + $0xe4] sm:$0xf0] }
  0xc4   :  { %v7428_v25 = vor.u32 %v8482_v17, %v7427_v16  ;;  %v8464_v16 = vld [vmem:[#allocation5 + $0x54] sm:$0xf0] }
  0xc6   :  { %1246 = vmatpush.bf16.msra.mxu1 %v7428_v25 }
  0xca   :  { %v9683_v8 = vpop.f32.mrf.mxu2 }
  0xcb   :  { %v9685_v27 = vpop.f32.mrf.mxu3 }
  0xcf   :  { %7176 = vmatmul.msk.bf16.gmra.mxu2 %vm178_vm1, %v9621_v33 }
  0xd0   :  { %7184 = vmatmul.msk.bf16.gmra.mxu3 %vm178_vm1, %v9621_v33 }
  0xd2   :  { %v9691_v28 = vpop.f32.mrf.mxu2 }
  0xd3   :  { %v9693_v29 = vpop.f32.mrf.mxu3 }
  0xda   :  { %v9695_v12 = vpop.f32.mrf.mxu2 }
  0xdb   :  { %v9697_v31 = vpop.f32.mrf.mxu3 }
  0xe2   :  { %v323_v33 = vpop.f32.mrf.mxu2 }
  0xe3   :  { %v372_v38 = vpop.f32.mrf.mxu3  ;;  %v324_v47 = vadd.f32 %v323_v33, %v9702_v37  ;;  %v231_v33 = vadd.f32 %v230_v40, %v9706_v41 }
  0xe4   :  { %v373_v49 = vadd.f32 %v372_v38, %v9704_v39 }
  0xe5   :  { %v414_v61 = vmax.f32 %v324_v47, 0.0  ;;  %v420_v40 = vmax.f32 %v231_v33, 0.0 }
  0xe6   :  { %v415_v3 = vmax.f32 %v373_v49, 0.0  ;;  %v8465_v49 = vld [vmem:[#allocation5 + $0x64] sm:$0xf] }
  0xe7   :  { %v9718_v14 = vadd.f32 %v414_v61, %v412_v60  ;;  %v7368_v52 = vor.u32 %v8465_v49, %v7365_v50  ;;  %v285_v49 = vadd.f32 %v284_v21, %v9708_v45 }
  0xe8   :  { %v9722_v23 = vadd.f32 %v415_v3, %v413_v2  ;;  %v424_v3 = vmax.f32 %v233_v51, 0.0  ;;  %v8463_v51 = vld [vmem:[#allocation5 + $0x54] sm:$0xf] }
  0xe9   :  { %1295 = vmatpush.bf16.msrb.mxu2 %v7368_v52  ;;  %v7357_v52 = vld [vmem:[#allocation5 + $0x58] sm:$0xf0]  ;;  %v429_v21 = vmax.f32 %v285_v49, 0.0 }
  0xea   :  { %v325_v58 = vpop.f32.mrf.mxu2 }
  0xeb   :  { %v326_v62 = vadd.f32 %v325_v58, %v9702_v37  ;;  %v374_v63 = vpop.f32.mrf.mxu3 }
  0xec   :  { %v375_v4 = vadd.f32 %v374_v63, %v9704_v39 }
  0xed   :  { %v418_v6 = vmax.f32 %v326_v62, 0.0  ;;  %v421_v62 = vmax.f32 %v280_v46, 0.0  ;;  %v236_v46 = vadd.f32 %v235_v48, %v9706_v41 }
  0xee   :  { %v419_v9 = vmax.f32 %v375_v4, 0.0 }
  0xef   :  { %v9720_v15 = vadd.f32 %v418_v6, %v416_v5  ;;  %v425_v5 = vmax.f32 %v282_v55, 0.0  ;;  %v7360_v55 = vor.u32 %v8463_v51, %v7357_v52 }
  0xf0   :  { %v9724_v24 = vadd.f32 %v419_v9, %v417_v7  ;;  %v7363_v7 = vld [vmem:[#allocation5 + $0x60] sm:$0xf]  ;;  %v8466_v9 = vld [vmem:[#allocation5 + $0x64] sm:$0xf0] }
  0xf1   :  { %v508_v26 = vpack.c.bf16 %v9720_v15, %v9718_v14  ;;  %v7364_v13 = vor.u32 %v8466_v9, %v7363_v7  ;;  %1296 = vmatpush.bf16.msrb.mxu2 %v7360_v55 }
  0xf2   :  { %v328_v30 = vpop.f32.mrf.mxu2  ;;  %v509_v32 = vpack.c.bf16 %v9724_v24, %v9722_v23 }
  0xf3   :  { %v377_v34 = vpop.f32.mrf.mxu3  ;;  %730 = vmatmul.bf16.vlgmr.msrb.gmra.mxu0 %v508_v26  ;;  %828 = vmatmul.bf16.vlgmr.msra.gmra.mxu2 %v508_v26  ;;  %v329_v38 = vadd.f32 %v328_v30, %v9702_v37  ;;  %v237_v30 = vpop.f32.mrf.mxu0 }
  0xf4   :  { %779 = vmatmul.bf16.vlgmr.msrb.gmra.mxu1 %v509_v32  ;;  %877 = vmatmul.bf16.vlgmr.msra.gmra.mxu3 %v509_v32  ;;  %v378_v47 = vadd.f32 %v377_v34, %v9704_v39  ;;  %v238_v54 = vadd.f32 %v237_v30, %v9706_v41  ;;  %v7419_v30 = vld [vmem:[#allocation5 + $0xd0] sm:$0xf] }
  0xf5   :  { %v422_v60 = vmax.f32 %v329_v38, 0.0  ;;  %1197 = vmatpush.bf16.msra.mxu0 %v7364_v13  ;;  %v286_v38 = vpop.f32.mrf.mxu1  ;;  %v7355_v13 = vld [vmem:[#allocation5 + $0x50] sm:$0xf] }
  0xf6   :  { %v423_v63 = vmax.f32 %v378_v47, 0.0  ;;  %v287_v59 = vadd.f32 %v286_v38, %v9708_v45 }
  0xf7   :  { %v9738_v10 = vadd.f32 %v422_v60, %v420_v40 }
  0xf8   :  { %v9742_v19 = vadd.f32 %v423_v63, %v421_v62  ;;  %v433_v7 = vmax.f32 %v287_v59, 0.0  ;;  %v8461_v59 = vld [vmem:[#allocation5 + $0x44] sm:$0xf] }
  0xfa   :  { %v330_v58 = vpop.f32.mrf.mxu2 }
  0xfb   :  { %v331_v61 = vadd.f32 %v330_v58, %v9702_v37  ;;  %v379_v43 = vpop.f32.mrf.mxu3  ;;  %v7421_v58 = vld [vmem:[#allocation5 + $0xd8] sm:$0xf0] }
  0xfc   :  { %v380_v2 = vadd.f32 %v379_v43, %v9704_v39  ;;  %v7424_v60 = vor.u32 %v8479_v53, %v7421_v58 }
  0xfd   :  { %v426_v4 = vmax.f32 %v331_v61, 0.0  ;;  %v428_v61 = vmax.f32 %v236_v46, 0.0 }
  0xfe   :  { %v427_v6 = vmax.f32 %v380_v2, 0.0  ;;  %v240_v2 = vpop.f32.mrf.mxu0  ;;  %1345 = vmatpush.bf16.msrb.mxu3 %v7424_v60  ;;  %v8477_v60 = vld [vmem:[#allocation5 + $0xc4] sm:$0xf] }
  0xff   :  { %v9740_v11 = vadd.f32 %v426_v4, %v424_v3  ;;  %v432_v4 = vmax.f32 %v238_v54, 0.0  ;;  %v241_v52 = vadd.f32 %v240_v2, %v9706_v41 }
 0x100   :  { %v9744_v22 = vadd.f32 %v427_v6, %v425_v5  ;;  %v289_v6 = vpop.f32.mrf.mxu1 }
 0x101   :  { %v510_v26 = vpack.c.bf16 %v9740_v11, %v9738_v10  ;;  %v290_v55 = vadd.f32 %v289_v6, %v9708_v45 }
 0x102   :  { %v333_v32 = vpop.f32.mrf.mxu2  ;;  %v511_v34 = vpack.c.bf16 %v9744_v22, %v9742_v19 }
 0x103   :  { %v382_v33 = vpop.f32.mrf.mxu3  ;;  %735 = vmatmul.bf16.gmra.mxu0 %v510_v26  ;;  %833 = vmatmul.bf16.gmra.mxu2 %v510_v26  ;;  %v334_v47 = vadd.f32 %v333_v32, %v9702_v37  ;;  %v7356_v26 = vor.u32 %v8464_v16, %v7355_v13  ;;  %v8480_v32 = vld [vmem:[#allocation5 + $0xd4] sm:$0xf0]  ;;  %v437_v6 = vmax.f32 %v290_v55, 0.0 }
 0x104   :  { %784 = vmatmul.bf16.gmra.mxu1 %v511_v34  ;;  %882 = vmatmul.bf16.gmra.mxu3 %v511_v34  ;;  %v383_v50 = vadd.f32 %v382_v33, %v9704_v39  ;;  %v7420_v38 = vor.u32 %v8480_v32, %v7419_v30  ;;  %v7347_v32 = vld [vmem:[#allocation5 + $0x40] sm:$0xf] }
 0x105   :  { %v430_v43 = vmax.f32 %v334_v47, 0.0  ;;  %1198 = vmatpush.bf16.msra.mxu0 %v7356_v26 }
 0x106   :  { %v431_v63 = vmax.f32 %v383_v50, 0.0  ;;  %1247 = vmatpush.bf16.msra.mxu1 %v7420_v38  ;;  %v242_v51 = vpop.f32.mrf.mxu0  ;;  %v8462_v38 = vld [vmem:[#allocation5 + $0x44] sm:$0xf0] }
 0x107   :  { %v9758_v17 = vadd.f32 %v430_v43, %v428_v61  ;;  %v243_v61 = vadd.f32 %v242_v51, %v9706_v41  ;;  %v8478_v51 = vld [vmem:[#allocation5 + $0xc4] sm:$0xf0] }
 0x108   :  { %v9762_v34 = vadd.f32 %v431_v63, %v429_v21  ;;  %v291_v54 = vpop.f32.mrf.mxu1 }
 0x109   :  { %v440_v13 = vmax.f32 %v243_v61, 0.0 }
 0x10a   :  { %v335_v40 = vpop.f32.mrf.mxu2 }
 0x10b   :  { %v336_v48 = vadd.f32 %v335_v40, %v9702_v37  ;;  %v384_v62 = vpop.f32.mrf.mxu3  ;;  %v7349_v40 = vld [vmem:[#allocation5 + $0x48] sm:$0xf0] }
 0x10c   :  { %v385_v3 = vadd.f32 %v384_v62, %v9704_v39  ;;  %v7352_v43 = vor.u32 %v8461_v59, %v7349_v40  ;;  %v292_v62 = vadd.f32 %v291_v54, %v9708_v45 }
 0x10d   :  { %v434_v5 = vmax.f32 %v336_v48, 0.0  ;;  %v7413_v48 = vld [vmem:[#allocation5 + $0xc8] sm:$0xf0] }
 0x10e   :  { %v435_v9 = vmax.f32 %v385_v3, 0.0  ;;  %v7416_v63 = vor.u32 %v8477_v60, %v7413_v48  ;;  %v436_v3 = vmax.f32 %v241_v52, 0.0  ;;  %1297 = vmatpush.bf16.msrb.mxu2 %v7352_v43  ;;  %v441_v26 = vmax.f32 %v292_v62, 0.0  ;;  %v8459_v43 = vld [vmem:[#allocation5 + $0x34] sm:$0xf] }
 0x10f   :  { %v9760_v25 = vadd.f32 %v434_v5, %v432_v4  ;;  %v7341_v48 = vld [vmem:[#allocation5 + $0x38] sm:$0xf0]  ;;  %v8475_v62 = vld [vmem:[#allocation5 + $0xb4] sm:$0xf] }
 0x110   :  { %v9764_v33 = vadd.f32 %v435_v9, %v433_v7  ;;  %1346 = vmatpush.bf16.msrb.mxu3 %v7416_v63  ;;  %v295_v63 = vadd.f32 %v9657_v20, %v9708_v45 }
 0x111   :  { %v512_v46 = vpack.c.bf16 %v9760_v25, %v9758_v17 }
 0x112   :  { %v338_v47 = vpop.f32.mrf.mxu2  ;;  %v513_v49 = vpack.c.bf16 %v9764_v33, %v9762_v34 }
 0x113   :  { %v387_v50 = vpop.f32.mrf.mxu3  ;;  %740 = vmatmul.bf16.gmra.mxu0 %v512_v46  ;;  %838 = vmatmul.bf16.gmra.mxu2 %v512_v46  ;;  %v339_v53 = vadd.f32 %v338_v47, %v9702_v37 }
 0x114   :  { %789 = vmatmul.bf16.gmra.mxu1 %v513_v49  ;;  %887 = vmatmul.bf16.gmra.mxu3 %v513_v49  ;;  %v388_v58 = vadd.f32 %v387_v50, %v9704_v39  ;;  %v7348_v49 = vor.u32 %v8462_v38, %v7347_v32  ;;  %v7411_v50 = vld [vmem:[#allocation5 + $0xc0] sm:$0xf] }
 0x115   :  { %v438_v2 = vmax.f32 %v339_v53, 0.0  ;;  %v7412_v54 = vor.u32 %v8478_v51, %v7411_v50  ;;  %v7339_v50 = vld [vmem:[#allocation5 + $0x30] sm:$0xf]  ;;  %v8460_v51 = vld [vmem:[#allocation5 + $0x34] sm:$0xf0] }
 0x116   :  { %v439_v7 = vmax.f32 %v388_v58, 0.0  ;;  %1199 = vmatpush.bf16.msra.mxu0 %v7348_v49 }
 0x117   :  { %v9778_v46 = vadd.f32 %v438_v2, %v436_v3  ;;  %1248 = vmatpush.bf16.msra.mxu1 %v7412_v54  ;;  %v248_v3 = vadd.f32 %v9659_v35, %v9706_v41  ;;  %v7344_v2 = vor.u32 %v8459_v43, %v7341_v48 }
 0x118   :  { %v9782_v52 = vadd.f32 %v439_v7, %v437_v6 }
 0x119   :  { %1298 = vmatpush.bf16.msrb.mxu2 %v7344_v2  ;;  %v448_v32 = vmax.f32 %v248_v3, 0.0  ;;  %v8457_v2 = vld [vmem:[#allocation5 + $0x24] sm:$0xf] }
 0x11a   :  { %v340_v21 = vpop.f32.mrf.mxu2 }
 0x11b   :  { %v341_v4 = vadd.f32 %v340_v21, %v9702_v37  ;;  %v389_v5 = vpop.f32.mrf.mxu3  ;;  %v246_v21 = vadd.f32 %v9655_v18, %v9706_v41 }
 0x11c   :  { %v390_v9 = vadd.f32 %v389_v5, %v9704_v39  ;;  %v297_v5 = vadd.f32 %v9661_v36, %v9708_v45 }
 0x11d   :  { %v442_v16 = vmax.f32 %v341_v4, 0.0  ;;  %v7405_v4 = vld [vmem:[#allocation5 + $0xb8] sm:$0xf0]  ;;  %v444_v20 = vmax.f32 %v246_v21, 0.0 }
 0x11e   :  { %v443_v30 = vmax.f32 %v390_v9, 0.0  ;;  %v7408_v7 = vor.u32 %v8475_v62, %v7405_v4  ;;  %v449_v38 = vmax.f32 %v297_v5, 0.0  ;;  %v7333_v4 = vld [vmem:[#allocation5 + $0x28] sm:$0xf0]  ;;  %v8473_v5 = vld [vmem:[#allocation5 + $0xa4] sm:$0xf] }
 0x11f   :  { %v9780_v47 = vadd.f32 %v442_v16, %v440_v13 }
 0x120   :  { %v9784_v53 = vadd.f32 %v443_v30, %v441_v26  ;;  %1347 = vmatpush.bf16.msrb.mxu3 %v7408_v7  ;;  %v445_v30 = vmax.f32 %v295_v63, 0.0  ;;  %v300_v7 = vadd.f32 %v9669_v44, %v9708_v45 }
 0x121   :  { %v514_v55 = vpack.c.bf16 %v9780_v47, %v9778_v46 }
 0x122   :  { %v343_v58 = vpop.f32.mrf.mxu2  ;;  %v515_v59 = vpack.c.bf16 %v9784_v53, %v9782_v52 }
 0x123   :  { %v392_v40 = vpop.f32.mrf.mxu3  ;;  %745 = vmatmul.bf16.gmra.mxu0 %v514_v55  ;;  %843 = vmatmul.bf16.gmra.mxu2 %v514_v55  ;;  %v344_v60 = vadd.f32 %v343_v58, %v9702_v37  ;;  %v7340_v55 = vor.u32 %v8460_v51, %v7339_v50  ;;  %v7403_v58 = vld [vmem:[#allocation5 + $0xb0] sm:$0xf] }
 0x124   :  { %794 = vmatmul.bf16.gmra.mxu1 %v515_v59  ;;  %892 = vmatmul.bf16.gmra.mxu3 %v515_v59  ;;  %v393_v61 = vadd.f32 %v392_v40, %v9704_v39  ;;  %v8476_v59 = vld [vmem:[#allocation5 + $0xb4] sm:$0xf0] }
 0x125   :  { %v446_v9 = vmax.f32 %v344_v60, 0.0  ;;  %1200 = vmatpush.bf16.msra.mxu0 %v7340_v55 }
 0x126   :  { %v447_v26 = vmax.f32 %v393_v61, 0.0  ;;  %v7404_v61 = vor.u32 %v8476_v59, %v7403_v58  ;;  %v7331_v58 = vld [vmem:[#allocation5 + $0x20] sm:$0xf]  ;;  %v8458_v59 = vld [vmem:[#allocation5 + $0x24] sm:$0xf0] }
 0x127   :  { %v9802_v36 = vadd.f32 %v446_v9, %v444_v20  ;;  %v253_v9 = vadd.f32 %v9671_v56, %v9706_v41 }
 0x128   :  { %v9806_v40 = vadd.f32 %v447_v26, %v445_v30  ;;  %1249 = vmatpush.bf16.msra.mxu1 %v7404_v61  ;;  %v302_v26 = vadd.f32 %v9673_v57, %v9708_v45 }
 0x129   :  { %v456_v50 = vmax.f32 %v253_v9, 0.0  ;;  %v7325_v9 = vld [vmem:[#allocation5 + $0x18] sm:$0xf0] }
 0x12a   :  { %v345_v6 = vpop.f32.mrf.mxu2  ;;  %v457_v51 = vmax.f32 %v302_v26, 0.0  ;;  %v7389_v26 = vld [vmem:[#allocation5 + $0x98] sm:$0xf0] }
 0x12b   :  { %v346_v13 = vadd.f32 %v345_v6, %v9702_v37  ;;  %v394_v16 = vpop.f32.mrf.mxu3  ;;  %v251_v6 = vadd.f32 %v9667_v42, %v9706_v41 }
 0x12c   :  { %v395_v18 = vadd.f32 %v394_v16, %v9704_v39  ;;  %v7397_v16 = vld [vmem:[#allocation5 + $0xa8] sm:$0xf0] }
 0x12d   :  { %v450_v35 = vmax.f32 %v346_v13, 0.0  ;;  %v7336_v13 = vor.u32 %v8457_v2, %v7333_v4  ;;  %v7400_v20 = vor.u32 %v8473_v5, %v7397_v16  ;;  %v452_v44 = vmax.f32 %v251_v6, 0.0 }
 0x12e   :  { %v451_v49 = vmax.f32 %v395_v18, 0.0 }
 0x12f   :  { %v9804_v54 = vadd.f32 %v450_v35, %v448_v32  ;;  %1299 = vmatpush.bf16.msrb.mxu2 %v7336_v13  ;;  %1348 = vmatpush.bf16.msrb.mxu3 %v7400_v20  ;;  %v8471_v13 = vld [vmem:[#allocation5 + $0x94] sm:$0xf] }
 0x130   :  { %v9808_v60 = vadd.f32 %v451_v49, %v449_v38  ;;  %v453_v49 = vmax.f32 %v300_v7, 0.0  ;;  %v8455_v7 = vld [vmem:[#allocation5 + $0x14] sm:$0xf]  ;;  %v7392_v20 = vor.u32 %v8471_v13, %v7389_v26 }
 0x131   :  { %v516_v43 = vpack.c.bf16 %v9804_v54, %v9802_v36  ;;  %v7328_v16 = vor.u32 %v8455_v7, %v7325_v9 }
 0x132   :  { %v348_v48 = vpop.f32.mrf.mxu2  ;;  %v517_v62 = vpack.c.bf16 %v9808_v60, %v9806_v40 }
 0x133   :  { %v397_v21 = vpop.f32.mrf.mxu3  ;;  %750 = vmatmul.bf16.gmra.mxu0 %v516_v43  ;;  %848 = vmatmul.bf16.gmra.mxu2 %v516_v43  ;;  %v349_v63 = vadd.f32 %v348_v48, %v9702_v37  ;;  %v7332_v43 = vor.u32 %v8458_v59, %v7331_v58  ;;  %v7395_v48 = vld [vmem:[#allocation5 + $0xa0] sm:$0xf] }
 0x134   :  { %799 = vmatmul.bf16.gmra.mxu1 %v517_v62  ;;  %897 = vmatmul.bf16.gmra.mxu3 %v517_v62  ;;  %v398_v3 = vadd.f32 %v397_v21, %v9704_v39  ;;  %v8474_v62 = vld [vmem:[#allocation5 + $0xa4] sm:$0xf0] }
 0x135   :  { %v454_v30 = vmax.f32 %v349_v63, 0.0  ;;  %1201 = vmatpush.bf16.msra.mxu0 %v7332_v43  ;;  %1300 = vmatpush.bf16.msrb.mxu2 %v7328_v16 }
 0x136   :  { %v455_v38 = vmax.f32 %v398_v3, 0.0  ;;  %v7396_v3 = vor.u32 %v8474_v62, %v7395_v48  ;;  %1349 = vmatpush.bf16.msrb.mxu3 %v7392_v20 }
 0x137   :  { %v9826_v57 = vadd.f32 %v454_v30, %v452_v44  ;;  %v8456_v30 = vld [vmem:[#allocation5 + $0x14] sm:$0xf0] }
 0x138   :  { %v9830_v21 = vadd.f32 %v455_v38, %v453_v49  ;;  %1250 = vmatpush.bf16.msra.mxu1 %v7396_v3 }
 0x13a   :  { %v350_v18 = vpop.f32.mrf.mxu2 }
 0x13b   :  { %v351_v32 = vadd.f32 %v350_v18, %v9702_v37  ;;  %v399_v35 = vpop.f32.mrf.mxu3  ;;  %v7323_v18 = vld [vmem:[#allocation5 + $0x10] sm:$0xf] }
 0x13c   :  { %v400_v42 = vadd.f32 %v399_v35, %v9704_v39  ;;  %v7324_v38 = vor.u32 %v8456_v30, %v7323_v18  ;;  %v261_v30 = vadd.f32 %v9691_v28, %v9706_v41 }
 0x13d   :  { %v458_v56 = vmax.f32 %v351_v32, 0.0  ;;  %v7387_v32 = vld [vmem:[#allocation5 + $0x90] sm:$0xf] }
 0x13e   :  { %v459_v55 = vmax.f32 %v400_v42, 0.0  ;;  %v8472_v42 = vld [vmem:[#allocation5 + $0x94] sm:$0xf0]  ;;  %1202 = vmatpush.bf16.msra.mxu0 %v7324_v38  ;;  %v263_v38 = vadd.f32 %v9695_v12, %v9706_v41 }
 0x13f   :  { %v9828_v61 = vadd.f32 %v458_v56, %v456_v50  ;;  %v7388_v49 = vor.u32 %v8472_v42, %v7387_v32  ;;  %v256_v50 = vadd.f32 %v9679_v0, %v9706_v41  ;;  %v258_v56 = vadd.f32 %v9683_v8, %v9706_v41  ;;  %v7315_v41 = vld [vmem:[#allocation5] sm:$0xf] }
 0x140   :  { %v9832_v63 = vadd.f32 %v459_v55, %v457_v51  ;;  %v305_v51 = vadd.f32 %v9681_v1, %v9708_v45  ;;  %v307_v55 = vadd.f32 %v9685_v27, %v9708_v45  ;;  %v310_v32 = vadd.f32 %v9693_v29, %v9708_v45 }
 0x141   :  { %v518_v2 = vpack.c.bf16 %v9828_v61, %v9826_v57  ;;  %1251 = vmatpush.bf16.msra.mxu1 %v7388_v49  ;;  %v460_v0 = vmax.f32 %v256_v50, 0.0  ;;  %v312_v42 = vadd.f32 %v9697_v31, %v9708_v45 }
 0x142   :  { %v353_v4 = vpop.f32.mrf.mxu2  ;;  %v519_v5 = vpack.c.bf16 %v9832_v63, %v9830_v21  ;;  %v461_v8 = vmax.f32 %v305_v51, 0.0  ;;  %v468_v51 = vmax.f32 %v261_v30, 0.0 }
 0x143   :  { %v402_v6 = vpop.f32.mrf.mxu3  ;;  %755 = vmatmul.bf16.gmra.mxu0 %v518_v2  ;;  %853 = vmatmul.bf16.gmra.mxu2 %v518_v2  ;;  %v354_v35 = vadd.f32 %v353_v4, %v9702_v37  ;;  %v464_v2 = vmax.f32 %v258_v56, 0.0 }
 0x144   :  { %804 = vmatmul.bf16.gmra.mxu1 %v519_v5  ;;  %902 = vmatmul.bf16.gmra.mxu3 %v519_v5  ;;  %v403_v44 = vadd.f32 %v402_v6, %v9704_v39  ;;  %v465_v5 = vmax.f32 %v307_v55, 0.0  ;;  %v469_v55 = vmax.f32 %v310_v32, 0.0 }
 0x145   :  { %v462_v59 = vmax.f32 %v354_v35, 0.0 }
 0x146   :  { %v463_v62 = vmax.f32 %v403_v44, 0.0 }
 0x147   :  { %v9850_v7 = vadd.f32 %v462_v59, %v460_v0  ;;  %v472_v59 = vmax.f32 %v263_v38, 0.0  ;;  %v8454_v0 = vld [vmem:[#allocation5 + $0x4] sm:$0xf0] }
 0x148   :  { %v9854_v27 = vadd.f32 %v463_v62, %v461_v8  ;;  %v473_v62 = vmax.f32 %v312_v42, 0.0  ;;  %v8469_v8 = vld [vmem:[#allocation5 + $0x84] sm:$0xf] }
 0x14a   :  { %v355_v58 = vpop.f32.mrf.mxu2 }
 0x14b   :  { %v356_v43 = vadd.f32 %v355_v58, %v9702_v37  ;;  %v404_v48 = vpop.f32.mrf.mxu3 }
 0x14c   :  { %v405_v3 = vadd.f32 %v404_v48, %v9704_v39  ;;  %v7317_v48 = vld [vmem:[#allocation5 + $0x8] sm:$0xf0] }
 0x14d   :  { %v466_v4 = vmax.f32 %v356_v43, 0.0  ;;  %v8453_v43 = vld [vmem:[#allocation5 + $0x4] sm:$0xf] }
 0x14e   :  { %v467_v6 = vmax.f32 %v405_v3, 0.0  ;;  %v7320_v12 = vor.u32 %v8453_v43, %v7317_v48 }
 0x14f   :  { %v9852_v1 = vadd.f32 %v466_v4, %v464_v2 }
 0x150   :  { %v9856_v9 = vadd.f32 %v467_v6, %v465_v5  ;;  %1301 = vmatpush.bf16.msrb.mxu2 %v7320_v12  ;;  %v7381_v5 = vld [vmem:[#allocation5 + $0x88] sm:$0xf0]  ;;  %v7379_v6 = vld [vmem:[#allocation5 + $0x80] sm:$0xf] }
 0x151   :  { %v520_v13 = vpack.c.bf16 %v9852_v1, %v9850_v7 }
 0x152   :  { %v358_v16 = vpop.f32.mrf.mxu2  ;;  %v521_v26 = vpack.c.bf16 %v9856_v9, %v9854_v27 }
 0x153   :  { %v407_v18 = vpop.f32.mrf.mxu3  ;;  %760 = vmatmul.bf16.gmra.mxu0 %v520_v13  ;;  %858 = vmatmul.bf16.gmra.mxu2 %v520_v13  ;;  %v359_v20 = vadd.f32 %v358_v16, %v9702_v37  ;;  %v7384_v16 = vor.u32 %v8469_v8, %v7381_v5 }
 0x154   :  { %809 = vmatmul.bf16.gmra.mxu1 %v521_v26  ;;  %907 = vmatmul.bf16.gmra.mxu3 %v521_v26  ;;  %v408_v35 = vadd.f32 %v407_v18, %v9704_v39  ;;  %v8470_v26 = vld [vmem:[#allocation5 + $0x84] sm:$0xf0] }
 0x155   :  { %v470_v49 = vmax.f32 %v359_v20, 0.0  ;;  %v7380_v18 = vor.u32 %v8470_v26, %v7379_v6  ;;  %1350 = vmatpush.bf16.msrb.mxu3 %v7384_v16  ;;  %v556_v20 = vld [vmem:[%s14698_s4] sm:$0x3]  ;;  %v7565_v6 = vld [vmem:[#allocation7 + $0xf8] sm:$0xf0] }
 0x156   :  { %v471_v58 = vmax.f32 %v408_v35, 0.0  ;;  %v9889_v30 = vperm.slane %v556_v20, 0  ;;  %v9892_v42 = vperm.slane %v556_v20, 1 }
 0x157   :  { %v9874_v31 = vadd.f32 %v470_v49, %v468_v51  ;;  %1252 = vmatpush.bf16.msra.mxu1 %v7380_v18 }
 0x158   :  { %v9878_v2 = vadd.f32 %v471_v58, %v469_v55 }
 0x15a   :  { %v360_v44 = vpop.f32.mrf.mxu2 }
 0x15b   :  { %v361_v50 = vadd.f32 %v360_v44, %v9702_v37  ;;  %v409_v56 = vpop.f32.mrf.mxu3  ;;  %v7316_v37 = vor.u32 %v8454_v0, %v7315_v41  ;;  %v8499_v0 = vld [vmem:[#allocation7 + $0x74] sm:$0xf] }
 0x15c   :  { %v410_v28 = vadd.f32 %v409_v56, %v9704_v39 }
 0x15d   :  { %v474_v29 = vmax.f32 %v361_v50, 0.0  ;;  %1203 = vmatpush.bf16.msra.mxu0 %v7316_v37  ;;  %v7501_v37 = vld [vmem:[#allocation7 + $0x78] sm:$0xf0] }
 0x15e   :  { %v475_v3 = vmax.f32 %v410_v28, 0.0  ;;  %v7504_v5 = vor.u32 %v8499_v0, %v7501_v37 }
 0x15f   :  { %v9876_v45 = vadd.f32 %v474_v29, %v472_v59 }
 0x160   :  { %v9880_v4 = vadd.f32 %v475_v3, %v473_v62  ;;  %1768 = vmatpush.bf16.msra.mxu2 %v7504_v5 }
 0x161   :  { %v522_v39 = vpack.c.bf16 %v9876_v45, %v9874_v31 }
 0x162   :  { %v523_v13 = vpack.c.bf16 %v9880_v4, %v9878_v2 }
 0x163   :  { %765 = vmatmul.bf16.gmra.mxu0 %v522_v39  ;;  %863 = vmatmul.bf16.gmra.mxu2 %v522_v39  ;;  %v8515_v39 = vld [vmem:[#allocation7 + $0xf4] sm:$0xf] }
 0x164   :  { %814 = vmatmul.bf16.gmra.mxu1 %v523_v13  ;;  %912 = vmatmul.bf16.gmra.mxu3 %v523_v13 }
 0x170   :  { %v731_v32 = vpop.f32.mrf.mxu0 }
 0x171   :  { %v780_v35 = vpop.f32.mrf.mxu1  ;;  %v732_v38 = vadd.f32 %v731_v32, %v9889_v30 }
 0x173   :  { %v781_v49 = vadd.f32 %v780_v35, %v732_v38  ;;  %v7499_v38 = vld [vmem:[#allocation7 + $0x70] sm:$0xf] }
 0x175   :  { %v918_v28 = vmax.f32 %v781_v49, 0.0 }
 0x176   :  { %v829_v44 = vpop.f32.mrf.mxu2 }
 0x177   :  { %v878_v50 = vpop.f32.mrf.mxu3  ;;  %v830_v51 = vadd.f32 %v829_v44, %v9892_v42  ;;  %v9897_v62 = vadd.f32 %v918_v28, %v9718_v14  ;;  %v7568_v14 = vor.u32 %v8515_v39, %v7565_v6  ;;  %v8500_v44 = vld [vmem:[#allocation7 + $0x74] sm:$0xf0] }
 0x178   :  { %v733_v56 = vpop.f32.mrf.mxu0  ;;  %v8516_v28 = vld [vmem:[#allocation7 + $0xf4] sm:$0xf0] }
 0x179   :  { %v734_v55 = vadd.f32 %v733_v56, %v9889_v30  ;;  %v782_v58 = vpop.f32.mrf.mxu1  ;;  %v879_v29 = vadd.f32 %v878_v50, %v830_v51  ;;  %1817 = vmatpush.bf16.msra.mxu3 %v7568_v14  ;;  %v7500_v50 = vor.u32 %v8500_v44, %v7499_v38 }
 0x17b   :  { %v783_v59 = vadd.f32 %v782_v58, %v734_v55  ;;  %v919_v13 = vmax.f32 %v879_v29, 0.0  ;;  %v7563_v58 = vld [vmem:[#allocation7 + $0xf0] sm:$0xf]  ;;  %1670 = vmatpush.bf16.msrb.mxu0 %v7500_v50 }
 0x17c   :  { %v7564_v29 = vor.u32 %v8516_v28, %v7563_v58  ;;  %v8498_v58 = vld [vmem:[#allocation7 + $0x64] sm:$0xf0] }
 0x17d   :  { %v920_v43 = vmax.f32 %v783_v59, 0.0  ;;  %v9907_v32 = vadd.f32 %v919_v13, %v9722_v23  ;;  %v8497_v13 = vld [vmem:[#allocation7 + $0x64] sm:$0xf] }
 0x17e   :  { %v831_v48 = vpop.f32.mrf.mxu2  ;;  %1719 = vmatpush.bf16.msrb.mxu1 %v7564_v29 }
 0x17f   :  { %v9900_v3 = vadd.f32 %v920_v43, %v9720_v15  ;;  %v832_v12 = vadd.f32 %v831_v48, %v9892_v42  ;;  %v880_v41 = vpop.f32.mrf.mxu3 }
 0x180   :  { %v736_v8 = vpop.f32.mrf.mxu0 }
 0x181   :  { %v982_v16 = vpack.c.bf16 %v9900_v3, %v9897_v62  ;;  %v881_v26 = vadd.f32 %v880_v41, %v832_v12  ;;  %v785_v18 = vpop.f32.mrf.mxu1  ;;  %v737_v15 = vadd.f32 %v736_v8, %v9889_v30 }
 0x183   :  { %v921_v20 = vmax.f32 %v881_v26, 0.0  ;;  %1204 = vmatmul.bf16.vlgmr.msra.gmra.mxu0 %v982_v16  ;;  %1302 = vmatmul.bf16.vlgmr.msrb.gmra.mxu2 %v982_v16  ;;  %v786_v51 = vadd.f32 %v785_v18, %v737_v15  ;;  %v7493_v16 = vld [vmem:[#allocation7 + $0x68] sm:$0xf0]  ;;  %v8513_v26 = vld [vmem:[#allocation7 + $0xe4] sm:$0xf] }
 0x184   :  { %v7496_v14 = vor.u32 %v8497_v13, %v7493_v16 }
 0x185   :  { %v9910_v35 = vadd.f32 %v921_v20, %v9724_v24  ;;  %v922_v48 = vmax.f32 %v786_v51, 0.0  ;;  %v7557_v20 = vld [vmem:[#allocation7 + $0xe8] sm:$0xf0] }
 0x186   :  { %v834_v49 = vpop.f32.mrf.mxu2  ;;  %1769 = vmatpush.bf16.msra.mxu2 %v7496_v14 }
 0x187   :  { %v983_v56 = vpack.c.bf16 %v9910_v35, %v9907_v32  ;;  %v883_v55 = vpop.f32.mrf.mxu3  ;;  %v835_v23 = vadd.f32 %v834_v49, %v9892_v42  ;;  %v9917_v39 = vadd.f32 %v922_v48, %v9738_v10  ;;  %v7560_v10 = vor.u32 %v8513_v26, %v7557_v20  ;;  %v8514_v48 = vld [vmem:[#allocation7 + $0xe4] sm:$0xf0] }
 0x188   :  { %v738_v59 = vpop.f32.mrf.mxu0 }
 0x189   :  { %v739_v43 = vadd.f32 %v738_v59, %v9889_v30  ;;  %v787_v24 = vpop.f32.mrf.mxu1  ;;  %1253 = vmatmul.bf16.vlgmr.msra.gmra.mxu1 %v983_v56  ;;  %1351 = vmatmul.bf16.vlgmr.msrb.gmra.mxu3 %v983_v56  ;;  %v884_v41 = vadd.f32 %v883_v55, %v835_v23  ;;  %v7491_v55 = vld [vmem:[#allocation7 + $0x60] sm:$0xf] }
 0x18a   :  { %1818 = vmatpush.bf16.msra.mxu3 %v7560_v10  ;;  %v7492_v59 = vor.u32 %v8498_v58, %v7491_v55 }
 0x18b   :  { %v788_v12 = vadd.f32 %v787_v24, %v739_v43  ;;  %v923_v15 = vmax.f32 %v884_v41, 0.0  ;;  %v7555_v24 = vld [vmem:[#allocation7 + $0xe0] sm:$0xf] }
 0x18c   :  { %1671 = vmatpush.bf16.msrb.mxu0 %v7492_v59  ;;  %v7556_v41 = vor.u32 %v8514_v48, %v7555_v24  ;;  %v8496_v24 = vld [vmem:[#allocation7 + $0x54] sm:$0xf0] }
 0x18d   :  { %v924_v0 = vmax.f32 %v788_v12, 0.0  ;;  %v9927_v56 = vadd.f32 %v923_v15, %v9742_v19  ;;  %v8495_v15 = vld [vmem:[#allocation7 + $0x54] sm:$0xf] }
 0x18e   :  { %v836_v37 = vpop.f32.mrf.mxu2  ;;  %1720 = vmatpush.bf16.msrb.mxu1 %v7556_v41 }
 0x18f   :  { %v9920_v8 = vadd.f32 %v924_v0, %v9740_v11  ;;  %v837_v5 = vadd.f32 %v836_v37, %v9892_v42  ;;  %v885_v6 = vpop.f32.mrf.mxu3 }
 0x190   :  { %v741_v18 = vpop.f32.mrf.mxu0 }
 0x191   :  { %v886_v38 = vadd.f32 %v885_v6, %v837_v5  ;;  %v790_v44 = vpop.f32.mrf.mxu1  ;;  %v984_v49 = vpack.c.bf16 %v9920_v8, %v9917_v39  ;;  %v742_v11 = vadd.f32 %v741_v18, %v9889_v30 }
 0x193   :  { %v925_v50 = vmax.f32 %v886_v38, 0.0  ;;  %1209 = vmatmul.bf16.gmra.mxu0 %v984_v49  ;;  %1307 = vmatmul.bf16.gmra.mxu2 %v984_v49  ;;  %v791_v29 = vadd.f32 %v790_v44, %v742_v11  ;;  %v7485_v38 = vld [vmem:[#allocation7 + $0x58] sm:$0xf0]  ;;  %v8511_v44 = vld [vmem:[#allocation7 + $0xd4] sm:$0xf] }
 0x194   :  { %v7488_v10 = vor.u32 %v8495_v15, %v7485_v38 }
 0x195   :  { %v9930_v51 = vadd.f32 %v925_v50, %v9744_v22  ;;  %v926_v37 = vmax.f32 %v791_v29, 0.0  ;;  %v7549_v50 = vld [vmem:[#allocation7 + $0xd8] sm:$0xf0] }
 0x196   :  { %v839_v28 = vpop.f32.mrf.mxu2  ;;  %1770 = vmatpush.bf16.msra.mxu2 %v7488_v10 }
 0x197   :  { %v888_v23 = vpop.f32.mrf.mxu3  ;;  %v985_v43 = vpack.c.bf16 %v9930_v51, %v9927_v56  ;;  %v840_v19 = vadd.f32 %v839_v28, %v9892_v42  ;;  %v9937_v26 = vadd.f32 %v926_v37, %v9758_v17  ;;  %v7552_v17 = vor.u32 %v8511_v44, %v7549_v50  ;;  %v8512_v37 = vld [vmem:[#allocation7 + $0xd4] sm:$0xf0] }
 0x198   :  { %v743_v12 = vpop.f32.mrf.mxu0 }
 0x199   :  { %v744_v0 = vadd.f32 %v743_v12, %v9889_v30  ;;  %v792_v22 = vpop.f32.mrf.mxu1  ;;  %1258 = vmatmul.bf16.gmra.mxu1 %v985_v43  ;;  %1356 = vmatmul.bf16.gmra.mxu3 %v985_v43  ;;  %v889_v6 = vadd.f32 %v888_v23, %v840_v19  ;;  %v7483_v43 = vld [vmem:[#allocation7 + $0x50] sm:$0xf] }
 0x19a   :  { %1819 = vmatpush.bf16.msra.mxu3 %v7552_v17  ;;  %v7484_v12 = vor.u32 %v8496_v24, %v7483_v43 }
 0x19b   :  { %v793_v5 = vadd.f32 %v792_v22, %v744_v0  ;;  %v927_v11 = vmax.f32 %v889_v6, 0.0  ;;  %v7547_v22 = vld [vmem:[#allocation7 + $0xd0] sm:$0xf] }
 0x19c   :  { %1672 = vmatpush.bf16.msrb.mxu0 %v7484_v12  ;;  %v7548_v6 = vor.u32 %v8512_v37, %v7547_v22  ;;  %v8494_v22 = vld [vmem:[#allocation7 + $0x44] sm:$0xf0] }
 0x19d   :  { %v928_v13 = vmax.f32 %v793_v5, 0.0  ;;  %v9947_v29 = vadd.f32 %v927_v11, %v9762_v34  ;;  %v8493_v11 = vld [vmem:[#allocation7 + $0x44] sm:$0xf] }
 0x19e   :  { %v841_v16 = vpop.f32.mrf.mxu2  ;;  %1721 = vmatpush.bf16.msrb.mxu1 %v7548_v6 }
 0x19f   :  { %v9940_v18 = vadd.f32 %v928_v13, %v9760_v25  ;;  %v842_v14 = vadd.f32 %v841_v16, %v9892_v42  ;;  %v890_v20 = vpop.f32.mrf.mxu3 }
 0x1a0   :  { %v746_v49 = vpop.f32.mrf.mxu0 }
 0x1a1   :  { %v891_v55 = vadd.f32 %v890_v20, %v842_v14  ;;  %v795_v58 = vpop.f32.mrf.mxu1  ;;  %v986_v28 = vpack.c.bf16 %v9940_v18, %v9937_v26  ;;  %v747_v25 = vadd.f32 %v746_v49, %v9889_v30 }
 0x1a3   :  { %v929_v59 = vmax.f32 %v891_v55, 0.0  ;;  %1214 = vmatmul.bf16.gmra.mxu0 %v986_v28  ;;  %1312 = vmatmul.bf16.gmra.mxu2 %v986_v28  ;;  %v796_v41 = vadd.f32 %v795_v58, %v747_v25  ;;  %v7477_v55 = vld [vmem:[#allocation7 + $0x48] sm:$0xf0]  ;;  %v8509_v58 = vld [vmem:[#allocation7 + $0xc4] sm:$0xf] }
 0x1a4   :  { %v7480_v17 = vor.u32 %v8493_v11, %v7477_v55 }
 0x1a5   :  { %v9950_v23 = vadd.f32 %v929_v59, %v9764_v33  ;;  %v930_v16 = vmax.f32 %v796_v41, 0.0  ;;  %v7541_v59 = vld [vmem:[#allocation7 + $0xc8] sm:$0xf0] }
 0x1a6   :  { %v844_v48 = vpop.f32.mrf.mxu2  ;;  %1771 = vmatpush.bf16.msra.mxu2 %v7480_v17 }
 0x1a7   :  { %v893_v19 = vpop.f32.mrf.mxu3  ;;  %v987_v0 = vpack.c.bf16 %v9950_v23, %v9947_v29  ;;  %v845_v34 = vadd.f32 %v844_v48, %v9892_v42  ;;  %v9957_v44 = vadd.f32 %v930_v16, %v9778_v46  ;;  %v7544_v46 = vor.u32 %v8509_v58, %v7541_v59  ;;  %v8510_v16 = vld [vmem:[#allocation7 + $0xc4] sm:$0xf0] }
 0x1a8   :  { %v748_v5 = vpop.f32.mrf.mxu0 }
 0x1a9   :  { %v749_v13 = vadd.f32 %v748_v5, %v9889_v30  ;;  %v797_v33 = vpop.f32.mrf.mxu1  ;;  %1263 = vmatmul.bf16.gmra.mxu1 %v987_v0  ;;  %1361 = vmatmul.bf16.gmra.mxu3 %v987_v0  ;;  %v894_v20 = vadd.f32 %v893_v19, %v845_v34  ;;  %v7475_v0 = vld [vmem:[#allocation7 + $0x40] sm:$0xf] }
 0x1aa   :  { %1820 = vmatpush.bf16.msra.mxu3 %v7544_v46  ;;  %v7476_v5 = vor.u32 %v8494_v22, %v7475_v0 }
 0x1ab   :  { %v798_v14 = vadd.f32 %v797_v33, %v749_v13  ;;  %v931_v25 = vmax.f32 %v894_v20, 0.0  ;;  %v7539_v33 = vld [vmem:[#allocation7 + $0xc0] sm:$0xf] }
 0x1ac   :  { %1673 = vmatpush.bf16.msrb.mxu0 %v7476_v5  ;;  %v7540_v20 = vor.u32 %v8510_v16, %v7539_v33  ;;  %v8492_v33 = vld [vmem:[#allocation7 + $0x34] sm:$0xf0] }
 0x1ad   :  { %v932_v15 = vmax.f32 %v798_v14, 0.0  ;;  %v9967_v41 = vadd.f32 %v931_v25, %v9782_v52  ;;  %v8491_v25 = vld [vmem:[#allocation7 + $0x34] sm:$0xf] }
 0x1ae   :  { %v846_v38 = vpop.f32.mrf.mxu2  ;;  %1722 = vmatpush.bf16.msrb.mxu1 %v7540_v20 }
 0x1af   :  { %v9960_v49 = vadd.f32 %v932_v15, %v9780_v47  ;;  %v847_v10 = vadd.f32 %v846_v38, %v9892_v42  ;;  %v895_v50 = vpop.f32.mrf.mxu3 }
 0x1b0   :  { %v751_v28 = vpop.f32.mrf.mxu0 }
 0x1b1   :  { %v896_v43 = vadd.f32 %v895_v50, %v847_v10  ;;  %v800_v24 = vpop.f32.mrf.mxu1  ;;  %v988_v48 = vpack.c.bf16 %v9960_v49, %v9957_v44  ;;  %v752_v47 = vadd.f32 %v751_v28, %v9889_v30 }
 0x1b3   :  { %v933_v12 = vmax.f32 %v896_v43, 0.0  ;;  %1219 = vmatmul.bf16.gmra.mxu0 %v988_v48  ;;  %1317 = vmatmul.bf16.gmra.mxu2 %v988_v48  ;;  %v801_v6 = vadd.f32 %v800_v24, %v752_v47  ;;  %v7469_v43 = vld [vmem:[#allocation7 + $0x38] sm:$0xf0]  ;;  %v8507_v24 = vld [vmem:[#allocation7 + $0xb4] sm:$0xf] }
 0x1b4   :  { %v7472_v46 = vor.u32 %v8491_v25, %v7469_v43 }
 0x1b5   :  { %v9970_v19 = vadd.f32 %v933_v12, %v9784_v53  ;;  %v934_v38 = vmax.f32 %v801_v6, 0.0  ;;  %v7533_v12 = vld [vmem:[#allocation7 + $0xb8] sm:$0xf0] }
 0x1b6   :  { %v849_v37 = vpop.f32.mrf.mxu2  ;;  %1772 = vmatpush.bf16.msra.mxu2 %v7472_v46 }
 0x1b7   :  { %v898_v34 = vpop.f32.mrf.mxu3  ;;  %v989_v13 = vpack.c.bf16 %v9970_v19, %v9967_v41  ;;  %v850_v52 = vadd.f32 %v849_v37, %v9892_v42  ;;  %v9977_v58 = vadd.f32 %v934_v38, %v9802_v36  ;;  %v7536_v36 = vor.u32 %v8507_v24, %v7533_v12  ;;  %v8508_v38 = vld [vmem:[#allocation7 + $0xb4] sm:$0xf0] }
 0x1b8   :  { %v753_v14 = vpop.f32.mrf.mxu0 }
 0x1b9   :  { %v754_v15 = vadd.f32 %v753_v14, %v9889_v30  ;;  %v802_v53 = vpop.f32.mrf.mxu1  ;;  %1268 = vmatmul.bf16.gmra.mxu1 %v989_v13  ;;  %1366 = vmatmul.bf16.gmra.mxu3 %v989_v13  ;;  %v899_v50 = vadd.f32 %v898_v34, %v850_v52  ;;  %v7467_v13 = vld [vmem:[#allocation7 + $0x30] sm:$0xf] }
 0x1ba   :  { %1821 = vmatpush.bf16.msra.mxu3 %v7536_v36  ;;  %v7468_v14 = vor.u32 %v8492_v33, %v7467_v13 }
 0x1bb   :  { %v803_v10 = vadd.f32 %v802_v53, %v754_v15  ;;  %v935_v47 = vmax.f32 %v899_v50, 0.0  ;;  %v7531_v53 = vld [vmem:[#allocation7 + $0xb0] sm:$0xf] }
 0x1bc   :  { %1674 = vmatpush.bf16.msrb.mxu0 %v7468_v14  ;;  %v7532_v50 = vor.u32 %v8508_v38, %v7531_v53  ;;  %v8490_v53 = vld [vmem:[#allocation7 + $0x24] sm:$0xf0] }
 0x1bd   :  { %v936_v11 = vmax.f32 %v803_v10, 0.0  ;;  %v9987_v6 = vadd.f32 %v935_v47, %v9806_v40  ;;  %v8489_v47 = vld [vmem:[#allocation7 + $0x24] sm:$0xf] }
 0x1be   :  { %v851_v55 = vpop.f32.mrf.mxu2  ;;  %1723 = vmatpush.bf16.msrb.mxu1 %v7532_v50  ;;  %v7523_v50 = vld [vmem:[#allocation7 + $0xa0] sm:$0xf] }
 0x1bf   :  { %v9980_v28 = vadd.f32 %v936_v11, %v9804_v54  ;;  %v852_v17 = vadd.f32 %v851_v55, %v9892_v42  ;;  %v900_v59 = vpop.f32.mrf.mxu3 }
 0x1c0   :  { %v756_v48 = vpop.f32.mrf.mxu0 }
 0x1c1   :  { %v901_v0 = vadd.f32 %v900_v59, %v852_v17  ;;  %v805_v22 = vpop.f32.mrf.mxu1  ;;  %v990_v37 = vpack.c.bf16 %v9980_v28, %v9977_v58  ;;  %v757_v54 = vadd.f32 %v756_v48, %v9889_v30 }
 0x1c3   :  { %v937_v5 = vmax.f32 %v901_v0, 0.0  ;;  %1224 = vmatmul.bf16.gmra.mxu0 %v990_v37  ;;  %1322 = vmatmul.bf16.gmra.mxu2 %v990_v37  ;;  %v806_v20 = vadd.f32 %v805_v22, %v757_v54  ;;  %v7461_v0 = vld [vmem:[#allocation7 + $0x28] sm:$0xf0]  ;;  %v8505_v22 = vld [vmem:[#allocation7 + $0xa4] sm:$0xf] }
 0x1c4   :  { %v7464_v36 = vor.u32 %v8489_v47, %v7461_v0  ;;  %v7517_v0 = vld [vmem:[#allocation7 + $0x98] sm:$0xf0] }
 0x1c5   :  { %v9990_v34 = vadd.f32 %v937_v5, %v9808_v60  ;;  %v938_v55 = vmax.f32 %v806_v20, 0.0  ;;  %v7525_v5 = vld [vmem:[#allocation7 + $0xa8] sm:$0xf0] }
 0x1c6   :  { %v854_v16 = vpop.f32.mrf.mxu2  ;;  %1773 = vmatpush.bf16.msra.mxu2 %v7464_v36 }
 0x1c7   :  { %v903_v52 = vpop.f32.mrf.mxu3  ;;  %v991_v15 = vpack.c.bf16 %v9990_v34, %v9987_v6  ;;  %v855_v40 = vadd.f32 %v854_v16, %v9892_v42  ;;  %v9997_v24 = vadd.f32 %v938_v55, %v9826_v57  ;;  %v7528_v57 = vor.u32 %v8505_v22, %v7525_v5  ;;  %v7451_v22 = vld [vmem:[#allocation7 + $0x10] sm:$0xf] }
 0x1c8   :  { %v758_v10 = vpop.f32.mrf.mxu0 }
 0x1c9   :  { %v759_v11 = vadd.f32 %v758_v10, %v9889_v30  ;;  %v807_v60 = vpop.f32.mrf.mxu1  ;;  %1273 = vmatmul.bf16.gmra.mxu1 %v991_v15  ;;  %1371 = vmatmul.bf16.gmra.mxu3 %v991_v15  ;;  %v904_v59 = vadd.f32 %v903_v52, %v855_v40  ;;  %v7459_v15 = vld [vmem:[#allocation7 + $0x20] sm:$0xf]  ;;  %v8506_v40 = vld [vmem:[#allocation7 + $0xa4] sm:$0xf0] }
 0x1ca   :  { %1822 = vmatpush.bf16.msra.mxu3 %v7528_v57  ;;  %v7460_v10 = vor.u32 %v8490_v53, %v7459_v15 }
 0x1cb   :  { %v808_v17 = vadd.f32 %v807_v60, %v759_v11  ;;  %v939_v54 = vmax.f32 %v904_v59, 0.0 }
 0x1cc   :  { %1675 = vmatpush.bf16.msrb.mxu0 %v7460_v10 }
 0x1cd   :  { %v940_v25 = vmax.f32 %v808_v17, 0.0  ;;  %v10007_v20 = vadd.f32 %v939_v54, %v9830_v21  ;;  %v7524_v17 = vor.u32 %v8506_v40, %v7523_v50 }
 0x1ce   :  { %v856_v43 = vpop.f32.mrf.mxu2 }
 0x1cf   :  { %v10000_v48 = vadd.f32 %v940_v25, %v9828_v61  ;;  %v857_v46 = vadd.f32 %v856_v43, %v9892_v42  ;;  %v905_v12 = vpop.f32.mrf.mxu3  ;;  %v8487_v43 = vld [vmem:[#allocation7 + $0x14] sm:$0xf]  ;;  %1724 = vmatpush.bf16.msrb.mxu1 %v7524_v17 }
 0x1d0   :  { %v761_v37 = vpop.f32.mrf.mxu0 }
 0x1d1   :  { %v906_v13 = vadd.f32 %v905_v12, %v857_v46  ;;  %v810_v33 = vpop.f32.mrf.mxu1  ;;  %v992_v16 = vpack.c.bf16 %v10000_v48, %v9997_v24  ;;  %v762_v61 = vadd.f32 %v761_v37, %v9889_v30  ;;  %v7453_v46 = vld [vmem:[#allocation7 + $0x18] sm:$0xf0]  ;;  %v8503_v12 = vld [vmem:[#allocation7 + $0x94] sm:$0xf]  ;;  %v8488_v37 = vld [vmem:[#allocation7 + $0x14] sm:$0xf0] }
 0x1d2   :  { %v7456_v47 = vor.u32 %v8487_v43, %v7453_v46  ;;  %v7520_v54 = vor.u32 %v8503_v12, %v7517_v0 }
 0x1d3   :  { %v941_v14 = vmax.f32 %v906_v13, 0.0  ;;  %1229 = vmatmul.bf16.gmra.mxu0 %v992_v16  ;;  %1327 = vmatmul.bf16.gmra.mxu2 %v992_v16  ;;  %v811_v11 = vadd.f32 %v810_v33, %v762_v61  ;;  %v7452_v13 = vor.u32 %v8488_v37, %v7451_v22 }
 0x1d4   :  { %1774 = vmatpush.bf16.msra.mxu2 %v7456_v47  ;;  %1823 = vmatpush.bf16.msra.mxu3 %v7520_v54 }
 0x1d5   :  { %v10010_v52 = vadd.f32 %v941_v14, %v9832_v63  ;;  %v942_v36 = vmax.f32 %v811_v11, 0.0  ;;  %1676 = vmatpush.bf16.msrb.mxu0 %v7452_v13 }
 0x1d6   :  { %v859_v38 = vpop.f32.mrf.mxu2 }
 0x1d7   :  { %v908_v60 = vpop.f32.mrf.mxu3  ;;  %v993_v55 = vpack.c.bf16 %v10010_v52, %v10007_v20  ;;  %v860_v21 = vadd.f32 %v859_v38, %v9892_v42  ;;  %v10017_v14 = vadd.f32 %v942_v36, %v9850_v7  ;;  %v8485_v36 = vld [vmem:[#allocation7 + $0x4] sm:$0xf] }
 0x1d8   :  { %v763_v59 = vpop.f32.mrf.mxu0 }
 0x1d9   :  { %v764_v25 = vadd.f32 %v763_v59, %v9889_v30  ;;  %v812_v63 = vpop.f32.mrf.mxu1  ;;  %1278 = vmatmul.bf16.gmra.mxu1 %v993_v55  ;;  %1376 = vmatmul.bf16.gmra.mxu3 %v993_v55  ;;  %v909_v33 = vadd.f32 %v908_v60, %v860_v21  ;;  %v7515_v60 = vld [vmem:[#allocation7 + $0x90] sm:$0xf]  ;;  %v8504_v55 = vld [vmem:[#allocation7 + $0x94] sm:$0xf0] }
 0x1da   :  { %v7516_v17 = vor.u32 %v8504_v55, %v7515_v60  ;;  %v7443_v60 = vld [vmem:[#allocation7] sm:$0xf]  ;;  %v8486_v55 = vld [vmem:[#allocation7 + $0x4] sm:$0xf0] }
 0x1db   :  { %v813_v5 = vadd.f32 %v812_v63, %v764_v25  ;;  %v943_v10 = vmax.f32 %v909_v33, 0.0 }
 0x1dc   :  { %1725 = vmatpush.bf16.msrb.mxu1 %v7516_v17 }
 0x1dd   :  { %v944_v16 = vmax.f32 %v813_v5, 0.0  ;;  %v7445_v5 = vld [vmem:[#allocation7 + $0x8] sm:$0xf0] }
 0x1de   :  { %v861_v57 = vpop.f32.mrf.mxu2 }
 0x1df   :  { %v10020_v61 = vadd.f32 %v944_v16, %v9852_v1  ;;  %v862_v15 = vadd.f32 %v861_v57, %v9892_v42  ;;  %v910_v53 = vpop.f32.mrf.mxu3  ;;  %v10027_v1 = vadd.f32 %v943_v10, %v9854_v27 }
 0x1e0   :  { %v766_v38 = vpop.f32.mrf.mxu0 }
 0x1e1   :  { %v911_v50 = vadd.f32 %v910_v53, %v862_v15  ;;  %v815_v40 = vpop.f32.mrf.mxu1  ;;  %v994_v11 = vpack.c.bf16 %v10020_v61, %v10017_v14  ;;  %v767_v7 = vadd.f32 %v766_v38, %v9889_v30 }
 0x1e3   :  { %v945_v59 = vmax.f32 %v911_v50, 0.0  ;;  %1234 = vmatmul.bf16.gmra.mxu0 %v994_v11  ;;  %1332 = vmatmul.bf16.gmra.mxu2 %v994_v11  ;;  %v816_v63 = vadd.f32 %v815_v40, %v767_v7  ;;  %v8501_v50 = vld [vmem:[#allocation7 + $0x84] sm:$0xf]  ;;  %v7509_v40 = vld [vmem:[#allocation7 + $0x88] sm:$0xf0] }
 0x1e4   :  { %v7512_v11 = vor.u32 %v8501_v50, %v7509_v40  ;;  %v8502_v7 = vld [vmem:[#allocation7 + $0x84] sm:$0xf0] }
 0x1e5   :  { %v10030_v21 = vadd.f32 %v945_v59, %v9856_v9  ;;  %v946_v37 = vmax.f32 %v816_v63, 0.0  ;;  %v7448_v9 = vor.u32 %v8485_v36, %v7445_v5  ;;  %v7507_v59 = vld [vmem:[#allocation7 + $0x80] sm:$0xf] }
 0x1e6   :  { %v864_v25 = vpop.f32.mrf.mxu2  ;;  %1824 = vmatpush.bf16.msra.mxu3 %v7512_v11  ;;  %v8531_v11 = vld [vmem:[#allocation8 + $0x74] sm:$0xf] }
 0x1e7   :  { %v913_v43 = vpop.f32.mrf.mxu3  ;;  %v995_v46 = vpack.c.bf16 %v10030_v21, %v10027_v1  ;;  %v865_v47 = vadd.f32 %v864_v25, %v9892_v42  ;;  %1775 = vmatpush.bf16.msra.mxu2 %v7448_v9  ;;  %v10037_v16 = vadd.f32 %v946_v37, %v9874_v31  ;;  %v7444_v31 = vor.u32 %v8486_v55, %v7443_v60  ;;  %v7629_v60 = vld [vmem:[#allocation8 + $0x78] sm:$0xf0]  ;;  %v8547_v55 = vld [vmem:[#allocation8 + $0xf4] sm:$0xf] }
 0x1e8   :  { %v768_v12 = vpop.f32.mrf.mxu0  ;;  %v7508_v25 = vor.u32 %v8502_v7, %v7507_v59  ;;  %v7693_v59 = vld [vmem:[#allocation8 + $0xf8] sm:$0xf0]  ;;  %v7627_v7 = vld [vmem:[#allocation8 + $0x70] sm:$0xf] }
 0x1e9   :  { %v769_v0 = vadd.f32 %v768_v12, %v9889_v30  ;;  %1283 = vmatmul.bf16.gmra.mxu1 %v995_v46  ;;  %1381 = vmatmul.bf16.gmra.mxu3 %v995_v46  ;;  %v817_v22 = vpop.f32.mrf.mxu1  ;;  %v914_v54 = vadd.f32 %v913_v43, %v865_v47  ;;  %v1030_v46 = vld [vmem:[%s14700_s6] sm:$0x3] }
 0x1ea   :  { %1677 = vmatpush.bf16.msrb.mxu0 %v7444_v31  ;;  %1726 = vmatpush.bf16.msrb.mxu1 %v7508_v25  ;;  %v10058_v47 = vperm.slane %v1030_v46, 1  ;;  %v7632_v31 = vor.u32 %v8531_v11, %v7629_v60  ;;  %v8532_v25 = vld [vmem:[#allocation8 + $0x74] sm:$0xf0] }
 0x1eb   :  { %v818_v27 = vadd.f32 %v817_v22, %v769_v0  ;;  %v947_v53 = vmax.f32 %v914_v54, 0.0 }
 0x1ec   :  { %2242 = vmatpush.bf16.msrb.mxu2 %v7632_v31 }
 0x1ed   :  { %v948_v13 = vmax.f32 %v818_v27, 0.0 }
 0x1ee   :  { %v866_v33 = vpop.f32.mrf.mxu2 }
 0x1ef   :  { %v10040_v57 = vadd.f32 %v948_v13, %v9876_v45  ;;  %v867_v30 = vadd.f32 %v866_v33, %v9892_v42  ;;  %v915_v15 = vpop.f32.mrf.mxu3  ;;  %v10046_v45 = vadd.f32 %v947_v53, %v9878_v2  ;;  %v10056_v2 = vperm.slane %v1030_v46, 0 }
 0x1f0   :  { %v7696_v46 = vor.u32 %v8547_v55, %v7693_v59 }
 0x1f1   :  { %v916_v38 = vadd.f32 %v915_v15, %v867_v30  ;;  %v996_v10 = vpack.c.bf16 %v10040_v57, %v10037_v16 }
 0x1f2   :  { %2291 = vmatpush.bf16.msrb.mxu3 %v7696_v46 }
 0x1f3   :  { %v949_v17 = vmax.f32 %v916_v38, 0.0  ;;  %1239 = vmatmul.bf16.gmra.mxu0 %v996_v10  ;;  %1337 = vmatmul.bf16.gmra.mxu2 %v996_v10 }
 0x1f5   :  { %v10049_v42 = vadd.f32 %v949_v17, %v9880_v4 }
 0x1f7   :  { %v997_v63 = vpack.c.bf16 %v10049_v42, %v10046_v45 }
 0x1f9   :  { %1288 = vmatmul.bf16.gmra.mxu1 %v997_v63  ;;  %1386 = vmatmul.bf16.gmra.mxu3 %v997_v63 }
 0x200   :  { %v1205_v43 = vpop.f32.mrf.mxu0 }
 0x201   :  { %v1206_v22 = vadd.f32 %v1205_v43, %v10056_v2 }
 0x206   :  { %v1254_v12 = vpop.f32.mrf.mxu1  ;;  %v1303_v4 = vpop.f32.mrf.mxu2 }
 0x207   :  { %v1255_v37 = vadd.f32 %v1254_v12, %v1206_v22  ;;  %v1304_v27 = vadd.f32 %v1303_v4, %v10058_v47 }
 0x208   :  { %v1207_v0 = vpop.f32.mrf.mxu0 }
 0x209   :  { %v1208_v5 = vadd.f32 %v1207_v0, %v10056_v2  ;;  %v1392_v33 = vmax.f32 %v1255_v37, 0.0 }
 0x20b   :  { %v10064_v10 = vadd.f32 %v1392_v33, %v9897_v62  ;;  %v7628_v62 = vor.u32 %v8532_v25, %v7627_v7  ;;  %v8529_v7 = vld [vmem:[#allocation8 + $0x64] sm:$0xf]  ;;  %v7621_v25 = vld [vmem:[#allocation8 + $0x68] sm:$0xf0] }
 0x20c   :  { %v1352_v36 = vpop.f32.mrf.mxu3  ;;  %v7624_v46 = vor.u32 %v8529_v7, %v7621_v25 }
 0x20d   :  { %v1353_v9 = vadd.f32 %v1352_v36, %v1304_v27  ;;  %2144 = vmatpush.bf16.msra.mxu0 %v7628_v62  ;;  %v7691_v36 = vld [vmem:[#allocation8 + $0xf0] sm:$0xf]  ;;  %v7685_v62 = vld [vmem:[#allocation8 + $0xe8] sm:$0xf0] }
 0x20e   :  { %v1256_v54 = vpop.f32.mrf.mxu1  ;;  %v1305_v13 = vpop.f32.mrf.mxu2  ;;  %2243 = vmatpush.bf16.msrb.mxu2 %v7624_v46 }
 0x20f   :  { %v1257_v30 = vadd.f32 %v1256_v54, %v1208_v5  ;;  %v1393_v38 = vmax.f32 %v1353_v9, 0.0  ;;  %v1306_v40 = vadd.f32 %v1305_v13, %v10058_v47  ;;  %v8548_v5 = vld [vmem:[#allocation8 + $0xf4] sm:$0xf0] }
 0x210   :  { %v1210_v15 = vpop.f32.mrf.mxu0  ;;  %v7692_v9 = vor.u32 %v8548_v5, %v7691_v36 }
 0x211   :  { %v1394_v53 = vmax.f32 %v1257_v30, 0.0  ;;  %v10073_v22 = vadd.f32 %v1393_v38, %v9907_v32  ;;  %v1211_v37 = vadd.f32 %v1210_v15, %v10056_v2 }
 0x212   :  { %2193 = vmatpush.bf16.msra.mxu1 %v7692_v9 }
 0x213   :  { %v10067_v50 = vadd.f32 %v1394_v53, %v9900_v3 }
 0x214   :  { %v1354_v17 = vpop.f32.mrf.mxu3 }
 0x215   :  { %v1456_v63 = vpack.c.bf16 %v10067_v50, %v10064_v10  ;;  %v1355_v43 = vadd.f32 %v1354_v17, %v1306_v40 }
 0x216   :  { %v1259_v12 = vpop.f32.mrf.mxu1  ;;  %v1308_v4 = vpop.f32.mrf.mxu2 }
 0x217   :  { %v1395_v3 = vmax.f32 %v1355_v43, 0.0  ;;  %1678 = vmatmul.bf16.vlgmr.msrb.gmra.mxu0 %v1456_v63  ;;  %1776 = vmatmul.bf16.vlgmr.msra.gmra.mxu2 %v1456_v63  ;;  %v1260_v13 = vadd.f32 %v1259_v12, %v1211_v37  ;;  %v1309_v33 = vadd.f32 %v1308_v4, %v10058_v47  ;;  %v8545_v63 = vld [vmem:[#allocation8 + $0xe4] sm:$0xf]  ;;  %v7619_v12 = vld [vmem:[#allocation8 + $0x60] sm:$0xf] }
 0x218   :  { %v1212_v0 = vpop.f32.mrf.mxu0  ;;  %v8530_v4 = vld [vmem:[#allocation8 + $0x64] sm:$0xf0]  ;;  %v7688_v37 = vor.u32 %v8545_v63, %v7685_v62 }
 0x219   :  { %v10077_v27 = vadd.f32 %v1395_v3, %v9910_v35  ;;  %v1213_v53 = vadd.f32 %v1212_v0, %v10056_v2  ;;  %v1396_v35 = vmax.f32 %v1260_v13, 0.0 }
 0x21a   :  { %2292 = vmatpush.bf16.msrb.mxu3 %v7688_v37 }
 0x21b   :  { %v1457_v54 = vpack.c.bf16 %v10077_v27, %v10073_v22  ;;  %v10084_v17 = vadd.f32 %v1396_v35, %v9917_v39  ;;  %v7620_v39 = vor.u32 %v8530_v4, %v7619_v12  ;;  %v8527_v12 = vld [vmem:[#allocation8 + $0x54] sm:$0xf]  ;;  %v7613_v4 = vld [vmem:[#allocation8 + $0x58] sm:$0xf0] }
 0x21c   :  { %v1357_v30 = vpop.f32.mrf.mxu3  ;;  %v7616_v37 = vor.u32 %v8527_v12, %v7613_v4 }
 0x21d   :  { %1727 = vmatmul.bf16.vlgmr.msrb.gmra.mxu1 %v1457_v54  ;;  %1825 = vmatmul.bf16.vlgmr.msra.gmra.mxu3 %v1457_v54  ;;  %v1358_v32 = vadd.f32 %v1357_v30, %v1309_v33  ;;  %v7683_v30 = vld [vmem:[#allocation8 + $0xe0] sm:$0xf] }
 0x21e   :  { %v1261_v15 = vpop.f32.mrf.mxu1  ;;  %v1310_v38 = vpop.f32.mrf.mxu2  ;;  %2145 = vmatpush.bf16.msra.mxu0 %v7620_v39  ;;  %v7677_v39 = vld [vmem:[#allocation8 + $0xd8] sm:$0xf0]  ;;  %2244 = vmatpush.bf16.msrb.mxu2 %v7616_v37 }
 0x21f   :  { %v1262_v40 = vadd.f32 %v1261_v15, %v1213_v53  ;;  %v1397_v55 = vmax.f32 %v1358_v32, 0.0  ;;  %v1311_v59 = vadd.f32 %v1310_v38, %v10058_v47  ;;  %v8546_v53 = vld [vmem:[#allocation8 + $0xe4] sm:$0xf0] }
 0x220   :  { %v1215_v11 = vpop.f32.mrf.mxu0  ;;  %v7684_v32 = vor.u32 %v8546_v53, %v7683_v30 }
 0x221   :  { %v1398_v60 = vmax.f32 %v1262_v40, 0.0  ;;  %v10093_v54 = vadd.f32 %v1397_v55, %v9927_v56  ;;  %v1216_v13 = vadd.f32 %v1215_v11, %v10056_v2 }
 0x222   :  { %2194 = vmatpush.bf16.msra.mxu1 %v7684_v32 }
 0x223   :  { %v10087_v31 = vadd.f32 %v1398_v60, %v9920_v8 }
 0x224   :  { %v1359_v43 = vpop.f32.mrf.mxu3 }
 0x225   :  { %v1360_v3 = vadd.f32 %v1359_v43, %v1311_v59  ;;  %v1458_v0 = vpack.c.bf16 %v10087_v31, %v10084_v17 }
 0x226   :  { %v1264_v36 = vpop.f32.mrf.mxu1  ;;  %v1313_v5 = vpop.f32.mrf.mxu2 }
 0x227   :  { %v1399_v8 = vmax.f32 %v1360_v3, 0.0  ;;  %1683 = vmatmul.bf16.gmra.mxu0 %v1458_v0  ;;  %1781 = vmatmul.bf16.gmra.mxu2 %v1458_v0  ;;  %v1265_v15 = vadd.f32 %v1264_v36, %v1216_v13  ;;  %v1314_v35 = vadd.f32 %v1313_v5, %v10058_v47  ;;  %v8543_v3 = vld [vmem:[#allocation8 + $0xd4] sm:$0xf]  ;;  %v7611_v36 = vld [vmem:[#allocation8 + $0x50] sm:$0xf] }
 0x228   :  { %v1217_v9 = vpop.f32.mrf.mxu0  ;;  %v8528_v5 = vld [vmem:[#allocation8 + $0x54] sm:$0xf0]  ;;  %v7680_v13 = vor.u32 %v8543_v3, %v7677_v39 }
 0x229   :  { %v10097_v33 = vadd.f32 %v1399_v8, %v9930_v51  ;;  %v1218_v60 = vadd.f32 %v1217_v9, %v10056_v2  ;;  %v1400_v51 = vmax.f32 %v1265_v15, 0.0 }
 0x22a   :  { %2293 = vmatpush.bf16.msrb.mxu3 %v7680_v13 }
 0x22b   :  { %v1459_v38 = vpack.c.bf16 %v10097_v33, %v10093_v54  ;;  %v10104_v43 = vadd.f32 %v1400_v51, %v9937_v26  ;;  %v7612_v26 = vor.u32 %v8528_v5, %v7611_v36  ;;  %v8525_v36 = vld [vmem:[#allocation8 + $0x44] sm:$0xf]  ;;  %v7605_v5 = vld [vmem:[#allocation8 + $0x48] sm:$0xf0] }
 0x22c   :  { %v1362_v40 = vpop.f32.mrf.mxu3  ;;  %v7608_v13 = vor.u32 %v8525_v36, %v7605_v5 }
 0x22d   :  { %1732 = vmatmul.bf16.gmra.mxu1 %v1459_v38  ;;  %1830 = vmatmul.bf16.gmra.mxu3 %v1459_v38  ;;  %v1363_v56 = vadd.f32 %v1362_v40, %v1314_v35  ;;  %v7675_v40 = vld [vmem:[#allocation8 + $0xd0] sm:$0xf] }
 0x22e   :  { %v1266_v11 = vpop.f32.mrf.mxu1  ;;  %v1315_v55 = vpop.f32.mrf.mxu2  ;;  %2146 = vmatpush.bf16.msra.mxu0 %v7612_v26  ;;  %v7669_v26 = vld [vmem:[#allocation8 + $0xc8] sm:$0xf0]  ;;  %2245 = vmatpush.bf16.msrb.mxu2 %v7608_v13 }
 0x22f   :  { %v1267_v59 = vadd.f32 %v1266_v11, %v1218_v60  ;;  %v1401_v63 = vmax.f32 %v1363_v56, 0.0  ;;  %v1316_v62 = vadd.f32 %v1315_v55, %v10058_v47  ;;  %v8544_v60 = vld [vmem:[#allocation8 + $0xd4] sm:$0xf0] }
 0x230   :  { %v1220_v7 = vpop.f32.mrf.mxu0  ;;  %v7676_v56 = vor.u32 %v8544_v60, %v7675_v40 }
 0x231   :  { %v1402_v25 = vmax.f32 %v1267_v59, 0.0  ;;  %v10113_v15 = vadd.f32 %v1401_v63, %v9947_v29  ;;  %v1221_v38 = vadd.f32 %v1220_v7, %v10056_v2 }
 0x232   :  { %2195 = vmatpush.bf16.msra.mxu1 %v7676_v56 }
 0x233   :  { %v10107_v46 = vadd.f32 %v1402_v25, %v9940_v18 }
 0x234   :  { %v1364_v0 = vpop.f32.mrf.mxu3 }
 0x235   :  { %v1365_v8 = vadd.f32 %v1364_v0, %v1316_v62  ;;  %v1460_v9 = vpack.c.bf16 %v10107_v46, %v10104_v43 }
 0x236   :  { %v1269_v30 = vpop.f32.mrf.mxu1  ;;  %v1318_v53 = vpop.f32.mrf.mxu2 }
 0x237   :  { %v1403_v18 = vmax.f32 %v1365_v8, 0.0  ;;  %1688 = vmatmul.bf16.gmra.mxu0 %v1460_v9  ;;  %1786 = vmatmul.bf16.gmra.mxu2 %v1460_v9  ;;  %v1270_v11 = vadd.f32 %v1269_v30, %v1221_v38  ;;  %v1319_v51 = vadd.f32 %v1318_v53, %v10058_v47  ;;  %v8541_v8 = vld [vmem:[#allocation8 + $0xc4] sm:$0xf]  ;;  %v7603_v30 = vld [vmem:[#allocation8 + $0x40] sm:$0xf] }
 0x238   :  { %v1222_v32 = vpop.f32.mrf.mxu0  ;;  %v8526_v53 = vld [vmem:[#allocation8 + $0x44] sm:$0xf0]  ;;  %v7672_v38 = vor.u32 %v8541_v8, %v7669_v26 }
 0x239   :  { %v10117_v35 = vadd.f32 %v1403_v18, %v9950_v23  ;;  %v1223_v25 = vadd.f32 %v1222_v32, %v10056_v2  ;;  %v1404_v23 = vmax.f32 %v1270_v11, 0.0 }
 0x23a   :  { %2294 = vmatpush.bf16.msrb.mxu3 %v7672_v38 }
 0x23b   :  { %v1461_v55 = vpack.c.bf16 %v10117_v35, %v10113_v15  ;;  %v10124_v0 = vadd.f32 %v1404_v23, %v9957_v44  ;;  %v7604_v44 = vor.u32 %v8526_v53, %v7603_v30  ;;  %v8523_v30 = vld [vmem:[#allocation8 + $0x34] sm:$0xf]  ;;  %v7597_v53 = vld [vmem:[#allocation8 + $0x38] sm:$0xf0] }
 0x23c   :  { %v1367_v59 = vpop.f32.mrf.mxu3  ;;  %v7600_v38 = vor.u32 %v8523_v30, %v7597_v53 }
 0x23d   :  { %1737 = vmatmul.bf16.gmra.mxu1 %v1461_v55  ;;  %1835 = vmatmul.bf16.gmra.mxu3 %v1461_v55  ;;  %v1368_v29 = vadd.f32 %v1367_v59, %v1319_v51  ;;  %v7667_v59 = vld [vmem:[#allocation8 + $0xc0] sm:$0xf] }
 0x23e   :  { %v1271_v7 = vpop.f32.mrf.mxu1  ;;  %v1320_v63 = vpop.f32.mrf.mxu2  ;;  %2147 = vmatpush.bf16.msra.mxu0 %v7604_v44  ;;  %v7661_v44 = vld [vmem:[#allocation8 + $0xb8] sm:$0xf0]  ;;  %2246 = vmatpush.bf16.msrb.mxu2 %v7600_v38 }
 0x23f   :  { %v1272_v62 = vadd.f32 %v1271_v7, %v1223_v25  ;;  %v1405_v3 = vmax.f32 %v1368_v29, 0.0  ;;  %v1321_v39 = vadd.f32 %v1320_v63, %v10058_v47  ;;  %v8542_v25 = vld [vmem:[#allocation8 + $0xc4] sm:$0xf0] }
 0x240   :  { %v1225_v12 = vpop.f32.mrf.mxu0  ;;  %v7668_v29 = vor.u32 %v8542_v25, %v7667_v59 }
 0x241   :  { %v1406_v4 = vmax.f32 %v1272_v62, 0.0  ;;  %v10133_v11 = vadd.f32 %v1405_v3, %v9967_v41  ;;  %v1226_v55 = vadd.f32 %v1225_v12, %v10056_v2 }
 0x242   :  { %2196 = vmatpush.bf16.msra.mxu1 %v7668_v29 }
 0x243   :  { %v10127_v37 = vadd.f32 %v1406_v4, %v9960_v49 }
 0x244   :  { %v1369_v9 = vpop.f32.mrf.mxu3 }
 0x245   :  { %v1370_v18 = vadd.f32 %v1369_v9, %v1321_v39  ;;  %v1462_v32 = vpack.c.bf16 %v10127_v37, %v10124_v0 }
 0x246   :  { %v1274_v40 = vpop.f32.mrf.mxu1  ;;  %v1323_v60 = vpop.f32.mrf.mxu2 }
 0x247   :  { %v1407_v49 = vmax.f32 %v1370_v18, 0.0  ;;  %1693 = vmatmul.bf16.gmra.mxu0 %v1462_v32  ;;  %1791 = vmatmul.bf16.gmra.mxu2 %v1462_v32  ;;  %v1275_v7 = vadd.f32 %v1274_v40, %v1226_v55  ;;  %v1324_v23 = vadd.f32 %v1323_v60, %v10058_v47  ;;  %v8539_v18 = vld [vmem:[#allocation8 + $0xb4] sm:$0xf]  ;;  %v7595_v40 = vld [vmem:[#allocation8 + $0x30] sm:$0xf] }
 0x248   :  { %v1227_v56 = vpop.f32.mrf.mxu0  ;;  %v8524_v60 = vld [vmem:[#allocation8 + $0x34] sm:$0xf0]  ;;  %v7664_v55 = vor.u32 %v8539_v18, %v7661_v44 }
 0x249   :  { %v10137_v51 = vadd.f32 %v1407_v49, %v9970_v19  ;;  %v1228_v4 = vadd.f32 %v1227_v56, %v10056_v2  ;;  %v1408_v19 = vmax.f32 %v1275_v7, 0.0 }
 0x24a   :  { %2295 = vmatpush.bf16.msrb.mxu3 %v7664_v55 }
 0x24b   :  { %v1463_v63 = vpack.c.bf16 %v10137_v51, %v10133_v11  ;;  %v10144_v9 = vadd.f32 %v1408_v19, %v9977_v58  ;;  %v7596_v58 = vor.u32 %v8524_v60, %v7595_v40  ;;  %v8521_v40 = vld [vmem:[#allocation8 + $0x24] sm:$0xf]  ;;  %v7589_v60 = vld [vmem:[#allocation8 + $0x28] sm:$0xf0] }
 0x24c   :  { %v1372_v62 = vpop.f32.mrf.mxu3  ;;  %v7592_v55 = vor.u32 %v8521_v40, %v7589_v60  ;;  %v7645_v40 = vld [vmem:[#allocation8 + $0x98] sm:$0xf0]  ;;  %v7579_v60 = vld [vmem:[#allocation8 + $0x10] sm:$0xf] }
 0x24d   :  { %1742 = vmatmul.bf16.gmra.mxu1 %v1463_v63  ;;  %1840 = vmatmul.bf16.gmra.mxu3 %v1463_v63  ;;  %v1373_v41 = vadd.f32 %v1372_v62, %v1324_v23  ;;  %v7659_v62 = vld [vmem:[#allocation8 + $0xb0] sm:$0xf] }
 0x24e   :  { %v1276_v12 = vpop.f32.mrf.mxu1  ;;  %v1325_v3 = vpop.f32.mrf.mxu2  ;;  %2148 = vmatpush.bf16.msra.mxu0 %v7596_v58  ;;  %v7653_v58 = vld [vmem:[#allocation8 + $0xa8] sm:$0xf0]  ;;  %2247 = vmatpush.bf16.msrb.mxu2 %v7592_v55 }
 0x24f   :  { %v1277_v39 = vadd.f32 %v1276_v12, %v1228_v4  ;;  %v1409_v8 = vmax.f32 %v1373_v41, 0.0  ;;  %v1326_v26 = vadd.f32 %v1325_v3, %v10058_v47  ;;  %v8540_v4 = vld [vmem:[#allocation8 + $0xb4] sm:$0xf0] }
 0x250   :  { %v1230_v36 = vpop.f32.mrf.mxu0  ;;  %v7660_v41 = vor.u32 %v8540_v4, %v7659_v62 }
 0x251   :  { %v1410_v5 = vmax.f32 %v1277_v39, 0.0  ;;  %v10153_v7 = vadd.f32 %v1409_v8, %v9987_v6  ;;  %v1231_v63 = vadd.f32 %v1230_v36, %v10056_v2 }
 0x252   :  { %2197 = vmatpush.bf16.msra.mxu1 %v7660_v41 }
 0x253   :  { %v10147_v13 = vadd.f32 %v1410_v5, %v9980_v28 }
 0x254   :  { %v1374_v32 = vpop.f32.mrf.mxu3 }
 0x255   :  { %v1375_v49 = vadd.f32 %v1374_v32, %v1326_v26  ;;  %v1464_v56 = vpack.c.bf16 %v10147_v13, %v10144_v9 }
 0x256   :  { %v1279_v59 = vpop.f32.mrf.mxu1  ;;  %v1328_v25 = vpop.f32.mrf.mxu2 }
 0x257   :  { %v1411_v28 = vmax.f32 %v1375_v49, 0.0  ;;  %1698 = vmatmul.bf16.gmra.mxu0 %v1464_v56  ;;  %1796 = vmatmul.bf16.gmra.mxu2 %v1464_v56  ;;  %v1280_v12 = vadd.f32 %v1279_v59, %v1231_v63  ;;  %v1329_v19 = vadd.f32 %v1328_v25, %v10058_v47  ;;  %v8537_v49 = vld [vmem:[#allocation8 + $0xa4] sm:$0xf]  ;;  %v7587_v59 = vld [vmem:[#allocation8 + $0x20] sm:$0xf] }
 0x258   :  { %v1232_v29 = vpop.f32.mrf.mxu0  ;;  %v8522_v25 = vld [vmem:[#allocation8 + $0x24] sm:$0xf0]  ;;  %v7656_v63 = vor.u32 %v8537_v49, %v7653_v58  ;;  %v8520_v49 = vld [vmem:[#allocation8 + $0x14] sm:$0xf0] }
 0x259   :  { %v10157_v23 = vadd.f32 %v1411_v28, %v9990_v34  ;;  %v1233_v5 = vadd.f32 %v1232_v29, %v10056_v2  ;;  %v1412_v34 = vmax.f32 %v1280_v12, 0.0 }
 0x25a   :  { %2296 = vmatpush.bf16.msrb.mxu3 %v7656_v63 }
 0x25b   :  { %v1465_v3 = vpack.c.bf16 %v10157_v23, %v10153_v7  ;;  %v10164_v32 = vadd.f32 %v1412_v34, %v9997_v24  ;;  %v7588_v24 = vor.u32 %v8522_v25, %v7587_v59 }
 0x25c   :  { %v1377_v39 = vpop.f32.mrf.mxu3 }
 0x25d   :  { %1747 = vmatmul.bf16.gmra.mxu1 %v1465_v3  ;;  %1845 = vmatmul.bf16.gmra.mxu3 %v1465_v3  ;;  %v1378_v6 = vadd.f32 %v1377_v39, %v1329_v19  ;;  %v7651_v39 = vld [vmem:[#allocation8 + $0xa0] sm:$0xf] }
 0x25e   :  { %v1281_v36 = vpop.f32.mrf.mxu1  ;;  %v1330_v8 = vpop.f32.mrf.mxu2  ;;  %2149 = vmatpush.bf16.msra.mxu0 %v7588_v24 }
 0x25f   :  { %v1282_v26 = vadd.f32 %v1281_v36, %v1233_v5  ;;  %v1413_v18 = vmax.f32 %v1378_v6, 0.0  ;;  %v1331_v44 = vadd.f32 %v1330_v8, %v10058_v47  ;;  %v8538_v5 = vld [vmem:[#allocation8 + $0xa4] sm:$0xf0] }
 0x260   :  { %v1235_v30 = vpop.f32.mrf.mxu0  ;;  %v7652_v6 = vor.u32 %v8538_v5, %v7651_v39  ;;  %v7643_v5 = vld [vmem:[#allocation8 + $0x90] sm:$0xf] }
 0x261   :  { %v1414_v53 = vmax.f32 %v1282_v26, 0.0  ;;  %v10173_v12 = vadd.f32 %v1413_v18, %v10007_v20  ;;  %v1236_v3 = vadd.f32 %v1235_v30, %v10056_v2  ;;  %v8519_v20 = vld [vmem:[#allocation8 + $0x14] sm:$0xf] }
 0x262   :  { %2198 = vmatpush.bf16.msra.mxu1 %v7652_v6  ;;  %v8535_v18 = vld [vmem:[#allocation8 + $0x94] sm:$0xf]  ;;  %v8536_v6 = vld [vmem:[#allocation8 + $0x94] sm:$0xf0] }
 0x263   :  { %v10167_v38 = vadd.f32 %v1414_v53, %v10000_v48  ;;  %v7581_v53 = vld [vmem:[#allocation8 + $0x18] sm:$0xf0]  ;;  %v7648_v59 = vor.u32 %v8535_v18, %v7645_v40 }
 0x264   :  { %v1379_v56 = vpop.f32.mrf.mxu3 }
 0x265   :  { %v1380_v28 = vadd.f32 %v1379_v56, %v1331_v44  ;;  %v1466_v29 = vpack.c.bf16 %v10167_v38, %v10164_v32  ;;  %2297 = vmatpush.bf16.msrb.mxu3 %v7648_v59 }
 0x266   :  { %v1284_v62 = vpop.f32.mrf.mxu1  ;;  %v1333_v4 = vpop.f32.mrf.mxu2 }
 0x267   :  { %v1415_v48 = vmax.f32 %v1380_v28, 0.0  ;;  %1703 = vmatmul.bf16.gmra.mxu0 %v1466_v29  ;;  %1801 = vmatmul.bf16.gmra.mxu2 %v1466_v29  ;;  %v1285_v36 = vadd.f32 %v1284_v62, %v1236_v3  ;;  %v1334_v55 = vadd.f32 %v1333_v4, %v10058_v47  ;;  %v7580_v28 = vor.u32 %v8520_v49, %v7579_v60 }
 0x268   :  { %v1237_v41 = vpop.f32.mrf.mxu0 }
 0x269   :  { %v10177_v19 = vadd.f32 %v1415_v48, %v10010_v52  ;;  %v1238_v26 = vadd.f32 %v1237_v41, %v10056_v2  ;;  %v7584_v52 = vor.u32 %v8519_v20, %v7581_v53  ;;  %v1416_v56 = vmax.f32 %v1285_v36, 0.0  ;;  %2150 = vmatpush.bf16.msra.mxu0 %v7580_v28 }
 0x26b   :  { %v1467_v8 = vpack.c.bf16 %v10177_v19, %v10173_v12  ;;  %2248 = vmatpush.bf16.msrb.mxu2 %v7584_v52  ;;  %v10184_v24 = vadd.f32 %v1416_v56, %v10017_v14  ;;  %v8517_v56 = vld [vmem:[#allocation8 + $0x4] sm:$0xf] }
 0x26c   :  { %v1382_v34 = vpop.f32.mrf.mxu3 }
 0x26d   :  { %1752 = vmatmul.bf16.gmra.mxu1 %v1467_v8  ;;  %1850 = vmatmul.bf16.gmra.mxu3 %v1467_v8  ;;  %v1383_v29 = vadd.f32 %v1382_v34, %v1334_v55  ;;  %v7644_v34 = vor.u32 %v8536_v6, %v7643_v5  ;;  %v7573_v55 = vld [vmem:[#allocation8 + $0x8] sm:$0xf0]  ;;  %v7571_v6 = vld [vmem:[#allocation8] sm:$0xf] }
 0x26e   :  { %v1286_v30 = vpop.f32.mrf.mxu1  ;;  %v1335_v44 = vpop.f32.mrf.mxu2 }
 0x26f   :  { %v1287_v58 = vadd.f32 %v1286_v30, %v1238_v26  ;;  %v1336_v48 = vadd.f32 %v1335_v44, %v10058_v47  ;;  %v1417_v3 = vmax.f32 %v1383_v29, 0.0  ;;  %2199 = vmatpush.bf16.msra.mxu1 %v7644_v34  ;;  %v7635_v34 = vld [vmem:[#allocation8 + $0x80] sm:$0xf] }
 0x270   :  { %v1240_v25 = vpop.f32.mrf.mxu0 }
 0x271   :  { %v1418_v63 = vmax.f32 %v1287_v58, 0.0  ;;  %v10193_v14 = vadd.f32 %v1417_v3, %v10027_v1 }
 0x273   :  { %v10187_v62 = vadd.f32 %v1418_v63, %v10020_v61  ;;  %v1241_v61 = vadd.f32 %v1240_v25, %v10056_v2 }
 0x274   :  { %v1384_v41 = vpop.f32.mrf.mxu3 }
 0x275   :  { %v1385_v4 = vadd.f32 %v1384_v41, %v1336_v48  ;;  %v1468_v39 = vpack.c.bf16 %v10187_v62, %v10184_v24 }
 0x276   :  { %v1289_v36 = vpop.f32.mrf.mxu1  ;;  %v1338_v8 = vpop.f32.mrf.mxu2 }
 0x277   :  { %v1419_v26 = vmax.f32 %v1385_v4, 0.0  ;;  %1708 = vmatmul.bf16.gmra.mxu0 %v1468_v39  ;;  %1806 = vmatmul.bf16.gmra.mxu2 %v1468_v39  ;;  %v1290_v18 = vadd.f32 %v1289_v36, %v1241_v61  ;;  %v1339_v1 = vadd.f32 %v1338_v8, %v10058_v47  ;;  %v8533_v4 = vld [vmem:[#allocation8 + $0x84] sm:$0xf]  ;;  %v7637_v39 = vld [vmem:[#allocation8 + $0x88] sm:$0xf0] }
 0x278   :  { %v1242_v53 = vpop.f32.mrf.mxu0  ;;  %v7640_v5 = vor.u32 %v8533_v4, %v7637_v39  ;;  %v8518_v36 = vld [vmem:[#allocation8 + $0x4] sm:$0xf0]  ;;  %v7951_v39 = vld [vmem:[#allocation10 + $0x1f8] sm:$0xf] }
 0x279   :  { %v10197_v20 = vadd.f32 %v1419_v26, %v10030_v21  ;;  %v1243_v52 = vadd.f32 %v1242_v53, %v10056_v2  ;;  %v1420_v60 = vmax.f32 %v1290_v18, 0.0  ;;  %v7576_v21 = vor.u32 %v8517_v56, %v7573_v55  ;;  %v8534_v26 = vld [vmem:[#allocation8 + $0x84] sm:$0xf0] }
 0x27a   :  { %2298 = vmatpush.bf16.msrb.mxu3 %v7640_v5  ;;  %v7636_v61 = vor.u32 %v8534_v26, %v7635_v34  ;;  %v8616_v5 = vld [vmem:[#allocation10 + $0x218] sm:$0xf0] }
 0x27b   :  { %v1469_v30 = vpack.c.bf16 %v10197_v20, %v10193_v14  ;;  %2249 = vmatpush.bf16.msrb.mxu2 %v7576_v21  ;;  %v10204_v28 = vadd.f32 %v1420_v60, %v10037_v16  ;;  %v7572_v16 = vor.u32 %v8518_v36, %v7571_v6  ;;  %v8239_v6 = vld [vmem:[#allocation10 + $0x438] sm:$0xf] }
 0x27c   :  { %v1387_v44 = vpop.f32.mrf.mxu3  ;;  %2200 = vmatpush.bf16.msra.mxu1 %v7636_v61 }
 0x27d   :  { %1757 = vmatmul.bf16.gmra.mxu1 %v1469_v30  ;;  %1855 = vmatmul.bf16.gmra.mxu3 %v1469_v30  ;;  %v1388_v59 = vadd.f32 %v1387_v44, %v1339_v1  ;;  %v1504_v30 = vld [vmem:[%s14702_s8] sm:$0x3] }
 0x27e   :  { %v1291_v40 = vpop.f32.mrf.mxu1  ;;  %v1340_v58 = vpop.f32.mrf.mxu2  ;;  %2151 = vmatpush.bf16.msra.mxu0 %v7572_v16  ;;  %v10226_v1 = vperm.slane %v1504_v30, 1  ;;  %v8688_v16 = vld [vmem:[#allocation10 + $0x458] sm:$0xf0] }
 0x27f   :  { %v1292_v49 = vadd.f32 %v1291_v40, %v1243_v52  ;;  %v1341_v2 = vadd.f32 %v1340_v58, %v10058_v47  ;;  %v1421_v48 = vmax.f32 %v1388_v59, 0.0 }
 0x281   :  { %v1422_v25 = vmax.f32 %v1292_v49, 0.0 }
 0x283   :  { %v10207_v29 = vadd.f32 %v1422_v25, %v10040_v57  ;;  %v10213_v57 = vadd.f32 %v1421_v48, %v10046_v45  ;;  %v10223_v45 = vperm.slane %v1504_v30, 0 }
 0x284   :  { %v1389_v63 = vpop.f32.mrf.mxu3 }
 0x285   :  { %v1390_v41 = vadd.f32 %v1389_v63, %v1341_v2  ;;  %v1470_v3 = vpack.c.bf16 %v10207_v29, %v10204_v28 }
 0x287   :  { %v1423_v8 = vmax.f32 %v1390_v41, 0.0  ;;  %1713 = vmatmul.bf16.gmra.mxu0 %v1470_v3  ;;  %1811 = vmatmul.bf16.gmra.mxu2 %v1470_v3 }
 0x289   :  { %v10216_v47 = vadd.f32 %v1423_v8, %v10049_v42  ;;  %v7952_v8 = vor.u32 %v8616_v5, %v7951_v39  ;;  %v7915_v39 = vld [vmem:[#allocation10 + $0x1b0] sm:$0xf]  ;;  %v8607_v5 = vld [vmem:[#allocation10 + $0x1d0] sm:$0xf0] }
 0x28b   :  { %v1471_v53 = vpack.c.bf16 %v10216_v47, %v10213_v57  ;;  %3338 = vmatpush.bf16.msrb.mxu0 %v7952_v8  ;;  %v7916_v8 = vor.u32 %v8607_v5, %v7915_v39  ;;  %v7879_v39 = vld [vmem:[#allocation10 + $0x168] sm:$0xf]  ;;  %v8598_v5 = vld [vmem:[#allocation10 + $0x188] sm:$0xf0] }
 0x28d   :  { %1762 = vmatmul.bf16.gmra.mxu1 %v1471_v53  ;;  %1860 = vmatmul.bf16.gmra.mxu3 %v1471_v53  ;;  %v8240_v53 = vor.u32 %v8688_v16, %v8239_v6  ;;  %v8203_v6 = vld [vmem:[#allocation10 + $0x3f0] sm:$0xf]  ;;  %v8679_v16 = vld [vmem:[#allocation10 + $0x410] sm:$0xf0] }
 0x28f   :  { %3387 = vmatpush.bf16.msrb.mxu1 %v8240_v53  ;;  %v8204_v53 = vor.u32 %v8679_v16, %v8203_v6  ;;  %3339 = vmatpush.bf16.msrb.mxu0 %v7916_v8  ;;  %v8167_v6 = vld [vmem:[#allocation10 + $0x3a8] sm:$0xf]  ;;  %v7880_v8 = vor.u32 %v8598_v5, %v7879_v39  ;;  %v8670_v16 = vld [vmem:[#allocation10 + $0x3c8] sm:$0xf0]  ;;  %v7843_v39 = vld [vmem:[#allocation10 + $0x120] sm:$0xf] }
 0x290   :  { %v8589_v5 = vld [vmem:[#allocation10 + $0x140] sm:$0xf0] }
 0x293   :  { %3388 = vmatpush.bf16.msrb.mxu1 %v8204_v53  ;;  %v8168_v53 = vor.u32 %v8670_v16, %v8167_v6  ;;  %3340 = vmatpush.bf16.msrb.mxu0 %v7880_v8  ;;  %v8131_v6 = vld [vmem:[#allocation10 + $0x360] sm:$0xf]  ;;  %v7844_v8 = vor.u32 %v8589_v5, %v7843_v39  ;;  %v8661_v16 = vld [vmem:[#allocation10 + $0x380] sm:$0xf0]  ;;  %v7807_v39 = vld [vmem:[#allocation10 + $0xd8] sm:$0xf] }
 0x294   :  { %v1679_v18 = vpop.f32.mrf.mxu0  ;;  %v8580_v5 = vld [vmem:[#allocation10 + $0xf8] sm:$0xf0] }
 0x295   :  { %v1680_v40 = vadd.f32 %v1679_v18, %v10223_v45 }
 0x297   :  { %3389 = vmatpush.bf16.msrb.mxu1 %v8168_v53  ;;  %v8132_v53 = vor.u32 %v8661_v16, %v8131_v6  ;;  %3341 = vmatpush.bf16.msrb.mxu0 %v7844_v8  ;;  %v8095_v6 = vld [vmem:[#allocation10 + $0x318] sm:$0xf]  ;;  %v7808_v8 = vor.u32 %v8580_v5, %v7807_v39  ;;  %v8652_v16 = vld [vmem:[#allocation10 + $0x338] sm:$0xf0]  ;;  %v7771_v39 = vld [vmem:[#allocation10 + $0x90] sm:$0xf] }
 0x298   :  { %v8571_v5 = vld [vmem:[#allocation10 + $0xb0] sm:$0xf0] }
 0x29a   :  { %v1728_v44 = vpop.f32.mrf.mxu1  ;;  %v1777_v42 = vpop.f32.mrf.mxu2 }
 0x29b   :  { %v1729_v60 = vadd.f32 %v1728_v44, %v1680_v40  ;;  %v1778_v59 = vadd.f32 %v1777_v42, %v10226_v1  ;;  %3390 = vmatpush.bf16.msrb.mxu1 %v8132_v53  ;;  %v8096_v53 = vor.u32 %v8652_v16, %v8095_v6  ;;  %3342 = vmatpush.bf16.msrb.mxu0 %v7808_v8  ;;  %v8059_v6 = vld [vmem:[#allocation10 + $0x2d0] sm:$0xf]  ;;  %v8643_v16 = vld [vmem:[#allocation10 + $0x2f0] sm:$0xf0] }
 0x29c   :  { %v1681_v52 = vpop.f32.mrf.mxu0  ;;  %v7772_v8 = vor.u32 %v8571_v5, %v7771_v39  ;;  %v8634_v39 = vld [vmem:[#allocation10 + $0x2a8] sm:$0xf0] }
 0x29d   :  { %v1682_v56 = vadd.f32 %v1681_v52, %v10223_v45  ;;  %v1866_v21 = vmax.f32 %v1729_v60, 0.0 }
 0x29f   :  { %v10231_v41 = vadd.f32 %v1866_v21, %v10064_v10  ;;  %3391 = vmatpush.bf16.msrb.mxu1 %v8096_v53  ;;  %v8060_v53 = vor.u32 %v8643_v16, %v8059_v6  ;;  %3343 = vmatpush.bf16.msrb.mxu0 %v7772_v8  ;;  %v8684_v16 = vld [vmem:[#allocation10 + $0x43c] sm:$0xf] }
 0x2a0   :  { %v1826_v49 = vpop.f32.mrf.mxu3 }
 0x2a1   :  { %v1827_v63 = vadd.f32 %v1826_v49, %v1778_v59 }
 0x2a2   :  { %v1730_v55 = vpop.f32.mrf.mxu1  ;;  %v1779_v58 = vpop.f32.mrf.mxu2 }
 0x2a3   :  { %v1731_v25 = vadd.f32 %v1730_v55, %v1682_v56  ;;  %v1780_v4 = vadd.f32 %v1779_v58, %v10226_v1  ;;  %v1867_v34 = vmax.f32 %v1827_v63, 0.0  ;;  %3392 = vmatpush.bf16.msrb.mxu1 %v8060_v53 }
 0x2a4   :  { %v1684_v2 = vpop.f32.mrf.mxu0 }
 0x2a5   :  { %v1868_v48 = vmax.f32 %v1731_v25, 0.0  ;;  %v10240_v44 = vadd.f32 %v1867_v34, %v10073_v22  ;;  %v1685_v42 = vadd.f32 %v1684_v2, %v10223_v45 }
 0x2a7   :  { %v10234_v3 = vadd.f32 %v1868_v48, %v10067_v50 }
 0x2a8   :  { %v1828_v36 = vpop.f32.mrf.mxu3 }
 0x2a9   :  { %v1930_v26 = vpack.c.bf16 %v10234_v3, %v10231_v41  ;;  %v1829_v61 = vadd.f32 %v1828_v36, %v1780_v4 }
 0x2aa   :  { %v1733_v18 = vpop.f32.mrf.mxu1  ;;  %v1782_v10 = vpop.f32.mrf.mxu2 }
 0x2ab   :  { %v1869_v30 = vmax.f32 %v1829_v61, 0.0  ;;  %2152 = vmatmul.bf16.vlgmr.msra.gmra.mxu0 %v1930_v26  ;;  %2250 = vmatmul.bf16.vlgmr.msrb.gmra.mxu2 %v1930_v26  ;;  %v1734_v60 = vadd.f32 %v1733_v18, %v1685_v42  ;;  %v1783_v22 = vadd.f32 %v1782_v10, %v10226_v1 }
 0x2ac   :  { %v1686_v50 = vpop.f32.mrf.mxu0 }
 0x2ad   :  { %v10244_v52 = vadd.f32 %v1869_v30, %v10077_v27  ;;  %v1687_v56 = vadd.f32 %v1686_v50, %v10223_v45  ;;  %v1870_v21 = vmax.f32 %v1734_v60, 0.0 }
 0x2af   :  { %v1931_v40 = vpack.c.bf16 %v10244_v52, %v10240_v44  ;;  %v10251_v27 = vadd.f32 %v1870_v21, %v10084_v17 }
 0x2b0   :  { %v1831_v49 = vpop.f32.mrf.mxu3 }
 0x2b1   :  { %2201 = vmatmul.bf16.vlgmr.msra.gmra.mxu1 %v1931_v40  ;;  %2299 = vmatmul.bf16.vlgmr.msrb.gmra.mxu3 %v1931_v40  ;;  %v1832_v2 = vadd.f32 %v1831_v49, %v1783_v22 }
 0x2b2   :  { %v1735_v55 = vpop.f32.mrf.mxu1  ;;  %v1784_v58 = vpop.f32.mrf.mxu2 }
 0x2b3   :  { %v1736_v59 = vadd.f32 %v1735_v55, %v1687_v56  ;;  %v1785_v4 = vadd.f32 %v1784_v58, %v10226_v1  ;;  %v1871_v34 = vmax.f32 %v1832_v2, 0.0 }
 0x2b4   :  { %v1689_v25 = vpop.f32.mrf.mxu0 }
 0x2b5   :  { %v1872_v63 = vmax.f32 %v1736_v59, 0.0  ;;  %v10260_v30 = vadd.f32 %v1871_v34, %v10093_v54  ;;  %v1690_v50 = vadd.f32 %v1689_v25, %v10223_v45 }
 0x2b7   :  { %v10254_v48 = vadd.f32 %v1872_v63, %v10087_v31 }
 0x2b8   :  { %v1833_v36 = vpop.f32.mrf.mxu3 }
 0x2b9   :  { %v1834_v26 = vadd.f32 %v1833_v36, %v1785_v4  ;;  %v1932_v61 = vpack.c.bf16 %v10254_v48, %v10251_v27 }
 0x2ba   :  { %v1738_v18 = vpop.f32.mrf.mxu1  ;;  %v1787_v17 = vpop.f32.mrf.mxu2 }
 0x2bb   :  { %v1873_v10 = vmax.f32 %v1834_v26, 0.0  ;;  %2157 = vmatmul.bf16.gmra.mxu0 %v1932_v61  ;;  %2255 = vmatmul.bf16.gmra.mxu2 %v1932_v61  ;;  %v1739_v40 = vadd.f32 %v1738_v18, %v1690_v50  ;;  %v1788_v54 = vadd.f32 %v1787_v17, %v10226_v1 }
 0x2bc   :  { %v1691_v31 = vpop.f32.mrf.mxu0 }
 0x2bd   :  { %v10264_v42 = vadd.f32 %v1873_v10, %v10097_v33  ;;  %v1692_v56 = vadd.f32 %v1691_v31, %v10223_v45  ;;  %v1874_v21 = vmax.f32 %v1739_v40, 0.0 }
 0x2bf   :  { %v1933_v60 = vpack.c.bf16 %v10264_v42, %v10260_v30  ;;  %v10271_v33 = vadd.f32 %v1874_v21, %v10104_v43 }
 0x2c0   :  { %v1836_v49 = vpop.f32.mrf.mxu3 }
 0x2c1   :  { %2206 = vmatmul.bf16.gmra.mxu1 %v1933_v60  ;;  %2304 = vmatmul.bf16.gmra.mxu3 %v1933_v60  ;;  %v1837_v25 = vadd.f32 %v1836_v49, %v1788_v54 }
 0x2c2   :  { %v1740_v55 = vpop.f32.mrf.mxu1  ;;  %v1789_v58 = vpop.f32.mrf.mxu2 }
 0x2c3   :  { %v1741_v22 = vadd.f32 %v1740_v55, %v1692_v56  ;;  %v1790_v4 = vadd.f32 %v1789_v58, %v10226_v1  ;;  %v1875_v34 = vmax.f32 %v1837_v25, 0.0 }
 0x2c4   :  { %v1694_v59 = vpop.f32.mrf.mxu0 }
 0x2c5   :  { %v1876_v2 = vmax.f32 %v1741_v22, 0.0  ;;  %v10280_v10 = vadd.f32 %v1875_v34, %v10113_v15  ;;  %v1695_v31 = vadd.f32 %v1694_v59, %v10223_v45 }
 0x2c7   :  { %v10274_v63 = vadd.f32 %v1876_v2, %v10107_v46 }
 0x2c8   :  { %v1838_v36 = vpop.f32.mrf.mxu3 }
 0x2c9   :  { %v1839_v26 = vadd.f32 %v1838_v36, %v1790_v4  ;;  %v1934_v61 = vpack.c.bf16 %v10274_v63, %v10271_v33 }
 0x2ca   :  { %v1743_v18 = vpop.f32.mrf.mxu1  ;;  %v1792_v43 = vpop.f32.mrf.mxu2 }
 0x2cb   :  { %v1877_v17 = vmax.f32 %v1839_v26, 0.0  ;;  %2162 = vmatmul.bf16.gmra.mxu0 %v1934_v61  ;;  %2260 = vmatmul.bf16.gmra.mxu2 %v1934_v61  ;;  %v1744_v40 = vadd.f32 %v1743_v18, %v1695_v31  ;;  %v1793_v15 = vadd.f32 %v1792_v43, %v10226_v1 }
 0x2cc   :  { %v1696_v46 = vpop.f32.mrf.mxu0 }
 0x2cd   :  { %v10284_v50 = vadd.f32 %v1877_v17, %v10117_v35  ;;  %v1697_v56 = vadd.f32 %v1696_v46, %v10223_v45  ;;  %v1878_v21 = vmax.f32 %v1744_v40, 0.0 }
 0x2cf   :  { %v1935_v60 = vpack.c.bf16 %v10284_v50, %v10280_v10  ;;  %v10291_v35 = vadd.f32 %v1878_v21, %v10124_v0 }
 0x2d0   :  { %v1841_v49 = vpop.f32.mrf.mxu3 }
 0x2d1   :  { %2211 = vmatmul.bf16.gmra.mxu1 %v1935_v60  ;;  %2309 = vmatmul.bf16.gmra.mxu3 %v1935_v60  ;;  %v1842_v59 = vadd.f32 %v1841_v49, %v1793_v15 }
 0x2d2   :  { %v1745_v55 = vpop.f32.mrf.mxu1  ;;  %v1794_v58 = vpop.f32.mrf.mxu2 }
 0x2d3   :  { %v1746_v54 = vadd.f32 %v1745_v55, %v1697_v56  ;;  %v1795_v4 = vadd.f32 %v1794_v58, %v10226_v1  ;;  %v1879_v34 = vmax.f32 %v1842_v59, 0.0 }
 0x2d4   :  { %v1699_v22 = vpop.f32.mrf.mxu0 }
 0x2d5   :  { %v1880_v25 = vmax.f32 %v1746_v54, 0.0  ;;  %v10300_v17 = vadd.f32 %v1879_v34, %v10133_v11  ;;  %v1700_v46 = vadd.f32 %v1699_v22, %v10223_v45 }
 0x2d7   :  { %v10294_v2 = vadd.f32 %v1880_v25, %v10127_v37 }
 0x2d8   :  { %v1843_v36 = vpop.f32.mrf.mxu3 }
 0x2d9   :  { %v1844_v26 = vadd.f32 %v1843_v36, %v1795_v4  ;;  %v1936_v61 = vpack.c.bf16 %v10294_v2, %v10291_v35 }
 0x2da   :  { %v1748_v18 = vpop.f32.mrf.mxu1  ;;  %v1797_v0 = vpop.f32.mrf.mxu2 }
 0x2db   :  { %v1881_v43 = vmax.f32 %v1844_v26, 0.0  ;;  %2167 = vmatmul.bf16.gmra.mxu0 %v1936_v61  ;;  %2265 = vmatmul.bf16.gmra.mxu2 %v1936_v61  ;;  %v1749_v40 = vadd.f32 %v1748_v18, %v1700_v46  ;;  %v1798_v11 = vadd.f32 %v1797_v0, %v10226_v1 }
 0x2dc   :  { %v1701_v37 = vpop.f32.mrf.mxu0 }
 0x2dd   :  { %v10304_v31 = vadd.f32 %v1881_v43, %v10137_v51  ;;  %v1702_v56 = vadd.f32 %v1701_v37, %v10223_v45  ;;  %v1882_v21 = vmax.f32 %v1749_v40, 0.0 }
 0x2df   :  { %v1937_v60 = vpack.c.bf16 %v10304_v31, %v10300_v17  ;;  %v10311_v51 = vadd.f32 %v1882_v21, %v10144_v9 }
 0x2e0   :  { %v1846_v49 = vpop.f32.mrf.mxu3 }
 0x2e1   :  { %2216 = vmatmul.bf16.gmra.mxu1 %v1937_v60  ;;  %2314 = vmatmul.bf16.gmra.mxu3 %v1937_v60  ;;  %v1847_v22 = vadd.f32 %v1846_v49, %v1798_v11 }
 0x2e2   :  { %v1750_v55 = vpop.f32.mrf.mxu1  ;;  %v1799_v58 = vpop.f32.mrf.mxu2 }
 0x2e3   :  { %v1751_v15 = vadd.f32 %v1750_v55, %v1702_v56  ;;  %v1800_v4 = vadd.f32 %v1799_v58, %v10226_v1  ;;  %v1883_v34 = vmax.f32 %v1847_v22, 0.0 }
 0x2e4   :  { %v1704_v54 = vpop.f32.mrf.mxu0 }
 0x2e5   :  { %v1884_v59 = vmax.f32 %v1751_v15, 0.0  ;;  %v10320_v43 = vadd.f32 %v1883_v34, %v10153_v7  ;;  %v1705_v37 = vadd.f32 %v1704_v54, %v10223_v45 }
 0x2e7   :  { %v10314_v25 = vadd.f32 %v1884_v59, %v10147_v13 }
 0x2e8   :  { %v1848_v36 = vpop.f32.mrf.mxu3 }
 0x2e9   :  { %v1849_v26 = vadd.f32 %v1848_v36, %v1800_v4  ;;  %v1938_v61 = vpack.c.bf16 %v10314_v25, %v10311_v51 }
 0x2ea   :  { %v1753_v18 = vpop.f32.mrf.mxu1  ;;  %v1802_v9 = vpop.f32.mrf.mxu2 }
 0x2eb   :  { %v1885_v0 = vmax.f32 %v1849_v26, 0.0  ;;  %2172 = vmatmul.bf16.gmra.mxu0 %v1938_v61  ;;  %2270 = vmatmul.bf16.gmra.mxu2 %v1938_v61  ;;  %v1754_v40 = vadd.f32 %v1753_v18, %v1705_v37  ;;  %v1803_v7 = vadd.f32 %v1802_v9, %v10226_v1 }
 0x2ec   :  { %v1706_v13 = vpop.f32.mrf.mxu0 }
 0x2ed   :  { %v10324_v46 = vadd.f32 %v1885_v0, %v10157_v23  ;;  %v1707_v56 = vadd.f32 %v1706_v13, %v10223_v45  ;;  %v1886_v21 = vmax.f32 %v1754_v40, 0.0  ;;  %v8612_v40 = vld [vmem:[#allocation10 + $0x1fc] sm:$0xf] }
 0x2ef   :  { %v1939_v60 = vpack.c.bf16 %v10324_v46, %v10320_v43  ;;  %v10331_v23 = vadd.f32 %v1886_v21, %v10164_v32 }
 0x2f0   :  { %v1851_v49 = vpop.f32.mrf.mxu3 }
 0x2f1   :  { %2221 = vmatmul.bf16.gmra.mxu1 %v1939_v60  ;;  %2319 = vmatmul.bf16.gmra.mxu3 %v1939_v60  ;;  %v1852_v54 = vadd.f32 %v1851_v49, %v1803_v7  ;;  %v7953_v60 = vld [vmem:[#allocation10 + $0x21c] sm:$0xf0]  ;;  %v8562_v7 = vld [vmem:[#allocation10 + $0x68] sm:$0xf0] }
 0x2f2   :  { %v1755_v55 = vpop.f32.mrf.mxu1  ;;  %v1804_v58 = vpop.f32.mrf.mxu2  ;;  %v7956_v49 = vor.u32 %v8612_v40, %v7953_v60 }
 0x2f3   :  { %v1756_v11 = vadd.f32 %v1755_v55, %v1707_v56  ;;  %v1805_v4 = vadd.f32 %v1804_v58, %v10226_v1  ;;  %v1887_v34 = vmax.f32 %v1852_v54, 0.0 }
 0x2f4   :  { %v1709_v15 = vpop.f32.mrf.mxu0  ;;  %3436 = vmatpush.bf16.msra.mxu2 %v7956_v49 }
 0x2f5   :  { %v1888_v22 = vmax.f32 %v1756_v11, 0.0  ;;  %v10340_v0 = vadd.f32 %v1887_v34, %v10173_v12  ;;  %v1710_v13 = vadd.f32 %v1709_v15, %v10223_v45  ;;  %v7735_v12 = vld [vmem:[#allocation10 + $0x48] sm:$0xf]  ;;  %v8603_v11 = vld [vmem:[#allocation10 + $0x1b4] sm:$0xf] }
 0x2f6   :  { %v8241_v34 = vld [vmem:[#allocation10 + $0x45c] sm:$0xf0] }
 0x2f7   :  { %v10334_v59 = vadd.f32 %v1888_v22, %v10167_v38  ;;  %v7917_v22 = vld [vmem:[#allocation10 + $0x1d4] sm:$0xf0]  ;;  %v8244_v53 = vor.u32 %v8684_v16, %v8241_v34  ;;  %v8576_v34 = vld [vmem:[#allocation10 + $0xdc] sm:$0xf] }
 0x2f8   :  { %v1853_v36 = vpop.f32.mrf.mxu3  ;;  %v7920_v8 = vor.u32 %v8603_v11, %v7917_v22 }
 0x2f9   :  { %v1854_v26 = vadd.f32 %v1853_v36, %v1805_v4  ;;  %v1940_v61 = vpack.c.bf16 %v10334_v59, %v10331_v23  ;;  %v8023_v4 = vld [vmem:[#allocation10 + $0x288] sm:$0xf]  ;;  %3485 = vmatpush.bf16.msra.mxu3 %v8244_v53 }
 0x2fa   :  { %v1758_v18 = vpop.f32.mrf.mxu1  ;;  %v1807_v32 = vpop.f32.mrf.mxu2  ;;  %3437 = vmatpush.bf16.msra.mxu2 %v7920_v8 }
 0x2fb   :  { %v1889_v9 = vmax.f32 %v1854_v26, 0.0  ;;  %2177 = vmatmul.bf16.gmra.mxu0 %v1940_v61  ;;  %2275 = vmatmul.bf16.gmra.mxu2 %v1940_v61  ;;  %v1759_v56 = vadd.f32 %v1758_v18, %v1710_v13  ;;  %v1808_v6 = vadd.f32 %v1807_v32, %v10226_v1  ;;  %v8024_v61 = vor.u32 %v8634_v39, %v8023_v4  ;;  %v7881_v13 = vld [vmem:[#allocation10 + $0x18c] sm:$0xf0] }
 0x2fc   :  { %v1711_v38 = vpop.f32.mrf.mxu0  ;;  %v8169_v39 = vld [vmem:[#allocation10 + $0x3cc] sm:$0xf0] }
 0x2fd   :  { %v10344_v37 = vadd.f32 %v1889_v9, %v10177_v19  ;;  %v1712_v21 = vadd.f32 %v1711_v38, %v10223_v45  ;;  %v7736_v19 = vor.u32 %v8562_v7, %v7735_v12  ;;  %v1890_v5 = vmax.f32 %v1759_v56, 0.0  ;;  %3393 = vmatpush.bf16.msrb.mxu1 %v8024_v61  ;;  %v8594_v38 = vld [vmem:[#allocation10 + $0x16c] sm:$0xf]  ;;  %v7809_v61 = vld [vmem:[#allocation10 + $0xfc] sm:$0xf0] }
 0x2fe   :  { %v7884_v49 = vor.u32 %v8594_v38, %v7881_v13  ;;  %v8657_v13 = vld [vmem:[#allocation10 + $0x364] sm:$0xf] }
 0x2ff   :  { %v1941_v55 = vpack.c.bf16 %v10344_v37, %v10340_v0  ;;  %3344 = vmatpush.bf16.msrb.mxu0 %v7736_v19  ;;  %v10351_v40 = vadd.f32 %v1890_v5, %v10184_v24  ;;  %v7845_v19 = vld [vmem:[#allocation10 + $0x144] sm:$0xf0] }
 0x300   :  { %v1856_v58 = vpop.f32.mrf.mxu3  ;;  %3438 = vmatpush.bf16.msra.mxu2 %v7884_v49  ;;  %v8567_v49 = vld [vmem:[#allocation10 + $0x94] sm:$0xf] }
 0x301   :  { %2226 = vmatmul.bf16.gmra.mxu1 %v1941_v55  ;;  %2324 = vmatmul.bf16.gmra.mxu3 %v1941_v55  ;;  %v1857_v18 = vadd.f32 %v1856_v58, %v1808_v6  ;;  %v8675_v55 = vld [vmem:[#allocation10 + $0x3f4] sm:$0xf] }
 0x302   :  { %v1760_v15 = vpop.f32.mrf.mxu1  ;;  %v1809_v54 = vpop.f32.mrf.mxu2 }
 0x303   :  { %v1761_v36 = vadd.f32 %v1760_v15, %v1712_v21  ;;  %v1810_v60 = vadd.f32 %v1809_v54, %v10226_v1  ;;  %v8205_v21 = vld [vmem:[#allocation10 + $0x414] sm:$0xf0]  ;;  %v1891_v12 = vmax.f32 %v1857_v18, 0.0  ;;  %v8585_v15 = vld [vmem:[#allocation10 + $0x124] sm:$0xf] }
 0x304   :  { %v1714_v26 = vpop.f32.mrf.mxu0  ;;  %v8208_v11 = vor.u32 %v8675_v55, %v8205_v21  ;;  %v7848_v4 = vor.u32 %v8585_v15, %v7845_v19  ;;  %v8666_v54 = vld [vmem:[#allocation10 + $0x3ac] sm:$0xf] }
 0x305   :  { %v1892_v9 = vmax.f32 %v1761_v36, 0.0  ;;  %v10360_v5 = vadd.f32 %v1891_v12, %v10193_v14  ;;  %v1715_v6 = vadd.f32 %v1714_v26, %v10223_v45  ;;  %v8172_v8 = vor.u32 %v8666_v54, %v8169_v39  ;;  %v8133_v14 = vld [vmem:[#allocation10 + $0x384] sm:$0xf0]  ;;  %v8558_v39 = vld [vmem:[#allocation10 + $0x4c] sm:$0xf] }
 0x306   :  { %3486 = vmatpush.bf16.msra.mxu3 %v8208_v11  ;;  %3439 = vmatpush.bf16.msra.mxu2 %v7848_v4  ;;  %v8097_v4 = vld [vmem:[#allocation10 + $0x33c] sm:$0xf0] }
 0x307   :  { %v10354_v32 = vadd.f32 %v1892_v9, %v10187_v62  ;;  %v7812_v9 = vor.u32 %v8576_v34, %v7809_v61 }
 0x308   :  { %v1858_v56 = vpop.f32.mrf.mxu3 }
 0x309   :  { %v1859_v58 = vadd.f32 %v1858_v56, %v1810_v60  ;;  %v1942_v7 = vpack.c.bf16 %v10354_v32, %v10351_v40  ;;  %v7773_v56 = vld [vmem:[#allocation10 + $0xb4] sm:$0xf0] }
 0x30a   :  { %v1763_v24 = vpop.f32.mrf.mxu1  ;;  %v1812_v22 = vpop.f32.mrf.mxu2  ;;  %3487 = vmatpush.bf16.msra.mxu3 %v8172_v8  ;;  %3440 = vmatpush.bf16.msra.mxu2 %v7812_v9  ;;  %v7776_v11 = vor.u32 %v8567_v49, %v7773_v56  ;;  %v8630_v56 = vld [vmem:[#allocation10 + $0x28c] sm:$0xf] }
 0x30b   :  { %v1893_v62 = vmax.f32 %v1859_v58, 0.0  ;;  %2182 = vmatmul.bf16.gmra.mxu0 %v1942_v7  ;;  %2280 = vmatmul.bf16.gmra.mxu2 %v1942_v7  ;;  %v1764_v53 = vadd.f32 %v1763_v24, %v1715_v6  ;;  %v1813_v21 = vadd.f32 %v1812_v22, %v10226_v1  ;;  %v7699_v58 = vld [vmem:[#allocation10] sm:$0xf]  ;;  %v8553_v7 = vld [vmem:[#allocation10 + $0x20] sm:$0xf0] }
 0x30c   :  { %v1716_v16 = vpop.f32.mrf.mxu0  ;;  %v7700_v19 = vor.u32 %v8553_v7, %v7699_v58  ;;  %v8648_v24 = vld [vmem:[#allocation10 + $0x31c] sm:$0xf]  ;;  %v7737_v6 = vld [vmem:[#allocation10 + $0x6c] sm:$0xf0] }
 0x30d   :  { %v10364_v36 = vadd.f32 %v1893_v62, %v10197_v20  ;;  %v1717_v60 = vadd.f32 %v1716_v16, %v10223_v45  ;;  %v8136_v20 = vor.u32 %v8657_v13, %v8133_v14  ;;  %v1894_v55 = vmax.f32 %v1764_v53, 0.0  ;;  %v8639_v53 = vld [vmem:[#allocation10 + $0x2d4] sm:$0xf]  ;;  %v7987_v14 = vld [vmem:[#allocation10 + $0x240] sm:$0xf] }
 0x30e   :  { %v8100_v54 = vor.u32 %v8648_v24, %v8097_v4  ;;  %3345 = vmatpush.bf16.msrb.mxu0 %v7700_v19  ;;  %3441 = vmatpush.bf16.msra.mxu2 %v7776_v11  ;;  %v7740_v34 = vor.u32 %v8558_v39, %v7737_v6  ;;  %v8621_v11 = vld [vmem:[#allocation10 + $0x244] sm:$0xf]  ;;  %v7959_v24 = vld [vmem:[#allocation10 + $0x200] sm:$0xf] }
 0x30f   :  { %v1943_v18 = vpack.c.bf16 %v10364_v36, %v10360_v5  ;;  %3488 = vmatpush.bf16.msra.mxu3 %v8136_v20  ;;  %v10371_v8 = vadd.f32 %v1894_v55, %v10204_v28  ;;  %v8025_v55 = vld [vmem:[#allocation10 + $0x2ac] sm:$0xf0]  ;;  %v8617_v4 = vld [vmem:[#allocation10 + $0x220] sm:$0xf0] }
 0x310   :  { %v1861_v38 = vpop.f32.mrf.mxu3  ;;  %v8028_v58 = vor.u32 %v8630_v56, %v8025_v55 }
 0x311   :  { %2231 = vmatmul.bf16.gmra.mxu1 %v1943_v18  ;;  %2329 = vmatmul.bf16.gmra.mxu3 %v1943_v18  ;;  %v1862_v45 = vadd.f32 %v1861_v38, %v1813_v21  ;;  %v8061_v18 = vld [vmem:[#allocation10 + $0x2f4] sm:$0xf0] }
 0x312   :  { %v1765_v26 = vpop.f32.mrf.mxu1  ;;  %v1814_v15 = vpop.f32.mrf.mxu2  ;;  %v8064_v20 = vor.u32 %v8639_v53, %v8061_v18  ;;  %3442 = vmatpush.bf16.msra.mxu2 %v7740_v34 }
 0x313   :  { %v1766_v12 = vadd.f32 %v1765_v26, %v1717_v60  ;;  %v1815_v16 = vadd.f32 %v1814_v15, %v10226_v1  ;;  %3489 = vmatpush.bf16.msra.mxu3 %v8100_v54  ;;  %v1895_v9 = vmax.f32 %v1862_v45, 0.0  ;;  %v8625_v60 = vld [vmem:[#allocation10 + $0x260] sm:$0xf0]  ;;  %v7989_v15 = vld [vmem:[#allocation10 + $0x264] sm:$0xf0]  ;;  %v7960_v45 = vor.u32 %v8617_v4, %v7959_v24 }
 0x314   :  { %v7988_v28 = vor.u32 %v8625_v60, %v7987_v14  ;;  %v8549_v26 = vld [vmem:[#allocation10 + $0x4] sm:$0xf]  ;;  %v7992_v19 = vor.u32 %v8621_v11, %v7989_v15  ;;  %v1978_v54 = vld [vmem:[%s14704_s10] sm:$0x3]  ;;  %v8680_v11 = vld [vmem:[#allocation10 + $0x418] sm:$0xf0] }
 0x315   :  { %v1896_v62 = vmax.f32 %v1766_v12, 0.0  ;;  %v10380_v21 = vadd.f32 %v1895_v9, %v10213_v57  ;;  %3534 = vmatpush.bf16.msra.mxu0 %v7960_v45  ;;  %v10390_v6 = vperm.slane %v1978_v54, 0  ;;  %v10393_v9 = vperm.slane %v1978_v54, 1 }
 0x316   :  { %3394 = vmatpush.bf16.msrb.mxu1 %v7988_v28 }
 0x317   :  { %v10374_v22 = vadd.f32 %v1896_v62, %v10207_v29  ;;  %v7701_v29 = vld [vmem:[#allocation10 + $0x24] sm:$0xf0]  ;;  %3490 = vmatpush.bf16.msra.mxu3 %v8064_v20  ;;  %v8247_v62 = vld [vmem:[#allocation10 + $0x440] sm:$0xf] }
 0x318   :  { %v1863_v61 = vpop.f32.mrf.mxu3  ;;  %v7704_v1 = vor.u32 %v8549_v26, %v7701_v29 }
 0x319   :  { %v1864_v38 = vadd.f32 %v1863_v61, %v1815_v16  ;;  %v1944_v13 = vpack.c.bf16 %v10374_v22, %v10371_v8 }
 0x31a   :  { %3443 = vmatpush.bf16.msra.mxu2 %v7704_v1 }
 0x31b   :  { %v1897_v49 = vmax.f32 %v1864_v38, 0.0  ;;  %2187 = vmatmul.bf16.gmra.mxu0 %v1944_v13  ;;  %2285 = vmatmul.bf16.gmra.mxu2 %v1944_v13  ;;  %v7923_v38 = vld [vmem:[#allocation10 + $0x1b8] sm:$0xf]  ;;  %v8608_v13 = vld [vmem:[#allocation10 + $0x1d8] sm:$0xf0] }
 0x31c   :  { %3491 = vmatpush.bf16.msra.mxu3 %v8028_v58  ;;  %v7924_v60 = vor.u32 %v8608_v13, %v7923_v38  ;;  %v7887_v38 = vld [vmem:[#allocation10 + $0x170] sm:$0xf]  ;;  %v8599_v13 = vld [vmem:[#allocation10 + $0x190] sm:$0xf0] }
 0x31d   :  { %v10383_v12 = vadd.f32 %v1897_v49, %v10216_v47  ;;  %v8689_v47 = vld [vmem:[#allocation10 + $0x460] sm:$0xf0] }
 0x31e   :  { %v8248_v39 = vor.u32 %v8689_v47, %v8247_v62  ;;  %3535 = vmatpush.bf16.msra.mxu0 %v7924_v60  ;;  %v7888_v60 = vor.u32 %v8599_v13, %v7887_v38 }
 0x31f   :  { %v1945_v7 = vpack.c.bf16 %v10383_v12, %v10380_v21 }
 0x320   :  { %3492 = vmatpush.bf16.msra.mxu3 %v7992_v19  ;;  %3583 = vmatpush.bf16.msra.mxu1 %v8248_v39 }
 0x321   :  { %2236 = vmatmul.bf16.gmra.mxu1 %v1945_v7  ;;  %2334 = vmatmul.bf16.gmra.mxu3 %v1945_v7  ;;  %v8211_v7 = vld [vmem:[#allocation10 + $0x3f8] sm:$0xf] }
 0x322   :  { %v8212_v15 = vor.u32 %v8680_v11, %v8211_v7  ;;  %3536 = vmatpush.bf16.msra.mxu0 %v7888_v60 }
 0x324   :  { %3584 = vmatpush.bf16.msra.mxu1 %v8212_v15 }
 0x328   :  { %v2153_v57 = vpop.f32.mrf.mxu0 }
 0x329   :  { %v2154_v53 = vadd.f32 %v2153_v57, %v10390_v6 }
 0x32e   :  { %v2202_v16 = vpop.f32.mrf.mxu1  ;;  %v2251_v34 = vpop.f32.mrf.mxu2 }
 0x32f   :  { %v2203_v18 = vadd.f32 %v2202_v16, %v2154_v53  ;;  %v2252_v49 = vadd.f32 %v2251_v34, %v10393_v9 }
 0x330   :  { %v2155_v61 = vpop.f32.mrf.mxu0 }
 0x331   :  { %v2156_v20 = vadd.f32 %v2155_v61, %v10390_v6  ;;  %v2340_v29 = vmax.f32 %v2203_v18, 0.0 }
 0x333   :  { %v2372_v19 = vadd.f32 %v2340_v29, %v10231_v41 }
 0x334   :  { %v2300_v14 = vpop.f32.mrf.mxu3 }
 0x335   :  { %v2301_v55 = vadd.f32 %v2300_v14, %v2252_v49 }
 0x336   :  { %v2204_v28 = vpop.f32.mrf.mxu1  ;;  %v2253_v26 = vpop.f32.mrf.mxu2 }
 0x337   :  { %v2205_v1 = vadd.f32 %v2204_v28, %v2156_v20  ;;  %v2254_v4 = vadd.f32 %v2253_v26, %v10393_v9  ;;  %v2341_v57 = vmax.f32 %v2301_v55, 0.0  ;;  %v8175_v55 = vld [vmem:[#allocation10 + $0x3b0] sm:$0xf] }
 0x338   :  { %v2158_v56 = vpop.f32.mrf.mxu0 }
 0x339   :  { %v2342_v58 = vmax.f32 %v2205_v1, 0.0  ;;  %v2373_v41 = vadd.f32 %v2341_v57, %v10240_v44 }
 0x33b   :  { %v2374_v24 = vadd.f32 %v2342_v58, %v10234_v3  ;;  %v2159_v3 = vadd.f32 %v2158_v56, %v10390_v6  ;;  %v8671_v58 = vld [vmem:[#allocation10 + $0x3d0] sm:$0xf0] }
 0x33c   :  { %v2302_v45 = vpop.f32.mrf.mxu3  ;;  %v8176_v7 = vor.u32 %v8671_v58, %v8175_v55 }
 0x33d   :  { %v10400_v62 = vpack.c.bf16 %v2374_v24, %v2372_v19  ;;  %v2303_v47 = vadd.f32 %v2302_v45, %v2254_v4 }
 0x33e   :  { %v2207_v54 = vpop.f32.mrf.mxu1  ;;  %v2256_v39 = vpop.f32.mrf.mxu2  ;;  %3585 = vmatpush.bf16.msra.mxu1 %v8176_v7 }
 0x33f   :  { %v2343_v16 = vmax.f32 %v2303_v47, 0.0  ;;  %3346 = vmatmul.bf16.vlgmr.msrb.gmra.mxu0 %v10400_v62  ;;  %3444 = vmatmul.bf16.vlgmr.msra.gmra.mxu2 %v10400_v62  ;;  %v2208_v18 = vadd.f32 %v2207_v54, %v2159_v3  ;;  %v2257_v29 = vadd.f32 %v2256_v39, %v10393_v9 }
 0x340   :  { %v2160_v34 = vpop.f32.mrf.mxu0 }
 0x341   :  { %v2375_v61 = vadd.f32 %v2343_v16, %v10244_v52  ;;  %v2161_v20 = vadd.f32 %v2160_v34, %v10390_v6  ;;  %v2344_v44 = vmax.f32 %v2208_v18, 0.0  ;;  %v8590_v18 = vld [vmem:[#allocation10 + $0x148] sm:$0xf0] }
 0x343   :  { %v10407_v53 = vpack.c.bf16 %v2375_v61, %v2373_v41  ;;  %v2376_v11 = vadd.f32 %v2344_v44, %v10251_v27  ;;  %v7851_v61 = vld [vmem:[#allocation10 + $0x128] sm:$0xf] }
 0x344   :  { %v2305_v14 = vpop.f32.mrf.mxu3  ;;  %v7852_v13 = vor.u32 %v8590_v18, %v7851_v61 }
 0x345   :  { %3395 = vmatmul.bf16.vlgmr.msrb.gmra.mxu1 %v10407_v53  ;;  %3493 = vmatmul.bf16.vlgmr.msra.gmra.mxu3 %v10407_v53  ;;  %v2306_v1 = vadd.f32 %v2305_v14, %v2257_v29 }
 0x346   :  { %v2209_v28 = vpop.f32.mrf.mxu1  ;;  %v2258_v26 = vpop.f32.mrf.mxu2  ;;  %3537 = vmatpush.bf16.msra.mxu0 %v7852_v13 }
 0x347   :  { %v2210_v52 = vadd.f32 %v2209_v28, %v2161_v20  ;;  %v2259_v19 = vadd.f32 %v2258_v26, %v10393_v9  ;;  %v2345_v4 = vmax.f32 %v2306_v1, 0.0 }
 0x348   :  { %v2163_v49 = vpop.f32.mrf.mxu0 }
 0x349   :  { %v2346_v56 = vmax.f32 %v2210_v52, 0.0  ;;  %v2377_v27 = vadd.f32 %v2345_v4, %v10260_v30  ;;  %v8139_v52 = vld [vmem:[#allocation10 + $0x368] sm:$0xf] }
 0x34b   :  { %v2378_v15 = vadd.f32 %v2346_v56, %v10254_v48  ;;  %v2164_v48 = vadd.f32 %v2163_v49, %v10390_v6  ;;  %v8662_v49 = vld [vmem:[#allocation10 + $0x388] sm:$0xf0] }
 0x34c   :  { %v2307_v24 = vpop.f32.mrf.mxu3  ;;  %v8140_v1 = vor.u32 %v8662_v49, %v8139_v52 }
 0x34d   :  { %v10416_v45 = vpack.c.bf16 %v2378_v15, %v2376_v11  ;;  %v2308_v57 = vadd.f32 %v2307_v24, %v2259_v19 }
 0x34e   :  { %v2212_v47 = vpop.f32.mrf.mxu1  ;;  %v2261_v54 = vpop.f32.mrf.mxu2  ;;  %3586 = vmatpush.bf16.msra.mxu1 %v8140_v1 }
 0x34f   :  { %v2347_v39 = vmax.f32 %v2308_v57, 0.0  ;;  %3351 = vmatmul.bf16.gmra.mxu0 %v10416_v45  ;;  %3449 = vmatmul.bf16.gmra.mxu2 %v10416_v45  ;;  %v2213_v3 = vadd.f32 %v2212_v47, %v2164_v48  ;;  %v2262_v28 = vadd.f32 %v2261_v54, %v10393_v9  ;;  %v8581_v48 = vld [vmem:[#allocation10 + $0x100] sm:$0xf0] }
 0x350   :  { %v2165_v16 = vpop.f32.mrf.mxu0 }
 0x351   :  { %v2379_v34 = vadd.f32 %v2347_v39, %v10264_v42  ;;  %v2166_v14 = vadd.f32 %v2165_v16, %v10390_v6  ;;  %v2348_v30 = vmax.f32 %v2213_v3, 0.0 }
 0x353   :  { %v10423_v41 = vpack.c.bf16 %v2379_v34, %v2377_v27  ;;  %v2380_v56 = vadd.f32 %v2348_v30, %v10271_v33  ;;  %v7815_v27 = vld [vmem:[#allocation10 + $0xe0] sm:$0xf] }
 0x354   :  { %v2310_v38 = vpop.f32.mrf.mxu3  ;;  %v7816_v3 = vor.u32 %v8581_v48, %v7815_v27  ;;  %v8103_v30 = vld [vmem:[#allocation10 + $0x320] sm:$0xf] }
 0x355   :  { %3400 = vmatmul.bf16.gmra.mxu1 %v10423_v41  ;;  %3498 = vmatmul.bf16.gmra.mxu3 %v10423_v41  ;;  %v2311_v44 = vadd.f32 %v2310_v38, %v2262_v28  ;;  %v8653_v28 = vld [vmem:[#allocation10 + $0x340] sm:$0xf0] }
 0x356   :  { %v2214_v60 = vpop.f32.mrf.mxu1  ;;  %v2263_v20 = vpop.f32.mrf.mxu2  ;;  %3538 = vmatpush.bf16.msra.mxu0 %v7816_v3 }
 0x357   :  { %v2215_v42 = vadd.f32 %v2214_v60, %v2166_v14  ;;  %v2264_v58 = vadd.f32 %v2263_v20, %v10393_v9  ;;  %v2349_v11 = vmax.f32 %v2311_v44, 0.0 }
 0x358   :  { %v2168_v26 = vpop.f32.mrf.mxu0 }
 0x359   :  { %v2350_v29 = vmax.f32 %v2215_v42, 0.0  ;;  %v2381_v33 = vadd.f32 %v2349_v11, %v10280_v10  ;;  %v8104_v42 = vor.u32 %v8653_v28, %v8103_v30 }
 0x35b   :  { %v2382_v55 = vadd.f32 %v2350_v29, %v10274_v63  ;;  %v2169_v63 = vadd.f32 %v2168_v26, %v10390_v6  ;;  %3587 = vmatpush.bf16.msra.mxu1 %v8104_v42 }
 0x35c   :  { %v2312_v7 = vpop.f32.mrf.mxu3 }
 0x35d   :  { %v10432_v15 = vpack.c.bf16 %v2382_v55, %v2380_v56  ;;  %v2313_v19 = vadd.f32 %v2312_v7, %v2264_v58 }
 0x35e   :  { %v2217_v24 = vpop.f32.mrf.mxu1  ;;  %v2266_v4 = vpop.f32.mrf.mxu2 }
 0x35f   :  { %v2351_v57 = vmax.f32 %v2313_v19, 0.0  ;;  %3356 = vmatmul.bf16.gmra.mxu0 %v10432_v15  ;;  %3454 = vmatmul.bf16.gmra.mxu2 %v10432_v15  ;;  %v2218_v16 = vadd.f32 %v2217_v24, %v2169_v63  ;;  %v2267_v13 = vadd.f32 %v2266_v4, %v10393_v9 }
 0x360   :  { %v2170_v47 = vpop.f32.mrf.mxu0 }
 0x361   :  { %v2383_v54 = vadd.f32 %v2351_v57, %v10284_v50  ;;  %v2171_v61 = vadd.f32 %v2170_v47, %v10390_v6  ;;  %v2352_v10 = vmax.f32 %v2218_v16, 0.0  ;;  %v7779_v57 = vld [vmem:[#allocation10 + $0x98] sm:$0xf]  ;;  %v8572_v47 = vld [vmem:[#allocation10 + $0xb8] sm:$0xf0] }
 0x362   :  { %v7780_v63 = vor.u32 %v8572_v47, %v7779_v57 }
 0x363   :  { %v10439_v39 = vpack.c.bf16 %v2383_v54, %v2381_v33  ;;  %v2384_v26 = vadd.f32 %v2352_v10, %v10291_v35 }
 0x364   :  { %v2315_v34 = vpop.f32.mrf.mxu3  ;;  %3539 = vmatpush.bf16.msra.mxu0 %v7780_v63  ;;  %v8249_v63 = vld [vmem:[#allocation10 + $0x464] sm:$0xf0] }
 0x365   :  { %3405 = vmatmul.bf16.gmra.mxu1 %v10439_v39  ;;  %3503 = vmatmul.bf16.gmra.mxu3 %v10439_v39  ;;  %v2316_v60 = vadd.f32 %v2315_v34, %v2267_v13 }
 0x366   :  { %v2219_v18 = vpop.f32.mrf.mxu1  ;;  %v2268_v38 = vpop.f32.mrf.mxu2 }
 0x367   :  { %v2220_v50 = vadd.f32 %v2219_v18, %v2171_v61  ;;  %v2269_v29 = vadd.f32 %v2268_v38, %v10393_v9  ;;  %v2353_v49 = vmax.f32 %v2316_v60, 0.0  ;;  %v8067_v18 = vld [vmem:[#allocation10 + $0x2d8] sm:$0xf]  ;;  %v8644_v38 = vld [vmem:[#allocation10 + $0x2f8] sm:$0xf0] }
 0x368   :  { %v2173_v14 = vpop.f32.mrf.mxu0  ;;  %v8068_v10 = vor.u32 %v8644_v38, %v8067_v18  ;;  %v8676_v18 = vld [vmem:[#allocation10 + $0x3fc] sm:$0xf]  ;;  %v8213_v38 = vld [vmem:[#allocation10 + $0x41c] sm:$0xf0] }
 0x369   :  { %v2354_v20 = vmax.f32 %v2220_v50, 0.0  ;;  %v2385_v35 = vadd.f32 %v2353_v49, %v10300_v17 }
 0x36a   :  { %3588 = vmatpush.bf16.msra.mxu1 %v8068_v10 }
 0x36b   :  { %v2386_v44 = vadd.f32 %v2354_v20, %v10294_v2  ;;  %v2174_v2 = vadd.f32 %v2173_v14, %v10390_v6 }
 0x36c   :  { %v2317_v52 = vpop.f32.mrf.mxu3 }
 0x36d   :  { %v10448_v1 = vpack.c.bf16 %v2386_v44, %v2384_v26  ;;  %v2318_v56 = vadd.f32 %v2317_v52, %v2269_v29  ;;  %v8613_v44 = vld [vmem:[#allocation10 + $0x204] sm:$0xf]  ;;  %v7961_v29 = vld [vmem:[#allocation10 + $0x224] sm:$0xf0] }
 0x36e   :  { %v2222_v55 = vpop.f32.mrf.mxu1  ;;  %v2271_v58 = vpop.f32.mrf.mxu2 }
 0x36f   :  { %v2355_v7 = vmax.f32 %v2318_v56, 0.0  ;;  %3361 = vmatmul.bf16.gmra.mxu0 %v10448_v1  ;;  %3459 = vmatmul.bf16.gmra.mxu2 %v10448_v1  ;;  %v2223_v4 = vadd.f32 %v2222_v55, %v2174_v2  ;;  %v2272_v48 = vadd.f32 %v2271_v58, %v10393_v9  ;;  %v8604_v58 = vld [vmem:[#allocation10 + $0x1bc] sm:$0xf]  ;;  %v7743_v2 = vld [vmem:[#allocation10 + $0x50] sm:$0xf] }
 0x370   :  { %v2175_v11 = vpop.f32.mrf.mxu0 }
 0x371   :  { %v2387_v19 = vadd.f32 %v2355_v7, %v10304_v31  ;;  %v2176_v54 = vadd.f32 %v2175_v11, %v10390_v6  ;;  %v2356_v17 = vmax.f32 %v2223_v4, 0.0  ;;  %v7925_v7 = vld [vmem:[#allocation10 + $0x1dc] sm:$0xf0] }
 0x372   :  { %v7928_v4 = vor.u32 %v8604_v58, %v7925_v7 }
 0x373   :  { %v10455_v24 = vpack.c.bf16 %v2387_v19, %v2385_v35  ;;  %v2388_v13 = vadd.f32 %v2356_v17, %v10311_v51  ;;  %v7964_v51 = vor.u32 %v8613_v44, %v7961_v29  ;;  %v8563_v19 = vld [vmem:[#allocation10 + $0x70] sm:$0xf0]  ;;  %v7889_v17 = vld [vmem:[#allocation10 + $0x194] sm:$0xf0] }
 0x374   :  { %v2320_v33 = vpop.f32.mrf.mxu3  ;;  %v7744_v47 = vor.u32 %v8563_v19, %v7743_v2  ;;  %v8577_v19 = vld [vmem:[#allocation10 + $0xe4] sm:$0xf] }
 0x375   :  { %3410 = vmatmul.bf16.gmra.mxu1 %v10455_v24  ;;  %3508 = vmatmul.bf16.gmra.mxu3 %v10455_v24  ;;  %v2321_v3 = vadd.f32 %v2320_v33, %v2272_v48  ;;  %v8685_v33 = vld [vmem:[#allocation10 + $0x444] sm:$0xf] }
 0x376   :  { %v2224_v16 = vpop.f32.mrf.mxu1  ;;  %v2273_v27 = vpop.f32.mrf.mxu2  ;;  %3632 = vmatpush.bf16.msrb.mxu2 %v7964_v51  ;;  %3540 = vmatpush.bf16.msra.mxu0 %v7744_v47  ;;  %v8658_v47 = vld [vmem:[#allocation10 + $0x36c] sm:$0xf] }
 0x377   :  { %v2225_v31 = vadd.f32 %v2224_v16, %v2176_v54  ;;  %v2274_v14 = vadd.f32 %v2273_v27, %v10393_v9  ;;  %v2357_v20 = vmax.f32 %v2321_v3, 0.0  ;;  %v8595_v27 = vld [vmem:[#allocation10 + $0x174] sm:$0xf] }
 0x378   :  { %v2178_v34 = vpop.f32.mrf.mxu0  ;;  %v7892_v3 = vor.u32 %v8595_v27, %v7889_v17  ;;  %v7781_v27 = vld [vmem:[#allocation10 + $0xbc] sm:$0xf0] }
 0x379   :  { %v2358_v61 = vmax.f32 %v2225_v31, 0.0  ;;  %v2179_v56 = vadd.f32 %v2178_v34, %v10390_v6 }
 0x37a   :  { %3633 = vmatpush.bf16.msrb.mxu2 %v7928_v4 }
 0x37b   :  { %v2390_v50 = vadd.f32 %v2358_v61, %v10314_v25  ;;  %v2389_v25 = vadd.f32 %v2357_v20, %v10320_v43  ;;  %v8252_v43 = vor.u32 %v8685_v33, %v8249_v63  ;;  %v8141_v33 = vld [vmem:[#allocation10 + $0x38c] sm:$0xf0] }
 0x37c   :  { %v2322_v60 = vpop.f32.mrf.mxu3 }
 0x37d   :  { %v10464_v30 = vpack.c.bf16 %v2390_v50, %v2388_v13  ;;  %v2323_v28 = vadd.f32 %v2322_v60, %v2274_v14  ;;  %3681 = vmatpush.bf16.msrb.mxu3 %v8252_v43  ;;  %v8031_v50 = vld [vmem:[#allocation10 + $0x290] sm:$0xf]  ;;  %v8635_v14 = vld [vmem:[#allocation10 + $0x2b0] sm:$0xf0]  ;;  %v8216_v60 = vor.u32 %v8676_v18, %v8213_v38 }
 0x37e   :  { %v2227_v42 = vpop.f32.mrf.mxu1  ;;  %v2276_v26 = vpop.f32.mrf.mxu2  ;;  %v8032_v20 = vor.u32 %v8635_v14, %v8031_v50  ;;  %3634 = vmatpush.bf16.msrb.mxu2 %v7892_v3  ;;  %v8559_v14 = vld [vmem:[#allocation10 + $0x54] sm:$0xf] }
 0x37f   :  { %v2359_v52 = vmax.f32 %v2323_v28, 0.0  ;;  %3366 = vmatmul.bf16.gmra.mxu0 %v10464_v30  ;;  %3464 = vmatmul.bf16.gmra.mxu2 %v10464_v30  ;;  %v2228_v35 = vadd.f32 %v2227_v42, %v2179_v56  ;;  %v2277_v31 = vadd.f32 %v2276_v26, %v10393_v9  ;;  %v8586_v28 = vld [vmem:[#allocation10 + $0x12c] sm:$0xf]  ;;  %v7853_v42 = vld [vmem:[#allocation10 + $0x14c] sm:$0xf0] }
 0x380   :  { %v2180_v49 = vpop.f32.mrf.mxu0  ;;  %3589 = vmatpush.bf16.msra.mxu1 %v8032_v20 }
 0x381   :  { %v2391_v55 = vadd.f32 %v2359_v52, %v10324_v46  ;;  %v2181_v54 = vadd.f32 %v2180_v49, %v10390_v6  ;;  %v2360_v48 = vmax.f32 %v2228_v35, 0.0  ;;  %3682 = vmatpush.bf16.msrb.mxu3 %v8216_v60  ;;  %v7856_v52 = vor.u32 %v8586_v28, %v7853_v42  ;;  %v8667_v49 = vld [vmem:[#allocation10 + $0x3b4] sm:$0xf]  ;;  %v7745_v42 = vld [vmem:[#allocation10 + $0x74] sm:$0xf0] }
 0x383   :  { %v10471_v11 = vpack.c.bf16 %v2391_v55, %v2389_v25  ;;  %v2392_v44 = vadd.f32 %v2360_v48, %v10331_v23  ;;  %v8177_v25 = vld [vmem:[#allocation10 + $0x3d4] sm:$0xf0]  ;;  %3635 = vmatpush.bf16.msrb.mxu2 %v7856_v52  ;;  %v7817_v23 = vld [vmem:[#allocation10 + $0x104] sm:$0xf0] }
 0x384   :  { %v2325_v57 = vpop.f32.mrf.mxu3  ;;  %v8180_v7 = vor.u32 %v8667_v49, %v8177_v25  ;;  %v7748_v49 = vor.u32 %v8559_v14, %v7745_v42 }
 0x385   :  { %3415 = vmatmul.bf16.gmra.mxu1 %v10471_v11  ;;  %3513 = vmatmul.bf16.gmra.mxu3 %v10471_v11  ;;  %v2326_v10 = vadd.f32 %v2325_v57, %v2277_v31  ;;  %v7707_v31 = vld [vmem:[#allocation10 + $0x8] sm:$0xf] }
 0x386   :  { %v2229_v46 = vpop.f32.mrf.mxu1  ;;  %v2278_v16 = vpop.f32.mrf.mxu2  ;;  %3683 = vmatpush.bf16.msrb.mxu3 %v8180_v7 }
 0x387   :  { %v2230_v34 = vadd.f32 %v2229_v46, %v2181_v54  ;;  %v2279_v26 = vadd.f32 %v2278_v16, %v10393_v9  ;;  %v2361_v56 = vmax.f32 %v2326_v10, 0.0  ;;  %v8144_v46 = vor.u32 %v8658_v47, %v8141_v33  ;;  %v8568_v16 = vld [vmem:[#allocation10 + $0x9c] sm:$0xf]  ;;  %v8649_v10 = vld [vmem:[#allocation10 + $0x324] sm:$0xf] }
 0x388   :  { %v2183_v61 = vpop.f32.mrf.mxu0  ;;  %v7784_v3 = vor.u32 %v8568_v16, %v7781_v27  ;;  %v8033_v33 = vld [vmem:[#allocation10 + $0x2b4] sm:$0xf0] }
 0x389   :  { %v2362_v13 = vmax.f32 %v2230_v34, 0.0  ;;  %v2393_v63 = vadd.f32 %v2361_v56, %v10340_v0  ;;  %v2184_v54 = vadd.f32 %v2183_v61, %v10390_v6  ;;  %v8554_v34 = vld [vmem:[#allocation10 + $0x28] sm:$0xf0] }
 0x38a   :  { %3684 = vmatpush.bf16.msrb.mxu3 %v8144_v46  ;;  %v7708_v38 = vor.u32 %v8554_v34, %v7707_v31  ;;  %v8626_v61 = vld [vmem:[#allocation10 + $0x268] sm:$0xf0] }
 0x38b   :  { %v2394_v29 = vadd.f32 %v2362_v13, %v10334_v59  ;;  %v7820_v59 = vor.u32 %v8577_v19, %v7817_v23  ;;  %v8105_v13 = vld [vmem:[#allocation10 + $0x344] sm:$0xf0]  ;;  %v7709_v19 = vld [vmem:[#allocation10 + $0x2c] sm:$0xf0] }
 0x38c   :  { %v2327_v51 = vpop.f32.mrf.mxu3  ;;  %v8108_v50 = vor.u32 %v8649_v10, %v8105_v13  ;;  %3541 = vmatpush.bf16.msra.mxu0 %v7708_v38 }
 0x38d   :  { %v10480_v55 = vpack.c.bf16 %v2394_v29, %v2392_v44  ;;  %v2328_v58 = vadd.f32 %v2327_v51, %v2279_v26  ;;  %3636 = vmatpush.bf16.msrb.mxu2 %v7820_v59  ;;  %v8640_v44 = vld [vmem:[#allocation10 + $0x2dc] sm:$0xf]  ;;  %v8069_v29 = vld [vmem:[#allocation10 + $0x2fc] sm:$0xf0] }
 0x38e   :  { %v2232_v35 = vpop.f32.mrf.mxu1  ;;  %v2281_v2 = vpop.f32.mrf.mxu2  ;;  %3685 = vmatpush.bf16.msrb.mxu3 %v8108_v50  ;;  %v8072_v56 = vor.u32 %v8640_v44, %v8069_v29 }
 0x38f   :  { %v2363_v4 = vmax.f32 %v2328_v58, 0.0  ;;  %3371 = vmatmul.bf16.gmra.mxu0 %v10480_v55  ;;  %3469 = vmatmul.bf16.gmra.mxu2 %v10480_v55  ;;  %v2233_v48 = vadd.f32 %v2232_v35, %v2184_v54  ;;  %v2282_v52 = vadd.f32 %v2281_v2, %v10393_v9  ;;  %v8550_v35 = vld [vmem:[#allocation10 + $0xc] sm:$0xf]  ;;  %v8631_v2 = vld [vmem:[#allocation10 + $0x294] sm:$0xf] }
 0x390   :  { %v2185_v57 = vpop.f32.mrf.mxu0  ;;  %v8036_v46 = vor.u32 %v8631_v2, %v8033_v33 }
 0x391   :  { %v2395_v43 = vadd.f32 %v2363_v4, %v10344_v37  ;;  %v2186_v0 = vadd.f32 %v2185_v57, %v10390_v6  ;;  %v7995_v37 = vld [vmem:[#allocation10 + $0x248] sm:$0xf]  ;;  %3637 = vmatpush.bf16.msrb.mxu2 %v7784_v3  ;;  %v2364_v26 = vmax.f32 %v2233_v48, 0.0  ;;  %v7712_v57 = vor.u32 %v8550_v35, %v7709_v19  ;;  %v8690_v19 = vld [vmem:[#allocation10 + $0x468] sm:$0xf0] }
 0x392   :  { %v7996_v28 = vor.u32 %v8626_v61, %v7995_v37  ;;  %3686 = vmatpush.bf16.msrb.mxu3 %v8072_v56 }
 0x393   :  { %v10487_v17 = vpack.c.bf16 %v2395_v43, %v2393_v63  ;;  %v2396_v23 = vadd.f32 %v2364_v26, %v10351_v40  ;;  %v8622_v40 = vld [vmem:[#allocation10 + $0x24c] sm:$0xf] }
 0x394   :  { %v2330_v18 = vpop.f32.mrf.mxu3  ;;  %3590 = vmatpush.bf16.msra.mxu1 %v7996_v28 }
 0x395   :  { %14718 = vst [vmem:[#allocation16_spill] sm:$0xff] %v10487_v17  ;;  %3420 = vmatmul.bf16.gmra.mxu1 %v10487_v17  ;;  %3518 = vmatmul.bf16.gmra.mxu3 %v10487_v17  ;;  %v2331_v58 = vadd.f32 %v2330_v18, %v2282_v52 }
 0x396   :  { %v2234_v60 = vpop.f32.mrf.mxu1  ;;  %v2283_v20 = vpop.f32.mrf.mxu2  ;;  %3638 = vmatpush.bf16.msrb.mxu2 %v7748_v49  ;;  %3687 = vmatpush.bf16.msrb.mxu3 %v8036_v46 }
 0x397   :  { %v2235_v51 = vadd.f32 %v2234_v60, %v2186_v0  ;;  %v2284_v59 = vadd.f32 %v2283_v20, %v10393_v9  ;;  %v2365_v63 = vmax.f32 %v2331_v58, 0.0  ;;  %v8618_v58 = vld [vmem:[#allocation10 + $0x228] sm:$0xf0] }
 0x398   :  { %v2188_v25 = vpop.f32.mrf.mxu0 }
 0x399   :  { %v2366_v7 = vmax.f32 %v2235_v51, 0.0  ;;  %v2397_v31 = vadd.f32 %v2365_v63, %v10360_v5  ;;  %v2189_v34 = vadd.f32 %v2188_v25, %v10390_v6 }
 0x39a   :  { %3639 = vmatpush.bf16.msrb.mxu2 %v7712_v57 }
 0x39b   :  { %v2398_v4 = vadd.f32 %v2366_v7, %v10354_v32  ;;  %v7997_v32 = vld [vmem:[#allocation10 + $0x26c] sm:$0xf0] }
 0x39c   :  { %v2332_v47 = vpop.f32.mrf.mxu3  ;;  %v8000_v18 = vor.u32 %v8622_v40, %v7997_v32 }
 0x39d   :  { %v10496_v54 = vpack.c.bf16 %v2398_v4, %v2396_v23  ;;  %v2333_v43 = vadd.f32 %v2332_v47, %v2284_v59 }
 0x39e   :  { %v2237_v16 = vpop.f32.mrf.mxu1  ;;  %v2286_v27 = vpop.f32.mrf.mxu2  ;;  %3688 = vmatpush.bf16.msrb.mxu3 %v8000_v18 }
 0x39f   :  { %14719 = vst [vmem:[#allocation17_spill] sm:$0xff] %v10496_v54  ;;  %v2367_v48 = vmax.f32 %v2333_v43, 0.0  ;;  %3376 = vmatmul.bf16.gmra.mxu0 %v10496_v54  ;;  %3474 = vmatmul.bf16.gmra.mxu2 %v10496_v54  ;;  %v2238_v13 = vadd.f32 %v2237_v16, %v2189_v34  ;;  %v2287_v5 = vadd.f32 %v2286_v27, %v10393_v9 }
 0x3a0   :  { %v2190_v38 = vpop.f32.mrf.mxu0 }
 0x3a1   :  { %v2399_v3 = vadd.f32 %v2367_v48, %v10364_v36  ;;  %v2191_v37 = vadd.f32 %v2190_v38, %v10390_v6  ;;  %v2368_v50 = vmax.f32 %v2238_v13, 0.0 }
 0x3a3   :  { %v10503_v10 = vpack.c.bf16 %v2399_v3, %v2397_v31  ;;  %v2400_v28 = vadd.f32 %v2368_v50, %v10371_v8  ;;  %v2580_v8 = vld [vmem:[%s14706_s12] sm:$0xff] }
 0x3a4   :  { %v2335_v0 = vpop.f32.mrf.mxu3  ;;  %v10530_v47 = vperm.slane %v2580_v8, 1  ;;  %v8609_v50 = vld [vmem:[#allocation10 + $0x1e0] sm:$0xf0] }
 0x3a5   :  { %14720 = vst [vmem:[#allocation18_spill] sm:$0xff] %v10503_v10  ;;  %3425 = vmatmul.bf16.gmra.mxu1 %v10503_v10  ;;  %3523 = vmatmul.bf16.gmra.mxu3 %v10503_v10  ;;  %v2336_v36 = vadd.f32 %v2335_v0, %v2287_v5  ;;  %v8219_v5 = vld [vmem:[#allocation10 + $0x400] sm:$0xf] }
 0x3a6   :  { %v2239_v61 = vpop.f32.mrf.mxu1  ;;  %v2288_v60 = vpop.f32.mrf.mxu2 }
 0x3a7   :  { %v2240_v14 = vadd.f32 %v2239_v61, %v2191_v37  ;;  %v2289_v44 = vadd.f32 %v2288_v60, %v10393_v9  ;;  %v2369_v6 = vmax.f32 %v2336_v36, 0.0  ;;  %v10525_v9 = vperm.slane %v2580_v8, 0  ;;  %v7931_v61 = vld [vmem:[#allocation10 + $0x1c0] sm:$0xf] }
 0x3a8   :  { %v7932_v36 = vor.u32 %v8609_v50, %v7931_v61 }
 0x3a9   :  { %v2370_v20 = vmax.f32 %v2240_v14, 0.0  ;;  %v2401_v49 = vadd.f32 %v2369_v6, %v10380_v21  ;;  %v7967_v21 = vld [vmem:[#allocation10 + $0x208] sm:$0xf] }
 0x3aa   :  { %v7968_v35 = vor.u32 %v8618_v58, %v7967_v21 }
 0x3ab   :  { %v2402_v42 = vadd.f32 %v2370_v20, %v10374_v22  ;;  %v8681_v20 = vld [vmem:[#allocation10 + $0x420] sm:$0xf0] }
 0x3ac   :  { %v2337_v29 = vpop.f32.mrf.mxu3  ;;  %3730 = vmatpush.bf16.msrb.mxu0 %v7968_v35 }
 0x3ad   :  { %v10512_v26 = vpack.c.bf16 %v2402_v42, %v2400_v28  ;;  %v2338_v52 = vadd.f32 %v2337_v29, %v2289_v44  ;;  %v8220_v29 = vor.u32 %v8681_v20, %v8219_v5 }
 0x3af   :  { %14721 = vst [vmem:[#allocation19_spill] sm:$0xff] %v10512_v26  ;;  %v2371_v51 = vmax.f32 %v2338_v52, 0.0  ;;  %3381 = vmatmul.bf16.gmra.mxu0 %v10512_v26  ;;  %3479 = vmatmul.bf16.gmra.mxu2 %v10512_v26 }
 0x3b0   :  { %3731 = vmatpush.bf16.msrb.mxu0 %v7932_v36 }
 0x3b1   :  { %v2403_v25 = vadd.f32 %v2371_v51, %v10383_v12  ;;  %v8255_v12 = vld [vmem:[#allocation10 + $0x448] sm:$0xf] }
 0x3b2   :  { %v8256_v59 = vor.u32 %v8690_v19, %v8255_v12 }
 0x3b3   :  { %v10518_v56 = vpack.c.bf16 %v2403_v25, %v2401_v49 }
 0x3b4   :  { %3779 = vmatpush.bf16.msrb.mxu1 %v8256_v59 }
 0x3b5   :  { %14722 = vst [vmem:[#allocation20_spill] sm:$0xff] %v10518_v56  ;;  %3430 = vmatmul.bf16.gmra.mxu1 %v10518_v56  ;;  %3528 = vmatmul.bf16.gmra.mxu3 %v10518_v56 }
 0x3b8   :  { %3780 = vmatpush.bf16.msrb.mxu1 %v8220_v29 }
 0x3bc   :  { %v3347_v22 = vpop.f32.mrf.mxu0 }
 0x3bd   :  { %v3348_v7 = vadd.f32 %v3347_v22, %v10525_v9 }
 0x3bf   :  { %3542 = vmatmul.bf16.vlgmr.msra.gmra.mxu0 %v10400_v62  ;;  %3640 = vmatmul.bf16.vlgmr.msrb.gmra.mxu2 %v10400_v62 }
 0x3c2   :  { %v3396_v23 = vpop.f32.mrf.mxu1  ;;  %v3445_v4 = vpop.f32.mrf.mxu2 }
 0x3c3   :  { %v3397_v57 = vadd.f32 %v3396_v23, %v3348_v7  ;;  %v3446_v63 = vadd.f32 %v3445_v4, %v10530_v47 }
 0x3c4   :  { %v3349_v2 = vpop.f32.mrf.mxu0 }
 0x3c5   :  { %v8273_v33 = vmul.f32 -1.442695, %v3397_v57  ;;  %3591 = vmatmul.bf16.vlgmr.msra.gmra.mxu1 %v10407_v53  ;;  %3689 = vmatmul.bf16.vlgmr.msrb.gmra.mxu3 %v10407_v53  ;;  %v3350_v46 = vadd.f32 %v3349_v2, %v10525_v9 }
 0x3c7   :  { %8706 = vpow2.f32 %v8273_v33 }
 0x3c8   :  { %v3494_v43 = vpop.f32.mrf.mxu3 }
 0x3c9   :  { %v3495_v16 = vadd.f32 %v3494_v43, %v3446_v63 }
 0x3ca   :  { %v3398_v27 = vpop.f32.mrf.mxu1  ;;  %v3447_v48 = vpop.f32.mrf.mxu2 }
 0x3cb   :  { %v8274_v40 = vmul.f32 -1.442695, %v3495_v16  ;;  %v3399_v32 = vadd.f32 %v3398_v27, %v3350_v46  ;;  %v3448_v38 = vadd.f32 %v3447_v48, %v10530_v47 }
 0x3cc   :  { %v3352_v31 = vpop.f32.mrf.mxu0 }
 0x3cd   :  { %v8707_v34 = vpop.eup %8706  ;;  %8708 = vpow2.f32 %v8274_v40  ;;  %v8282_v3 = vmul.f32 -1.442695, %v3399_v32  ;;  %v3353_v0 = vadd.f32 %v3352_v31, %v10525_v9 }
 0x3ce   :  { %v10536_v18 = vadd.f32 1.0, %v8707_v34 }
 0x3cf   :  { %8710 = vpow2.f32 %v8282_v3  ;;  %3547 = vmatmul.bf16.gmra.mxu0 %v10416_v45  ;;  %3645 = vmatmul.bf16.gmra.mxu2 %v10416_v45 }
 0x3d0   :  { %8712 = vrcp.f32 %v10536_v18  ;;  %v3496_v13 = vpop.f32.mrf.mxu3  ;;  %v4805_v35 = vand.u32 2147483647, %v10536_v18  ;;  %v4807_v19 = vand.u32 2147483648, %v10536_v18  ;;  %vm4801_vm2 = vweird.f32 %v10536_v18 }
 0x3d1   :  { %v3497_v37 = vadd.f32 %v3496_v13, %v3448_v38 }
 0x3d2   :  { %v3401_v14 = vpop.f32.mrf.mxu1  ;;  %v3450_v60 = vpop.f32.mrf.mxu2  ;;  %vm10568_vm4 = vcmp.eq.f32.partialorder %v4805_v35, 8.507059e+37  ;;  %v4808_v3 = vor.u32 1.1754944e-38, %v4807_v19 }
 0x3d3   :  { %v8709_v28 = vpop.eup %8708  ;;  %v8283_v42 = vmul.f32 -1.442695, %v3497_v37  ;;  %v3402_v44 = vadd.f32 %v3401_v14, %v3353_v0  ;;  %v3451_v21 = vadd.f32 %v3450_v60, %v10530_v47 }
 0x3d4   :  { %v10543_v6 = vadd.f32 1.0, %v8709_v28  ;;  %v3354_v52 = vpop.f32.mrf.mxu0 }
 0x3d5   :  { %v8711_v51 = vpop.eup %8710  ;;  %8714 = vpow2.f32 %v8283_v42  ;;  %v8291_v49 = vmul.f32 -1.442695, %v3402_v44  ;;  %3596 = vmatmul.bf16.gmra.mxu1 %v10423_v41  ;;  %3694 = vmatmul.bf16.gmra.mxu3 %v10423_v41  ;;  %v3355_v7 = vadd.f32 %v3354_v52, %v10525_v9 }
 0x3d6   :  { %v10547_v25 = vpop.eup %8712  ;;  %8716 = vrcp.f32 %v10543_v6  ;;  %v10552_v22 = vadd.f32 1.0, %v8711_v51  ;;  %v4820_v43 = vand.u32 2147483647, %v10543_v6  ;;  %v4822_v46 = vand.u32 2147483648, %v10543_v6 }
 0x3d7   :  { %v4797_v8 = vmul.f32 %v10547_v25, %v10536_v18  ;;  %8718 = vpow2.f32 %v8291_v49  ;;  %vm4802_vm3 = vweird.f32 %v10547_v25  ;;  %vm4816_vm5 = vweird.f32 %v10543_v6 }
 0x3d8   :  { %v3499_v58 = vpop.f32.mrf.mxu3  ;;  %8720 = vrcp.f32 %v10552_v22  ;;  %vm10580_vm6 = vmor %vm4801_vm2, %vm4802_vm3  ;;  %vm10584_vm7 = vcmp.eq.f32.partialorder %v4820_v43, 8.507059e+37  ;;  %v4823_v50 = vor.u32 1.1754944e-38, %v4822_v46  ;;  %vm4936_vm9 = vweird.f32 %v10552_v22  ;;  %v7895_v43 = vld [vmem:[#allocation10 + $0x178] sm:$0xf] }
 0x3d9   :  { %v4798_v12 = vsub.f32 1.0, %v4797_v8  ;;  %v3500_v23 = vadd.f32 %v3499_v58, %v3451_v21  ;;  %v4940_v42 = vand.u32 2147483647, %v10552_v22  ;;  %v4942_v51 = vand.u32 2147483648, %v10552_v22 }
 0x3da   :  { %v3403_v4 = vpop.f32.mrf.mxu1  ;;  %v3452_v59 = vpop.f32.mrf.mxu2 }
 0x3db   :  { %v8715_v57 = vpop.eup %8714  ;;  %v4799_v2 = vmul.f32 %v10547_v25, %v4798_v12  ;;  %v3404_v33 = vadd.f32 %v3403_v4, %v3355_v7  ;;  %v8292_v27 = vmul.f32 -1.442695, %v3500_v23  ;;  %v3453_v14 = vadd.f32 %v3452_v59, %v10530_v47 }
 0x3dc   :  { %v8717_v63 = vpop.eup %8716  ;;  %v10562_v16 = vadd.f32 1.0, %v8715_v57  ;;  %v3357_v48 = vpop.f32.mrf.mxu0  ;;  %vm10622_vm12 = vcmp.eq.f32.partialorder %v4940_v42, 8.507059e+37  ;;  %v4943_v34 = vor.u32 1.1754944e-38, %v4942_v51 }
 0x3dd   :  { %v8719_v40 = vpop.eup %8718  ;;  %v4800_v32 = vadd.f32 %v10547_v25, %v4799_v2  ;;  %v4812_v31 = vmul.f32 %v8717_v63, %v10543_v6  ;;  %v8300_v38 = vmul.f32 -1.442695, %v3404_v33  ;;  %vm4817_vm8 = vweird.f32 %v8717_v63 }
 0x3de   :  { %8722 = vrcp.f32 %v10562_v16  ;;  %v10573_v13 = vpop.eup %8720  ;;  %v10576_v37 = vadd.f32 1.0, %v8719_v40  ;;  %v4955_v49 = vand.u32 2147483647, %v10562_v16  ;;  %vm4818_vm10 = vmor %vm4816_vm5, %vm4817_vm8  ;;  %v4957_v12 = vand.u32 2147483648, %v10562_v16 }
 0x3df   :  { %v4813_v0 = vsub.f32 1.0, %v4812_v31  ;;  %8724 = vpow2.f32 %v8292_v27  ;;  %3552 = vmatmul.bf16.gmra.mxu0 %v10432_v15  ;;  %3650 = vmatmul.bf16.gmra.mxu2 %v10432_v15  ;;  %v4932_v5 = vmul.f32 %v10573_v13, %v10552_v22  ;;  %v4804_v36 = vsel %vm10580_vm6, %v10547_v25, %v4800_v32 }
 0x3e0   :  { %v3501_v60 = vpop.f32.mrf.mxu3  ;;  %8726 = vrcp.f32 %v10576_v37  ;;  %v4809_v25 = vsel %vm10568_vm4, %v4808_v3, %v4804_v36  ;;  %v3358_v7 = vadd.f32 %v3357_v48, %v10525_v9  ;;  %vm4937_vm11 = vweird.f32 %v10573_v13 }
 0x3e1   :  { %v4814_v20 = vmul.f32 %v8717_v63, %v4813_v0  ;;  %v4933_v28 = vsub.f32 1.0, %v4932_v5  ;;  %8728 = vpow2.f32 %v8300_v38  ;;  %v3502_v8 = vadd.f32 %v3501_v60, %v3453_v14  ;;  %v8183_v38 = vld [vmem:[#allocation10 + $0x3b8] sm:$0xf]  ;;  %v8672_v0 = vld [vmem:[#allocation10 + $0x3d8] sm:$0xf0]  ;;  %vm10640_vm0 = vmor %vm4936_vm9, %vm4937_vm11 }
 0x3e2   :  { %v3406_v44 = vpop.f32.mrf.mxu1  ;;  %v3455_v29 = vpop.f32.mrf.mxu2  ;;  %vm4951_vm13 = vweird.f32 %v10562_v16  ;;  %vm10632_vm15 = vcmp.eq.f32.partialorder %v4955_v49, 8.507059e+37  ;;  %v5075_v60 = vand.u32 2147483647, %v10576_v37  ;;  %v4958_v51 = vor.u32 1.1754944e-38, %v4957_v12 }
 0x3e3   :  { %v4815_v52 = vadd.f32 %v8717_v63, %v4814_v20  ;;  %v4934_v58 = vmul.f32 %v10573_v13, %v4933_v28  ;;  %v8301_v59 = vmul.f32 -1.442695, %v3502_v8  ;;  %v3407_v33 = vadd.f32 %v3406_v44, %v3358_v7 }
 0x3e4   :  { %v10599_v21 = vpop.eup %8722  ;;  %v10608_v35 = vpop.f32.mrf.mxu0  ;;  %v8184_v22 = vor.u32 %v8672_v0, %v8183_v38  ;;  %v5077_v8 = vand.u32 2147483648, %v10576_v37  ;;  %vm5071_vm2 = vweird.f32 %v10576_v37  ;;  %vm10664_vm3 = vcmp.eq.f32.partialorder %v5075_v60, 8.507059e+37 }
 0x3e5   :  { %v8725_v19 = vpop.eup %8724  ;;  %v4819_v23 = vsel %vm4818_vm10, %v8717_v63, %v4815_v52  ;;  %v4947_v4 = vmul.f32 %v10599_v21, %v10562_v16  ;;  %3601 = vmatmul.bf16.gmra.mxu1 %v10439_v39  ;;  %3699 = vmatmul.bf16.gmra.mxu3 %v10439_v39  ;;  %v4935_v57 = vadd.f32 %v10573_v13, %v4934_v58  ;;  %v8600_v63 = vld [vmem:[#allocation10 + $0x198] sm:$0xf0]  ;;  %8730 = vpow2.f32 %v8301_v59 }
 0x3e6   :  { %v4824_v6 = vsel %vm10584_vm7, %v4823_v50, %v4819_v23  ;;  %v10618_v2 = vadd.f32 1.0, %v8725_v19  ;;  %v10620_v46 = vpop.eup %8726  ;;  %v7896_v40 = vor.u32 %v8600_v63, %v7895_v43  ;;  %vm4952_vm14 = vweird.f32 %v10599_v21  ;;  %3781 = vmatpush.bf16.msrb.mxu1 %v8184_v22 }
 0x3e7   :  { %v6956_v27 = vpack.c.bf16 %v4824_v6, %v4809_v25  ;;  %v4948_v48 = vsub.f32 1.0, %v4947_v4  ;;  %v8729_v32 = vpop.eup %8728  ;;  %v5067_v3 = vmul.f32 %v10620_v46, %v10576_v37  ;;  %v8309_v20 = vmul.f32 -1.442695, %v3407_v33  ;;  %vm4953_vm1 = vmor %vm4951_vm13, %vm4952_vm14  ;;  %v8591_v4 = vld [vmem:[#allocation10 + $0x150] sm:$0xf0] }
 0x3e8   :  { %8732 = vrcp.f32 %v10618_v2  ;;  %v3504_v18 = vpop.f32.mrf.mxu3  ;;  %3732 = vmatpush.bf16.msrb.mxu0 %v7896_v40  ;;  %v10645_v36 = vadd.f32 1.0, %v8729_v32  ;;  %v4939_v44 = vsel %vm10640_vm0, %v10573_v13, %v4935_v57  ;;  %v3456_v25 = vadd.f32 %v3455_v29, %v10530_v47 }
 0x3e9   :  { %7036 = vst [vmem:[#allocation11] sm:$0xff] %v6956_v27  ;;  %v4949_v61 = vmul.f32 %v10599_v21, %v4948_v48  ;;  %v5068_v14 = vsub.f32 1.0, %v5067_v3  ;;  %v5090_v13 = vand.u32 2147483647, %v10618_v2  ;;  %v4944_v12 = vsel %vm10622_vm12, %v4943_v34, %v4939_v44 }
 0x3ea   :  { %v3408_v28 = vpop.f32.mrf.mxu1  ;;  %v3457_v42 = vpop.f32.mrf.mxu2  ;;  %8734 = vrcp.f32 %v10645_v36  ;;  %vm5072_vm4 = vweird.f32 %v10620_v46  ;;  %v5078_v33 = vor.u32 1.1754944e-38, %v5077_v8  ;;  %vm5086_vm5 = vweird.f32 %v10618_v2 }
 0x3eb   :  { %v4950_v52 = vadd.f32 %v10599_v21, %v4949_v61  ;;  %v5069_v49 = vmul.f32 %v10620_v46, %v5068_v14  ;;  %v8731_v7 = vpop.eup %8730  ;;  %8736 = vpow2.f32 %v8309_v20  ;;  %v3360_v43 = vadd.f32 %v10608_v35, %v10525_v9  ;;  %vm10691_vm7 = vmor %vm5071_vm2, %vm5072_vm4 }
 0x3ec   :  { %v3362_v58 = vpop.f32.mrf.mxu0  ;;  %v10668_v29 = vadd.f32 1.0, %v8731_v7  ;;  %vm10679_vm6 = vcmp.eq.f32.partialorder %v5090_v13, 8.507059e+37  ;;  %v5092_v40 = vand.u32 2147483648, %v10618_v2  ;;  %v5210_v32 = vand.u32 2147483647, %v10645_v36 }
 0x3ed   :  { %v4954_v19 = vsel %vm4953_vm1, %v10599_v21, %v4950_v52  ;;  %v3505_v21 = vadd.f32 %v3504_v18, %v3456_v25  ;;  %v5070_v6 = vadd.f32 %v10620_v46, %v5069_v49  ;;  %v5212_v35 = vand.u32 2147483648, %v10645_v36 }
 0x3ee   :  { %v8733_v16 = vpop.eup %8732  ;;  %v4959_v23 = vsel %vm10632_vm15, %v4958_v51, %v4954_v19  ;;  %8738 = vrcp.f32 %v10668_v29  ;;  %v3409_v38 = vadd.f32 %v3408_v28, %v3360_v43  ;;  %v3458_v14 = vadd.f32 %v3457_v42, %v10530_v47 }
 0x3ef   :  { %v6961_v59 = vpack.c.bf16 %v4959_v23, %v4944_v12  ;;  %v5082_v57 = vmul.f32 %v8733_v16, %v10618_v2  ;;  %3557 = vmatmul.bf16.gmra.mxu0 %v10448_v1  ;;  %3655 = vmatmul.bf16.gmra.mxu2 %v10448_v1  ;;  %vm5087_vm8 = vweird.f32 %v8733_v16  ;;  %v8310_v3 = vmul.f32 -1.442695, %v3505_v21  ;;  %v7859_v23 = vld [vmem:[#allocation10 + $0x130] sm:$0xf] }
 0x3f0   :  { %v3506_v63 = vpop.f32.mrf.mxu3  ;;  %v10685_v31 = vpop.eup %8734  ;;  %v5074_v50 = vsel %vm10691_vm7, %v10620_v46, %v5070_v6  ;;  %v8318_v20 = vmul.f32 -1.442695, %v3409_v38  ;;  %v3363_v44 = vadd.f32 %v3362_v58, %v10525_v9  ;;  %v5093_v51 = vor.u32 1.1754944e-38, %v5092_v40  ;;  %vm5088_vm9 = vmor %vm5086_vm5, %vm5087_vm8 }
 0x3f1   :  { %7041 = vst [vmem:[#allocation11 + $0x24] sm:$0xff] %v6961_v59  ;;  %v5083_v27 = vsub.f32 1.0, %v5082_v57  ;;  %v8737_v61 = vpop.eup %8736  ;;  %v5202_v37 = vmul.f32 %v10685_v31, %v10645_v36  ;;  %8740 = vpow2.f32 %v8310_v3  ;;  %v3507_v49 = vadd.f32 %v3506_v63, %v3458_v14 }
 0x3f2   :  { %v3411_v0 = vpop.f32.mrf.mxu1  ;;  %v3460_v18 = vpop.f32.mrf.mxu2  ;;  %v10702_v60 = vadd.f32 1.0, %v8737_v61  ;;  %vm5206_vm10 = vweird.f32 %v10645_v36  ;;  %v5213_v42 = vor.u32 1.1754944e-38, %v5212_v35  ;;  %v5079_v25 = vsel %vm10664_vm3, %v5078_v33, %v5074_v50  ;;  %v8147_v33 = vld [vmem:[#allocation10 + $0x370] sm:$0xf] }
 0x3f3   :  { %v5084_v5 = vmul.f32 %v8733_v16, %v5083_v27  ;;  %v5203_v22 = vsub.f32 1.0, %v5202_v37  ;;  %v3412_v8 = vadd.f32 %v3411_v0, %v3363_v44  ;;  %vm10719_vm11 = vcmp.eq.f32.partialorder %v5210_v32, 8.507059e+37  ;;  %v8663_v32 = vld [vmem:[#allocation10 + $0x390] sm:$0xf0] }
 0x3f4   :  { %v10705_v28 = vpop.f32.mrf.mxu0  ;;  %v10709_v46 = vpop.eup %8738  ;;  %8742 = vrcp.f32 %v10702_v60  ;;  %vm5207_vm12 = vweird.f32 %v10685_v31  ;;  %v5225_v12 = vand.u32 2147483647, %v10668_v29  ;;  %v8319_v57 = vmul.f32 -1.442695, %v3507_v49 }
 0x3f5   :  { %v5085_v52 = vadd.f32 %v8733_v16, %v5084_v5  ;;  %3606 = vmatmul.bf16.gmra.mxu1 %v10455_v24  ;;  %3704 = vmatmul.bf16.gmra.mxu3 %v10455_v24  ;;  %v5204_v7 = vmul.f32 %v10685_v31, %v5203_v22  ;;  %v5217_v2 = vmul.f32 %v10709_v46, %v10668_v29  ;;  %8744 = vpow2.f32 %v8318_v20  ;;  %vm10744_vm14 = vmor %vm5206_vm10, %vm5207_vm12 }
 0x3f6   :  { %v5227_v63 = vand.u32 2147483648, %v10668_v29  ;;  %v8327_v27 = vmul.f32 -1.442695, %v3412_v8  ;;  %v3461_v48 = vadd.f32 %v3460_v18, %v10530_v47  ;;  %v7860_v40 = vor.u32 %v8591_v4, %v7859_v23 }
 0x3f7   :  { %v5089_v58 = vsel %vm5088_vm9, %v8733_v16, %v5085_v52  ;;  %v5205_v59 = vadd.f32 %v10685_v31, %v5204_v7  ;;  %v5218_v6 = vsub.f32 1.0, %v5217_v2  ;;  %v8741_v43 = vpop.eup %8740  ;;  %vm5222_vm13 = vweird.f32 %v10709_v46 }
 0x3f8   :  { %v5094_v13 = vsel %vm10679_vm6, %v5093_v51, %v5089_v58  ;;  %v3509_v16 = vpop.f32.mrf.mxu3  ;;  %v10736_v38 = vadd.f32 1.0, %v8741_v43  ;;  %8746 = vpow2.f32 %v8319_v57  ;;  %vm5221_vm15 = vweird.f32 %v10668_v29  ;;  %3733 = vmatpush.bf16.msrb.mxu0 %v7860_v40 }
 0x3f9   :  { %v6966_v21 = vpack.c.bf16 %v5094_v13, %v5079_v25  ;;  %v5219_v3 = vmul.f32 %v10709_v46, %v5218_v6  ;;  %8748 = vpow2.f32 %v8327_v27  ;;  %v8148_v61 = vor.u32 %v8663_v32, %v8147_v33  ;;  %vm5223_vm0 = vmor %vm5221_vm15, %vm5222_vm13 }
 0x3fa   :  { %v3413_v34 = vpop.f32.mrf.mxu1  ;;  %v10732_v35 = vpop.f32.mrf.mxu2  ;;  %v3510_v50 = vadd.f32 %v3509_v16, %v3461_v48  ;;  %v5209_v37 = vsel %vm10744_vm14, %v10685_v31, %v5205_v59  ;;  %8750 = vrcp.f32 %v10736_v38  ;;  %vm5226_vm1 = vcmp.eq.f32.partialorder %v5225_v12, 8.507059e+37 }
 0x3fb   :  { %7046 = vst [vmem:[#allocation11 + $0x48] sm:$0xff] %v6966_v21  ;;  %v10738_v0 = vpop.eup %8742  ;;  %v5220_v14 = vadd.f32 %v10709_v46, %v5219_v3  ;;  %v5228_v29 = vor.u32 1.1754944e-38, %v5227_v63  ;;  %v5345_v44 = vand.u32 2147483647, %v10702_v60  ;;  %3782 = vmatpush.bf16.msrb.mxu1 %v8148_v61  ;;  %v3365_v49 = vadd.f32 %v10705_v28, %v10525_v9 }
 0x3fc   :  { %v10749_v5 = vpop.f32.mrf.mxu0  ;;  %v5337_v36 = vmul.f32 %v10738_v0, %v10702_v60  ;;  %v8745_v20 = vpop.eup %8744  ;;  %v8328_v52 = vmul.f32 -1.442695, %v3510_v50  ;;  %v5214_v8 = vsel %vm10719_vm11, %v5213_v42, %v5209_v37  ;;  %v5347_v58 = vand.u32 2147483648, %v10702_v60 }
 0x3fd   :  { %v5224_v51 = vsel %vm5223_vm0, %v10709_v46, %v5220_v14  ;;  %v10762_v22 = vadd.f32 1.0, %v8745_v20  ;;  %v3414_v12 = vadd.f32 %v3413_v34, %v3365_v49  ;;  %v5360_v23 = vand.u32 2147483647, %v10736_v38 }
 0x3fe   :  { %v5338_v31 = vsub.f32 1.0, %v5337_v36  ;;  %v5229_v25 = vsel %vm5226_vm1, %v5228_v29, %v5224_v51  ;;  %8752 = vpow2.f32 %v8328_v52  ;;  %v8747_v2 = vpop.eup %8746  ;;  %vm5342_vm2 = vweird.f32 %v10738_v0 }
 0x3ff   :  { %3562 = vmatmul.bf16.gmra.mxu0 %v10464_v30  ;;  %3660 = vmatmul.bf16.gmra.mxu2 %v10464_v30  ;;  %v6971_v46 = vpack.c.bf16 %v5229_v25, %v5214_v8  ;;  %8754 = vrcp.f32 %v10762_v22  ;;  %v8749_v28 = vpop.eup %8748  ;;  %v10774_v4 = vadd.f32 1.0, %v8747_v2  ;;  %v5362_v59 = vand.u32 2147483648, %v10736_v38 }
 0x400   :  { %v3511_v7 = vpop.f32.mrf.mxu3  ;;  %v5339_v13 = vmul.f32 %v10738_v0, %v5338_v31  ;;  %v8751_v42 = vpop.eup %8750  ;;  %v10781_v6 = vadd.f32 1.0, %v8749_v28  ;;  %vm5341_vm3 = vweird.f32 %v10702_v60  ;;  %vm10784_vm4 = vcmp.eq.f32.partialorder %v5345_v44, 8.507059e+37 }
 0x401   :  { %7051 = vst [vmem:[#allocation11 + $0x6c] sm:$0xff] %v6971_v46  ;;  %v5352_v33 = vmul.f32 %v8751_v42, %v10736_v38  ;;  %v5348_v63 = vor.u32 1.1754944e-38, %v5347_v58  ;;  %v5482_v27 = vand.u32 2147483648, %v10762_v22  ;;  %8756 = vrcp.f32 %v10774_v4  ;;  %vm10795_vm5 = vmor %vm5341_vm3, %vm5342_vm2 }
 0x402   :  { %v3416_v16 = vpop.f32.mrf.mxu1  ;;  %v10776_v19 = vpop.f32.mrf.mxu2  ;;  %v5340_v21 = vadd.f32 %v10738_v0, %v5339_v13  ;;  %v8336_v48 = vmul.f32 -1.442695, %v3414_v12  ;;  %vm5356_vm6 = vweird.f32 %v10736_v38  ;;  %vm10800_vm7 = vcmp.eq.f32.partialorder %v5360_v23, 8.507059e+37 }
 0x403   :  { %v5353_v32 = vsub.f32 1.0, %v5352_v33  ;;  %8758 = vrcp.f32 %v10781_v6  ;;  %v5363_v61 = vor.u32 1.1754944e-38, %v5362_v59  ;;  %v5480_v50 = vand.u32 2147483647, %v10762_v22  ;;  %v7823_v33 = vld [vmem:[#allocation10 + $0xe8] sm:$0xf] }
 0x404   :  { %v10789_v43 = vpop.f32.mrf.mxu0  ;;  %v8753_v40 = vpop.eup %8752  ;;  %v5344_v18 = vsel %vm10795_vm5, %v10738_v0, %v5340_v21  ;;  %v3463_v37 = vadd.f32 %v10732_v35, %v10530_v47  ;;  %vm5357_vm8 = vweird.f32 %v8751_v42  ;;  %vm5476_vm9 = vweird.f32 %v10762_v22 }
 0x405   :  { %3611 = vmatmul.bf16.gmra.mxu1 %v10471_v11  ;;  %3709 = vmatmul.bf16.gmra.mxu3 %v10471_v11  ;;  %v10805_v3 = vpop.eup %8754  ;;  %v5354_v14 = vmul.f32 %v8751_v42, %v5353_v32  ;;  %v3368_v20 = vadd.f32 %v10749_v5, %v10525_v9  ;;  %v10820_v44 = vor.u32 1.1754944e-38, %v5482_v27  ;;  %v5495_v0 = vand.u32 2147483647, %v10774_v4  ;;  %vm5358_vm11 = vmor %vm5356_vm6, %vm5357_vm8 }
 0x406   :  { %v5472_v36 = vmul.f32 %v10805_v3, %v10762_v22  ;;  %v10823_v52 = vadd.f32 1.0, %v8753_v40  ;;  %8760 = vpow2.f32 %v8336_v48  ;;  %v5349_v35 = vsel %vm10784_vm4, %v5348_v63, %v5344_v18  ;;  %v8582_v63 = vld [vmem:[#allocation10 + $0x108] sm:$0xf0] }
 0x407   :  { %v5355_v51 = vadd.f32 %v8751_v42, %v5354_v14  ;;  %vm5491_vm10 = vweird.f32 %v10774_v4  ;;  %v10832_v5 = vpop.eup %8756  ;;  %v5497_v25 = vand.u32 2147483648, %v10774_v4  ;;  %v5615_v58 = vand.u32 2147483647, %v10781_v6 }
 0x408   :  { %v10818_v29 = vpop.f32.mrf.mxu3  ;;  %v5473_v31 = vsub.f32 1.0, %v5472_v36  ;;  %8762 = vrcp.f32 %v10823_v52  ;;  %v3512_v2 = vadd.f32 %v3511_v7, %v3463_v37  ;;  %vm10843_vm12 = vcmp.eq.f32.partialorder %v5480_v50, 8.507059e+37 }
 0x409   :  { %v10840_v46 = vpop.eup %8758  ;;  %v5359_v13 = vsel %vm5358_vm11, %v8751_v42, %v5355_v51  ;;  %v5487_v38 = vmul.f32 %v10832_v5, %v10774_v4  ;;  %v3417_v23 = vadd.f32 %v3416_v16, %v3368_v20  ;;  %vm10853_vm13 = vcmp.eq.f32.partialorder %v5495_v0, 8.507059e+37  ;;  %v8111_v51 = vld [vmem:[#allocation10 + $0x328] sm:$0xf] }
 0x40a   :  { %v10828_v49 = vpop.f32.mrf.mxu1  ;;  %v10830_v8 = vpop.f32.mrf.mxu2  ;;  %v5474_v12 = vmul.f32 %v10805_v3, %v5473_v31  ;;  %v5364_v59 = vsel %vm10800_vm7, %v5363_v61, %v5359_v13  ;;  %v5607_v42 = vmul.f32 %v10840_v46, %v10781_v6  ;;  %v5617_v57 = vand.u32 2147483648, %v10781_v6  ;;  %v8654_v31 = vld [vmem:[#allocation10 + $0x348] sm:$0xf0] }
 0x40b   :  { %v6976_v27 = vpack.c.bf16 %v5364_v59, %v5349_v35  ;;  %vm5477_vm14 = vweird.f32 %v10805_v3  ;;  %v5488_v16 = vsub.f32 1.0, %v5487_v38  ;;  %vm5492_vm15 = vweird.f32 %v10832_v5 }
 0x40c   :  { %v10849_v21 = vpop.f32.mrf.mxu0  ;;  %v5475_v48 = vadd.f32 %v10805_v3, %v5474_v12  ;;  %v8761_v40 = vpop.eup %8760  ;;  %v5608_v60 = vsub.f32 1.0, %v5607_v42  ;;  %vm5611_vm0 = vweird.f32 %v10781_v6  ;;  %v8337_v32 = vmul.f32 -1.442695, %v3512_v2  ;;  %vm10875_vm1 = vmor %vm5476_vm9, %vm5477_vm14 }
 0x40d   :  { %7056 = vst [vmem:[#allocation11 + $0x90] sm:$0xff] %v6976_v27  ;;  %v5489_v34 = vmul.f32 %v10832_v5, %v5488_v16  ;;  %v10867_v18 = vadd.f32 1.0, %v8761_v40  ;;  %v8345_v61 = vmul.f32 -1.442695, %v3417_v23  ;;  %v7824_v50 = vor.u32 %v8582_v63, %v7823_v33  ;;  %vm5493_vm3 = vmor %vm5491_vm10, %vm5492_vm15 }
 0x40e   :  { %v10869_v14 = vpop.eup %8762  ;;  %v5498_v20 = vor.u32 1.1754944e-38, %v5497_v25  ;;  %v5609_v0 = vmul.f32 %v10840_v46, %v5608_v60  ;;  %v5618_v35 = vor.u32 1.1754944e-38, %v5617_v57  ;;  %8764 = vpow2.f32 %v8337_v32 }
 0x40f   :  { %3567 = vmatmul.bf16.gmra.mxu0 %v10480_v55  ;;  %3665 = vmatmul.bf16.gmra.mxu2 %v10480_v55  ;;  %v5479_v2 = vsel %vm10875_vm1, %v10805_v3, %v5475_v48  ;;  %v5490_v13 = vadd.f32 %v10832_v5, %v5489_v34  ;;  %vm10884_vm2 = vcmp.eq.f32.partialorder %v5615_v58, 8.507059e+37  ;;  %v5622_v22 = vmul.f32 %v10869_v14, %v10823_v52 }
 0x410   :  { %v3516_v37 = vpop.f32.mrf.mxu3  ;;  %8766 = vrcp.f32 %v10867_v18  ;;  %3734 = vmatpush.bf16.msrb.mxu0 %v7824_v50  ;;  %v5610_v3 = vadd.f32 %v10840_v46, %v5609_v0  ;;  %vm5612_vm4 = vweird.f32 %v10840_v46  ;;  %v5630_v58 = vand.u32 2147483647, %v10823_v52 }
 0x411   :  { %v3466_v23 = vadd.f32 %v10776_v19, %v10530_v47  ;;  %v5494_v59 = vsel %vm5493_vm3, %v10832_v5, %v5490_v13  ;;  %v5623_v42 = vsub.f32 1.0, %v5622_v22  ;;  %8768 = vpow2.f32 %v8345_v61  ;;  %vm10920_vm6 = vmor %vm5611_vm0, %vm5612_vm4 }
 0x412   :  { %v10891_v25 = vpop.f32.mrf.mxu1  ;;  %v3470_v38 = vpop.f32.mrf.mxu2  ;;  %v8112_v57 = vor.u32 %v8654_v31, %v8111_v51  ;;  %v5484_v4 = vsel %vm10843_vm12, %v10820_v44, %v5479_v2  ;;  %v5499_v63 = vsel %vm10853_vm13, %v5498_v20, %v5494_v59  ;;  %v5632_v27 = vand.u32 2147483648, %v10823_v52 }
 0x413   :  { %v3370_v48 = vadd.f32 %v10789_v43, %v10525_v9  ;;  %v6981_v19 = vpack.c.bf16 %v5499_v63, %v5484_v4  ;;  %v5624_v5 = vmul.f32 %v10869_v14, %v5623_v42  ;;  %vm5627_vm5 = vweird.f32 %v10869_v14  ;;  %v8573_v4 = vld [vmem:[#allocation10 + $0xc0] sm:$0xf0]  ;;  %v8075_v63 = vld [vmem:[#allocation10 + $0x2e0] sm:$0xf] }
 0x414   :  { %v3374_v33 = vpop.f32.mrf.mxu0  ;;  %3783 = vmatpush.bf16.msrb.mxu1 %v8112_v57  ;;  %v3515_v44 = vadd.f32 %v10818_v29, %v3466_v23  ;;  %v8765_v28 = vpop.eup %8764  ;;  %vm5626_vm7 = vweird.f32 %v10823_v52  ;;  %vm10925_vm8 = vcmp.eq.f32.partialorder %v5630_v58, 8.507059e+37  ;;  %v3468_v29 = vadd.f32 %v10830_v8, %v10530_v47 }
 0x415   :  { %3616 = vmatmul.bf16.gmra.mxu1 %v10487_v17  ;;  %3714 = vmatmul.bf16.gmra.mxu3 %v10487_v17  ;;  %v3419_v16 = vadd.f32 %v10828_v49, %v3370_v48  ;;  %7061 = vst [vmem:[#allocation11 + $0xb4] sm:$0xff] %v6981_v19  ;;  %v5614_v6 = vsel %vm10920_vm6, %v10840_v46, %v5610_v3  ;;  %v10938_v32 = vadd.f32 1.0, %v8765_v28  ;;  %vm5628_vm9 = vmor %vm5626_vm7, %vm5627_vm5  ;;  %v5633_v49 = vor.u32 1.1754944e-38, %v5632_v27 }
 0x416   :  { %v10932_v40 = vpop.eup %8766  ;;  %v5625_v60 = vadd.f32 %v10869_v14, %v5624_v5  ;;  %v8346_v52 = vmul.f32 -1.442695, %v3515_v44  ;;  %v5750_v61 = vand.u32 2147483647, %v10867_v18  ;;  %v3517_v50 = vadd.f32 %v3516_v37, %v3468_v29  ;;  %v8645_v44 = vld [vmem:[#allocation10 + $0x300] sm:$0xf0] }
 0x417   :  { %v5742_v8 = vmul.f32 %v10932_v40, %v10867_v18  ;;  %v8769_v36 = vpop.eup %8768  ;;  %v5752_v46 = vand.u32 2147483648, %v10867_v18  ;;  %8770 = vrcp.f32 %v10938_v32  ;;  %v8354_v0 = vmul.f32 -1.442695, %v3419_v16  ;;  %v8614_v29 = vld [vmem:[#allocation10 + $0x20c] sm:$0xf] }
 0x418   :  { %v3519_v34 = vpop.f32.mrf.mxu3  ;;  %v5629_v20 = vsel %vm5628_vm9, %v10869_v14, %v5625_v60  ;;  %v5619_v2 = vsel %vm10884_vm2, %v5618_v35, %v5614_v6  ;;  %v10954_v3 = vadd.f32 1.0, %v8769_v36  ;;  %8772 = vpow2.f32 %v8346_v52  ;;  %v7969_v6 = vld [vmem:[#allocation10 + $0x22c] sm:$0xf0] }
 0x419   :  { %v5634_v13 = vsel %vm10925_vm8, %v5633_v49, %v5629_v20  ;;  %v5743_v22 = vsub.f32 1.0, %v5742_v8  ;;  %v3373_v14 = vadd.f32 %v10849_v21, %v10525_v9  ;;  %v8355_v58 = vmul.f32 -1.442695, %v3517_v50  ;;  %v7787_v21 = vld [vmem:[#allocation10 + $0xa0] sm:$0xf] }
 0x41a   :  { %v3423_v51 = vpop.f32.mrf.mxu1  ;;  %v10948_v31 = vpop.f32.mrf.mxu2  ;;  %v6986_v37 = vpack.c.bf16 %v5634_v13, %v5619_v2  ;;  %8774 = vrcp.f32 %v10954_v3  ;;  %v3471_v59 = vadd.f32 %v3470_v38, %v10530_v47  ;;  %v3375_v35 = vadd.f32 %v3374_v33, %v10525_v9 }
 0x41b   :  { %v5744_v12 = vmul.f32 %v10932_v40, %v5743_v22  ;;  %v5765_v42 = vand.u32 2147483647, %v10938_v32  ;;  %8776 = vpow2.f32 %v8354_v0  ;;  %v3422_v57 = vadd.f32 %v10891_v25, %v3373_v14 }
 0x41c   :  { %v10958_v23 = vpop.f32.mrf.mxu0  ;;  %7066 = vst [vmem:[#allocation11 + $0xd8] sm:$0xff] %v6986_v37  ;;  %vm5746_vm10 = vweird.f32 %v10867_v18  ;;  %8778 = vpow2.f32 %v8355_v58  ;;  %v3520_v27 = vadd.f32 %v3519_v34, %v3471_v59  ;;  %v3424_v48 = vadd.f32 %v3423_v51, %v3375_v35 }
 0x41d   :  { %v10969_v38 = vpop.eup %8770  ;;  %vm10971_vm11 = vcmp.eq.f32.partialorder %v5750_v61, 8.507059e+37  ;;  %v5753_v19 = vor.u32 1.1754944e-38, %v5752_v46  ;;  %v8363_v25 = vmul.f32 -1.442695, %v3422_v57  ;;  %v7788_v5 = vor.u32 %v8573_v4, %v7787_v21 }
 0x41e   :  { %vm5747_vm12 = vweird.f32 %v10932_v40  ;;  %v5757_v7 = vmul.f32 %v10969_v38, %v10938_v32  ;;  %v5767_v43 = vand.u32 2147483648, %v10938_v32  ;;  %v8076_v16 = vor.u32 %v8645_v44, %v8075_v63  ;;  %v8773_v60 = vpop.eup %8772 }
 0x41f   :  { %3572 = vmatmul.bf16.gmra.mxu0 %v10496_v54  ;;  %3670 = vmatmul.bf16.gmra.mxu2 %v10496_v54  ;;  %v5745_v52 = vadd.f32 %v10932_v40, %v5744_v12  ;;  %vm5761_vm13 = vweird.f32 %v10938_v32  ;;  %vm10983_vm14 = vcmp.eq.f32.partialorder %v5765_v42, 8.507059e+37  ;;  %v8364_v49 = vmul.f32 -1.442695, %v3520_v27  ;;  %vm11004_vm15 = vmor %vm5746_vm10, %vm5747_vm12 }
 0x420   :  { %v10975_v28 = vpop.f32.mrf.mxu3  ;;  %3735 = vmatpush.bf16.msrb.mxu0 %v7788_v5  ;;  %v10991_v50 = vpop.eup %8774  ;;  %v5758_v36 = vsub.f32 1.0, %v5757_v7  ;;  %v10993_v20 = vadd.f32 1.0, %v8773_v60  ;;  %8780 = vpow2.f32 %v8363_v25  ;;  %3784 = vmatpush.bf16.msrb.mxu1 %v8076_v16  ;;  %v8372_v46 = vmul.f32 -1.442695, %v3424_v48 }
 0x421   :  { %v8777_v0 = vpop.eup %8776  ;;  %v5877_v51 = vmul.f32 %v10991_v50, %v10954_v3  ;;  %v5885_v2 = vand.u32 2147483647, %v10954_v3  ;;  %8782 = vpow2.f32 %v8364_v49  ;;  %v7972_v13 = vor.u32 %v8614_v29, %v7969_v6 }
 0x422   :  { %v10987_v8 = vpop.f32.mrf.mxu1  ;;  %v10989_v61 = vpop.f32.mrf.mxu2  ;;  %v5759_v58 = vmul.f32 %v10969_v38, %v5758_v36  ;;  %vm5762_vm0 = vweird.f32 %v10969_v38  ;;  %v5768_v59 = vor.u32 1.1754944e-38, %v5767_v43  ;;  %8784 = vrcp.f32 %v10993_v20 }
 0x423   :  { %v8779_v37 = vpop.eup %8778  ;;  %v5749_v35 = vsel %vm11004_vm15, %v10932_v40, %v5745_v52  ;;  %v5878_v18 = vsub.f32 1.0, %v5877_v51  ;;  %v11016_v12 = vadd.f32 1.0, %v8777_v0  ;;  %3828 = vmatpush.bf16.msra.mxu2 %v7972_v13  ;;  %vm5881_vm1 = vweird.f32 %v10954_v3  ;;  %vm5763_vm2 = vmor %vm5761_vm13, %vm5762_vm0 }
 0x424   :  { %v10998_v22 = vpop.f32.mrf.mxu0  ;;  %v11018_v42 = vadd.f32 1.0, %v8779_v37  ;;  %v5760_v57 = vadd.f32 %v10969_v38, %v5759_v58  ;;  %v5887_v21 = vand.u32 2147483648, %v10954_v3  ;;  %8786 = vpow2.f32 %v8372_v46 }
 0x425   :  { %3621 = vmatmul.bf16.gmra.mxu1 %v10503_v10  ;;  %3719 = vmatmul.bf16.gmra.mxu3 %v10503_v10  ;;  %v5879_v4 = vmul.f32 %v10991_v50, %v5878_v18  ;;  %vm11026_vm3 = vcmp.eq.f32.partialorder %v5885_v2, 8.507059e+37  ;;  %v5900_v63 = vand.u32 2147483647, %v10993_v20  ;;  %8788 = vrcp.f32 %v11016_v12 }
 0x426   :  { %v8781_v48 = vpop.eup %8780  ;;  %v5754_v25 = vsel %vm10971_vm11, %v5753_v19, %v5749_v35  ;;  %v5764_v5 = vsel %vm5763_vm2, %v10969_v38, %v5760_v57  ;;  %v5902_v32 = vand.u32 2147483648, %v10993_v20  ;;  %8790 = vrcp.f32 %v11018_v42 }
 0x427   :  { %v8783_v44 = vpop.eup %8782  ;;  %v5769_v7 = vsel %vm10983_vm14, %v5768_v59, %v5764_v5  ;;  %v5880_v43 = vadd.f32 %v10991_v50, %v5879_v4  ;;  %vm5882_vm4 = vweird.f32 %v10991_v50  ;;  %v3473_v16 = vadd.f32 %v10948_v31, %v10530_v47 }
 0x428   :  { %v11032_v27 = vpop.f32.mrf.mxu3  ;;  %v8785_v38 = vpop.eup %8784  ;;  %v6991_v19 = vpack.c.bf16 %v5769_v7, %v5754_v25  ;;  %v5888_v6 = vor.u32 1.1754944e-38, %v5887_v21  ;;  %vm5896_vm5 = vweird.f32 %v10993_v20  ;;  %v3378_v60 = vadd.f32 %v10958_v23, %v10525_v9  ;;  %vm11066_vm7 = vmor %vm5881_vm1, %vm5882_vm4 }
 0x429   :  { %v5892_v52 = vmul.f32 %v8785_v38, %v10993_v20  ;;  %vm11053_vm6 = vcmp.eq.f32.partialorder %v5900_v63, 8.507059e+37  ;;  %v6020_v31 = vand.u32 2147483647, %v11016_v12  ;;  %v6022_v49 = vand.u32 2147483648, %v11016_v12 }
 0x42a   :  { %v11045_v29 = vpop.f32.mrf.mxu1  ;;  %v11047_v33 = vpop.f32.mrf.mxu2  ;;  %v3522_v36 = vadd.f32 %v10975_v28, %v3473_v16  ;;  %7071 = vst [vmem:[#allocation11 + $0xfc] sm:$0xff] %v6991_v19  ;;  %v5903_v51 = vor.u32 1.1754944e-38, %v5902_v32  ;;  %v6035_v2 = vand.u32 2147483647, %v11018_v42  ;;  %v11071_v13 = vadd.f32 1.0, %v8781_v48 }
 0x42b   :  { %v8787_v0 = vpop.eup %8786  ;;  %v11073_v37 = vadd.f32 1.0, %v8783_v44  ;;  %v5884_v14 = vsel %vm11066_vm7, %v10991_v50, %v5880_v43  ;;  %v5893_v58 = vsub.f32 1.0, %v5892_v52  ;;  %vm6016_vm8 = vweird.f32 %v11016_v12 }
 0x42c   :  { %v11060_v46 = vpop.f32.mrf.mxu0  ;;  %v11075_v28 = vpop.eup %8788  ;;  %v6037_v3 = vand.u32 2147483648, %v11018_v42  ;;  %vm6031_vm9 = vweird.f32 %v11018_v42  ;;  %8792 = vrcp.f32 %v11071_v13  ;;  %v11088_v18 = vadd.f32 1.0, %v8787_v0 }
 0x42d   :  { %v11082_v59 = vpop.eup %8790  ;;  %v6012_v35 = vmul.f32 %v11075_v28, %v11016_v12  ;;  %v5894_v50 = vmul.f32 %v8785_v38, %v5893_v58  ;;  %vm5897_vm10 = vweird.f32 %v8785_v38  ;;  %vm11092_vm11 = vcmp.eq.f32.partialorder %v6020_v31, 8.507059e+37 }
 0x42e   :  { %v6023_v21 = vor.u32 1.1754944e-38, %v6022_v49  ;;  %v6027_v4 = vmul.f32 %v11082_v59, %v11018_v42  ;;  %v5889_v48 = vsel %vm11026_vm3, %v5888_v6, %v5884_v14  ;;  %vm11102_vm12 = vcmp.eq.f32.partialorder %v6035_v2, 8.507059e+37  ;;  %vm5898_vm13 = vmor %vm5896_vm5, %vm5897_vm10 }
 0x42f   :  { %3577 = vmatmul.bf16.gmra.mxu0 %v10512_v26  ;;  %3675 = vmatmul.bf16.gmra.mxu2 %v10512_v26  ;;  %v6013_v25 = vsub.f32 1.0, %v6012_v35  ;;  %8794 = vrcp.f32 %v11073_v37  ;;  %v5895_v32 = vadd.f32 %v8785_v38, %v5894_v50  ;;  %v6038_v7 = vor.u32 1.1754944e-38, %v6037_v3  ;;  %v7751_v35 = vld [vmem:[#allocation10 + $0x58] sm:$0xf] }
 0x430   :  { %v11098_v63 = vpop.f32.mrf.mxu3  ;;  %v6028_v44 = vsub.f32 1.0, %v6027_v4  ;;  %v8373_v43 = vmul.f32 -1.442695, %v3522_v36  ;;  %vm6017_vm14 = vweird.f32 %v11075_v28  ;;  %v6157_v6 = vand.u32 2147483648, %v11071_v13  ;;  %v8668_v4 = vld [vmem:[#allocation10 + $0x3bc] sm:$0xf] }
 0x431   :  { %v6014_v40 = vmul.f32 %v11075_v28, %v6013_v25  ;;  %8796 = vrcp.f32 %v11088_v18  ;;  %v5899_v52 = vsel %vm5898_vm13, %v8785_v38, %v5895_v32  ;;  %vm6032_vm15 = vweird.f32 %v11082_v59  ;;  %vm11136_vm1 = vmor %vm6016_vm8, %vm6017_vm14  ;;  %v8564_v25 = vld [vmem:[#allocation10 + $0x78] sm:$0xf0]  ;;  %v8605_v32 = vld [vmem:[#allocation10 + $0x1c4] sm:$0xf] }
 0x432   :  { %v11107_v16 = vpop.f32.mrf.mxu1  ;;  %v11109_v19 = vpop.f32.mrf.mxu2  ;;  %v6029_v31 = vmul.f32 %v11082_v59, %v6028_v44  ;;  %v6155_v49 = vand.u32 2147483647, %v11071_v13  ;;  %v5904_v20 = vsel %vm11053_vm6, %v5903_v51, %v5899_v52  ;;  %vm6151_vm0 = vweird.f32 %v11071_v13  ;;  %vm11153_vm3 = vmor %vm6031_vm9, %vm6032_vm15  ;;  %v7933_v44 = vld [vmem:[#allocation10 + $0x1e4] sm:$0xf0] }
 0x433   :  { %v11123_v0 = vpop.eup %8792  ;;  %v6015_v23 = vadd.f32 %v11075_v28, %v6014_v40  ;;  %v3427_v2 = vadd.f32 %v10987_v8, %v3378_v60  ;;  %v6996_v38 = vpack.c.bf16 %v5904_v20, %v5889_v48  ;;  %vm6166_vm2 = vweird.f32 %v11073_v37 }
 0x434   :  { %v11121_v36 = vpop.f32.mrf.mxu0  ;;  %v6030_v34 = vadd.f32 %v11082_v59, %v6029_v31  ;;  %v6147_v51 = vmul.f32 %v11123_v0, %v11071_v13  ;;  %v11157_v58 = vor.u32 1.1754944e-38, %v6157_v6  ;;  %v6170_v3 = vand.u32 2147483647, %v11073_v37  ;;  %v8686_v31 = vld [vmem:[#allocation10 + $0x44c] sm:$0xf] }
 0x435   :  { %3626 = vmatmul.bf16.gmra.mxu1 %v10518_v56  ;;  %3724 = vmatmul.bf16.gmra.mxu3 %v10518_v56  ;;  %v11144_v8 = vpop.eup %8794  ;;  %v6019_v60 = vsel %vm11136_vm1, %v11075_v28, %v6015_v23  ;;  %8798 = vpow2.f32 %v8373_v43  ;;  %7076 = vst [vmem:[#allocation11 + $0x120] sm:$0xff] %v6996_v38  ;;  %vm11163_vm4 = vcmp.eq.f32.partialorder %v6155_v49, 8.507059e+37  ;;  %v6172_v48 = vand.u32 2147483648, %v11073_v37  ;;  %v8257_v49 = vld [vmem:[#allocation10 + $0x46c] sm:$0xf0] }
 0x436   :  { %v6034_v50 = vsel %vm11153_vm3, %v11082_v59, %v6030_v34  ;;  %v6148_v28 = vsub.f32 1.0, %v6147_v51  ;;  %v6162_v42 = vmul.f32 %v11144_v8, %v11073_v37  ;;  %v6024_v59 = vsel %vm11092_vm11, %v6023_v21, %v6019_v60  ;;  %v8039_v34 = vld [vmem:[#allocation10 + $0x298] sm:$0xf]  ;;  %v8636_v51 = vld [vmem:[#allocation10 + $0x2b8] sm:$0xf0] }
 0x437   :  { %v11172_v40 = vpop.eup %8796  ;;  %v6039_v6 = vsel %vm11102_vm12, %v6038_v7, %v6034_v50  ;;  %vm6152_vm5 = vweird.f32 %v11123_v0  ;;  %v8381_v52 = vmul.f32 -1.442695, %v3427_v2  ;;  %vm6167_vm6 = vweird.f32 %v11144_v8 }
 0x438   :  { %v11170_v43 = vpop.f32.mrf.mxu3  ;;  %v7001_v20 = vpack.c.bf16 %v6039_v6, %v6024_v59  ;;  %v6149_v23 = vmul.f32 %v11123_v0, %v6148_v28  ;;  %v6163_v38 = vsub.f32 1.0, %v6162_v42  ;;  %v6282_v14 = vmul.f32 %v11172_v40, %v11088_v18  ;;  %v8596_v28 = vld [vmem:[#allocation10 + $0x17c] sm:$0xf]  ;;  %v7897_v42 = vld [vmem:[#allocation10 + $0x19c] sm:$0xf0]  ;;  %vm11199_vm7 = vmor %vm6151_vm0, %vm6152_vm5 }
 0x439   :  { %8800 = vpow2.f32 %v8381_v52  ;;  %v3476_v21 = vadd.f32 %v10989_v61, %v10530_v47  ;;  %v7752_v5 = vor.u32 %v8564_v25, %v7751_v35  ;;  %v3380_v50 = vadd.f32 %v10998_v22, %v10525_v9  ;;  %vm11215_vm8 = vmor %vm6166_vm2, %vm6167_vm6 }
 0x43a   :  { %v11182_v12 = vpop.f32.mrf.mxu1  ;;  %v11184_v57 = vpop.f32.mrf.mxu2  ;;  %7081 = vst [vmem:[#allocation11 + $0x144] sm:$0xff] %v7001_v20  ;;  %v6150_v7 = vadd.f32 %v11123_v0, %v6149_v23  ;;  %v6164_v2 = vmul.f32 %v11144_v8, %v6163_v38  ;;  %v6283_v60 = vsub.f32 1.0, %v6282_v14  ;;  %v7936_v35 = vor.u32 %v8605_v32, %v7933_v44 }
 0x43b   :  { %v8799_v6 = vpop.eup %8798  ;;  %3736 = vmatpush.bf16.msrb.mxu0 %v7752_v5  ;;  %v8040_v25 = vor.u32 %v8636_v51, %v8039_v34  ;;  %v8260_v52 = vor.u32 %v8686_v31, %v8257_v49  ;;  %v3525_v20 = vadd.f32 %v11032_v27, %v3476_v21  ;;  %v6173_v32 = vor.u32 1.1754944e-38, %v6172_v48  ;;  %v8221_v21 = vld [vmem:[#allocation10 + $0x424] sm:$0xf0] }
 0x43c   :  { %v11193_v59 = vpop.f32.mrf.mxu0  ;;  %v6154_v22 = vsel %vm11199_vm7, %v11123_v0, %v6150_v7  ;;  %v6165_v23 = vadd.f32 %v11144_v8, %v6164_v2  ;;  %v6284_v38 = vmul.f32 %v11172_v40, %v6283_v60  ;;  %v11209_v14 = vadd.f32 1.0, %v8799_v6  ;;  %3829 = vmatpush.bf16.msra.mxu2 %v7936_v35  ;;  %v7861_v60 = vld [vmem:[#allocation10 + $0x154] sm:$0xf0]  ;;  %v8578_v35 = vld [vmem:[#allocation10 + $0xec] sm:$0xf] }
 0x43d   :  { %3785 = vmatpush.bf16.msrb.mxu1 %v8040_v25  ;;  %v8382_v27 = vmul.f32 -1.442695, %v3525_v20  ;;  %v7900_v44 = vor.u32 %v8596_v28, %v7897_v42  ;;  %v3429_v0 = vadd.f32 %v11045_v29, %v3380_v50  ;;  %vm6171_vm9 = vcmp.eq.f32.partialorder %v6170_v3, 8.507059e+37  ;;  %3877 = vmatpush.bf16.msra.mxu3 %v8260_v52  ;;  %v8677_v29 = vld [vmem:[#allocation10 + $0x404] sm:$0xf] }
 0x43e   :  { %v6169_v31 = vsel %vm11215_vm8, %v11144_v8, %v6165_v23  ;;  %v6290_v49 = vand.u32 2147483647, %v11088_v18  ;;  %8802 = vrcp.f32 %v11209_v14  ;;  %v6159_v48 = vsel %vm11163_vm4, %v11157_v58, %v6154_v22  ;;  %v8587_v8 = vld [vmem:[#allocation10 + $0x134] sm:$0xf]  ;;  %v8185_v42 = vld [vmem:[#allocation10 + $0x3dc] sm:$0xf0] }
 0x43f   :  { %v8801_v34 = vpop.eup %8800  ;;  %v6174_v51 = vsel %vm6171_vm9, %v6173_v32, %v6169_v31  ;;  %vm6287_vm10 = vweird.f32 %v11172_v40  ;;  %8804 = vpow2.f32 %v8382_v27  ;;  %v6285_v5 = vadd.f32 %v11172_v40, %v6284_v38  ;;  %v7825_v25 = vld [vmem:[#allocation10 + $0x10c] sm:$0xf0] }
 0x440   :  { %v11225_v37 = vpop.f32.mrf.mxu3  ;;  %v7006_v3 = vpack.c.bf16 %v6174_v51, %v6159_v48  ;;  %v11232_v7 = vadd.f32 1.0, %v8801_v34  ;;  %v8390_v2 = vmul.f32 -1.442695, %v3429_v0  ;;  %v6292_v58 = vand.u32 2147483648, %v11088_v18  ;;  %3830 = vmatpush.bf16.msra.mxu2 %v7900_v44  ;;  %v7715_v44 = vld [vmem:[#allocation10 + $0x10] sm:$0xf] }
 0x441   :  { %vm6286_vm11 = vweird.f32 %v11088_v18  ;;  %vm11240_vm12 = vcmp.eq.f32.partialorder %v6290_v49, 8.507059e+37  ;;  %v3478_v61 = vadd.f32 %v11047_v33, %v10530_v47  ;;  %v8224_v18 = vor.u32 %v8677_v29, %v8221_v21  ;;  %v8555_v0 = vld [vmem:[#allocation10 + $0x30] sm:$0xf0]  ;;  %v8149_v29 = vld [vmem:[#allocation10 + $0x394] sm:$0xf0] }
 0x442   :  { %v11234_v50 = vpop.f32.mrf.mxu1  ;;  %v11236_v28 = vpop.f32.mrf.mxu2  ;;  %7086 = vst [vmem:[#allocation11 + $0x168] sm:$0xff] %v7006_v3  ;;  %8806 = vrcp.f32 %v11232_v7  ;;  %vm11251_vm13 = vmor %vm6286_vm11, %vm6287_vm10  ;;  %v3383_v22 = vadd.f32 %v11060_v46, %v10525_v9  ;;  %v7864_v23 = vor.u32 %v8587_v8, %v7861_v60  ;;  %v6305_v13 = vand.u32 2147483647, %v11209_v14  ;;  %v8659_v51 = vld [vmem:[#allocation10 + $0x374] sm:$0xf] }
 0x443   :  { %8808 = vpow2.f32 %v8390_v2  ;;  %v6289_v33 = vsel %vm11251_vm13, %v11172_v40, %v6285_v5  ;;  %v8188_v32 = vor.u32 %v8668_v4, %v8185_v42  ;;  %v3527_v27 = vadd.f32 %v11098_v63, %v3478_v61  ;;  %3878 = vmatpush.bf16.msra.mxu3 %v8224_v18  ;;  %v8569_v8 = vld [vmem:[#allocation10 + $0xa4] sm:$0xf]  ;;  %v7789_v3 = vld [vmem:[#allocation10 + $0xc4] sm:$0xf0]  ;;  %v8003_v4 = vld [vmem:[#allocation10 + $0x250] sm:$0xf] }
 0x444   :  { %v11247_v52 = vpop.f32.mrf.mxu0  ;;  %v11257_v38 = vpop.eup %8802  ;;  %v6293_v49 = vor.u32 1.1754944e-38, %v6292_v58  ;;  %3831 = vmatpush.bf16.msra.mxu2 %v7864_v23  ;;  %v7828_v46 = vor.u32 %v8578_v35, %v7825_v25  ;;  %v3432_v48 = vadd.f32 %v11107_v16, %v3383_v22  ;;  %vm6301_vm14 = vweird.f32 %v11209_v14  ;;  %v8627_v25 = vld [vmem:[#allocation10 + $0x270] sm:$0xf0] }
 0x445   :  { %v8805_v31 = vpop.eup %8804  ;;  %v6297_v34 = vmul.f32 %v11257_v38, %v11209_v14  ;;  %v6307_v40 = vand.u32 2147483648, %v11209_v14  ;;  %v8391_v63 = vmul.f32 -1.442695, %v3527_v27  ;;  %v7716_v16 = vor.u32 %v8555_v0, %v7715_v44  ;;  %v8113_v0 = vld [vmem:[#allocation10 + $0x34c] sm:$0xf0] }
 0x446   :  { %v11269_v21 = vadd.f32 1.0, %v8805_v31  ;;  %v11275_v2 = vsel %vm11240_vm12, %v6293_v49, %v6289_v33  ;;  %v8399_v58 = vmul.f32 -1.442695, %v3432_v48  ;;  %vm6302_vm15 = vweird.f32 %v11257_v38  ;;  %v8650_v33 = vld [vmem:[#allocation10 + $0x32c] sm:$0xf] }
 0x447   :  { %v6298_v60 = vsub.f32 1.0, %v6297_v34  ;;  %vm11280_vm0 = vcmp.eq.f32.partialorder %v6305_v13, 8.507059e+37  ;;  %v6425_v35 = vand.u32 2147483647, %v11232_v7  ;;  %3879 = vmatpush.bf16.msra.mxu3 %v8188_v32  ;;  %v8152_v23 = vor.u32 %v8659_v51, %v8149_v29  ;;  %3737 = vmatpush.bf16.msrb.mxu0 %v7716_v16  ;;  %vm11301_vm1 = vmor %vm6301_vm14, %vm6302_vm15  ;;  %v7753_v16 = vld [vmem:[#allocation10 + $0x7c] sm:$0xf0] }
 0x448   :  { %v11271_v5 = vpop.f32.mrf.mxu3  ;;  %v11277_v42 = vpop.eup %8806  ;;  %8810 = vrcp.f32 %v11269_v21  ;;  %3832 = vmatpush.bf16.msra.mxu2 %v7828_v46  ;;  %v6308_v13 = vor.u32 1.1754944e-38, %v6307_v40  ;;  %v6427_v27 = vand.u32 2147483648, %v11232_v7  ;;  %v7792_v48 = vor.u32 %v8569_v8, %v7789_v3  ;;  %v8641_v32 = vld [vmem:[#allocation10 + $0x2e4] sm:$0xf] }
 0x449   :  { %v8809_v20 = vpop.eup %8808  ;;  %v6299_v18 = vmul.f32 %v11257_v38, %v6298_v60  ;;  %v6417_v22 = vmul.f32 %v11277_v42, %v11232_v7  ;;  %8812 = vpow2.f32 %v8391_v63  ;;  %v8004_v60 = vor.u32 %v8627_v25, %v8003_v4 }
 0x44a   :  { %v11286_v6 = vpop.f32.mrf.mxu1  ;;  %v11292_v44 = vadd.f32 1.0, %v8809_v20  ;;  %8814 = vpow2.f32 %v8399_v58  ;;  %v11294_v31 = vpop.f32.mrf.mxu2  ;;  %vm6421_vm2 = vweird.f32 %v11232_v7  ;;  %v6440_v46 = vand.u32 2147483647, %v11269_v21  ;;  %v8560_v58 = vld [vmem:[#allocation10 + $0x5c] sm:$0xf]  ;;  %3738 = vmatmul.bf16.vlgmr.msrb.gmra.mxu0 %v10400_v62 }
 0x44b   :  { %v6300_v49 = vadd.f32 %v11257_v38, %v6299_v18  ;;  %v6418_v34 = vsub.f32 1.0, %v6417_v22  ;;  %v3481_v51 = vadd.f32 %v11109_v19, %v10530_v47  ;;  %vm11316_vm3 = vcmp.eq.f32.partialorder %v6425_v35, 8.507059e+37  ;;  %3880 = vmatpush.bf16.msra.mxu3 %v8152_v23  ;;  %3786 = vmatpush.bf16.msrb.mxu1 %v8004_v60 }
 0x44c   :  { %8816 = vrcp.f32 %v11292_v44  ;;  %v11310_v29 = vpop.f32.mrf.mxu0  ;;  %v6442_v8 = vand.u32 2147483648, %v11269_v21  ;;  %3833 = vmatpush.bf16.msra.mxu2 %v7792_v48  ;;  %v8116_v3 = vor.u32 %v8650_v33, %v8113_v0  ;;  %v6428_v25 = vor.u32 1.1754944e-38, %v6427_v27 }
 0x44d   :  { %v6304_v40 = vsel %vm11301_vm1, %v11257_v38, %v6300_v49  ;;  %v6419_v14 = vmul.f32 %v11277_v42, %v6418_v34  ;;  %v3385_v38 = vadd.f32 %v11121_v36, %v10525_v9  ;;  %v3530_v35 = vadd.f32 %v11170_v43, %v3481_v51 }
 0x44e   :  { %v11321_v19 = vpop.eup %8810  ;;  %v6309_v4 = vsel %vm11280_vm0, %v6308_v13, %v6304_v40  ;;  %vm6422_vm4 = vweird.f32 %v11277_v42  ;;  %vm6436_vm5 = vweird.f32 %v11269_v21  ;;  %v6562_v9 = vand.u32 2147483648, %v11292_v44  ;;  %3787 = vmatmul.bf16.vlgmr.msrb.gmra.mxu1 %v10407_v53 }
 0x44f   :  { %v8813_v20 = vpop.eup %8812  ;;  %v7011_v18 = vpack.c.bf16 %v6309_v4, %v11275_v2  ;;  %v6420_v22 = vadd.f32 %v11277_v42, %v6419_v14  ;;  %v6432_v61 = vmul.f32 %v11321_v19, %v11269_v21  ;;  %v7756_v43 = vor.u32 %v8560_v58, %v7753_v16  ;;  %3881 = vmatpush.bf16.msra.mxu3 %v8116_v3  ;;  %vm11353_vm7 = vmor %vm6421_vm2, %vm6422_vm4  ;;  %v8551_v3 = vld [vmem:[#allocation10 + $0x14] sm:$0xf]  ;;  %v7717_v58 = vld [vmem:[#allocation10 + $0x34] sm:$0xf0] }
 0x450   :  { %v8815_v23 = vpop.eup %8814  ;;  %v11336_v36 = vadd.f32 1.0, %v8813_v20  ;;  %v11338_v33 = vpop.f32.mrf.mxu3  ;;  %vm11340_vm6 = vcmp.eq.f32.partialorder %v6440_v46, 8.507059e+37  ;;  %v6443_v27 = vor.u32 1.1754944e-38, %v6442_v8  ;;  %v8400_v48 = vmul.f32 -1.442695, %v3530_v35  ;;  %v9282_v46 = vld [vmem:[%s14706_s12] sm:$0xff] }
 0x451   :  { %7091 = vst [vmem:[#allocation11 + $0x18c] sm:$0xff] %v7011_v18  ;;  %v6433_v13 = vsub.f32 1.0, %v6432_v61  ;;  %v11344_v0 = vadd.f32 1.0, %v8815_v23  ;;  %3834 = vmatpush.bf16.msra.mxu2 %v7756_v43  ;;  %v3434_v60 = vadd.f32 %v11182_v12, %v3385_v38  ;;  %v11362_v51 = vperm.slane %v9282_v46, 2  ;;  %v8077_v8 = vld [vmem:[#allocation10 + $0x304] sm:$0xf0] }
 0x452   :  { %v11347_v49 = vpop.eup %8816  ;;  %8818 = vrcp.f32 %v11336_v36  ;;  %v11364_v40 = vpop.f32.mrf.mxu1  ;;  %v6424_v7 = vsel %vm11353_vm7, %v11277_v42, %v6420_v22  ;;  %vm6437_vm8 = vweird.f32 %v11321_v19  ;;  %vm6556_vm9 = vweird.f32 %v11292_v44  ;;  %v8632_v38 = vld [vmem:[#allocation10 + $0x29c] sm:$0xf]  ;;  %v8041_v61 = vld [vmem:[#allocation10 + $0x2bc] sm:$0xf0]  ;;  %v8623_v2 = vld [vmem:[#allocation10 + $0x254] sm:$0xf] }
 0x453   :  { %v6434_v14 = vmul.f32 %v11321_v19, %v6433_v13  ;;  %v6552_v12 = vmul.f32 %v11347_v49, %v11292_v44  ;;  %v6560_v16 = vand.u32 2147483647, %v11292_v44  ;;  %v11375_v4 = vor.u32 1.1754944e-38, %v6562_v9  ;;  %v11378_v42 = vpop.f32.mrf.mxu2  ;;  %vm6438_vm10 = vmor %vm6436_vm5, %vm6437_vm8 }
 0x454   :  { %8820 = vrcp.f32 %v11344_v0  ;;  %v6575_v18 = vand.u32 2147483647, %v11336_v36  ;;  %v3483_v22 = vadd.f32 %v11184_v57, %v10530_v47  ;;  %v6429_v23 = vsel %vm11316_vm3, %v6428_v25, %v6424_v7  ;;  %v11390_v13 = vpop.f32.mrf.mxu0 }
 0x455   :  { %v6435_v35 = vadd.f32 %v11321_v19, %v6434_v14  ;;  %v6553_v20 = vsub.f32 1.0, %v6552_v12  ;;  %8822 = vpow2.f32 %v8400_v48  ;;  %v8408_v9 = vmul.f32 -1.442695, %v3434_v60 }
 0x456   :  { %v8080_v43 = vor.u32 %v8641_v32, %v8077_v8  ;;  %vm6557_vm11 = vweird.f32 %v11347_v49  ;;  %v3544_v47 = vadd.f32 %v11193_v59, %v11362_v51  ;;  %v7720_v63 = vor.u32 %v8551_v3, %v7717_v58 }
 0x457   :  { %v6439_v34 = vsel %vm6438_vm10, %v11321_v19, %v6435_v35  ;;  %v6554_v14 = vmul.f32 %v11347_v49, %v6553_v20  ;;  %8824 = vpow2.f32 %v8408_v9  ;;  %v8044_v25 = vor.u32 %v8632_v38, %v8041_v61  ;;  %v8619_v38 = vld [vmem:[#allocation10 + $0x230] sm:$0xf0]  ;;  %v8263_v61 = vld [vmem:[#allocation10 + $0x450] sm:$0xf]  ;;  %vm11433_vm0 = vmor %vm6556_vm9, %vm6557_vm11 }
 0x458   :  { %v11397_v57 = vpop.eup %8818  ;;  %v6444_v21 = vsel %vm11340_vm6, %v6443_v27, %v6439_v34  ;;  %3882 = vmatpush.bf16.msra.mxu3 %v8080_v43  ;;  %vm11401_vm12 = vcmp.eq.f32.partialorder %v6560_v16, 8.507059e+37  ;;  %vm11407_vm13 = vcmp.eq.f32.partialorder %v6575_v18, 8.507059e+37  ;;  %v6577_v59 = vand.u32 2147483648, %v11336_v36  ;;  %v8005_v27 = vld [vmem:[#allocation10 + $0x274] sm:$0xf0]  ;;  %3835 = vmatpush.bf16.msra.mxu2 %v7720_v63  ;;  %v11419_v35 = vpop.f32.mrf.mxu3 }
 0x459   :  { %v7016_v48 = vpack.c.bf16 %v6444_v21, %v6429_v23  ;;  %v6567_v19 = vmul.f32 %v11397_v57, %v11336_v36  ;;  %v6555_v12 = vadd.f32 %v11347_v49, %v6554_v14  ;;  %v3532_v8 = vadd.f32 %v11225_v37, %v3483_v22  ;;  %v7975_v16 = vld [vmem:[#allocation10 + $0x210] sm:$0xf]  ;;  %v8691_v23 = vld [vmem:[#allocation10 + $0x470] sm:$0xf0] }
 0x45a   :  { %v11412_v7 = vpop.eup %8820  ;;  %v3593_v3 = vadd.f32 %v11234_v50, %v3544_v47  ;;  %v11417_v58 = vperm.slane %v9282_v46, 3  ;;  %vm6571_vm14 = vweird.f32 %v11336_v36  ;;  %vm6572_vm15 = vweird.f32 %v11397_v57  ;;  %v11427_v43 = vpop.f32.mrf.mxu1  ;;  %3743 = vmatmul.bf16.gmra.mxu0 %v10416_v45 }
 0x45b   :  { %7096 = vst [vmem:[#allocation11 + $0x1b0] sm:$0xff] %v7016_v48  ;;  %v6568_v20 = vsub.f32 1.0, %v6567_v19  ;;  %v6687_v18 = vmul.f32 %v11412_v7, %v11344_v0  ;;  %v8823_v37 = vpop.eup %8822  ;;  %v8409_v50 = vmul.f32 -1.442695, %v3532_v8  ;;  %v8008_v9 = vor.u32 %v8623_v2, %v8005_v27  ;;  %3836 = vmatmul.bf16.vlgmr.msra.gmra.mxu2 %v10400_v62  ;;  %v11446_v19 = vpop.f32.mrf.mxu2  ;;  %vm6573_vm1 = vmor %vm6571_vm14, %vm6572_vm15 }
 0x45c   :  { %3883 = vmatpush.bf16.msra.mxu3 %v8044_v25  ;;  %v8275_v46 = vmul.f32 -1.442695, %v3593_v3  ;;  %v3642_v22 = vadd.f32 %v11236_v28, %v11417_v58  ;;  %v11438_v21 = vadd.f32 1.0, %v8823_v37  ;;  %v7976_v63 = vor.u32 %v8619_v38, %v7975_v16  ;;  %v11460_v3 = vpop.f32.mrf.mxu0 }
 0x45d   :  { %v6569_v14 = vmul.f32 %v11397_v57, %v6568_v20  ;;  %v6688_v47 = vsub.f32 1.0, %v6687_v18  ;;  %v8825_v28 = vpop.eup %8824  ;;  %v6559_v25 = vsel %vm11433_vm0, %v11347_v49, %v6555_v12  ;;  %8826 = vpow2.f32 %v8409_v50 }
 0x45e   :  { %v8264_v48 = vor.u32 %v8691_v23, %v8263_v61  ;;  %v3691_v44 = vadd.f32 %v11271_v5, %v3642_v22  ;;  %8828 = vrcp.f32 %v11438_v21  ;;  %3926 = vmatpush.bf16.msra.mxu0 %v7976_v63  ;;  %v3546_v8 = vadd.f32 %v11247_v52, %v11362_v51  ;;  %3792 = vmatmul.bf16.gmra.mxu1 %v10423_v41 }
 0x45f   :  { %v6570_v2 = vadd.f32 %v11397_v57, %v6569_v14  ;;  %v6689_v27 = vmul.f32 %v11412_v7, %v6688_v47  ;;  %v6578_v5 = vor.u32 1.1754944e-38, %v6577_v59  ;;  %v6695_v49 = vand.u32 2147483647, %v11344_v0 }
 0x460   :  { %v11458_v12 = vadd.f32 1.0, %v8825_v28  ;;  %8830 = vpow2.f32 %v8275_v46  ;;  %3884 = vmatpush.bf16.msra.mxu3 %v8008_v9  ;;  %3975 = vmatpush.bf16.msra.mxu1 %v8264_v48  ;;  %v6697_v38 = vand.u32 2147483648, %v11344_v0  ;;  %v8276_v52 = vmul.f32 -1.442695, %v3691_v44 }
 0x461   :  { %v6574_v16 = vsel %vm6573_vm1, %v11397_v57, %v6570_v2  ;;  %v3595_v20 = vadd.f32 %v11286_v6, %v3546_v8  ;;  %v6564_v36 = vsel %vm11401_vm12, %v11375_v4, %v6559_v25  ;;  %v6690_v61 = vadd.f32 %v11412_v7, %v6689_v27  ;;  %v11477_v4 = vpop.f32.mrf.mxu3 }
 0x462   :  { %v6579_v59 = vsel %vm11407_vm13, %v6578_v5, %v6574_v16  ;;  %8832 = vrcp.f32 %v11458_v12  ;;  %vm6692_vm2 = vweird.f32 %v11412_v7  ;;  %v6710_v57 = vand.u32 2147483647, %v11438_v21  ;;  %v11496_v14 = vpop.f32.mrf.mxu1 }
 0x463   :  { %v7021_v18 = vpack.c.bf16 %v6579_v59, %v6564_v36  ;;  %3885 = vmatmul.bf16.vlgmr.msra.gmra.mxu3 %v10407_v53  ;;  %v8827_v6 = vpop.eup %8826  ;;  %vm6691_vm3 = vweird.f32 %v11344_v0  ;;  %8834 = vpow2.f32 %v8276_v52  ;;  %v8284_v60 = vmul.f32 -1.442695, %v3595_v20  ;;  %v11513_v27 = vpop.f32.mrf.mxu2 }
 0x464   :  { %v8829_v32 = vpop.eup %8828  ;;  %vm11479_vm4 = vcmp.eq.f32.partialorder %v6695_v49, 8.507059e+37  ;;  %v6698_v37 = vor.u32 1.1754944e-38, %v6697_v38  ;;  %v6712_v50 = vand.u32 2147483648, %v11438_v21  ;;  %v11484_v46 = vadd.f32 1.0, %v8827_v6  ;;  %vm11488_vm5 = vmor %vm6691_vm3, %vm6692_vm2  ;;  %v11522_v52 = vpop.f32.mrf.mxu0 }
 0x465   :  { %7101 = vst [vmem:[#allocation11 + $0x1d4] sm:$0xff] %v7021_v18  ;;  %v6702_v9 = vmul.f32 %v8829_v32, %v11438_v21  ;;  %vm6706_vm6 = vweird.f32 %v11438_v21  ;;  %8836 = vpow2.f32 %v8284_v60  ;;  %v3644_v34 = vadd.f32 %v11294_v31, %v11417_v58 }
 0x466   :  { %v8831_v22 = vpop.eup %8830  ;;  %v6694_v47 = vsel %vm11488_vm5, %v11412_v7, %v6690_v61  ;;  %vm11501_vm7 = vcmp.eq.f32.partialorder %v6710_v57, 8.507059e+37  ;;  %v6830_v28 = vand.u32 2147483647, %v11458_v12  ;;  %8838 = vrcp.f32 %v11484_v46 }
 0x467   :  { %v6703_v48 = vsub.f32 1.0, %v6702_v9  ;;  %v6832_v44 = vand.u32 2147483648, %v11458_v12  ;;  %v11510_v31 = vadd.f32 1.0, %v8831_v22  ;;  %v3693_v2 = vadd.f32 %v11338_v33, %v3644_v34 }
 0x468   :  { %v11507_v25 = vpop.eup %8832  ;;  %v6713_v7 = vor.u32 1.1754944e-38, %v6712_v50  ;;  %vm6826_vm8 = vweird.f32 %v11458_v12  ;;  %v3549_v5 = vadd.f32 %v11310_v29, %v11362_v51  ;;  %vm6707_vm9 = vweird.f32 %v8829_v32 }
 0x469   :  { %v6822_v8 = vmul.f32 %v11507_v25, %v11458_v12  ;;  %v8835_v49 = vpop.eup %8834  ;;  %v6704_v16 = vmul.f32 %v8829_v32, %v6703_v48  ;;  %v6845_v38 = vand.u32 2147483647, %v11484_v46  ;;  %8840 = vrcp.f32 %v11510_v31  ;;  %vm6708_vm11 = vmor %vm6706_vm6, %vm6707_vm9  ;;  %v11552_v0 = vpop.f32.mrf.mxu3 }
 0x46a   :  { %v6699_v33 = vsel %vm11479_vm4, %v6698_v37, %v6694_v47  ;;  %v11526_v36 = vadd.f32 1.0, %v8835_v49  ;;  %v3598_v59 = vadd.f32 %v11364_v40, %v3549_v5  ;;  %vm11529_vm10 = vcmp.eq.f32.partialorder %v6830_v28, 8.507059e+37  ;;  %3748 = vmatmul.bf16.gmra.mxu0 %v10432_v15  ;;  %v7939_v49 = vld [vmem:[#allocation10 + $0x1c8] sm:$0xf] }
 0x46b   :  { %v6823_v20 = vsub.f32 1.0, %v6822_v8  ;;  %v8837_v18 = vpop.eup %8836  ;;  %v6705_v61 = vadd.f32 %v8829_v32, %v6704_v16  ;;  %v6833_v57 = vor.u32 1.1754944e-38, %v6832_v44  ;;  %v6847_v6 = vand.u32 2147483648, %v11484_v46  ;;  %3841 = vmatmul.bf16.gmra.mxu2 %v10416_v45  ;;  %v11561_v8 = vpop.f32.mrf.mxu1  ;;  %v8610_v16 = vld [vmem:[#allocation10 + $0x1e8] sm:$0xf0] }
 0x46c   :  { %v8285_v60 = vmul.f32 -1.442695, %v3693_v2  ;;  %v11534_v50 = vpop.eup %8838  ;;  %vm6827_vm12 = vweird.f32 %v11507_v25  ;;  %vm6841_vm13 = vweird.f32 %v11484_v46  ;;  %8842 = vrcp.f32 %v11526_v36 }
 0x46d   :  { %v6824_v23 = vmul.f32 %v11507_v25, %v6823_v20  ;;  %v6709_v40 = vsel %vm6708_vm11, %v8829_v32, %v6705_v61  ;;  %v6837_v37 = vmul.f32 %v11534_v50, %v11484_v46  ;;  %vm11546_vm14 = vcmp.eq.f32.partialorder %v6845_v38, 8.507059e+37  ;;  %vm11567_vm15 = vmor %vm6826_vm8, %vm6827_vm12  ;;  %v11583_v20 = vpop.f32.mrf.mxu2 }
 0x46e   :  { %v4835_v21 = vand.u32 2147483647, %v11510_v31  ;;  %v6714_v9 = vsel %vm11501_vm7, %v6713_v7, %v6709_v40  ;;  %v11557_v47 = vadd.f32 1.0, %v8837_v18  ;;  %v8293_v32 = vmul.f32 -1.442695, %v3598_v59  ;;  %3797 = vmatmul.bf16.gmra.mxu1 %v10439_v39 }
 0x46f   :  { %v6825_v34 = vadd.f32 %v11507_v25, %v6824_v23  ;;  %v11559_v28 = vpop.eup %8840  ;;  %v7026_v48 = vpack.c.bf16 %v6714_v9, %v6699_v33  ;;  %v6838_v44 = vsub.f32 1.0, %v6837_v37  ;;  %v6848_v2 = vor.u32 1.1754944e-38, %v6847_v6 }
 0x470   :  { %8844 = vpow2.f32 %v8285_v60  ;;  %vm6842_vm0 = vweird.f32 %v11534_v50  ;;  %v4827_v7 = vmul.f32 %v11559_v28, %v11510_v31  ;;  %vm4831_vm1 = vweird.f32 %v11510_v31  ;;  %v8682_v60 = vld [vmem:[#allocation10 + $0x428] sm:$0xf0] }
 0x471   :  { %v4837_v5 = vand.u32 2147483648, %v11510_v31  ;;  %7106 = vst [vmem:[#allocation11 + $0x1f8] sm:$0xff] %v7026_v48  ;;  %v6829_v12 = vsel %vm11567_vm15, %v11507_v25, %v6825_v34  ;;  %v6839_v38 = vmul.f32 %v11534_v50, %v6838_v44  ;;  %v4850_v33 = vand.u32 2147483647, %v11526_v36  ;;  %v8227_v25 = vld [vmem:[#allocation10 + $0x408] sm:$0xf]  ;;  %v11595_v34 = vpop.f32.mrf.mxu0  ;;  %vm6843_vm3 = vmor %vm6841_vm13, %vm6842_vm0 }
 0x472   :  { %8846 = vrcp.f32 %v11557_v47  ;;  %v8843_v59 = vpop.eup %8842  ;;  %v4828_v18 = vsub.f32 1.0, %v4827_v7  ;;  %vm11585_vm2 = vcmp.eq.f32.partialorder %v4835_v21, 8.507059e+37  ;;  %v3647_v6 = vadd.f32 %v11378_v42, %v11417_v58 }
 0x473   :  { %8848 = vpow2.f32 %v8293_v32  ;;  %3890 = vmatmul.bf16.gmra.mxu3 %v10423_v41  ;;  %v6840_v23 = vadd.f32 %v11534_v50, %v6839_v38  ;;  %v4842_v40 = vmul.f32 %v8843_v59, %v11526_v36  ;;  %v4852_v37 = vand.u32 2147483648, %v11526_v36 }
 0x474   :  { %v7940_v9 = vor.u32 %v8610_v16, %v7939_v49  ;;  %v6834_v21 = vsel %vm11529_vm10, %v6833_v57, %v6829_v12  ;;  %v4829_v42 = vmul.f32 %v11559_v28, %v4828_v18  ;;  %vm4832_vm4 = vweird.f32 %v11559_v28 }
 0x475   :  { %v3551_v32 = vadd.f32 %v11390_v13, %v11362_v51  ;;  %v6844_v44 = vsel %vm6843_vm3, %v11534_v50, %v6840_v23  ;;  %v4843_v63 = vsub.f32 1.0, %v4842_v40  ;;  %v8228_v7 = vor.u32 %v8682_v60, %v8227_v25  ;;  %vm11618_vm6 = vmor %vm4831_vm1, %vm4832_vm4 }
 0x476   :  { %v8845_v48 = vpop.eup %8844  ;;  %3927 = vmatpush.bf16.msra.mxu0 %v7940_v9  ;;  %v3696_v29 = vadd.f32 %v11419_v35, %v3647_v6  ;;  %v6849_v57 = vsel %vm11546_vm14, %v6848_v2, %v6844_v44  ;;  %v4830_v46 = vadd.f32 %v11559_v28, %v4829_v42  ;;  %vm4847_vm5 = vweird.f32 %v8843_v59  ;;  %v11623_v2 = vpop.f32.mrf.mxu3 }
 0x477   :  { %v11612_v49 = vadd.f32 1.0, %v8845_v48  ;;  %v7031_v12 = vpack.c.bf16 %v6849_v57, %v6834_v21  ;;  %v4844_v50 = vmul.f32 %v8843_v59, %v4843_v63  ;;  %3976 = vmatpush.bf16.msra.mxu1 %v8228_v7  ;;  %v3600_v22 = vadd.f32 %v11427_v43, %v3551_v32  ;;  %v11632_v43 = vpop.f32.mrf.mxu1  ;;  %v7903_v57 = vld [vmem:[#allocation10 + $0x180] sm:$0xf] }
 0x478   :  { %v11614_v16 = vpop.eup %8846  ;;  %v8294_v35 = vmul.f32 -1.442695, %v3696_v29  ;;  %v4834_v18 = vsel %vm11618_vm6, %v11559_v28, %v4830_v46  ;;  %v4838_v6 = vor.u32 1.1754944e-38, %v4837_v5  ;;  %vm4846_vm7 = vweird.f32 %v11526_v36 }
 0x479   :  { %v8849_v38 = vpop.eup %8848  ;;  %v4962_v31 = vmul.f32 %v11614_v16, %v11557_v47  ;;  %8850 = vrcp.f32 %v11612_v49  ;;  %7111 = vst [vmem:[#allocation11 + $0x21c] sm:$0xff] %v7031_v12  ;;  %v4845_v25 = vadd.f32 %v8843_v59, %v4844_v50  ;;  %vm4851_vm8 = vcmp.eq.f32.partialorder %v4850_v33, 8.507059e+37  ;;  %vm4848_vm9 = vmor %vm4846_vm7, %vm4847_vm5  ;;  %v11642_v33 = vpop.f32.mrf.mxu2  ;;  %v8601_v50 = vld [vmem:[#allocation10 + $0x1a0] sm:$0xf0] }
 0x47a   :  { %v4853_v60 = vor.u32 1.1754944e-38, %v4852_v37  ;;  %v4970_v40 = vand.u32 2147483647, %v11557_v47  ;;  %v11636_v28 = vadd.f32 1.0, %v8849_v38  ;;  %8852 = vpow2.f32 %v8294_v35  ;;  %3753 = vmatmul.bf16.gmra.mxu0 %v10448_v1 }
 0x47b   :  { %v4963_v23 = vsub.f32 1.0, %v4962_v31  ;;  %v4839_v5 = vsel %vm11585_vm2, %v4838_v6, %v4834_v18  ;;  %v4849_v9 = vsel %vm4848_vm9, %v8843_v59, %v4845_v25  ;;  %v8302_v21 = vmul.f32 -1.442695, %v3600_v22  ;;  %3846 = vmatmul.bf16.gmra.mxu2 %v10432_v15  ;;  %v11650_v59 = vpop.f32.mrf.mxu0  ;;  %v8191_v18 = vld [vmem:[#allocation10 + $0x3c0] sm:$0xf] }
 0x47c   :  { %v3649_v36 = vadd.f32 %v11446_v19, %v11417_v58  ;;  %v4854_v37 = vsel %vm4851_vm8, %v4853_v60, %v4849_v9  ;;  %8854 = vrcp.f32 %v11636_v28  ;;  %v3554_v32 = vadd.f32 %v11460_v3, %v11362_v51  ;;  %v8673_v6 = vld [vmem:[#allocation10 + $0x3e0] sm:$0xf0] }
 0x47d   :  { %v4964_v42 = vmul.f32 %v11614_v16, %v4963_v23  ;;  %v6957_v48 = vpack.c.bf16 %v4854_v37, %v4839_v5  ;;  %v4972_v19 = vand.u32 2147483648, %v11557_v47  ;;  %8856 = vpow2.f32 %v8302_v21 }
 0x47e   :  { %v3698_v44 = vadd.f32 %v11477_v4, %v3649_v36  ;;  %v3603_v63 = vadd.f32 %v11496_v14, %v3554_v32  ;;  %vm4967_vm10 = vweird.f32 %v11614_v16  ;;  %vm11658_vm11 = vcmp.eq.f32.partialorder %v4970_v40, 8.507059e+37  ;;  %3802 = vmatmul.bf16.gmra.mxu1 %v10455_v24  ;;  %v11672_v31 = vpop.f32.mrf.mxu3 }
 0x47f   :  { %v11652_v61 = vpop.eup %8850  ;;  %7037 = vst [vmem:[#allocation11 + $0x8] sm:$0xff] %v6957_v48  ;;  %v4985_v29 = vand.u32 2147483647, %v11612_v49  ;;  %v4965_v12 = vadd.f32 %v11614_v16, %v4964_v42  ;;  %v3652_v14 = vadd.f32 %v11513_v27, %v11417_v58  ;;  %vm4966_vm12 = vweird.f32 %v11557_v47  ;;  %v11690_v9 = vpop.f32.mrf.mxu1 }
 0x480   :  { %v4977_v7 = vmul.f32 %v11652_v61, %v11612_v49  ;;  %v8853_v46 = vpop.eup %8852  ;;  %v8303_v13 = vmul.f32 -1.442695, %v3698_v44  ;;  %v8311_v4 = vmul.f32 -1.442695, %v3603_v63  ;;  %v7904_v38 = vor.u32 %v8601_v50, %v7903_v57  ;;  %vm11681_vm13 = vmor %vm4966_vm12, %vm4967_vm10 }
 0x481   :  { %v11670_v22 = vadd.f32 1.0, %v8853_v46  ;;  %v4987_v60 = vand.u32 2147483648, %v11612_v49  ;;  %v8192_v27 = vor.u32 %v8673_v6, %v8191_v18  ;;  %v3701_v23 = vadd.f32 %v11552_v0, %v3652_v14  ;;  %v11701_v44 = vpop.f32.mrf.mxu2 }
 0x482   :  { %v4978_v35 = vsub.f32 1.0, %v4977_v7  ;;  %v11674_v25 = vpop.eup %8854  ;;  %8858 = vpow2.f32 %v8303_v13  ;;  %vm4982_vm14 = vweird.f32 %v11652_v61  ;;  %3928 = vmatpush.bf16.msra.mxu0 %v7904_v38  ;;  %v4969_v0 = vsel %vm11681_vm13, %v11614_v16, %v4965_v12 }
 0x483   :  { %3895 = vmatmul.bf16.gmra.mxu3 %v10439_v39  ;;  %v5097_v5 = vmul.f32 %v11674_v25, %v11636_v28  ;;  %8860 = vrcp.f32 %v11670_v22  ;;  %v8857_v21 = vpop.eup %8856  ;;  %vm4981_vm15 = vweird.f32 %v11612_v49  ;;  %v3556_v36 = vadd.f32 %v11522_v52, %v11362_v51  ;;  %3977 = vmatpush.bf16.msra.mxu1 %v8192_v27  ;;  %v11710_v46 = vpop.f32.mrf.mxu0 }
 0x484   :  { %v4979_v40 = vmul.f32 %v11652_v61, %v4978_v35  ;;  %8862 = vpow2.f32 %v8311_v4  ;;  %v11699_v32 = vadd.f32 1.0, %v8857_v21  ;;  %v8312_v48 = vmul.f32 -1.442695, %v3701_v23  ;;  %vm4983_vm0 = vmor %vm4981_vm15, %vm4982_vm14 }
 0x485   :  { %v5098_v42 = vsub.f32 1.0, %v5097_v5  ;;  %v4973_v63 = vor.u32 1.1754944e-38, %v4972_v19  ;;  %v4988_v16 = vor.u32 1.1754944e-38, %v4987_v60  ;;  %v5105_v49 = vand.u32 2147483647, %v11636_v28 }
 0x486   :  { %v4980_v37 = vadd.f32 %v11652_v61, %v4979_v40  ;;  %v3605_v7 = vadd.f32 %v11561_v8, %v3556_v36  ;;  %vm4986_vm1 = vcmp.eq.f32.partialorder %v4985_v29, 8.507059e+37  ;;  %8864 = vrcp.f32 %v11699_v32  ;;  %v11730_v27 = vpop.f32.mrf.mxu3 }
 0x487   :  { %v5099_v57 = vmul.f32 %v11674_v25, %v5098_v42  ;;  %v4974_v19 = vsel %vm11658_vm11, %v4973_v63, %v4969_v0  ;;  %v5107_v4 = vand.u32 2147483648, %v11636_v28  ;;  %8866 = vpow2.f32 %v8312_v48 }
 0x488   :  { %v4984_v52 = vsel %vm4983_vm0, %v11652_v61, %v4980_v37  ;;  %v8859_v12 = vpop.eup %8858  ;;  %vm5101_vm2 = vweird.f32 %v11636_v28  ;;  %v8320_v61 = vmul.f32 -1.442695, %v3605_v7  ;;  %vm5102_vm3 = vweird.f32 %v11674_v25 }
 0x489   :  { %v4989_v13 = vsel %vm4986_vm1, %v4988_v16, %v4984_v52  ;;  %v8861_v14 = vpop.eup %8860  ;;  %v11716_v8 = vadd.f32 1.0, %v8859_v12  ;;  %vm11719_vm4 = vcmp.eq.f32.partialorder %v5105_v49, 8.507059e+37  ;;  %v5120_v38 = vand.u32 2147483647, %v11670_v22  ;;  %vm11748_vm6 = vmor %vm5101_vm2, %vm5102_vm3  ;;  %v11764_v7 = vpop.f32.mrf.mxu2 }
 0x48a   :  { %v6962_v50 = vpack.c.bf16 %v4989_v13, %v4974_v19  ;;  %v8863_v29 = vpop.eup %8862  ;;  %v5112_v3 = vmul.f32 %v8861_v14, %v11670_v22  ;;  %v5100_v18 = vadd.f32 %v11674_v25, %v5099_v57  ;;  %v5122_v6 = vand.u32 2147483648, %v11670_v22  ;;  %3758 = vmatmul.bf16.gmra.mxu0 %v10464_v30 }
 0x48b   :  { %8868 = vrcp.f32 %v11716_v8  ;;  %v3654_v60 = vadd.f32 %v11583_v20, %v11417_v58  ;;  %v5108_v23 = vor.u32 1.1754944e-38, %v5107_v4  ;;  %vm5116_vm5 = vweird.f32 %v11670_v22  ;;  %3851 = vmatmul.bf16.gmra.mxu2 %v10448_v1  ;;  %v11742_v20 = vpop.f32.mrf.mxu1 }
 0x48c   :  { %7042 = vst [vmem:[#allocation11 + $0x2c] sm:$0xff] %v6962_v50  ;;  %v5113_v47 = vsub.f32 1.0, %v5112_v3  ;;  %v11733_v40 = vadd.f32 1.0, %v8863_v29  ;;  %v11736_v5 = vpop.eup %8864  ;;  %v5240_v21 = vand.u32 2147483647, %v11699_v32  ;;  %v5242_v0 = vand.u32 2147483648, %v11699_v32 }
 0x48d   :  { %8870 = vpow2.f32 %v8320_v61  ;;  %v3703_v36 = vadd.f32 %v11623_v2, %v3654_v60  ;;  %v8867_v37 = vpop.eup %8866  ;;  %vm5117_vm7 = vweird.f32 %v8861_v14  ;;  %vm11752_vm8 = vcmp.eq.f32.partialorder %v5120_v38, 8.507059e+37  ;;  %v11778_v61 = vpop.f32.mrf.mxu0 }
 0x48e   :  { %v5114_v48 = vmul.f32 %v8861_v14, %v5113_v47  ;;  %v5232_v2 = vmul.f32 %v11736_v5, %v11699_v32  ;;  %v5104_v16 = vsel %vm11748_vm6, %v11674_v25, %v5100_v18  ;;  %v5123_v49 = vor.u32 1.1754944e-38, %v5122_v6  ;;  %3807 = vmatmul.bf16.gmra.mxu1 %v10471_v11  ;;  %vm5118_vm10 = vmor %vm5116_vm5, %vm5117_vm7  ;;  %v7867_v47 = vld [vmem:[#allocation10 + $0x138] sm:$0xf]  ;;  %v11797_v42 = vpop.f32.mrf.mxu3 }
 0x48f   :  { %8872 = vrcp.f32 %v11733_v40  ;;  %v3559_v28 = vadd.f32 %v11595_v34, %v11362_v51  ;;  %vm5236_vm9 = vweird.f32 %v11699_v32  ;;  %v11767_v12 = vadd.f32 1.0, %v8867_v37  ;;  %v8592_v37 = vld [vmem:[#allocation10 + $0x158] sm:$0xf0] }
 0x490   :  { %v5115_v52 = vadd.f32 %v8861_v14, %v5114_v48  ;;  %v5233_v57 = vsub.f32 1.0, %v5232_v2  ;;  %vm11772_vm11 = vcmp.eq.f32.partialorder %v5240_v21, 8.507059e+37  ;;  %v5243_v13 = vor.u32 1.1754944e-38, %v5242_v0 }
 0x491   :  { %v8869_v19 = vpop.eup %8868  ;;  %v5255_v34 = vand.u32 2147483647, %v11716_v8  ;;  %v8321_v4 = vmul.f32 -1.442695, %v3703_v36  ;;  %v3608_v50 = vadd.f32 %v11632_v43, %v3559_v28  ;;  %v5109_v29 = vsel %vm11719_vm4, %v5108_v23, %v5104_v16  ;;  %v8664_v28 = vld [vmem:[#allocation10 + $0x398] sm:$0xf0] }
 0x492   :  { %v5119_v3 = vsel %vm5118_vm10, %v8861_v14, %v5115_v52  ;;  %v5234_v38 = vmul.f32 %v11736_v5, %v5233_v57  ;;  %v5247_v22 = vmul.f32 %v8869_v19, %v11716_v8  ;;  %vm5237_vm12 = vweird.f32 %v11736_v5 }
 0x493   :  { %3900 = vmatmul.bf16.gmra.mxu3 %v10455_v24  ;;  %v8871_v18 = vpop.eup %8870  ;;  %v5124_v6 = vsel %vm11752_vm8, %v5123_v49, %v5119_v3  ;;  %v5257_v43 = vand.u32 2147483648, %v11716_v8  ;;  %8874 = vrcp.f32 %v11767_v12  ;;  %v5375_v23 = vand.u32 2147483647, %v11733_v40  ;;  %vm11803_vm14 = vmor %vm5236_vm9, %vm5237_vm12  ;;  %v8155_v49 = vld [vmem:[#allocation10 + $0x378] sm:$0xf]  ;;  %v11818_v57 = vpop.f32.mrf.mxu1 }
 0x494   :  { %v6967_v60 = vpack.c.bf16 %v5124_v6, %v5109_v29  ;;  %v5235_v35 = vadd.f32 %v11736_v5, %v5234_v38  ;;  %v5248_v14 = vsub.f32 1.0, %v5247_v22  ;;  %vm5251_vm13 = vweird.f32 %v11716_v8 }
 0x495   :  { %v11792_v21 = vpop.eup %8872  ;;  %v11795_v0 = vadd.f32 1.0, %v8871_v18  ;;  %8876 = vpow2.f32 %v8321_v4  ;;  %v8329_v36 = vmul.f32 -1.442695, %v3608_v50  ;;  %vm5252_vm15 = vweird.f32 %v8869_v19  ;;  %v11827_v18 = vpop.f32.mrf.mxu2 }
 0x496   :  { %7047 = vst [vmem:[#allocation11 + $0x50] sm:$0xff] %v6967_v60  ;;  %v5249_v63 = vmul.f32 %v8869_v19, %v5248_v14  ;;  %vm11807_vm0 = vcmp.eq.f32.partialorder %v5255_v34, 8.507059e+37  ;;  %v5367_v16 = vmul.f32 %v11792_v21, %v11733_v40  ;;  %v5239_v52 = vsel %vm11803_vm14, %v11736_v5, %v5235_v35  ;;  %vm5253_vm2 = vmor %vm5251_vm13, %vm5252_vm15 }
 0x497   :  { %v5258_v32 = vor.u32 1.1754944e-38, %v5257_v43  ;;  %vm5371_vm1 = vweird.f32 %v11733_v40  ;;  %8878 = vrcp.f32 %v11795_v0  ;;  %v5377_v50 = vand.u32 2147483648, %v11733_v40 }
 0x498   :  { %v5250_v34 = vadd.f32 %v8869_v19, %v5249_v63  ;;  %v5368_v4 = vsub.f32 1.0, %v5367_v16  ;;  %v3657_v29 = vadd.f32 %v11642_v33, %v11417_v58  ;;  %v5392_v5 = vand.u32 2147483648, %v11767_v12 }
 0x499   :  { %v8875_v3 = vpop.eup %8874  ;;  %8880 = vpow2.f32 %v8329_v36  ;;  %v7868_v38 = vor.u32 %v8592_v37, %v7867_v47  ;;  %v8156_v22 = vor.u32 %v8664_v28, %v8155_v49  ;;  %v5244_v6 = vsel %vm11772_vm11, %v5243_v13, %v5239_v52  ;;  %v11843_v13 = vpop.f32.mrf.mxu0 }
 0x49a   :  { %v5254_v43 = vsel %vm5253_vm2, %v8869_v19, %v5250_v34  ;;  %v5369_v60 = vmul.f32 %v11792_v21, %v5368_v4  ;;  %vm11832_vm3 = vcmp.eq.f32.partialorder %v5375_v23, 8.507059e+37  ;;  %v5382_v8 = vmul.f32 %v8875_v3, %v11767_v12  ;;  %3763 = vmatmul.bf16.gmra.mxu0 %v10480_v55  ;;  %v11869_v4 = vpop.f32.mrf.mxu3 }
 0x49b   :  { %v8877_v35 = vpop.eup %8876  ;;  %v5259_v14 = vsel %vm11807_vm0, %v5258_v32, %v5254_v43  ;;  %vm5372_vm4 = vweird.f32 %v11792_v21  ;;  %3929 = vmatpush.bf16.msra.mxu0 %v7868_v38  ;;  %v3561_v25 = vadd.f32 %v11650_v59, %v11362_v51  ;;  %3978 = vmatpush.bf16.msra.mxu1 %v8156_v22  ;;  %v3706_v19 = vadd.f32 %v11672_v31, %v3657_v29 }
 0x49c   :  { %v6972_v23 = vpack.c.bf16 %v5259_v14, %v5244_v6  ;;  %v5370_v47 = vadd.f32 %v11792_v21, %v5369_v60  ;;  %v5383_v36 = vsub.f32 1.0, %v5382_v8  ;;  %v11846_v37 = vadd.f32 1.0, %v8877_v35  ;;  %3856 = vmatmul.bf16.gmra.mxu2 %v10464_v30  ;;  %vm11861_vm7 = vmor %vm5371_vm1, %vm5372_vm4  ;;  %v11882_v6 = vpop.f32.mrf.mxu1 }
 0x49d   :  { %v11849_v48 = vpop.eup %8878  ;;  %v5378_v63 = vor.u32 1.1754944e-38, %v5377_v50  ;;  %vm5386_vm5 = vweird.f32 %v11767_v12  ;;  %v8330_v2 = vmul.f32 -1.442695, %v3706_v19  ;;  %v3610_v59 = vadd.f32 %v11690_v9, %v3561_v25  ;;  %v11891_v35 = vpop.f32.mrf.mxu2 }
 0x49e   :  { %7052 = vst [vmem:[#allocation11 + $0x74] sm:$0xff] %v6972_v23  ;;  %v5384_v31 = vmul.f32 %v8875_v3, %v5383_v36  ;;  %vm5387_vm6 = vweird.f32 %v8875_v3  ;;  %v5390_v16 = vand.u32 2147483647, %v11767_v12  ;;  %v5502_v49 = vmul.f32 %v11849_v48, %v11795_v0  ;;  %3812 = vmatmul.bf16.gmra.mxu1 %v10487_v17  ;;  %v7831_v23 = vld [vmem:[#allocation10 + $0xf0] sm:$0xf] }
 0x49f   :  { %v8881_v28 = vpop.eup %8880  ;;  %v5393_v9 = vor.u32 1.1754944e-38, %v5392_v5  ;;  %v5510_v32 = vand.u32 2147483647, %v11795_v0  ;;  %8882 = vrcp.f32 %v11846_v37  ;;  %v3659_v34 = vadd.f32 %v11701_v44, %v11417_v58  ;;  %vm5388_vm8 = vmor %vm5386_vm5, %vm5387_vm6 }
 0x4a0   :  { %v5374_v50 = vsel %vm11861_vm7, %v11792_v21, %v5370_v47  ;;  %v5385_v29 = vadd.f32 %v8875_v3, %v5384_v31  ;;  %v5503_v40 = vsub.f32 1.0, %v5502_v49  ;;  %v11874_v38 = vadd.f32 1.0, %v8881_v28  ;;  %v8655_v31 = vld [vmem:[#allocation10 + $0x350] sm:$0xf0] }
 0x4a1   :  { %v5512_v5 = vand.u32 2147483648, %v11795_v0  ;;  %8884 = vpow2.f32 %v8330_v2  ;;  %v8338_v44 = vmul.f32 -1.442695, %v3610_v59  ;;  %v3708_v22 = vadd.f32 %v11730_v27, %v3659_v34  ;;  %v11902_v47 = vpop.f32.mrf.mxu0  ;;  %v8119_v59 = vld [vmem:[#allocation10 + $0x330] sm:$0xf] }
 0x4a2   :  { %v5389_v43 = vsel %vm5388_vm8, %v8875_v3, %v5385_v29  ;;  %vm5391_vm9 = vcmp.eq.f32.partialorder %v5390_v16, 8.507059e+37  ;;  %v5504_v21 = vmul.f32 %v11849_v48, %v5503_v40  ;;  %8886 = vrcp.f32 %v11874_v38 }
 0x4a3   :  { %3905 = vmatmul.bf16.gmra.mxu3 %v10471_v11  ;;  %v5379_v12 = vsel %vm11832_vm3, %v5378_v63, %v5374_v50  ;;  %v5394_v60 = vsel %vm5391_vm9, %v5393_v9, %v5389_v43  ;;  %v3564_v8 = vadd.f32 %v11710_v46, %v11362_v51  ;;  %vm5506_vm10 = vweird.f32 %v11795_v0  ;;  %v8583_v46 = vld [vmem:[#allocation10 + $0x110] sm:$0xf0] }
 0x4a4   :  { %v6977_v27 = vpack.c.bf16 %v5394_v60, %v5379_v12  ;;  %8888 = vpow2.f32 %v8338_v44  ;;  %v8339_v3 = vmul.f32 -1.442695, %v3708_v22  ;;  %vm5507_vm11 = vweird.f32 %v11849_v48  ;;  %v11929_v44 = vpop.f32.mrf.mxu3  ;;  %v11940_v60 = vpop.f32.mrf.mxu1 }
 0x4a5   :  { %v11894_v14 = vpop.eup %8882  ;;  %vm11897_vm12 = vcmp.eq.f32.partialorder %v5510_v32, 8.507059e+37  ;;  %v5513_v33 = vor.u32 1.1754944e-38, %v5512_v5  ;;  %v3613_v19 = vadd.f32 %v11742_v20, %v3564_v8  ;;  %v5505_v36 = vadd.f32 %v11849_v48, %v5504_v21  ;;  %vm11920_vm13 = vmor %vm5506_vm10, %vm5507_vm11 }
 0x4a6   :  { %7057 = vst [vmem:[#allocation11 + $0x98] sm:$0xff] %v6977_v27  ;;  %v5517_v63 = vmul.f32 %v11894_v14, %v11846_v37  ;;  %8890 = vpow2.f32 %v8339_v3  ;;  %v3662_v2 = vadd.f32 %v11764_v7, %v11417_v58  ;;  %v5525_v49 = vand.u32 2147483647, %v11846_v37 }
 0x4a7   :  { %v8885_v16 = vpop.eup %8884  ;;  %v5527_v20 = vand.u32 2147483648, %v11846_v37  ;;  %v8347_v28 = vmul.f32 -1.442695, %v3613_v19  ;;  %v7832_v52 = vor.u32 %v8583_v46, %v7831_v23  ;;  %v8120_v50 = vor.u32 %v8655_v31, %v8119_v59 }
 0x4a8   :  { %v11911_v9 = vpop.eup %8886  ;;  %v5518_v32 = vsub.f32 1.0, %v5517_v63  ;;  %v11913_v34 = vadd.f32 1.0, %v8885_v16  ;;  %v3711_v29 = vadd.f32 %v11797_v42, %v3662_v2  ;;  %vm5521_vm14 = vweird.f32 %v11846_v37 }
 0x4a9   :  { %v5637_v40 = vmul.f32 %v11911_v9, %v11874_v38  ;;  %8892 = vpow2.f32 %v8347_v28  ;;  %3930 = vmatpush.bf16.msra.mxu0 %v7832_v52  ;;  %v3566_v5 = vadd.f32 %v11778_v61, %v11362_v51  ;;  %v5509_v0 = vsel %vm11920_vm13, %v11849_v48, %v5505_v36  ;;  %3979 = vmatpush.bf16.msra.mxu1 %v8120_v50  ;;  %v11958_v36 = vpop.f32.mrf.mxu2  ;;  %v11969_v16 = vpop.f32.mrf.mxu0 }
 0x4aa   :  { %v8889_v42 = vpop.eup %8888  ;;  %v5519_v22 = vmul.f32 %v11894_v14, %v5518_v32  ;;  %vm5522_vm15 = vweird.f32 %v11894_v14  ;;  %8894 = vrcp.f32 %v11913_v34  ;;  %v8348_v12 = vmul.f32 -1.442695, %v3711_v29  ;;  %3768 = vmatmul.bf16.gmra.mxu0 %v10496_v54 }
 0x4ab   :  { %v5638_v43 = vsub.f32 1.0, %v5637_v40  ;;  %v11937_v21 = vadd.f32 1.0, %v8889_v42  ;;  %v3615_v61 = vadd.f32 %v11818_v57, %v3566_v5  ;;  %vm11943_vm0 = vcmp.eq.f32.partialorder %v5525_v49, 8.507059e+37  ;;  %vm5523_vm1 = vmor %vm5521_vm14, %vm5522_vm15 }
 0x4ac   :  { %v8891_v8 = vpop.eup %8890  ;;  %v5520_v27 = vadd.f32 %v11894_v14, %v5519_v22  ;;  %v5528_v3 = vor.u32 1.1754944e-38, %v5527_v20  ;;  %v5645_v19 = vand.u32 2147483647, %v11874_v38  ;;  %3861 = vmatmul.bf16.gmra.mxu2 %v10480_v55  ;;  %v5514_v23 = vsel %vm11897_vm12, %v5513_v33, %v5509_v0  ;;  %v12003_v22 = vpop.f32.mrf.mxu3 }
 0x4ad   :  { %v5639_v57 = vmul.f32 %v11911_v9, %v5638_v43  ;;  %v5647_v46 = vand.u32 2147483648, %v11874_v38  ;;  %8896 = vrcp.f32 %v11937_v21  ;;  %vm5642_vm2 = vweird.f32 %v11911_v9  ;;  %v12012_v48 = vpop.f32.mrf.mxu1 }
 0x4ae   :  { %v5524_v63 = vsel %vm5523_vm1, %v11894_v14, %v5520_v27  ;;  %v5660_v25 = vand.u32 2147483647, %v11913_v34  ;;  %v11964_v33 = vadd.f32 1.0, %v8891_v8  ;;  %8898 = vpow2.f32 %v8348_v12  ;;  %3817 = vmatmul.bf16.gmra.mxu1 %v10503_v10 }
 0x4af   :  { %v8893_v37 = vpop.eup %8892  ;;  %v5529_v2 = vsel %vm11943_vm0, %v5528_v3, %v5524_v63  ;;  %v5640_v59 = vadd.f32 %v11911_v9, %v5639_v57  ;;  %v8356_v31 = vmul.f32 -1.442695, %v3615_v61  ;;  %vm5641_vm3 = vweird.f32 %v11874_v38 }
 0x4b0   :  { %v8895_v49 = vpop.eup %8894  ;;  %v6982_v20 = vpack.c.bf16 %v5529_v2, %v5514_v23  ;;  %v5662_v14 = vand.u32 2147483648, %v11913_v34  ;;  %8900 = vrcp.f32 %v11964_v33  ;;  %vm11975_vm4 = vcmp.eq.f32.partialorder %v5645_v19, 8.507059e+37  ;;  %vm11984_vm5 = vmor %vm5641_vm3, %vm5642_vm2 }
 0x4b1   :  { %v5648_v52 = vor.u32 1.1754944e-38, %v5647_v46  ;;  %v5652_v32 = vmul.f32 %v8895_v49, %v11913_v34  ;;  %v3664_v50 = vadd.f32 %v11827_v18, %v11417_v58  ;;  %vm5656_vm6 = vweird.f32 %v11913_v34  ;;  %v12028_v2 = vpop.f32.mrf.mxu2 }
 0x4b2   :  { %7062 = vst [vmem:[#allocation11 + $0xbc] sm:$0xff] %v6982_v20  ;;  %vm11989_vm7 = vcmp.eq.f32.partialorder %v5660_v25, 8.507059e+37  ;;  %v5780_v7 = vand.u32 2147483647, %v11937_v21  ;;  %v11994_v40 = vadd.f32 1.0, %v8893_v37  ;;  %v5644_v5 = vsel %vm11984_vm5, %v11911_v9, %v5640_v59 }
 0x4b3   :  { %3910 = vmatmul.bf16.gmra.mxu3 %v10487_v17  ;;  %v11997_v18 = vpop.eup %8896  ;;  %v5653_v42 = vsub.f32 1.0, %v5652_v32  ;;  %8902 = vpow2.f32 %v8356_v31  ;;  %v3713_v0 = vadd.f32 %v11869_v4, %v3664_v50  ;;  %v5663_v43 = vor.u32 1.1754944e-38, %v5662_v14  ;;  %v12039_v50 = vpop.f32.mrf.mxu0 }
 0x4b4   :  { %v5772_v12 = vmul.f32 %v11997_v18, %v11937_v21  ;;  %vm5776_vm8 = vweird.f32 %v11937_v21  ;;  %v5782_v61 = vand.u32 2147483648, %v11937_v21  ;;  %v8899_v8 = vpop.eup %8898  ;;  %vm5657_vm9 = vweird.f32 %v8895_v49 }
 0x4b5   :  { %v5654_v27 = vmul.f32 %v8895_v49, %v5653_v42  ;;  %8904 = vrcp.f32 %v11994_v40  ;;  %v3569_v9 = vadd.f32 %v11843_v13, %v11362_v51  ;;  %v5649_v3 = vsel %vm11975_vm4, %v5648_v52, %v5644_v5  ;;  %vm5658_vm11 = vmor %vm5656_vm6, %vm5657_vm9 }
 0x4b6   :  { %v12014_v4 = vpop.eup %8900  ;;  %v5773_v19 = vsub.f32 1.0, %v5772_v12  ;;  %vm12018_vm10 = vcmp.eq.f32.partialorder %v5780_v7, 8.507059e+37  ;;  %v12022_v57 = vadd.f32 1.0, %v8899_v8  ;;  %v8357_v46 = vmul.f32 -1.442695, %v3713_v0 }
 0x4b7   :  { %v5655_v63 = vadd.f32 %v8895_v49, %v5654_v27  ;;  %v5787_v25 = vmul.f32 %v12014_v4, %v11964_v33  ;;  %v5795_v13 = vand.u32 2147483647, %v11964_v33  ;;  %v5797_v37 = vand.u32 2147483648, %v11964_v33  ;;  %v12072_v27 = vpop.f32.mrf.mxu3 }
 0x4b8   :  { %v5774_v59 = vmul.f32 %v11997_v18, %v5773_v19  ;;  %vm5777_vm12 = vweird.f32 %v11997_v18  ;;  %8906 = vrcp.f32 %v12022_v57  ;;  %v3618_v31 = vadd.f32 %v11882_v6, %v3569_v9 }
 0x4b9   :  { %v8903_v20 = vpop.eup %8902  ;;  %v5659_v14 = vsel %vm5658_vm11, %v8895_v49, %v5655_v63  ;;  %v5788_v28 = vsub.f32 1.0, %v5787_v25  ;;  %v5915_v52 = vand.u32 2147483647, %v11994_v40  ;;  %v5917_v32 = vand.u32 2147483648, %v11994_v40  ;;  %vm12052_vm13 = vmor %vm5776_vm8, %vm5777_vm12  ;;  %v8574_v25 = vld [vmem:[#allocation10 + $0xc8] sm:$0xf0]  ;;  %v12103_v49 = vpop.f32.mrf.mxu2 }
 0x4ba   :  { %v5664_v34 = vsel %vm11989_vm7, %v5663_v43, %v5659_v14  ;;  %v5775_v38 = vadd.f32 %v11997_v18, %v5774_v59  ;;  %v12044_v7 = vadd.f32 1.0, %v8903_v20  ;;  %8908 = vpow2.f32 %v8357_v46  ;;  %3773 = vmatmul.bf16.gmra.mxu0 %v10512_v26  ;;  %v8083_v20 = vld [vmem:[#allocation10 + $0x2e8] sm:$0xf]  ;;  %v8646_v14 = vld [vmem:[#allocation10 + $0x308] sm:$0xf0] }
 0x4bb   :  { %v12046_v5 = vpop.eup %8904  ;;  %v6987_v6 = vpack.c.bf16 %v5664_v34, %v5649_v3  ;;  %v5783_v42 = vor.u32 1.1754944e-38, %v5782_v61  ;;  %v5789_v29 = vmul.f32 %v12014_v4, %v5788_v28  ;;  %vm5792_vm14 = vweird.f32 %v12014_v4  ;;  %v12093_v28 = vpop.f32.mrf.mxu1 }
 0x4bc   :  { %v5779_v0 = vsel %vm12052_vm13, %v11997_v18, %v5775_v38  ;;  %vm12061_vm15 = vcmp.eq.f32.partialorder %v5795_v13, 8.507059e+37  ;;  %v5907_v21 = vmul.f32 %v12046_v5, %v11994_v40  ;;  %8910 = vrcp.f32 %v12044_v7  ;;  %3866 = vmatmul.bf16.gmra.mxu2 %v10496_v54  ;;  %v7795_v18 = vld [vmem:[#allocation10 + $0xa8] sm:$0xf] }
 0x4bd   :  { %7067 = vst [vmem:[#allocation11 + $0xe0] sm:$0xff] %v6987_v6  ;;  %v5790_v12 = vadd.f32 %v12014_v4, %v5789_v29  ;;  %vm5791_vm0 = vweird.f32 %v11964_v33  ;;  %v5798_v61 = vor.u32 1.1754944e-38, %v5797_v37  ;;  %v5930_v8 = vand.u32 2147483647, %v12022_v57  ;;  %v7761_v54 = vld [vmem:[#allocation10 + $0x84] sm:$0xf0] }
 0x4be   :  { %v8907_v9 = vpop.eup %8906  ;;  %vm12077_vm1 = vmor %vm5791_vm0, %vm5792_vm14  ;;  %v5908_v19 = vsub.f32 1.0, %v5907_v21  ;;  %vm5911_vm2 = vweird.f32 %v11994_v40  ;;  %vm12082_vm3 = vcmp.eq.f32.partialorder %v5915_v52, 8.507059e+37  ;;  %v5918_v46 = vor.u32 1.1754944e-38, %v5917_v32  ;;  %3822 = vmatmul.bf16.gmra.mxu1 %v10518_v56 }
 0x4bf   :  { %v8365_v63 = vmul.f32 -1.442695, %v3618_v31  ;;  %v5784_v13 = vsel %vm12018_vm10, %v5783_v42, %v5779_v0  ;;  %v5794_v37 = vsel %vm12077_vm1, %v12014_v4, %v5790_v12  ;;  %vm5912_vm4 = vweird.f32 %v12046_v5 }
 0x4c0   :  { %v5922_v59 = vmul.f32 %v8907_v9, %v12022_v57  ;;  %v8909_v52 = vpop.eup %8908  ;;  %v5799_v31 = vsel %vm12061_vm15, %v5798_v61, %v5794_v37  ;;  %v5909_v32 = vmul.f32 %v12046_v5, %v5908_v19  ;;  %v3667_v23 = vadd.f32 %v11891_v35, %v11417_v58  ;;  %vm12115_vm5 = vmor %vm5911_vm2, %vm5912_vm4  ;;  %v8565_v35 = vld [vmem:[#allocation10 + $0x80] sm:$0xf0] }
 0x4c1   :  { %8912 = vpow2.f32 %v8365_v63  ;;  %v6992_v4 = vpack.c.bf16 %v5799_v31, %v5784_v13  ;;  %v12101_v38 = vadd.f32 1.0, %v8909_v52  ;;  %v7796_v6 = vor.u32 %v8574_v25, %v7795_v18  ;;  %v12144_v52 = vpop.f32.mrf.mxu3 }
 0x4c2   :  { %v5923_v34 = vsub.f32 1.0, %v5922_v59  ;;  %v12105_v42 = vpop.eup %8910  ;;  %v5910_v29 = vadd.f32 %v12046_v5, %v5909_v32  ;;  %v5932_v0 = vand.u32 2147483648, %v12022_v57  ;;  %v8084_v43 = vor.u32 %v8646_v14, %v8083_v20 }
 0x4c3   :  { %v3716_v21 = vadd.f32 %v11929_v44, %v3667_v23  ;;  %3915 = vmatmul.bf16.gmra.mxu3 %v10503_v10  ;;  %7072 = vst [vmem:[#allocation11 + $0x104] sm:$0xff] %v6992_v4  ;;  %vm5927_vm6 = vweird.f32 %v8907_v9  ;;  %v6042_v61 = vmul.f32 %v12105_v42, %v12044_v7  ;;  %8914 = vrcp.f32 %v12101_v38  ;;  %3931 = vmatpush.bf16.msra.mxu0 %v7796_v6  ;;  %v12122_v44 = vpop.f32.mrf.mxu0  ;;  %v8615_v4 = vld [vmem:[#allocation10 + $0x214] sm:$0xf]  ;;  %v7941_v6 = vld [vmem:[#allocation10 + $0x1ec] sm:$0xf0] }
 0x4c4   :  { %v5924_v12 = vmul.f32 %v8907_v9, %v5923_v34  ;;  %v5914_v18 = vsel %vm12115_vm5, %v12046_v5, %v5910_v29  ;;  %vm5926_vm7 = vweird.f32 %v12022_v57  ;;  %vm12128_vm8 = vcmp.eq.f32.partialorder %v5930_v8, 8.507059e+37  ;;  %3980 = vmatpush.bf16.msra.mxu1 %v8084_v43  ;;  %v7977_v34 = vld [vmem:[#allocation10 + $0x234] sm:$0xf0]  ;;  %v12155_v29 = vpop.f32.mrf.mxu1  ;;  %v8561_v10 = vld [vmem:[#allocation10 + $0x64] sm:$0xf] }
 0x4c5   :  { %v3571_v3 = vadd.f32 %v11902_v47, %v11362_v51  ;;  %v6043_v63 = vsub.f32 1.0, %v6042_v61  ;;  %v6052_v25 = vand.u32 2147483648, %v12044_v7  ;;  %v8366_v13 = vmul.f32 -1.442695, %v3716_v21  ;;  %vm5928_vm9 = vmor %vm5926_vm7, %vm5927_vm6  ;;  %v7759_v21 = vld [vmem:[#allocation10 + $0x60] sm:$0xf] }
 0x4c6   :  { %v5925_v19 = vadd.f32 %v8907_v9, %v5924_v12  ;;  %v5933_v59 = vor.u32 1.1754944e-38, %v5932_v0  ;;  %v6050_v5 = vand.u32 2147483647, %v12044_v7  ;;  %v3669_v8 = vadd.f32 %v11958_v36, %v11417_v58  ;;  %v8687_v12 = vld [vmem:[#allocation10 + $0x454] sm:$0xf] }
 0x4c7   :  { %v8913_v37 = vpop.eup %8912  ;;  %v3620_v57 = vadd.f32 %v11940_v60, %v3571_v3  ;;  %v5919_v47 = vsel %vm12082_vm3, %v5918_v46, %v5914_v18  ;;  %8916 = vpow2.f32 %v8366_v13  ;;  %v6044_v32 = vmul.f32 %v12105_v42, %v6043_v63  ;;  %v8265_v3 = vld [vmem:[#allocation10 + $0x474] sm:$0xf0] }
 0x4c8   :  { %v5929_v20 = vsel %vm5928_vm9, %v8907_v9, %v5925_v19  ;;  %v12142_v14 = vadd.f32 1.0, %v8913_v37  ;;  %v3718_v60 = vadd.f32 %v12003_v22, %v3669_v8  ;;  %v12152_v46 = vor.u32 1.1754944e-38, %v6052_v25  ;;  %v8606_v9 = vld [vmem:[#allocation10 + $0x1cc] sm:$0xf]  ;;  %v12168_v19 = vpop.f32.mrf.mxu2  ;;  %v8047_v37 = vld [vmem:[#allocation10 + $0x2a0] sm:$0xf] }
 0x4c9   :  { %v5934_v31 = vsel %vm12128_vm8, %v5933_v59, %v5929_v20  ;;  %v8374_v23 = vmul.f32 -1.442695, %v3620_v57  ;;  %v12150_v36 = vpop.eup %8914  ;;  %vm6046_vm10 = vweird.f32 %v12044_v7  ;;  %vm6047_vm11 = vweird.f32 %v12105_v42  ;;  %v8637_v59 = vld [vmem:[#allocation10 + $0x2c0] sm:$0xf0] }
 0x4ca   :  { %v6997_v33 = vpack.c.bf16 %v5934_v31, %v5919_v47  ;;  %8918 = vrcp.f32 %v12142_v14  ;;  %vm12159_vm12 = vcmp.eq.f32.partialorder %v6050_v5, 8.507059e+37  ;;  %v6057_v22 = vmul.f32 %v12150_v36, %v12101_v38  ;;  %vm12189_vm15 = vmor %vm6046_vm10, %vm6047_vm11  ;;  %v8597_v7 = vld [vmem:[#allocation10 + $0x184] sm:$0xf] }
 0x4cb   :  { %v6065_v43 = vand.u32 2147483647, %v12101_v38  ;;  %8920 = vpow2.f32 %v8374_v23  ;;  %v3574_v61 = vadd.f32 %v11969_v16, %v11362_v51  ;;  %v8375_v18 = vmul.f32 -1.442695, %v3718_v60  ;;  %v12177_v47 = vpop.f32.mrf.mxu0 }
 0x4cc   :  { %7077 = vst [vmem:[#allocation11 + $0x128] sm:$0xff] %v6997_v33  ;;  %v7980_v40 = vor.u32 %v8615_v4, %v7977_v34  ;;  %v6045_v63 = vadd.f32 %v12105_v42, %v6044_v32  ;;  %v6058_v25 = vsub.f32 1.0, %v6057_v22  ;;  %vm6061_vm13 = vweird.f32 %v12101_v38  ;;  %3871 = vmatmul.bf16.gmra.mxu2 %v10512_v26  ;;  %v7905_v22 = vld [vmem:[#allocation10 + $0x1a4] sm:$0xf0] }
 0x4cd   :  { %v6067_v13 = vand.u32 2147483648, %v12101_v38  ;;  %v8917_v5 = vpop.eup %8916  ;;  %8922 = vpow2.f32 %v8375_v18  ;;  %v3623_v16 = vadd.f32 %v12012_v48, %v3574_v61  ;;  %v3672_v57 = vadd.f32 %v12028_v2, %v11417_v58 }
 0x4ce   :  { %4024 = vmatpush.bf16.msrb.mxu2 %v7980_v40  ;;  %v7760_v8 = vor.u32 %v8565_v35, %v7759_v21  ;;  %v6059_v20 = vmul.f32 %v12150_v36, %v6058_v25  ;;  %vm6062_vm14 = vweird.f32 %v12150_v36  ;;  %v12181_v31 = vadd.f32 1.0, %v8917_v5  ;;  %v12222_v5 = vpop.f32.mrf.mxu1 }
 0x4cf   :  { %v7944_v32 = vor.u32 %v8606_v9, %v7941_v6  ;;  %v8383_v2 = vmul.f32 -1.442695, %v3623_v16  ;;  %v8048_v60 = vor.u32 %v8637_v59, %v8047_v37  ;;  %v8268_v4 = vor.u32 %v8687_v12, %v8265_v3  ;;  %vm12205_vm0 = vmor %vm6061_vm13, %vm6062_vm14  ;;  %v12210_v12 = vpop.f32.mrf.mxu3  ;;  %v8678_v37 = vld [vmem:[#allocation10 + $0x40c] sm:$0xf]  ;;  %v8229_v59 = vld [vmem:[#allocation10 + $0x42c] sm:$0xf0] }
 0x4d0   :  { %v12183_v23 = vpop.eup %8918  ;;  %3932 = vmatpush.bf16.msra.mxu0 %v7760_v8  ;;  %v3721_v34 = vadd.f32 %v12072_v27, %v3672_v57  ;;  %v6049_v33 = vsel %vm12189_vm15, %v12105_v42, %v6045_v63  ;;  %v6060_v9 = vadd.f32 %v12150_v36, %v6059_v20  ;;  %8924 = vrcp.f32 %v12181_v31  ;;  %v12231_v8 = vpop.f32.mrf.mxu2 }
 0x4d1   :  { %v6177_v6 = vmul.f32 %v12183_v23, %v12142_v14  ;;  %v8921_v21 = vpop.eup %8920  ;;  %vm6066_vm1 = vcmp.eq.f32.partialorder %v6065_v43, 8.507059e+37  ;;  %v6068_v42 = vor.u32 1.1754944e-38, %v6067_v13  ;;  %v6185_v35 = vand.u32 2147483647, %v12142_v14  ;;  %3981 = vmatpush.bf16.msra.mxu1 %v8048_v60  ;;  %4073 = vmatpush.bf16.msrb.mxu3 %v8268_v4 }
 0x4d2   :  { %8926 = vpow2.f32 %v8383_v2  ;;  %4025 = vmatpush.bf16.msrb.mxu2 %v7944_v32  ;;  %v6064_v61 = vsel %vm12205_vm0, %v12150_v36, %v6060_v9  ;;  %v12215_v40 = vadd.f32 1.0, %v8921_v21  ;;  %v8384_v38 = vmul.f32 -1.442695, %v3721_v34  ;;  %v8588_v34 = vld [vmem:[#allocation10 + $0x13c] sm:$0xf] }
 0x4d3   :  { %v6178_v18 = vsub.f32 1.0, %v6177_v6  ;;  %v8923_v3 = vpop.eup %8922  ;;  %v6054_v43 = vsel %vm12159_vm12, %v12152_v46, %v6049_v33  ;;  %v6069_v63 = vsel %vm6066_vm1, %v6068_v42, %v6064_v61  ;;  %v6187_v25 = vand.u32 2147483648, %v12142_v14  ;;  %3920 = vmatmul.bf16.gmra.mxu3 %v10518_v56  ;;  %v7869_v33 = vld [vmem:[#allocation10 + $0x15c] sm:$0xf0]  ;;  %v12242_v9 = vpop.f32.mrf.mxu0 }
 0x4d4   :  { %v7908_v13 = vor.u32 %v8597_v7, %v7905_v22  ;;  %v7002_v36 = vpack.c.bf16 %v6069_v63, %v6054_v43  ;;  %8928 = vrcp.f32 %v12215_v40  ;;  %v3576_v57 = vadd.f32 %v12039_v50, %v11362_v51 }
 0x4d5   :  { %v6179_v16 = vmul.f32 %v12183_v23, %v6178_v18  ;;  %v6200_v46 = vand.u32 2147483647, %v12181_v31  ;;  %v12229_v0 = vadd.f32 1.0, %v8923_v3  ;;  %8930 = vpow2.f32 %v8384_v38 }
 0x4d6   :  { %4026 = vmatpush.bf16.msrb.mxu2 %v7908_v13  ;;  %v12233_v20 = vpop.eup %8924  ;;  %7082 = vst [vmem:[#allocation11 + $0x14c] sm:$0xff] %v7002_v36  ;;  %v6202_v32 = vand.u32 2147483648, %v12181_v31  ;;  %v3625_v48 = vadd.f32 %v12093_v28, %v3576_v57  ;;  %v8232_v2 = vor.u32 %v8678_v37, %v8229_v59  ;;  %vm6181_vm2 = vweird.f32 %v12142_v14  ;;  %v8669_v13 = vld [vmem:[#allocation10 + $0x3c4] sm:$0xf]  ;;  %v8193_v37 = vld [vmem:[#allocation10 + $0x3e4] sm:$0xf0] }
 0x4d7   :  { %v6180_v4 = vadd.f32 %v12183_v23, %v6179_v16  ;;  %vm6182_vm3 = vweird.f32 %v12183_v23  ;;  %v6192_v50 = vmul.f32 %v12233_v20, %v12181_v31  ;;  %vm12244_vm4 = vcmp.eq.f32.partialorder %v6185_v35, 8.507059e+37  ;;  %v12276_v59 = vpop.f32.mrf.mxu3 }
 0x4d8   :  { %v8927_v60 = vpop.eup %8926  ;;  %v6188_v28 = vor.u32 1.1754944e-38, %v6187_v25  ;;  %v6322_v7 = vand.u32 2147483648, %v12215_v40  ;;  %8932 = vrcp.f32 %v12229_v0  ;;  %4074 = vmatpush.bf16.msrb.mxu3 %v8232_v2  ;;  %vm6196_vm5 = vweird.f32 %v12181_v31  ;;  %vm12263_vm7 = vmor %vm6181_vm2, %vm6182_vm3  ;;  %v8579_v31 = vld [vmem:[#allocation10 + $0xf4] sm:$0xf] }
 0x4d9   :  { %v6193_v22 = vsub.f32 1.0, %v6192_v50  ;;  %vm12251_vm6 = vcmp.eq.f32.partialorder %v6200_v46, 8.507059e+37  ;;  %v12255_v27 = vadd.f32 1.0, %v8927_v60  ;;  %v6203_v61 = vor.u32 1.1754944e-38, %v6202_v32 }
 0x4da   :  { %v12257_v42 = vpop.eup %8928  ;;  %v6320_v18 = vand.u32 2147483647, %v12215_v40  ;;  %v8392_v38 = vmul.f32 -1.442695, %v3625_v48  ;;  %v7872_v3 = vor.u32 %v8588_v34, %v7869_v33  ;;  %v6184_v63 = vsel %vm12263_vm7, %v12183_v23, %v6180_v4  ;;  %v12287_v48 = vpop.f32.mrf.mxu1 }
 0x4db   :  { %v8931_v43 = vpop.eup %8930  ;;  %v6194_v25 = vmul.f32 %v12233_v20, %v6193_v22  ;;  %vm6197_vm8 = vweird.f32 %v12233_v20  ;;  %v6312_v14 = vmul.f32 %v12257_v42, %v12215_v40  ;;  %vm6316_vm9 = vweird.f32 %v12215_v40  ;;  %v12310_v35 = vpop.f32.mrf.mxu0 }
 0x4dc   :  { %v12278_v36 = vor.u32 1.1754944e-38, %v6322_v7  ;;  %v6335_v16 = vand.u32 2147483647, %v12229_v0  ;;  %8934 = vrcp.f32 %v12255_v27  ;;  %v3674_v23 = vadd.f32 %v12103_v49, %v11417_v58  ;;  %4027 = vmatpush.bf16.msrb.mxu2 %v7872_v3  ;;  %vm6198_vm10 = vmor %vm6196_vm5, %vm6197_vm8  ;;  %v7833_v7 = vld [vmem:[#allocation10 + $0x114] sm:$0xf0] }
 0x4dd   :  { %v6195_v57 = vadd.f32 %v12233_v20, %v6194_v25  ;;  %v6313_v46 = vsub.f32 1.0, %v6312_v14  ;;  %v12285_v32 = vadd.f32 1.0, %v8931_v43  ;;  %8936 = vpow2.f32 %v8392_v38 }
 0x4de   :  { %v12289_v2 = vpop.eup %8932  ;;  %v6189_v60 = vsel %vm12244_vm4, %v6188_v28, %v6184_v63  ;;  %vm6331_vm11 = vweird.f32 %v12229_v0  ;;  %v8196_v49 = vor.u32 %v8669_v13, %v8193_v37  ;;  %v3723_v4 = vadd.f32 %v12144_v52, %v3674_v23  ;;  %v12308_v22 = vpop.f32.mrf.mxu2  ;;  %v8651_v23 = vld [vmem:[#allocation10 + $0x334] sm:$0xf] }
 0x4df   :  { %v6199_v50 = vsel %vm6198_vm10, %v12233_v20, %v6195_v57  ;;  %v6314_v34 = vmul.f32 %v12257_v42, %v6313_v46  ;;  %vm12301_vm12 = vcmp.eq.f32.partialorder %v6320_v18, 8.507059e+37  ;;  %v6327_v6 = vmul.f32 %v12289_v2, %v12229_v0  ;;  %v8660_v46 = vld [vmem:[#allocation10 + $0x37c] sm:$0xf] }
 0x4e0   :  { %v6337_v28 = vand.u32 2147483648, %v12229_v0  ;;  %v6204_v52 = vsel %vm12251_vm6, %v6203_v61, %v6199_v50  ;;  %vm12314_vm13 = vcmp.eq.f32.partialorder %v6335_v16, 8.507059e+37  ;;  %8938 = vrcp.f32 %v12285_v32  ;;  %4075 = vmatpush.bf16.msrb.mxu3 %v8196_v49 }
 0x4e1   :  { %v3579_v18 = vadd.f32 %v12122_v44, %v11362_v51  ;;  %v7007_v38 = vpack.c.bf16 %v6204_v52, %v6189_v60  ;;  %v6315_v3 = vadd.f32 %v12257_v42, %v6314_v34  ;;  %vm6317_vm14 = vweird.f32 %v12257_v42  ;;  %v8157_v60 = vld [vmem:[#allocation10 + $0x39c] sm:$0xf0]  ;;  %v7723_v34 = vld [vmem:[#allocation10 + $0x18] sm:$0xf] }
 0x4e2   :  { %v6328_v43 = vsub.f32 1.0, %v6327_v6  ;;  %v12323_v63 = vpop.eup %8934  ;;  %v6457_v21 = vand.u32 2147483648, %v12255_v27  ;;  %v8393_v61 = vmul.f32 -1.442695, %v3723_v4  ;;  %v7836_v25 = vor.u32 %v8579_v31, %v7833_v7  ;;  %vm12334_vm0 = vmor %vm6316_vm9, %vm6317_vm14  ;;  %v8570_v6 = vld [vmem:[#allocation10 + $0xac] sm:$0xf]  ;;  %v12347_v7 = vpop.f32.mrf.mxu1 }
 0x4e3   :  { %v3628_v14 = vadd.f32 %v12155_v29, %v3579_v18  ;;  %v8937_v13 = vpop.eup %8936  ;;  %7087 = vst [vmem:[#allocation11 + $0x170] sm:$0xff] %v7007_v38  ;;  %vm6332_vm15 = vweird.f32 %v12289_v2  ;;  %v6447_v44 = vmul.f32 %v12323_v63, %v12255_v27  ;;  %v6455_v16 = vand.u32 2147483647, %v12255_v27  ;;  %v7797_v31 = vld [vmem:[#allocation10 + $0xcc] sm:$0xf0] }
 0x4e4   :  { %v6329_v37 = vmul.f32 %v12289_v2, %v6328_v43  ;;  %v6338_v57 = vor.u32 1.1754944e-38, %v6337_v28  ;;  %vm6451_vm1 = vweird.f32 %v12255_v27  ;;  %v12339_v29 = vadd.f32 1.0, %v8937_v13  ;;  %4028 = vmatpush.bf16.msrb.mxu2 %v7836_v25  ;;  %vm12355_vm2 = vmor %vm6331_vm11, %vm6332_vm15  ;;  %v8628_v13 = vld [vmem:[#allocation10 + $0x278] sm:$0xf0] }
 0x4e5   :  { %8940 = vpow2.f32 %v8393_v61  ;;  %v6319_v49 = vsel %vm12334_vm0, %v12257_v42, %v6315_v3  ;;  %v6448_v40 = vsub.f32 1.0, %v6447_v44  ;;  %v8401_v50 = vmul.f32 -1.442695, %v3628_v14  ;;  %v8556_v3 = vld [vmem:[#allocation10 + $0x38] sm:$0xf0]  ;;  %v12377_v44 = vpop.f32.mrf.mxu0 }
 0x4e6   :  { %v6330_v4 = vadd.f32 %v12289_v2, %v6329_v37  ;;  %v12345_v28 = vpop.f32.mrf.mxu3  ;;  %v12349_v52 = vpop.eup %8938  ;;  %v12359_v42 = vor.u32 1.1754944e-38, %v6457_v21  ;;  %vm6466_vm3 = vweird.f32 %v12285_v32  ;;  %v6470_v38 = vand.u32 2147483647, %v12285_v32  ;;  %v8011_v14 = vld [vmem:[#allocation10 + $0x258] sm:$0xf] }
 0x4e7   :  { %8942 = vrcp.f32 %v12339_v29  ;;  %v6449_v61 = vmul.f32 %v12323_v63, %v6448_v40  ;;  %vm12368_vm4 = vcmp.eq.f32.partialorder %v6455_v16, 8.507059e+37  ;;  %v6462_v21 = vmul.f32 %v12349_v52, %v12285_v32  ;;  %v12375_v37 = vpop.f32.mrf.mxu2 }
 0x4e8   :  { %v6334_v43 = vsel %vm12355_vm2, %v12289_v2, %v6330_v4  ;;  %v6472_v25 = vand.u32 2147483648, %v12285_v32  ;;  %v6324_v2 = vsel %vm12301_vm12, %v12278_v36, %v6319_v49  ;;  %vm6452_vm5 = vweird.f32 %v12323_v63  ;;  %v8121_v4 = vld [vmem:[#allocation10 + $0x354] sm:$0xf0] }
 0x4e9   :  { %v6339_v16 = vsel %vm12314_vm13, %v6338_v57, %v6334_v43  ;;  %8944 = vpow2.f32 %v8401_v50  ;;  %v6450_v18 = vadd.f32 %v12323_v63, %v6449_v61  ;;  %v6463_v56 = vsub.f32 1.0, %v6462_v21  ;;  %vm12398_vm7 = vmor %vm6451_vm1, %vm6452_vm5 }
 0x4ea   :  { %v7012_v40 = vpack.c.bf16 %v6339_v16, %v6324_v2  ;;  %v8160_v26 = vor.u32 %v8660_v46, %v8157_v60  ;;  %v3677_v33 = vadd.f32 %v12168_v19, %v11417_v58  ;;  %v7724_v36 = vor.u32 %v8556_v3, %v7723_v34 }
 0x4eb   :  { %v8941_v17 = vpop.eup %8940  ;;  %v7800_v49 = vor.u32 %v8570_v6, %v7797_v31  ;;  %v8012_v20 = vor.u32 %v8628_v13, %v8011_v14  ;;  %v6464_v57 = vmul.f32 %v12349_v52, %v6463_v56  ;;  %vm6467_vm6 = vweird.f32 %v12349_v52  ;;  %v12418_v31 = vpop.f32.mrf.mxu1  ;;  %v8642_v14 = vld [vmem:[#allocation10 + $0x2ec] sm:$0xf]  ;;  %v8085_v13 = vld [vmem:[#allocation10 + $0x30c] sm:$0xf0] }
 0x4ec   :  { %7092 = vst [vmem:[#allocation11 + $0x194] sm:$0xff] %v7012_v40  ;;  %v12390_v50 = vadd.f32 1.0, %v8941_v17  ;;  %4076 = vmatpush.bf16.msrb.mxu3 %v8160_v26  ;;  %v8124_v43 = vor.u32 %v8651_v23, %v8121_v4  ;;  %vm12402_vm8 = vcmp.eq.f32.partialorder %v6470_v38, 8.507059e+37  ;;  %3933 = vmatpush.bf16.msra.mxu0 %v7724_v36  ;;  %v3581_v17 = vadd.f32 %v12177_v47, %v11362_v51  ;;  %vm12424_vm9 = vmor %vm6466_vm3, %vm6467_vm6  ;;  %v8552_v4 = vld [vmem:[#allocation10 + $0x1c] sm:$0xf] }
 0x4ed   :  { %v12392_v61 = vpop.eup %8942  ;;  %4029 = vmatpush.bf16.msrb.mxu2 %v7800_v49  ;;  %v3726_v26 = vadd.f32 %v12210_v12, %v3677_v33  ;;  %v7764_v56 = vor.u32 %v8561_v10, %v7761_v54  ;;  %v6454_v27 = vsel %vm12398_vm7, %v12323_v63, %v6450_v18  ;;  %v6465_v60 = vadd.f32 %v12349_v52, %v6464_v57  ;;  %v12439_v2 = vpop.f32.mrf.mxu0  ;;  %v7725_v40 = vld [vmem:[#allocation10 + $0x3c] sm:$0xf0] }
 0x4ee   :  { %v6582_v34 = vmul.f32 %v12392_v61, %v12339_v29  ;;  %8946 = vrcp.f32 %v12390_v50  ;;  %3982 = vmatpush.bf16.msra.mxu1 %v8012_v20  ;;  %v12416_v6 = vpop.f32.mrf.mxu3  ;;  %v6473_v10 = vor.u32 1.1754944e-38, %v6472_v25  ;;  %v6590_v47 = vand.u32 2147483647, %v12339_v29  ;;  %v8049_v20 = vld [vmem:[#allocation10 + $0x2c4] sm:$0xf0] }
 0x4ef   :  { %v8945_v51 = vpop.eup %8944  ;;  %v6592_v12 = vand.u32 2147483648, %v12339_v29  ;;  %v8402_v63 = vmul.f32 -1.442695, %v3726_v26  ;;  %v6469_v38 = vsel %vm12424_vm9, %v12349_v52, %v6465_v60  ;;  %v3630_v32 = vadd.f32 %v12222_v5, %v3581_v17  ;;  %3934 = vmatmul.bf16.vlgmr.msra.gmra.mxu0 %v10400_v62  ;;  %v12437_v25 = vpop.f32.mrf.mxu2  ;;  %v9283_v5 = vld [vmem:[%s14706_s12] sm:$0xff] }
 0x4f0   :  { %v6583_v3 = vsub.f32 1.0, %v6582_v34  ;;  %v12433_v21 = vadd.f32 1.0, %v8945_v51  ;;  %4077 = vmatpush.bf16.msrb.mxu3 %v8124_v43  ;;  %v6459_v16 = vsel %vm12368_vm4, %v12359_v42, %v6454_v27  ;;  %v6474_v52 = vsel %vm12402_vm8, %v6473_v10, %v6469_v38  ;;  %v8633_v42 = vld [vmem:[#allocation10 + $0x2a4] sm:$0xf]  ;;  %v8624_v34 = vld [vmem:[#allocation10 + $0x25c] sm:$0xf] }
 0x4f1   :  { %8948 = vpow2.f32 %v8402_v63  ;;  %4030 = vmatpush.bf16.msrb.mxu2 %v7764_v56  ;;  %v12449_v23 = vperm.slane %v9283_v5, 4  ;;  %3983 = vmatmul.bf16.vlgmr.msra.gmra.mxu1 %v10407_v53  ;;  %v7017_v18 = vpack.c.bf16 %v6474_v52, %v6459_v16  ;;  %v6605_v33 = vand.u32 2147483647, %v12390_v50  ;;  %v8013_v51 = vld [vmem:[#allocation10 + $0x27c] sm:$0xf0] }
 0x4f2   :  { %8950 = vrcp.f32 %v12433_v21  ;;  %v6584_v0 = vmul.f32 %v12392_v61, %v6583_v3  ;;  %v6607_v36 = vand.u32 2147483648, %v12390_v50  ;;  %v8410_v49 = vmul.f32 -1.442695, %v3630_v32  ;;  %v8620_v38 = vld [vmem:[#allocation10 + $0x238] sm:$0xf0] }
 0x4f3   :  { %7097 = vst [vmem:[#allocation11 + $0x1b8] sm:$0xff] %v7017_v18  ;;  %vm6586_vm10 = vweird.f32 %v12339_v29  ;;  %v3679_v43 = vadd.f32 %v12231_v8, %v11417_v58  ;;  %v8088_v19 = vor.u32 %v8642_v14, %v8085_v13  ;;  %v7728_v46 = vor.u32 %v8552_v4, %v7725_v40  ;;  %v12477_v3 = vpop.f32.mrf.mxu1 }
 0x4f4   :  { %v12456_v57 = vpop.eup %8946  ;;  %vm6587_vm11 = vweird.f32 %v12392_v61  ;;  %vm12462_vm12 = vcmp.eq.f32.partialorder %v6590_v47, 8.507059e+37  ;;  %v6593_v26 = vor.u32 1.1754944e-38, %v6592_v12  ;;  %v3740_v27 = vadd.f32 %v12242_v9, %v12449_v23  ;;  %v7983_v9 = vld [vmem:[#allocation10 + $0x218] sm:$0xf] }
 0x4f5   :  { %v6597_v56 = vmul.f32 %v12456_v57, %v12390_v50  ;;  %vm12470_vm13 = vcmp.eq.f32.partialorder %v6605_v33, 8.507059e+37  ;;  %8952 = vpow2.f32 %v8410_v49  ;;  %4078 = vmatpush.bf16.msrb.mxu3 %v8088_v19  ;;  %4031 = vmatpush.bf16.msrb.mxu2 %v7728_v46  ;;  %v8052_v58 = vor.u32 %v8633_v42, %v8049_v20  ;;  %vm12496_vm15 = vmor %vm6586_vm10, %vm6587_vm11  ;;  %v8271_v42 = vld [vmem:[#allocation10 + $0x458] sm:$0xf]  ;;  %v12505_v49 = vpop.f32.mrf.mxu0 }
 0x4f6   :  { %v3728_v8 = vadd.f32 %v12276_v59, %v3679_v43  ;;  %v6585_v10 = vadd.f32 %v12392_v61, %v6584_v0  ;;  %v6608_v12 = vor.u32 1.1754944e-38, %v6607_v36  ;;  %v3789_v63 = vadd.f32 %v12287_v48, %v3740_v27  ;;  %v12485_v52 = vpop.f32.mrf.mxu3  ;;  %v8692_v0 = vld [vmem:[#allocation10 + $0x478] sm:$0xf0] }
 0x4f7   :  { %v8949_v54 = vpop.eup %8948  ;;  %v6598_v47 = vsub.f32 1.0, %v6597_v56  ;;  %v12483_v16 = vperm.slane %v9283_v5, 5  ;;  %v7984_v59 = vor.u32 %v8620_v38, %v7983_v9  ;;  %vm6602_vm14 = vweird.f32 %v12456_v57  ;;  %v12503_v36 = vpop.f32.mrf.mxu2 }
 0x4f8   :  { %v12479_v32 = vpop.eup %8950  ;;  %v12481_v14 = vadd.f32 1.0, %v8949_v54  ;;  %v8411_v13 = vmul.f32 -1.442695, %v3728_v8  ;;  %4032 = vmatmul.bf16.vlgmr.msrb.gmra.mxu2 %v10400_v62  ;;  %v8277_v40 = vmul.f32 -1.442695, %v3789_v63  ;;  %vm6601_vm0 = vweird.f32 %v12390_v50 }
 0x4f9   :  { %v6599_v4 = vmul.f32 %v12456_v57, %v6598_v47  ;;  %v6717_v48 = vmul.f32 %v12479_v32, %v12433_v21  ;;  %v6725_v18 = vand.u32 2147483647, %v12433_v21  ;;  %4079 = vmatpush.bf16.msrb.mxu3 %v8052_v58  ;;  %v8016_v33 = vor.u32 %v8624_v34, %v8013_v51  ;;  %4122 = vmatpush.bf16.msrb.mxu0 %v7984_v59  ;;  %vm6603_vm1 = vmor %vm6601_vm0, %vm6602_vm14 }
 0x4fa   :  { %8954 = vrcp.f32 %v12481_v14  ;;  %v6589_v29 = vsel %vm12496_vm15, %v12392_v61, %v6585_v10  ;;  %v6727_v46 = vand.u32 2147483648, %v12433_v21  ;;  %v3838_v56 = vadd.f32 %v12308_v22, %v12483_v16 }
 0x4fb   :  { %v6600_v20 = vadd.f32 %v12456_v57, %v6599_v4  ;;  %v6718_v43 = vsub.f32 1.0, %v6717_v48  ;;  %8956 = vpow2.f32 %v8411_v13  ;;  %v8953_v19 = vpop.eup %8952  ;;  %v3742_v27 = vadd.f32 %v12310_v35, %v12449_v23 }
 0x4fc   :  { %8958 = vpow2.f32 %v8277_v40  ;;  %v12522_v8 = vadd.f32 1.0, %v8953_v19  ;;  %v8272_v34 = vor.u32 %v8692_v0, %v8271_v42  ;;  %v6594_v50 = vsel %vm12462_vm12, %v6593_v26, %v6589_v29 }
 0x4fd   :  { %v6604_v61 = vsel %vm6603_vm1, %v12456_v57, %v6600_v20  ;;  %v6719_v58 = vmul.f32 %v12479_v32, %v6718_v43  ;;  %4080 = vmatpush.bf16.msrb.mxu3 %v8016_v33  ;;  %v3887_v54 = vadd.f32 %v12345_v28, %v3838_v56  ;;  %v3791_v35 = vadd.f32 %v12347_v7, %v3742_v27  ;;  %v12542_v7 = vpop.f32.mrf.mxu1  ;;  %v12554_v5 = vpop.f32.mrf.mxu0  ;;  %v8611_v20 = vld [vmem:[#allocation10 + $0x1f0] sm:$0xf0] }
 0x4fe   :  { %v6609_v51 = vsel %vm12470_vm13, %v6608_v12, %v6604_v61  ;;  %8960 = vrcp.f32 %v12522_v8  ;;  %4171 = vmatpush.bf16.msrb.mxu1 %v8272_v34  ;;  %vm6721_vm2 = vweird.f32 %v12433_v21  ;;  %vm12532_vm3 = vcmp.eq.f32.partialorder %v6725_v18, 8.507059e+37  ;;  %v12550_v59 = vpop.f32.mrf.mxu3 }
 0x4ff   :  { %v7022_v22 = vpack.c.bf16 %v6609_v51, %v6594_v50  ;;  %v8278_v17 = vmul.f32 -1.442695, %v3887_v54  ;;  %3939 = vmatmul.bf16.gmra.mxu0 %v10416_v45  ;;  %v6720_v28 = vadd.f32 %v12479_v32, %v6719_v58  ;;  %vm6722_vm4 = vweird.f32 %v12479_v32  ;;  %v12568_v42 = vpop.f32.mrf.mxu2 }
 0x500   :  { %v8955_v57 = vpop.eup %8954  ;;  %v6728_v60 = vor.u32 1.1754944e-38, %v6727_v46  ;;  %4081 = vmatmul.bf16.vlgmr.msrb.gmra.mxu3 %v10407_v53  ;;  %v6740_v63 = vand.u32 2147483647, %v12481_v14  ;;  %v6742_v9 = vand.u32 2147483648, %v12481_v14  ;;  %v3840_v13 = vadd.f32 %v12375_v37, %v12483_v16  ;;  %vm12560_vm5 = vmor %vm6721_vm2, %vm6722_vm4 }
 0x501   :  { %v8957_v26 = vpop.eup %8956  ;;  %7102 = vst [vmem:[#allocation11 + $0x1dc] sm:$0xff] %v7022_v22  ;;  %v6732_v47 = vmul.f32 %v8955_v57, %v12481_v14  ;;  %3988 = vmatmul.bf16.gmra.mxu1 %v10423_v41  ;;  %8962 = vpow2.f32 %v8278_v17  ;;  %v8286_v40 = vmul.f32 -1.442695, %v3791_v35  ;;  %vm6736_vm6 = vweird.f32 %v12481_v14 }
 0x502   :  { %v8959_v12 = vpop.eup %8958  ;;  %v12546_v38 = vadd.f32 1.0, %v8957_v26  ;;  %v6862_v37 = vand.u32 2147483648, %v12522_v8  ;;  %v3889_v33 = vadd.f32 %v12416_v6, %v3840_v13  ;;  %v6724_v21 = vsel %vm12560_vm5, %v12479_v32, %v6720_v28 }
 0x503   :  { %v6733_v4 = vsub.f32 1.0, %v6732_v47  ;;  %v12552_v48 = vadd.f32 1.0, %v8959_v12  ;;  %vm6737_vm7 = vweird.f32 %v8955_v57  ;;  %vm12576_vm8 = vcmp.eq.f32.partialorder %v6740_v63, 8.507059e+37 }
 0x504   :  { %8964 = vrcp.f32 %v12546_v38  ;;  %v12570_v0 = vpop.eup %8960  ;;  %v6743_v43 = vor.u32 1.1754944e-38, %v6742_v9  ;;  %v3745_v19 = vadd.f32 %v12377_v44, %v12449_v23  ;;  %vm6856_vm9 = vweird.f32 %v12522_v8  ;;  %vm6738_vm10 = vmor %vm6736_vm6, %vm6737_vm7 }
 0x505   :  { %v6734_v29 = vmul.f32 %v8955_v57, %v6733_v4  ;;  %8966 = vrcp.f32 %v12552_v48  ;;  %v6852_v6 = vmul.f32 %v12570_v0, %v12522_v8  ;;  %v6860_v32 = vand.u32 2147483647, %v12522_v8 }
 0x506   :  { %8968 = vpow2.f32 %v8286_v40  ;;  %v6729_v56 = vsel %vm12532_vm3, %v6728_v60, %v6724_v21  ;;  %v8287_v61 = vmul.f32 -1.442695, %v3889_v33  ;;  %v3794_v58 = vadd.f32 %v12418_v31, %v3745_v19  ;;  %v12612_v60 = vpop.f32.mrf.mxu1  ;;  %v12619_v9 = vpop.f32.mrf.mxu3 }
 0x507   :  { %v6735_v46 = vadd.f32 %v8955_v57, %v6734_v29  ;;  %v6853_v27 = vsub.f32 1.0, %v6852_v6  ;;  %v8963_v34 = vpop.eup %8962  ;;  %v12591_v51 = vor.u32 1.1754944e-38, %v6862_v37  ;;  %vm6871_vm11 = vweird.f32 %v12546_v38  ;;  %v12627_v37 = vpop.f32.mrf.mxu0  ;;  %v7947_v29 = vld [vmem:[#allocation10 + $0x1d0] sm:$0xf] }
 0x508   :  { %v6875_v44 = vand.u32 2147483647, %v12546_v38  ;;  %4037 = vmatmul.bf16.gmra.mxu2 %v10416_v45  ;;  %v12601_v35 = vadd.f32 1.0, %v8963_v34  ;;  %8970 = vpow2.f32 %v8287_v61  ;;  %vm12605_vm12 = vcmp.eq.f32.partialorder %v6860_v32, 8.507059e+37  ;;  %v8235_v32 = vld [vmem:[#allocation10 + $0x410] sm:$0xf] }
 0x509   :  { %v6739_v50 = vsel %vm6738_vm10, %v8955_v57, %v6735_v46  ;;  %v6854_v22 = vmul.f32 %v12570_v0, %v6853_v27  ;;  %v6877_v26 = vand.u32 2147483648, %v12546_v38  ;;  %v8295_v28 = vmul.f32 -1.442695, %v3794_v58 }
 0x50a   :  { %v12596_v54 = vpop.eup %8964  ;;  %v6744_v14 = vsel %vm12576_vm8, %v6743_v43, %v6739_v50  ;;  %v4865_v12 = vand.u32 2147483647, %v12552_v48  ;;  %v4867_v63 = vand.u32 2147483648, %v12552_v48  ;;  %8972 = vrcp.f32 %v12601_v35  ;;  %v12632_v43 = vpop.f32.mrf.mxu2 }
 0x50b   :  { %v12603_v31 = vpop.eup %8966  ;;  %v7027_v57 = vpack.c.bf16 %v6744_v14, %v6729_v56  ;;  %v6867_v17 = vmul.f32 %v12596_v54, %v12546_v38  ;;  %v6855_v4 = vadd.f32 %v12570_v0, %v6854_v22  ;;  %vm6857_vm13 = vweird.f32 %v12570_v0  ;;  %v8683_v56 = vld [vmem:[#allocation10 + $0x430] sm:$0xf0] }
 0x50c   :  { %v4857_v47 = vmul.f32 %v12603_v31, %v12552_v48  ;;  %v8969_v13 = vpop.eup %8968  ;;  %vm12623_vm14 = vcmp.eq.f32.partialorder %v6875_v44, 8.507059e+37  ;;  %vm4861_vm15 = vweird.f32 %v12552_v48  ;;  %8974 = vpow2.f32 %v8295_v28  ;;  %vm12642_vm1 = vmor %vm6856_vm9, %vm6857_vm13 }
 0x50d   :  { %7107 = vst [vmem:[#allocation11 + $0x200] sm:$0xff] %v7027_v57  ;;  %v6868_v40 = vsub.f32 1.0, %v6867_v17  ;;  %v12630_v21 = vadd.f32 1.0, %v8969_v13  ;;  %vm6872_vm0 = vweird.f32 %v12596_v54  ;;  %v6878_v19 = vor.u32 1.1754944e-38, %v6877_v26 }
 0x50e   :  { %v4858_v33 = vsub.f32 1.0, %v4857_v47  ;;  %v3843_v46 = vadd.f32 %v12437_v25, %v12483_v16  ;;  %v8971_v27 = vpop.eup %8970  ;;  %v4868_v34 = vor.u32 1.1754944e-38, %v4867_v63  ;;  %v3747_v50 = vadd.f32 %v12439_v2, %v12449_v23  ;;  %vm6873_vm3 = vmor %vm6871_vm11, %vm6872_vm0 }
 0x50f   :  { %v6869_v6 = vmul.f32 %v12596_v54, %v6868_v40  ;;  %8976 = vrcp.f32 %v12630_v21  ;;  %3944 = vmatmul.bf16.gmra.mxu0 %v10432_v15  ;;  %v6859_v25 = vsel %vm12642_vm1, %v12570_v0, %v6855_v4  ;;  %vm12655_vm2 = vcmp.eq.f32.partialorder %v4865_v12, 8.507059e+37  ;;  %v12684_v40 = vpop.f32.mrf.mxu1 }
 0x510   :  { %v4859_v58 = vmul.f32 %v12603_v31, %v4858_v33  ;;  %v12659_v14 = vadd.f32 1.0, %v8971_v27  ;;  %v7948_v22 = vor.u32 %v8611_v20, %v7947_v29  ;;  %4086 = vmatmul.bf16.gmra.mxu3 %v10423_v41  ;;  %v8973_v2 = vpop.eup %8972  ;;  %vm4862_vm4 = vweird.f32 %v12603_v31 }
 0x511   :  { %v6870_v8 = vadd.f32 %v12596_v54, %v6869_v6  ;;  %3993 = vmatmul.bf16.gmra.mxu1 %v10439_v39  ;;  %v8236_v0 = vor.u32 %v8683_v56, %v8235_v32  ;;  %v3892_v57 = vadd.f32 %v12485_v52, %v3843_v46  ;;  %v3845_v17 = vadd.f32 %v12503_v36, %v12483_v16  ;;  %vm12692_vm6 = vmor %vm4861_vm15, %vm4862_vm4  ;;  %v12700_v6 = vpop.f32.mrf.mxu3  ;;  %v12707_v32 = vpop.f32.mrf.mxu0 }
 0x512   :  { %v4860_v28 = vadd.f32 %v12603_v31, %v4859_v58  ;;  %v4872_v47 = vmul.f32 %v8973_v2, %v12601_v35  ;;  %v4880_v12 = vand.u32 2147483647, %v12601_v35  ;;  %4123 = vmatpush.bf16.msrb.mxu0 %v7948_v22  ;;  %v8975_v63 = vpop.eup %8974  ;;  %v6864_v38 = vsel %vm12605_vm12, %v12591_v51, %v6859_v25 }
 0x513   :  { %v6874_v26 = vsel %vm6873_vm3, %v12596_v54, %v6870_v8  ;;  %v4882_v13 = vand.u32 2147483648, %v12601_v35  ;;  %8978 = vrcp.f32 %v12659_v14  ;;  %4172 = vmatpush.bf16.msrb.mxu1 %v8236_v0  ;;  %vm4876_vm5 = vweird.f32 %v12601_v35 }
 0x514   :  { %v6879_v52 = vsel %vm12623_vm14, %v6878_v19, %v6874_v26  ;;  %v4873_v54 = vsub.f32 1.0, %v4872_v47  ;;  %v5002_v4 = vand.u32 2147483648, %v12630_v21  ;;  %v5000_v10 = vand.u32 2147483647, %v12630_v21 }
 0x515   :  { %v7032_v36 = vpack.c.bf16 %v6879_v52, %v6864_v38  ;;  %v12686_v33 = vpop.eup %8976  ;;  %v12697_v18 = vadd.f32 1.0, %v8975_v63  ;;  %v8296_v29 = vmul.f32 -1.442695, %v3892_v57  ;;  %v3796_v20 = vadd.f32 %v12477_v3, %v3747_v50  ;;  %v12715_v3 = vpop.f32.mrf.mxu2  ;;  %v8602_v63 = vld [vmem:[#allocation10 + $0x1a8] sm:$0xf0] }
 0x516   :  { %v4864_v19 = vsel %vm12692_vm6, %v12603_v31, %v4860_v28  ;;  %v4874_v46 = vmul.f32 %v8973_v2, %v4873_v54  ;;  %vm4877_vm7 = vweird.f32 %v8973_v2  ;;  %v4992_v48 = vmul.f32 %v12686_v33, %v12630_v21  ;;  %v8199_v38 = vld [vmem:[#allocation10 + $0x3c8] sm:$0xf]  ;;  %v8674_v54 = vld [vmem:[#allocation10 + $0x3e8] sm:$0xf0] }
 0x517   :  { %7112 = vst [vmem:[#allocation11 + $0x224] sm:$0xff] %v7032_v36  ;;  %vm12709_vm8 = vcmp.eq.f32.partialorder %v4880_v12, 8.507059e+37  ;;  %v4883_v27 = vor.u32 1.1754944e-38, %v4882_v13  ;;  %vm4996_vm9 = vweird.f32 %v12630_v21  ;;  %8980 = vrcp.f32 %v12697_v18  ;;  %vm4878_vm10 = vmor %vm4876_vm5, %vm4877_vm7 }
 0x518   :  { %v4875_v61 = vadd.f32 %v8973_v2, %v4874_v46  ;;  %v4993_v31 = vsub.f32 1.0, %v4992_v48  ;;  %v12717_v58 = vor.u32 1.1754944e-38, %v5002_v4  ;;  %8982 = vpow2.f32 %v8296_v29  ;;  %4042 = vmatmul.bf16.gmra.mxu2 %v10432_v15  ;;  %v12753_v29 = vpop.f32.mrf.mxu1 }
 0x519   :  { %v12720_v50 = vpop.eup %8978  ;;  %v4869_v25 = vsel %vm12655_vm2, %v4868_v34, %v4864_v19  ;;  %vm5011_vm11 = vweird.f32 %v12659_v14  ;;  %v8304_v8 = vmul.f32 -1.442695, %v3796_v20  ;;  %v3894_v22 = vadd.f32 %v12550_v59, %v3845_v17 }
 0x51a   :  { %v4879_v0 = vsel %vm4878_vm10, %v8973_v2, %v4875_v61  ;;  %v4994_v57 = vmul.f32 %v12686_v33, %v4993_v31  ;;  %vm12730_vm12 = vcmp.eq.f32.partialorder %v5000_v10, 8.507059e+37  ;;  %v5007_v44 = vmul.f32 %v12720_v50, %v12659_v14  ;;  %v7911_v2 = vld [vmem:[#allocation10 + $0x188] sm:$0xf] }
 0x51b   :  { %v3750_v34 = vadd.f32 %v12505_v49, %v12449_v23  ;;  %v4884_v35 = vsel %vm12709_vm8, %v4883_v27, %v4879_v0  ;;  %vm4997_vm13 = vweird.f32 %v12686_v33  ;;  %8984 = vpow2.f32 %v8304_v8  ;;  %v12767_v27 = vpop.f32.mrf.mxu3 }
 0x51c   :  { %v8305_v59 = vmul.f32 -1.442695, %v3894_v22  ;;  %v6958_v17 = vpack.c.bf16 %v4884_v35, %v4869_v25  ;;  %v4995_v28 = vadd.f32 %v12686_v33, %v4994_v57  ;;  %v5008_v47 = vsub.f32 1.0, %v5007_v44  ;;  %vm12759_vm15 = vmor %vm4996_vm9, %vm4997_vm13  ;;  %v12776_v25 = vpop.f32.mrf.mxu0 }
 0x51d   :  { %v3799_v12 = vadd.f32 %v12542_v7, %v3750_v34  ;;  %v12743_v52 = vpop.eup %8980  ;;  %v5015_v49 = vand.u32 2147483647, %v12659_v14  ;;  %v5017_v13 = vand.u32 2147483648, %v12659_v14  ;;  %v7912_v36 = vor.u32 %v8602_v63, %v7911_v2  ;;  %v12784_v22 = vpop.f32.mrf.mxu2 }
 0x51e   :  { %8986 = vpow2.f32 %v8305_v59  ;;  %v8983_v4 = vpop.eup %8982  ;;  %7038 = vst [vmem:[#allocation11 + $0x10] sm:$0xff] %v6958_v17  ;;  %v5009_v51 = vmul.f32 %v12720_v50, %v5008_v47  ;;  %vm5012_vm14 = vweird.f32 %v12720_v50  ;;  %v5127_v7 = vmul.f32 %v12743_v52, %v12697_v18 }
 0x51f   :  { %v3848_v10 = vadd.f32 %v12568_v42, %v12483_v16  ;;  %v12763_v19 = vadd.f32 1.0, %v8983_v4  ;;  %v8313_v46 = vmul.f32 -1.442695, %v3799_v12  ;;  %4124 = vmatpush.bf16.msrb.mxu0 %v7912_v36  ;;  %v3752_v48 = vadd.f32 %v12554_v5, %v12449_v23  ;;  %vm5013_vm0 = vmor %vm5011_vm11, %vm5012_vm14 }
 0x520   :  { %v8200_v56 = vor.u32 %v8674_v54, %v8199_v38  ;;  %v4999_v42 = vsel %vm12759_vm15, %v12686_v33, %v4995_v28  ;;  %v5010_v21 = vadd.f32 %v12720_v50, %v5009_v51  ;;  %v5128_v61 = vsub.f32 1.0, %v5127_v7  ;;  %4091 = vmatmul.bf16.gmra.mxu3 %v10439_v39  ;;  %3949 = vmatmul.bf16.gmra.mxu0 %v10448_v1  ;;  %v12802_v26 = vpop.f32.mrf.mxu1  ;;  %v7875_v54 = vld [vmem:[#allocation10 + $0x140] sm:$0xf] }
 0x521   :  { %v3897_v31 = vadd.f32 %v12619_v9, %v3848_v10  ;;  %v8985_v8 = vpop.eup %8984  ;;  %vm5016_vm1 = vcmp.eq.f32.partialorder %v5015_v49, 8.507059e+37  ;;  %v5018_v5 = vor.u32 1.1754944e-38, %v5017_v13  ;;  %8988 = vrcp.f32 %v12763_v19  ;;  %3998 = vmatmul.bf16.gmra.mxu1 %v10455_v24 }
 0x522   :  { %4173 = vmatpush.bf16.msrb.mxu1 %v8200_v56  ;;  %v3801_v33 = vadd.f32 %v12612_v60, %v3752_v48  ;;  %v5014_v9 = vsel %vm5013_vm0, %v12720_v50, %v5010_v21  ;;  %v5129_v0 = vmul.f32 %v12743_v52, %v5128_v61  ;;  %v12788_v57 = vadd.f32 1.0, %v8985_v8 }
 0x523   :  { %8990 = vpow2.f32 %v8313_v46  ;;  %v5004_v44 = vsel %vm12730_vm12, %v12717_v58, %v4999_v42  ;;  %v5019_v34 = vsel %vm5016_vm1, %v5018_v5, %v5014_v9  ;;  %v8314_v35 = vmul.f32 -1.442695, %v3897_v31  ;;  %v12826_v7 = vpop.f32.mrf.mxu3 }
 0x524   :  { %v8987_v14 = vpop.eup %8986  ;;  %v6963_v59 = vpack.c.bf16 %v5019_v34, %v5004_v44  ;;  %v5135_v60 = vand.u32 2147483647, %v12697_v18  ;;  %v5137_v2 = vand.u32 2147483648, %v12697_v18  ;;  %8992 = vrcp.f32 %v12788_v57  ;;  %v12828_v10 = vpop.f32.mrf.mxu0 }
 0x525   :  { %v12797_v50 = vadd.f32 1.0, %v8987_v14  ;;  %8994 = vpow2.f32 %v8314_v35  ;;  %v5130_v17 = vadd.f32 %v12743_v52, %v5129_v0  ;;  %vm5131_vm2 = vweird.f32 %v12697_v18  ;;  %v12845_v31 = vpop.f32.mrf.mxu2 }
 0x526   :  { %7043 = vst [vmem:[#allocation11 + $0x34] sm:$0xff] %v6963_v59  ;;  %vm5132_vm3 = vweird.f32 %v12743_v52  ;;  %v8322_v58 = vmul.f32 -1.442695, %v3801_v33  ;;  %v5150_v47 = vand.u32 2147483647, %v12763_v19  ;;  %v5152_v12 = vand.u32 2147483648, %v12763_v19 }
 0x527   :  { %v8989_v28 = vpop.eup %8988  ;;  %8996 = vrcp.f32 %v12797_v50  ;;  %v3850_v63 = vadd.f32 %v12632_v43, %v12483_v16  ;;  %vm12809_vm4 = vcmp.eq.f32.partialorder %v5135_v60, 8.507059e+37  ;;  %v5138_v13 = vor.u32 1.1754944e-38, %v5137_v2  ;;  %vm12818_vm6 = vmor %vm5131_vm2, %vm5132_vm3 }
 0x528   :  { %v5142_v36 = vmul.f32 %v8989_v28, %v12763_v19  ;;  %vm5146_vm5 = vweird.f32 %v12763_v19  ;;  %4047 = vmatmul.bf16.gmra.mxu2 %v10448_v1  ;;  %v5270_v43 = vand.u32 2147483647, %v12788_v57  ;;  %8998 = vpow2.f32 %v8322_v58 }
 0x529   :  { %v8991_v38 = vpop.eup %8990  ;;  %v3899_v51 = vadd.f32 %v12700_v6, %v3850_v63  ;;  %v5134_v18 = vsel %vm12818_vm6, %v12743_v52, %v5130_v17  ;;  %v5272_v48 = vand.u32 2147483648, %v12788_v57  ;;  %v3755_v56 = vadd.f32 %v12627_v37, %v12449_v23  ;;  %v12867_v17 = vpop.f32.mrf.mxu1 }
 0x52a   :  { %v12823_v4 = vadd.f32 1.0, %v8991_v38  ;;  %v12830_v20 = vpop.eup %8992  ;;  %v5143_v46 = vsub.f32 1.0, %v5142_v36  ;;  %vm12838_vm7 = vcmp.eq.f32.partialorder %v5150_v47, 8.507059e+37  ;;  %v5153_v6 = vor.u32 1.1754944e-38, %v5152_v12 }
 0x52b   :  { %v8995_v42 = vpop.eup %8994  ;;  %v5262_v61 = vmul.f32 %v12830_v20, %v12788_v57  ;;  %vm5147_vm8 = vweird.f32 %v8989_v28  ;;  %vm5266_vm9 = vweird.f32 %v12788_v57  ;;  %v3804_v8 = vadd.f32 %v12684_v40, %v3755_v56 }
 0x52c   :  { %9000 = vrcp.f32 %v12823_v4  ;;  %v5144_v52 = vmul.f32 %v8989_v28, %v5143_v46  ;;  %v5139_v5 = vsel %vm12809_vm4, %v5138_v13, %v5134_v18  ;;  %v12853_v9 = vadd.f32 1.0, %v8995_v42  ;;  %vm5148_vm11 = vmor %vm5146_vm5, %vm5147_vm8  ;;  %v12902_v56 = vpop.f32.mrf.mxu0 }
 0x52d   :  { %v12849_v37 = vpop.eup %8996  ;;  %v5263_v33 = vsub.f32 1.0, %v5262_v61  ;;  %v8323_v0 = vmul.f32 -1.442695, %v3899_v51  ;;  %vm12855_vm10 = vcmp.eq.f32.partialorder %v5270_v43, 8.507059e+37  ;;  %v5273_v34 = vor.u32 1.1754944e-38, %v5272_v48  ;;  %v12900_v48 = vpop.f32.mrf.mxu3 }
 0x52e   :  { %v5145_v14 = vadd.f32 %v8989_v28, %v5144_v52  ;;  %v5277_v35 = vmul.f32 %v12849_v37, %v12797_v50  ;;  %v8999_v59 = vpop.eup %8998  ;;  %v5285_v60 = vand.u32 2147483647, %v12797_v50  ;;  %v5287_v2 = vand.u32 2147483648, %v12797_v50  ;;  %v8593_v43 = vld [vmem:[#allocation10 + $0x160] sm:$0xf0] }
 0x52f   :  { %v5264_v40 = vmul.f32 %v12830_v20, %v5263_v33  ;;  %9002 = vrcp.f32 %v12853_v9  ;;  %vm5267_vm12 = vweird.f32 %v12830_v20  ;;  %v8331_v12 = vmul.f32 -1.442695, %v3804_v8  ;;  %v12912_v8 = vpop.f32.mrf.mxu2 }
 0x530   :  { %v5149_v58 = vsel %vm5148_vm11, %v8989_v28, %v5145_v14  ;;  %v5278_v47 = vsub.f32 1.0, %v5277_v35  ;;  %4096 = vmatmul.bf16.gmra.mxu3 %v10455_v24  ;;  %3954 = vmatmul.bf16.gmra.mxu0 %v10464_v30  ;;  %v12877_v49 = vadd.f32 1.0, %v8999_v59  ;;  %9004 = vpow2.f32 %v8323_v0  ;;  %vm12888_vm14 = vmor %vm5266_vm9, %vm5267_vm12  ;;  %v8163_v14 = vld [vmem:[#allocation10 + $0x380] sm:$0xf]  ;;  %v8665_v35 = vld [vmem:[#allocation10 + $0x3a0] sm:$0xf0] }
 0x531   :  { %v5154_v63 = vsel %vm12838_vm7, %v5153_v6, %v5149_v58  ;;  %v5265_v38 = vadd.f32 %v12830_v20, %v5264_v40  ;;  %vm5282_vm13 = vweird.f32 %v12849_v37  ;;  %4003 = vmatmul.bf16.gmra.mxu1 %v10471_v11  ;;  %vm5281_vm15 = vweird.f32 %v12797_v50 }
 0x532   :  { %v12872_v19 = vpop.eup %9000  ;;  %v6968_v13 = vpack.c.bf16 %v5154_v63, %v5139_v5  ;;  %v5279_v28 = vmul.f32 %v12849_v37, %v5278_v47  ;;  %vm12893_vm0 = vcmp.eq.f32.partialorder %v5285_v60, 8.507059e+37  ;;  %9006 = vrcp.f32 %v12877_v49  ;;  %vm5283_vm1 = vmor %vm5281_vm15, %vm5282_vm13 }
 0x533   :  { %v5397_v36 = vmul.f32 %v12872_v19, %v12823_v4  ;;  %v3853_v46 = vadd.f32 %v12715_v3, %v12483_v16  ;;  %v5269_v57 = vsel %vm12888_vm14, %v12830_v20, %v5265_v38  ;;  %v5288_v42 = vor.u32 1.1754944e-38, %v5287_v2 }
 0x534   :  { %7048 = vst [vmem:[#allocation11 + $0x58] sm:$0xff] %v6968_v13  ;;  %v5280_v50 = vadd.f32 %v12849_v37, %v5279_v28  ;;  %v5405_v61 = vand.u32 2147483647, %v12823_v4  ;;  %v5407_v3 = vand.u32 2147483648, %v12823_v4  ;;  %9008 = vpow2.f32 %v8331_v12  ;;  %v12934_v28 = vpop.f32.mrf.mxu1 }
 0x535   :  { %v5398_v21 = vsub.f32 1.0, %v5397_v36  ;;  %v9003_v6 = vpop.eup %9002  ;;  %v7876_v52 = vor.u32 %v8593_v43, %v7875_v54  ;;  %v5420_v0 = vand.u32 2147483647, %v12853_v9  ;;  %v5274_v40 = vsel %vm12855_vm10, %v5273_v34, %v5269_v57  ;;  %v12956_v57 = vpop.f32.mrf.mxu0 }
 0x536   :  { %v5284_v5 = vsel %vm5283_vm1, %v12849_v37, %v5280_v50  ;;  %v5412_v33 = vmul.f32 %v9003_v6, %v12853_v9  ;;  %v9005_v59 = vpop.eup %9004  ;;  %vm5402_vm2 = vweird.f32 %v12872_v19  ;;  %v3757_v37 = vadd.f32 %v12707_v32, %v12449_v23 }
 0x537   :  { %v5399_v20 = vmul.f32 %v12872_v19, %v5398_v21  ;;  %v5289_v60 = vsel %vm12893_vm0, %v5288_v42, %v5284_v5  ;;  %4125 = vmatpush.bf16.msrb.mxu0 %v7876_v52  ;;  %v12926_v12 = vadd.f32 1.0, %v9005_v59  ;;  %v5422_v44 = vand.u32 2147483648, %v12853_v9  ;;  %v7839_v59 = vld [vmem:[#allocation10 + $0xf8] sm:$0xf] }
 0x538   :  { %v6973_v2 = vpack.c.bf16 %v5289_v60, %v5274_v40  ;;  %v5413_v47 = vsub.f32 1.0, %v5412_v33  ;;  %4052 = vmatmul.bf16.gmra.mxu2 %v10464_v30  ;;  %v12929_v63 = vpop.eup %9006  ;;  %v8164_v34 = vor.u32 %v8665_v35, %v8163_v14  ;;  %v3902_v38 = vadd.f32 %v12767_v27, %v3853_v46  ;;  %v12968_v33 = vpop.f32.mrf.mxu2  ;;  %v8584_v40 = vld [vmem:[#allocation10 + $0x118] sm:$0xf0] }
 0x539   :  { %v5400_v58 = vadd.f32 %v12872_v19, %v5399_v20  ;;  %v3806_v13 = vadd.f32 %v12753_v29, %v3757_v37  ;;  %vm5401_vm3 = vweird.f32 %v12823_v4  ;;  %vm5417_vm4 = vweird.f32 %v9003_v6 }
 0x53a   :  { %7053 = vst [vmem:[#allocation11 + $0x7c] sm:$0xff] %v6973_v2  ;;  %v5414_v32 = vmul.f32 %v9003_v6, %v5413_v47  ;;  %v5532_v36 = vmul.f32 %v12929_v63, %v12877_v49  ;;  %v9009_v54 = vpop.eup %9008  ;;  %vm12941_vm5 = vmor %vm5401_vm3, %vm5402_vm2  ;;  %vm12945_vm6 = vcmp.eq.f32.partialorder %v5405_v61, 8.507059e+37  ;;  %v5408_v29 = vor.u32 1.1754944e-38, %v5407_v3  ;;  %4174 = vmatpush.bf16.msrb.mxu1 %v8164_v34  ;;  %v12958_v61 = vpop.f32.mrf.mxu3  ;;  %v8127_v2 = vld [vmem:[#allocation10 + $0x338] sm:$0xf] }
 0x53b   :  { %vm5416_vm7 = vweird.f32 %v12853_v9  ;;  %9010 = vrcp.f32 %v12926_v12  ;;  %v5404_v4 = vsel %vm12941_vm5, %v12872_v19, %v5400_v58  ;;  %v12954_v46 = vadd.f32 1.0, %v9009_v54  ;;  %v14945_v58 = vld [vmem:[#allocation16_spill] sm:$0xff] }
 0x53c   :  { %v5415_v51 = vadd.f32 %v9003_v6, %v5414_v32  ;;  %v5533_v18 = vsub.f32 1.0, %v5532_v36  ;;  %vm5418_vm8 = vmor %vm5416_vm7, %vm5417_vm4  ;;  %vm5421_vm9 = vcmp.eq.f32.partialorder %v5420_v0, 8.507059e+37  ;;  %v5423_v50 = vor.u32 1.1754944e-38, %v5422_v44  ;;  %v12987_v47 = vpop.f32.mrf.mxu1 }
 0x53d   :  { %v8332_v42 = vmul.f32 -1.442695, %v3902_v38  ;;  %v8340_v21 = vmul.f32 -1.442695, %v3806_v13  ;;  %v5540_v3 = vand.u32 2147483647, %v12877_v49  ;;  %9012 = vrcp.f32 %v12954_v46 }
 0x53e   :  { %v5419_v9 = vsel %vm5418_vm8, %v9003_v6, %v5415_v51  ;;  %v3855_v19 = vadd.f32 %v12784_v22, %v12483_v16  ;;  %v5409_v52 = vsel %vm12945_vm6, %v5408_v29, %v5404_v4  ;;  %v3760_v20 = vadd.f32 %v12776_v25, %v12449_v23  ;;  %v8656_v13 = vld [vmem:[#allocation10 + $0x358] sm:$0xf0] }
 0x53f   :  { %v5424_v5 = vsel %vm5421_vm9, %v5423_v50, %v5419_v9  ;;  %v5534_v14 = vmul.f32 %v12929_v63, %v5533_v18  ;;  %9014 = vpow2.f32 %v8332_v42  ;;  %vm5536_vm10 = vweird.f32 %v12877_v49  ;;  %v13002_v50 = vpop.f32.mrf.mxu0 }
 0x540   :  { %v6978_v0 = vpack.c.bf16 %v5424_v5, %v5409_v52  ;;  %v3904_v6 = vadd.f32 %v12826_v7, %v3855_v19  ;;  %4101 = vmatmul.bf16.gmra.mxu3 %v10471_v11  ;;  %3959 = vmatmul.bf16.gmra.mxu0 %v10480_v55  ;;  %v5542_v35 = vand.u32 2147483648, %v12877_v49  ;;  %9016 = vpow2.f32 %v8340_v21 }
 0x541   :  { %v12974_v22 = vpop.eup %9010  ;;  %v3809_v25 = vadd.f32 %v12802_v26, %v3760_v20  ;;  %vm5537_vm11 = vweird.f32 %v12929_v63  ;;  %vm12980_vm12 = vcmp.eq.f32.partialorder %v5540_v3, 8.507059e+37  ;;  %4008 = vmatmul.bf16.gmra.mxu1 %v14945_v58  ;;  %v5555_v26 = vand.u32 2147483647, %v12926_v12 }
 0x542   :  { %7058 = vst [vmem:[#allocation11 + $0xa0] sm:$0xff] %v6978_v0  ;;  %v5547_v60 = vmul.f32 %v12974_v22, %v12926_v12  ;;  %v8341_v37 = vmul.f32 -1.442695, %v3904_v6  ;;  %v3858_v34 = vadd.f32 %v12845_v31, %v12483_v16  ;;  %v7840_v38 = vor.u32 %v8584_v40, %v7839_v59  ;;  %vm13008_vm15 = vmor %vm5536_vm10, %vm5537_vm11  ;;  %v13019_v52 = vpop.f32.mrf.mxu3 }
 0x543   :  { %v8349_v44 = vmul.f32 -1.442695, %v3809_v25  ;;  %v12992_v32 = vpop.eup %9012  ;;  %v5535_v36 = vadd.f32 %v12929_v63, %v5534_v14  ;;  %v8128_v43 = vor.u32 %v8656_v13, %v8127_v2  ;;  %v5557_v27 = vand.u32 2147483648, %v12926_v12 }
 0x544   :  { %v5548_v54 = vsub.f32 1.0, %v5547_v60  ;;  %9018 = vpow2.f32 %v8341_v37  ;;  %v5667_v29 = vmul.f32 %v12992_v32, %v12954_v46  ;;  %4126 = vmatpush.bf16.msrb.mxu0 %v7840_v38  ;;  %v3907_v4 = vadd.f32 %v12900_v48, %v3858_v34 }
 0x545   :  { %9020 = vpow2.f32 %v8349_v44  ;;  %v9015_v51 = vpop.eup %9014  ;;  %v5543_v31 = vor.u32 1.1754944e-38, %v5542_v35  ;;  %vm5551_vm13 = vweird.f32 %v12926_v12  ;;  %vm5552_vm14 = vweird.f32 %v12974_v22  ;;  %4175 = vmatpush.bf16.msrb.mxu1 %v8128_v43  ;;  %v13036_v35 = vpop.f32.mrf.mxu2 }
 0x546   :  { %v5549_v18 = vmul.f32 %v12974_v22, %v5548_v54  ;;  %v9017_v42 = vpop.eup %9016  ;;  %vm13012_vm0 = vcmp.eq.f32.partialorder %v5555_v26, 8.507059e+37  ;;  %v5668_v9 = vsub.f32 1.0, %v5667_v29  ;;  %v5675_v3 = vand.u32 2147483647, %v12954_v46  ;;  %vm5553_vm1 = vmor %vm5551_vm13, %vm5552_vm14 }
 0x547   :  { %v13017_v19 = vadd.f32 1.0, %v9015_v51  ;;  %v5539_v5 = vsel %vm13008_vm15, %v12929_v63, %v5535_v36  ;;  %v13025_v20 = vadd.f32 1.0, %v9017_v42  ;;  %v3762_v0 = vadd.f32 %v12828_v10, %v12449_v23  ;;  %v13068_v43 = vpop.f32.mrf.mxu0 }
 0x548   :  { %v5550_v49 = vadd.f32 %v12974_v22, %v5549_v18  ;;  %4057 = vmatmul.bf16.gmra.mxu2 %v10480_v55  ;;  %v5558_v14 = vor.u32 1.1754944e-38, %v5557_v27  ;;  %v5669_v6 = vmul.f32 %v12992_v32, %v5668_v9  ;;  %v8350_v63 = vmul.f32 -1.442695, %v3907_v4 }
 0x549   :  { %9022 = vrcp.f32 %v13017_v19  ;;  %v5677_v10 = vand.u32 2147483648, %v12954_v46  ;;  %v3811_v40 = vadd.f32 %v12867_v17, %v3762_v0  ;;  %v5544_v12 = vsel %vm12980_vm12, %v5543_v31, %v5539_v5  ;;  %v13055_v17 = vpop.f32.mrf.mxu1  ;;  %v14957_v5 = vld [vmem:[#allocation18_spill] sm:$0xff] }
 0x54a   :  { %v9019_v25 = vpop.eup %9018  ;;  %v5554_v59 = vsel %vm5553_vm1, %v12974_v22, %v5550_v49  ;;  %9024 = vrcp.f32 %v13025_v20  ;;  %v5670_v2 = vadd.f32 %v12992_v32, %v5669_v6  ;;  %vm5672_vm2 = vweird.f32 %v12992_v32  ;;  %v13094_v9 = vpop.f32.mrf.mxu3 }
 0x54b   :  { %v9021_v60 = vpop.eup %9020  ;;  %v5559_v37 = vsel %vm13012_vm0, %v5558_v14, %v5554_v59  ;;  %vm5671_vm3 = vweird.f32 %v12954_v46  ;;  %vm13049_vm4 = vcmp.eq.f32.partialorder %v5675_v3, 8.507059e+37  ;;  %v13053_v44 = vadd.f32 1.0, %v9019_v25 }
 0x54c   :  { %v6983_v26 = vpack.c.bf16 %v5559_v37, %v5544_v12  ;;  %v5690_v7 = vand.u32 2147483647, %v13017_v19  ;;  %v13058_v34 = vadd.f32 1.0, %v9021_v60  ;;  %9026 = vpow2.f32 %v8350_v63  ;;  %vm13062_vm5 = vmor %vm5671_vm3, %vm5672_vm2 }
 0x54d   :  { %v3860_v38 = vadd.f32 %v12912_v8, %v12483_v16  ;;  %v5678_v46 = vor.u32 1.1754944e-38, %v5677_v10  ;;  %v5692_v36 = vand.u32 2147483648, %v13017_v19  ;;  %9028 = vrcp.f32 %v13053_v44  ;;  %v13102_v63 = vpop.f32.mrf.mxu2 }
 0x54e   :  { %7063 = vst [vmem:[#allocation11 + $0xc4] sm:$0xff] %v6983_v26  ;;  %v8358_v54 = vmul.f32 -1.442695, %v3811_v40  ;;  %v5674_v29 = vsel %vm13062_vm5, %v12992_v32, %v5670_v2  ;;  %v5812_v8 = vand.u32 2147483648, %v13025_v20  ;;  %9030 = vrcp.f32 %v13058_v34  ;;  %v14954_v32 = vld [vmem:[#allocation17_spill] sm:$0xff] }
 0x54f   :  { %v9023_v27 = vpop.eup %9022  ;;  %v3909_v4 = vadd.f32 %v12958_v61, %v3860_v38  ;;  %vm5686_vm6 = vweird.f32 %v13017_v19  ;;  %v3765_v18 = vadd.f32 %v12902_v56, %v12449_v23  ;;  %v3863_v42 = vadd.f32 %v12968_v33, %v12483_v16 }
 0x550   :  { %v13076_v51 = vpop.eup %9024  ;;  %v5682_v31 = vmul.f32 %v9023_v27, %v13017_v19  ;;  %4106 = vmatmul.bf16.gmra.mxu3 %v14945_v58  ;;  %3964 = vmatmul.bf16.gmra.mxu0 %v14954_v32  ;;  %vm13086_vm7 = vcmp.eq.f32.partialorder %v5690_v7, 8.507059e+37  ;;  %vm5806_vm8 = vweird.f32 %v13025_v20  ;;  %v5810_v48 = vand.u32 2147483647, %v13025_v20 }
 0x551   :  { %v5802_v61 = vmul.f32 %v13076_v51, %v13025_v20  ;;  %v5679_v56 = vsel %vm13049_vm4, %v5678_v46, %v5674_v29  ;;  %v5693_v3 = vor.u32 1.1754944e-38, %v5692_v36  ;;  %9032 = vpow2.f32 %v8358_v54  ;;  %4013 = vmatmul.bf16.gmra.mxu1 %v14957_v5  ;;  %v13119_v22 = vpop.f32.mrf.mxu1  ;;  %v7803_v29 = vld [vmem:[#allocation10 + $0xb0] sm:$0xf] }
 0x552   :  { %v5683_v33 = vsub.f32 1.0, %v5682_v31  ;;  %v9027_v49 = vpop.eup %9026  ;;  %v13099_v14 = vor.u32 1.1754944e-38, %v5812_v8  ;;  %vm5821_vm9 = vweird.f32 %v13053_v44  ;;  %v8359_v6 = vmul.f32 -1.442695, %v3909_v4  ;;  %v13165_v38 = vpop.f32.mrf.mxu3 }
 0x553   :  { %v5803_v0 = vsub.f32 1.0, %v5802_v61  ;;  %v13104_v25 = vpop.eup %9028  ;;  %vm5687_vm10 = vweird.f32 %v9023_v27  ;;  %v13106_v10 = vadd.f32 1.0, %v9027_v49  ;;  %v3814_v40 = vadd.f32 %v12934_v28, %v3765_v18  ;;  %v8575_v61 = vld [vmem:[#allocation10 + $0xd0] sm:$0xf0] }
 0x554   :  { %v5684_v59 = vmul.f32 %v9023_v27, %v5683_v33  ;;  %v13109_v60 = vpop.eup %9030  ;;  %vm13112_vm11 = vcmp.eq.f32.partialorder %v5810_v48, 8.507059e+37  ;;  %v5817_v2 = vmul.f32 %v13104_v25, %v13053_v44  ;;  %v5825_v26 = vand.u32 2147483647, %v13053_v44  ;;  %vm13127_vm13 = vmor %vm5686_vm6, %vm5687_vm10  ;;  %v13139_v48 = vpop.f32.mrf.mxu0 }
 0x555   :  { %v5804_v12 = vmul.f32 %v13076_v51, %v5803_v0  ;;  %9034 = vpow2.f32 %v8359_v6  ;;  %vm5807_vm12 = vweird.f32 %v13076_v51  ;;  %v5937_v28 = vmul.f32 %v13109_v60, %v13058_v34  ;;  %v8091_v0 = vld [vmem:[#allocation10 + $0x2f0] sm:$0xf]  ;;  %v8647_v6 = vld [vmem:[#allocation10 + $0x310] sm:$0xf0] }
 0x556   :  { %v5685_v7 = vadd.f32 %v9023_v27, %v5684_v59  ;;  %9036 = vrcp.f32 %v13106_v10  ;;  %v5818_v46 = vsub.f32 1.0, %v5817_v2  ;;  %v5827_v36 = vand.u32 2147483648, %v13053_v44  ;;  %vm13147_vm15 = vmor %vm5806_vm8, %vm5807_vm12 }
 0x557   :  { %v5805_v13 = vadd.f32 %v13076_v51, %v5804_v12  ;;  %v5945_v54 = vand.u32 2147483647, %v13058_v34  ;;  %v9033_v8 = vpop.eup %9032  ;;  %v5938_v31 = vsub.f32 1.0, %v5937_v28  ;;  %vm5941_vm14 = vweird.f32 %v13058_v34 }
 0x558   :  { %v5689_v4 = vsel %vm13127_vm13, %v9023_v27, %v5685_v7  ;;  %v5947_v19 = vand.u32 2147483648, %v13058_v34  ;;  %v8367_v18 = vmul.f32 -1.442695, %v3814_v40  ;;  %4062 = vmatmul.bf16.gmra.mxu2 %v14954_v32  ;;  %v5819_v49 = vmul.f32 %v13104_v25, %v5818_v46 }
 0x559   :  { %v5694_v33 = vsel %vm13086_vm7, %v5693_v3, %v5689_v4  ;;  %vm5822_vm0 = vweird.f32 %v13104_v25  ;;  %v3912_v59 = vadd.f32 %v13019_v52, %v3863_v42  ;;  %v5809_v21 = vsel %vm13147_vm15, %v13076_v51, %v5805_v13 }
 0x55a   :  { %v6988_v40 = vpack.c.bf16 %v5694_v33, %v5679_v56  ;;  %vm13157_vm1 = vcmp.eq.f32.partialorder %v5825_v26, 8.507059e+37  ;;  %v5939_v20 = vmul.f32 %v13109_v60, %v5938_v31  ;;  %v5820_v2 = vadd.f32 %v13104_v25, %v5819_v49  ;;  %vm5823_vm2 = vmor %vm5821_vm9, %vm5822_vm0  ;;  %v13191_v33 = vpop.f32.mrf.mxu1 }
 0x55b   :  { %v9035_v12 = vpop.eup %9034  ;;  %v13163_v7 = vadd.f32 1.0, %v9033_v8  ;;  %9038 = vpow2.f32 %v8367_v18  ;;  %v7804_v28 = vor.u32 %v8575_v61, %v7803_v29  ;;  %v5828_v51 = vor.u32 1.1754944e-38, %v5827_v36  ;;  %v13177_v29 = vpop.f32.mrf.mxu2 }
 0x55c   :  { %v9037_v52 = vpop.eup %9036  ;;  %7068 = vst [vmem:[#allocation11 + $0xe8] sm:$0xff] %v6988_v40  ;;  %vm5942_vm3 = vweird.f32 %v13109_v60  ;;  %v13172_v42 = vadd.f32 1.0, %v9035_v12  ;;  %v8092_v56 = vor.u32 %v8647_v6, %v8091_v0  ;;  %v5824_v26 = vsel %vm5823_vm2, %v13104_v25, %v5820_v2  ;;  %v14973_v40 = vld [vmem:[#allocation20_spill] sm:$0xff] }
 0x55d   :  { %v5952_v13 = vmul.f32 %v9037_v52, %v13106_v10  ;;  %9040 = vrcp.f32 %v13163_v7  ;;  %4127 = vmatpush.bf16.msrb.mxu0 %v7804_v28  ;;  %v8368_v46 = vmul.f32 -1.442695, %v3912_v59  ;;  %v5814_v44 = vsel %vm13112_vm11, %v13099_v14, %v5809_v21  ;;  %vm13204_vm5 = vmor %vm5941_vm14, %vm5942_vm3  ;;  %v13219_v59 = vpop.f32.mrf.mxu0 }
 0x55e   :  { %v5829_v36 = vsel %vm13157_vm1, %v5828_v51, %v5824_v26  ;;  %v5940_v8 = vadd.f32 %v13109_v60, %v5939_v20  ;;  %v5960_v4 = vand.u32 2147483647, %v13106_v10  ;;  %4176 = vmatpush.bf16.msrb.mxu1 %v8092_v56  ;;  %vm13186_vm4 = vcmp.eq.f32.partialorder %v5945_v54, 8.507059e+37  ;;  %v14968_v54 = vld [vmem:[#allocation19_spill] sm:$0xff]  ;;  %v7767_v26 = vld [vmem:[#allocation10 + $0x68] sm:$0xf] }
 0x55f   :  { %v6993_v25 = vpack.c.bf16 %v5829_v36, %v5814_v44  ;;  %v5953_v18 = vsub.f32 1.0, %v5952_v13  ;;  %v5962_v61 = vand.u32 2147483648, %v13106_v10  ;;  %v5948_v37 = vor.u32 1.1754944e-38, %v5947_v19 }
 0x560   :  { %9042 = vrcp.f32 %v13172_v42  ;;  %v3767_v14 = vadd.f32 %v12956_v57, %v12449_v23  ;;  %v3865_v27 = vadd.f32 %v13036_v35, %v12483_v16  ;;  %4111 = vmatmul.bf16.gmra.mxu3 %v14957_v5  ;;  %3969 = vmatmul.bf16.gmra.mxu0 %v14968_v54  ;;  %vm5956_vm6 = vweird.f32 %v13106_v10 }
 0x561   :  { %v9039_v49 = vpop.eup %9038  ;;  %7073 = vst [vmem:[#allocation11 + $0x10c] sm:$0xff] %v6993_v25  ;;  %v5954_v0 = vmul.f32 %v9037_v52, %v5953_v18  ;;  %vm5957_vm7 = vweird.f32 %v9037_v52  ;;  %9044 = vpow2.f32 %v8368_v46  ;;  %v5944_v57 = vsel %vm13204_vm5, %v13109_v60, %v5940_v8  ;;  %4018 = vmatmul.bf16.gmra.mxu1 %v14973_v40 }
 0x562   :  { %vm13212_vm8 = vcmp.eq.f32.partialorder %v5960_v4, 8.507059e+37  ;;  %v13216_v6 = vadd.f32 1.0, %v9039_v49  ;;  %v3816_v34 = vadd.f32 %v12987_v47, %v3767_v14  ;;  %v5963_v3 = vor.u32 1.1754944e-38, %v5962_v61  ;;  %vm5958_vm9 = vmor %vm5956_vm6, %vm5957_vm7  ;;  %v8566_v4 = vld [vmem:[#allocation10 + $0x88] sm:$0xf0]  ;;  %v13253_v19 = vpop.f32.mrf.mxu1 }
 0x563   :  { %v13222_v21 = vpop.eup %9040  ;;  %v5955_v10 = vadd.f32 %v9037_v52, %v5954_v0  ;;  %v6080_v20 = vand.u32 2147483647, %v13163_v7  ;;  %v3914_v60 = vadd.f32 %v13094_v9, %v3865_v27  ;;  %vm6076_vm10 = vweird.f32 %v13163_v7  ;;  %v13235_v9 = vpop.f32.mrf.mxu3 }
 0x564   :  { %v6072_v12 = vmul.f32 %v13222_v21, %v13163_v7  ;;  %9046 = vrcp.f32 %v13216_v6  ;;  %v3770_v47 = vadd.f32 %v13002_v50, %v12449_v23  ;;  %v5949_v2 = vsel %vm13186_vm4, %v5948_v37, %v5944_v57  ;;  %v13246_v61 = vpop.f32.mrf.mxu2 }
 0x565   :  { %v5959_v28 = vsel %vm5958_vm9, %v9037_v52, %v5955_v10  ;;  %v6082_v51 = vand.u32 2147483648, %v13163_v7  ;;  %v8376_v56 = vmul.f32 -1.442695, %v3816_v34  ;;  %v8377_v36 = vmul.f32 -1.442695, %v3914_v60 }
 0x566   :  { %v9043_v13 = vpop.eup %9042  ;;  %v5964_v46 = vsel %vm13212_vm8, %v5963_v3, %v5959_v28  ;;  %v6073_v44 = vsub.f32 1.0, %v6072_v12  ;;  %v3819_v8 = vadd.f32 %v13055_v17, %v3770_v47  ;;  %vm13240_vm11 = vcmp.eq.f32.partialorder %v6080_v20, 8.507059e+37  ;;  %v8055_v20 = vld [vmem:[#allocation10 + $0x2a8] sm:$0xf]  ;;  %v8638_v60 = vld [vmem:[#allocation10 + $0x2c8] sm:$0xf0] }
 0x567   :  { %v9045_v50 = vpop.eup %9044  ;;  %v6998_v25 = vpack.c.bf16 %v5964_v46, %v5949_v2  ;;  %v6087_v52 = vmul.f32 %v9043_v13, %v13172_v42  ;;  %v6095_v18 = vand.u32 2147483647, %v13172_v42  ;;  %vm6077_vm12 = vweird.f32 %v13222_v21 }
 0x568   :  { %v6074_v37 = vmul.f32 %v13222_v21, %v6073_v44  ;;  %v13250_v14 = vadd.f32 1.0, %v9045_v50  ;;  %9048 = vpow2.f32 %v8376_v56  ;;  %4067 = vmatmul.bf16.gmra.mxu2 %v14968_v54  ;;  %v8385_v27 = vmul.f32 -1.442695, %v3819_v8  ;;  %vm13267_vm15 = vmor %vm6076_vm10, %vm6077_vm12 }
 0x569   :  { %7078 = vst [vmem:[#allocation11 + $0x130] sm:$0xff] %v6998_v25  ;;  %v6088_v17 = vsub.f32 1.0, %v6087_v52  ;;  %9050 = vpow2.f32 %v8377_v36  ;;  %v7768_v49 = vor.u32 %v8566_v4, %v7767_v26  ;;  %vm6091_vm13 = vweird.f32 %v13172_v42 }
 0x56a   :  { %v13255_v0 = vpop.eup %9046  ;;  %v6075_v57 = vadd.f32 %v13222_v21, %v6074_v37  ;;  %v6097_v35 = vand.u32 2147483648, %v13172_v42  ;;  %9052 = vrcp.f32 %v13250_v14  ;;  %v6083_v34 = vor.u32 1.1754944e-38, %v6082_v51 }
 0x56b   :  { %v6089_v10 = vmul.f32 %v9043_v13, %v6088_v17  ;;  %vm6092_vm14 = vweird.f32 %v9043_v13  ;;  %v6207_v3 = vmul.f32 %v13255_v0, %v13216_v6  ;;  %4128 = vmatpush.bf16.msrb.mxu0 %v7768_v49  ;;  %vm13271_vm0 = vcmp.eq.f32.partialorder %v6095_v18, 8.507059e+37  ;;  %v13294_v52 = vpop.f32.mrf.mxu3 }
 0x56c   :  { %9054 = vpow2.f32 %v8385_v27  ;;  %v3868_v2 = vadd.f32 %v13102_v63, %v12483_v16  ;;  %v3772_v28 = vadd.f32 %v13068_v43, %v12449_v23  ;;  %v13279_v51 = vpop.f32.mrf.mxu0  ;;  %v6079_v7 = vsel %vm13267_vm15, %v13222_v21, %v6075_v57  ;;  %vm6093_vm1 = vmor %vm6091_vm13, %vm6092_vm14  ;;  %v13309_v31 = vpop.f32.mrf.mxu2 }
 0x56d   :  { %v6090_v56 = vadd.f32 %v9043_v13, %v6089_v10  ;;  %v6208_v26 = vsub.f32 1.0, %v6207_v3  ;;  %v6215_v46 = vand.u32 2147483647, %v13216_v6  ;;  %v6098_v36 = vor.u32 1.1754944e-38, %v6097_v35 }
 0x56e   :  { %v9049_v44 = vpop.eup %9048  ;;  %v8056_v63 = vor.u32 %v8638_v60, %v8055_v20  ;;  %v3917_v8 = vadd.f32 %v13165_v38, %v3868_v2  ;;  %v3821_v43 = vadd.f32 %v13119_v22, %v3772_v28  ;;  %vm6211_vm2 = vweird.f32 %v13216_v6  ;;  %v13314_v10 = vpop.f32.mrf.mxu1 }
 0x56f   :  { %v9051_v4 = vpop.eup %9050  ;;  %v6094_v50 = vsel %vm6093_vm1, %v9043_v13, %v6090_v56  ;;  %v6209_v25 = vmul.f32 %v13255_v0, %v6208_v26  ;;  %v13292_v21 = vadd.f32 1.0, %v9049_v44  ;;  %v6084_v42 = vsel %vm13240_vm11, %v6083_v34, %v6079_v7 }
 0x570   :  { %v9053_v18 = vpop.eup %9052  ;;  %v6099_v37 = vsel %vm13271_vm0, %v6098_v36, %v6094_v50  ;;  %v6217_v38 = vand.u32 2147483648, %v13216_v6  ;;  %v13301_v22 = vadd.f32 1.0, %v9051_v4  ;;  %4177 = vmatpush.bf16.msrb.mxu1 %v8056_v63  ;;  %4116 = vmatmul.bf16.gmra.mxu3 %v14973_v40  ;;  %vm13304_vm3 = vcmp.eq.f32.partialorder %v6215_v46, 8.507059e+37 }
 0x571   :  { %v7003_v13 = vpack.c.bf16 %v6099_v37, %v6084_v42  ;;  %v6222_v27 = vmul.f32 %v9053_v18, %v13250_v14  ;;  %v8386_v49 = vmul.f32 -1.442695, %v3917_v8  ;;  %vm6212_vm4 = vweird.f32 %v13255_v0  ;;  %v8557_v42 = vld [vmem:[#allocation10 + $0x40] sm:$0xf0] }
 0x572   :  { %v9055_v57 = vpop.eup %9054  ;;  %v6230_v35 = vand.u32 2147483647, %v13250_v14  ;;  %9056 = vrcp.f32 %v13292_v21  ;;  %v8394_v34 = vmul.f32 -1.442695, %v3821_v43  ;;  %v6210_v3 = vadd.f32 %v13255_v0, %v6209_v25  ;;  %vm13332_vm7 = vmor %vm6211_vm2, %vm6212_vm4  ;;  %v7731_v25 = vld [vmem:[#allocation10 + $0x20] sm:$0xf] }
 0x573   :  { %7083 = vst [vmem:[#allocation11 + $0x154] sm:$0xff] %v7003_v13  ;;  %v6223_v20 = vsub.f32 1.0, %v6222_v27  ;;  %v6232_v60 = vand.u32 2147483648, %v13250_v14  ;;  %9058 = vrcp.f32 %v13301_v22  ;;  %v6218_v12 = vor.u32 1.1754944e-38, %v6217_v38  ;;  %v8019_v27 = vld [vmem:[#allocation10 + $0x260] sm:$0xf] }
 0x574   :  { %vm6226_vm5 = vweird.f32 %v13250_v14  ;;  %v3870_v47 = vadd.f32 %v13177_v29, %v12483_v16  ;;  %v3775_v2 = vadd.f32 %v13139_v48, %v12449_v23  ;;  %v13324_v28 = vpop.f32.mrf.mxu0  ;;  %vm6227_vm6 = vweird.f32 %v9053_v18  ;;  %v13358_v14 = vpop.f32.mrf.mxu3 }
 0x575   :  { %v6224_v7 = vmul.f32 %v9053_v18, %v6223_v20  ;;  %v13326_v56 = vadd.f32 1.0, %v9055_v57  ;;  %9060 = vpow2.f32 %v8386_v49  ;;  %vm13336_vm8 = vcmp.eq.f32.partialorder %v6230_v35, 8.507059e+37  ;;  %vm6228_vm9 = vmor %vm6226_vm5, %vm6227_vm6  ;;  %v8629_v49 = vld [vmem:[#allocation10 + $0x280] sm:$0xf0] }
 0x576   :  { %9062 = vpow2.f32 %v8394_v34  ;;  %v3919_v48 = vadd.f32 %v13235_v9, %v3870_v47  ;;  %v3824_v46 = vadd.f32 %v13191_v33, %v3775_v2  ;;  %v6214_v44 = vsel %vm13332_vm7, %v13255_v0, %v6210_v3  ;;  %v13370_v17 = vpop.f32.mrf.mxu1 }
 0x577   :  { %v6225_v36 = vadd.f32 %v9053_v18, %v6224_v7  ;;  %v6233_v63 = vor.u32 1.1754944e-38, %v6232_v60  ;;  %9064 = vrcp.f32 %v13326_v56  ;;  %vm6346_vm10 = vweird.f32 %v13292_v21 }
 0x578   :  { %v13346_v6 = vpop.eup %9056  ;;  %v6350_v8 = vand.u32 2147483647, %v13292_v21  ;;  %v6352_v9 = vand.u32 2147483648, %v13292_v21  ;;  %v8395_v33 = vmul.f32 -1.442695, %v3919_v48  ;;  %vm6361_vm11 = vweird.f32 %v13301_v22 }
 0x579   :  { %v13353_v43 = vpop.eup %9058  ;;  %v6229_v4 = vsel %vm6228_vm9, %v9053_v18, %v6225_v36  ;;  %v6342_v0 = vmul.f32 %v13346_v6, %v13292_v21  ;;  %v8403_v50 = vmul.f32 -1.442695, %v3824_v46  ;;  %v6219_v37 = vsel %vm13304_vm3, %v6218_v12, %v6214_v44 }
 0x57a   :  { %v6234_v38 = vsel %vm13336_vm8, %v6233_v63, %v6229_v4  ;;  %v6357_v13 = vmul.f32 %v13353_v43, %v13301_v22  ;;  %v6365_v18 = vand.u32 2147483647, %v13301_v22  ;;  %v6367_v3 = vand.u32 2147483648, %v13301_v22 }
 0x57b   :  { %v9061_v57 = vpop.eup %9060  ;;  %v7008_v35 = vpack.c.bf16 %v6234_v38, %v6219_v37  ;;  %v6343_v34 = vsub.f32 1.0, %v6342_v0  ;;  %9066 = vpow2.f32 %v8395_v33  ;;  %v13368_v20 = vpop.f32.mrf.mxu2  ;;  %v7732_v2 = vor.u32 %v8557_v42, %v7731_v25 }
 0x57c   :  { %v9063_v60 = vpop.eup %9062  ;;  %v6358_v12 = vsub.f32 1.0, %v6357_v13  ;;  %v13372_v47 = vadd.f32 1.0, %v9061_v57  ;;  %9068 = vpow2.f32 %v8403_v50  ;;  %vm6347_vm12 = vweird.f32 %v13346_v6  ;;  %v13385_v36 = vpop.f32.mrf.mxu0 }
 0x57d   :  { %v13374_v7 = vpop.eup %9064  ;;  %7088 = vst [vmem:[#allocation11 + $0x178] sm:$0xff] %v7008_v35  ;;  %v6344_v26 = vmul.f32 %v13346_v6, %v6343_v34  ;;  %v13378_v29 = vadd.f32 1.0, %v9063_v60  ;;  %v8020_v48 = vor.u32 %v8629_v49, %v8019_v27  ;;  %vm6362_vm13 = vweird.f32 %v13353_v43  ;;  %4129 = vmatpush.bf16.msrb.mxu0 %v7732_v2  ;;  %vm13398_vm0 = vmor %vm6346_vm10, %vm6347_vm12 }
 0x57e   :  { %v6359_v46 = vmul.f32 %v13353_v43, %v6358_v12  ;;  %v6477_v44 = vmul.f32 %v13374_v7, %v13326_v56  ;;  %9070 = vrcp.f32 %v13372_v47  ;;  %vm13388_vm14 = vcmp.eq.f32.partialorder %v6350_v8, 8.507059e+37  ;;  %vm6363_vm1 = vmor %vm6361_vm11, %vm6362_vm13 }
 0x57f   :  { %v6345_v63 = vadd.f32 %v13346_v6, %v6344_v26  ;;  %v6353_v4 = vor.u32 1.1754944e-38, %v6352_v9  ;;  %vm13392_vm15 = vcmp.eq.f32.partialorder %v6365_v18, 8.507059e+37  ;;  %4178 = vmatpush.bf16.msrb.mxu1 %v8020_v48  ;;  %v6368_v42 = vor.u32 1.1754944e-38, %v6367_v3  ;;  %v13443_v48 = vpop.f32.mrf.mxu1 }
 0x580   :  { %v6360_v25 = vadd.f32 %v13353_v43, %v6359_v46  ;;  %v6478_v37 = vsub.f32 1.0, %v6477_v44  ;;  %9072 = vrcp.f32 %v13378_v29  ;;  %vm6481_vm2 = vweird.f32 %v13326_v56  ;;  %4130 = vmatmul.bf16.vlgmr.msrb.gmra.mxu0 %v10400_v62 }
 0x581   :  { %v9067_v8 = vpop.eup %9066  ;;  %v6349_v9 = vsel %vm13398_vm0, %v13346_v6, %v6345_v63  ;;  %v6485_v21 = vand.u32 2147483647, %v13326_v56  ;;  %v6487_v38 = vand.u32 2147483648, %v13326_v56  ;;  %vm6482_vm3 = vweird.f32 %v13374_v7 }
 0x582   :  { %v9069_v13 = vpop.eup %9068  ;;  %v6364_v18 = vsel %vm6363_vm1, %v13353_v43, %v6360_v25  ;;  %v6479_v27 = vmul.f32 %v13374_v7, %v6478_v37  ;;  %v3873_v6 = vadd.f32 %v13246_v61, %v12483_v16  ;;  %4179 = vmatmul.bf16.vlgmr.msrb.gmra.mxu1 %v10407_v53  ;;  %v6354_v22 = vsel %vm13388_vm14, %v6353_v4, %v6349_v9  ;;  %vm13455_vm5 = vmor %vm6481_vm2, %vm6482_vm3 }
 0x583   :  { %v6369_v49 = vsel %vm13392_vm15, %v6368_v42, %v6364_v18  ;;  %v13425_v57 = vadd.f32 1.0, %v9067_v8  ;;  %v13427_v62 = vadd.f32 1.0, %v9069_v13  ;;  %v13429_v43 = vpop.f32.mrf.mxu3  ;;  %v13431_v35 = vpop.f32.mrf.mxu2  ;;  %v6500_v53 = vand.u32 2147483647, %v13372_v47 }
 0x584   :  { %v9071_v34 = vpop.eup %9070  ;;  %v7013_v3 = vpack.c.bf16 %v6369_v49, %v6354_v22  ;;  %v6480_v61 = vadd.f32 %v13374_v7, %v6479_v27  ;;  %v6502_v60 = vand.u32 2147483648, %v13372_v47  ;;  %vm13436_vm4 = vcmp.eq.f32.partialorder %v6485_v21, 8.507059e+37  ;;  %v13471_v25 = vpop.f32.mrf.mxu0 }
 0x585   :  { %v6492_v2 = vmul.f32 %v9071_v34, %v13372_v47  ;;  %9074 = vrcp.f32 %v13425_v57  ;;  %v3922_v26 = vadd.f32 %v13294_v52, %v3873_v6  ;;  %v6488_v44 = vor.u32 1.1754944e-38, %v6487_v38 }
 0x586   :  { %v13445_v46 = vpop.eup %9072  ;;  %7093 = vst [vmem:[#allocation11 + $0x19c] sm:$0xff] %v7013_v3  ;;  %v6622_v63 = vand.u32 2147483648, %v13378_v29  ;;  %9076 = vrcp.f32 %v13427_v62  ;;  %v3777_v33 = vadd.f32 %v13219_v59, %v12449_v23  ;;  %vm6496_vm6 = vweird.f32 %v13372_v47 }
 0x587   :  { %v6493_v52 = vsub.f32 1.0, %v6492_v2  ;;  %v6612_v0 = vmul.f32 %v13445_v46, %v13378_v29  ;;  %vm6616_vm7 = vweird.f32 %v13378_v29  ;;  %v6484_v23 = vsel %vm13455_vm5, %v13374_v7, %v6480_v61  ;;  %v9284_v7 = vld [vmem:[%s14706_s12] sm:$0xff] }
 0x588   :  { %vm13466_vm8 = vcmp.eq.f32.partialorder %v6500_v53, 8.507059e+37  ;;  %v6503_v56 = vor.u32 1.1754944e-38, %v6502_v60  ;;  %v6620_v50 = vand.u32 2147483647, %v13378_v29  ;;  %vm6497_vm9 = vweird.f32 %v9071_v34 }
 0x589   :  { %v6494_v42 = vmul.f32 %v9071_v34, %v6493_v52  ;;  %v6613_v37 = vsub.f32 1.0, %v6612_v0  ;;  %v8404_v8 = vmul.f32 -1.442695, %v3922_v26  ;;  %v6623_v9 = vor.u32 1.1754944e-38, %v6622_v63  ;;  %vm6498_vm10 = vmor %vm6496_vm6, %vm6497_vm9 }
 0x58a   :  { %v6635_v21 = vand.u32 2147483647, %v13425_v57  ;;  %v3826_v38 = vadd.f32 %v13253_v19, %v3777_v33  ;;  %v13478_v13 = vperm.slane %v9284_v7, 6  ;;  %v6489_v27 = vsel %vm13436_vm4, %v6488_v44, %v6484_v23 }
 0x58b   :  { %v9075_v18 = vpop.eup %9074  ;;  %v6495_v6 = vadd.f32 %v9071_v34, %v6494_v42  ;;  %v6614_v22 = vmul.f32 %v13445_v46, %v6613_v37  ;;  %9078 = vpow2.f32 %v8404_v8  ;;  %v13483_v49 = vpop.f32.mrf.mxu3  ;;  %vm6617_vm11 = vweird.f32 %v13445_v46 }
 0x58c   :  { %v13485_v3 = vpop.f32.mrf.mxu2  ;;  %v13487_v61 = vpop.eup %9076  ;;  %vm13493_vm12 = vcmp.eq.f32.partialorder %v6620_v50, 8.507059e+37  ;;  %v6627_v53 = vmul.f32 %v9075_v18, %v13425_v57  ;;  %v8412_v60 = vmul.f32 -1.442695, %v3826_v38  ;;  %v3875_v12 = vadd.f32 %v13309_v31, %v12483_v16  ;;  %vm13516_vm13 = vmor %vm6616_vm7, %vm6617_vm11 }
 0x58d   :  { %v6499_v2 = vsel %vm6498_vm10, %v9071_v34, %v6495_v6  ;;  %v6615_v26 = vadd.f32 %v13445_v46, %v6614_v22  ;;  %v6747_v44 = vmul.f32 %v13487_v61, %v13427_v62  ;;  %v3936_v47 = vadd.f32 %v13279_v51, %v13478_v13  ;;  %v13510_v34 = vpop.f32.mrf.mxu1  ;;  %v13535_v38 = vpop.f32.mrf.mxu0 }
 0x58e   :  { %v6504_v63 = vsel %vm13466_vm8, %v6503_v56, %v6499_v2  ;;  %v6628_v33 = vsub.f32 1.0, %v6627_v53  ;;  %9080 = vpow2.f32 %v8412_v60  ;;  %v3924_v4 = vadd.f32 %v13358_v14, %v3875_v12 }
 0x58f   :  { %v7018_v52 = vpack.c.bf16 %v6504_v63, %v6489_v27  ;;  %v6637_v0 = vand.u32 2147483648, %v13425_v57  ;;  %v6748_v16 = vsub.f32 1.0, %v6747_v44  ;;  %v3985_v31 = vadd.f32 %v13314_v10, %v3936_v47 }
 0x590   :  { %v6629_v23 = vmul.f32 %v9075_v18, %v6628_v33  ;;  %vm6632_vm14 = vweird.f32 %v9075_v18  ;;  %v8413_v59 = vmul.f32 -1.442695, %v3924_v4  ;;  %v13520_v14 = vperm.slane %v9284_v7, 7  ;;  %4135 = vmatmul.bf16.gmra.mxu0 %v10416_v45 }
 0x591   :  { %v9079_v56 = vpop.eup %9078  ;;  %7098 = vst [vmem:[#allocation11 + $0x1c0] sm:$0xff] %v7018_v52  ;;  %v6619_v10 = vsel %vm13516_vm13, %v13445_v46, %v6615_v26  ;;  %vm6631_vm15 = vweird.f32 %v13425_v57  ;;  %vm13526_vm0 = vcmp.eq.f32.partialorder %v6635_v21, 8.507059e+37  ;;  %v8279_v29 = vmul.f32 -1.442695, %v3985_v31 }
 0x592   :  { %v6630_v42 = vadd.f32 %v9075_v18, %v6629_v23  ;;  %v6749_v37 = vmul.f32 %v13487_v61, %v6748_v16  ;;  %v13532_v8 = vadd.f32 1.0, %v9079_v56  ;;  %9082 = vpow2.f32 %v8413_v59  ;;  %4184 = vmatmul.bf16.gmra.mxu1 %v10423_v41  ;;  %vm6633_vm1 = vmor %vm6631_vm15, %vm6632_vm14 }
 0x593   :  { %v6638_v57 = vor.u32 1.1754944e-38, %v6637_v0  ;;  %v6755_v46 = vand.u32 2147483647, %v13427_v62  ;;  %9084 = vpow2.f32 %v8279_v29  ;;  %v3938_v21 = vadd.f32 %v13324_v28, %v13478_v13  ;;  %v13541_v45 = vpop.f32.mrf.mxu3 }
 0x594   :  { %v9081_v7 = vpop.eup %9080  ;;  %v6634_v27 = vsel %vm6633_vm1, %v9075_v18, %v6630_v42  ;;  %vm6752_vm2 = vweird.f32 %v13487_v61  ;;  %9086 = vrcp.f32 %v13532_v8  ;;  %v4034_v41 = vadd.f32 %v13368_v20, %v13520_v14  ;;  %v13554_v60 = vpop.f32.mrf.mxu2 }
 0x595   :  { %v6624_v6 = vsel %vm13493_vm12, %v6623_v9, %v6619_v10  ;;  %v6639_v22 = vsel %vm13526_vm0, %v6638_v57, %v6634_v27  ;;  %v13551_v53 = vadd.f32 1.0, %v9081_v7  ;;  %v3987_v28 = vadd.f32 %v13370_v17, %v3938_v21  ;;  %v13568_v47 = vpop.f32.mrf.mxu1  ;;  %v13591_v56 = vpop.f32.mrf.mxu0 }
 0x596   :  { %v7023_v18 = vpack.c.bf16 %v6639_v22, %v6624_v6  ;;  %v6750_v12 = vadd.f32 %v13487_v61, %v6749_v37  ;;  %v4083_v2 = vadd.f32 %v13429_v43, %v4034_v41  ;;  %v4036_v20 = vadd.f32 %v13431_v35, %v13520_v14 }
 0x597   :  { %v6757_v19 = vand.u32 2147483648, %v13427_v62  ;;  %9088 = vrcp.f32 %v13551_v53  ;;  %vm6751_vm3 = vweird.f32 %v13427_v62  ;;  %vm13563_vm4 = vcmp.eq.f32.partialorder %v6755_v46, 8.507059e+37 }
 0x598   :  { %v9083_v9 = vpop.eup %9082  ;;  %7103 = vst [vmem:[#allocation11 + $0x1e4] sm:$0xff] %v7023_v18  ;;  %v8280_v26 = vmul.f32 -1.442695, %v4083_v2  ;;  %v4085_v44 = vadd.f32 %v13483_v49, %v4036_v20  ;;  %vm13572_vm5 = vmor %vm6751_vm3, %vm6752_vm2  ;;  %v6770_v63 = vand.u32 2147483647, %v13532_v8  ;;  %v3941_v4 = vadd.f32 %v13385_v36, %v13478_v13 }
 0x599   :  { %v9085_v43 = vpop.eup %9084  ;;  %v13577_v33 = vadd.f32 1.0, %v9083_v9  ;;  %v8288_v62 = vmul.f32 -1.442695, %v3987_v28  ;;  %v6754_v49 = vsel %vm13572_vm5, %v13487_v61, %v6750_v12  ;;  %v6772_v0 = vand.u32 2147483648, %v13532_v8 }
 0x59a   :  { %v9087_v52 = vpop.eup %9086  ;;  %v13585_v16 = vadd.f32 1.0, %v9085_v43  ;;  %9090 = vpow2.f32 %v8280_v26  ;;  %v6758_v31 = vor.u32 1.1754944e-38, %v6757_v19  ;;  %v8289_v23 = vmul.f32 -1.442695, %v4085_v44 }
 0x59b   :  { %v6762_v51 = vmul.f32 %v9087_v52, %v13532_v8  ;;  %9092 = vrcp.f32 %v13577_v33  ;;  %v13589_v59 = vpop.f32.mrf.mxu3  ;;  %vm6766_vm6 = vweird.f32 %v13532_v8  ;;  %v6892_v36 = vand.u32 2147483648, %v13551_v53 }
 0x59c   :  { %9094 = vrcp.f32 %v13585_v16  ;;  %v3990_v61 = vadd.f32 %v13443_v48, %v3941_v4  ;;  %v6759_v50 = vsel %vm13563_vm4, %v6758_v31, %v6754_v49  ;;  %vm13601_vm7 = vcmp.eq.f32.partialorder %v6770_v63, 8.507059e+37  ;;  %v13611_v7 = vpop.f32.mrf.mxu2 }
 0x59d   :  { %v13597_v10 = vpop.eup %9088  ;;  %v6763_v29 = vsub.f32 1.0, %v6762_v51  ;;  %9096 = vpow2.f32 %v8288_v62  ;;  %v6773_v37 = vor.u32 1.1754944e-38, %v6772_v0  ;;  %vm6886_vm8 = vweird.f32 %v13551_v53 }
 0x59e   :  { %v6882_v57 = vmul.f32 %v13597_v10, %v13551_v53  ;;  %v6890_v46 = vand.u32 2147483647, %v13551_v53  ;;  %vm6767_vm9 = vweird.f32 %v9087_v52  ;;  %9098 = vpow2.f32 %v8289_v23  ;;  %v13651_v23 = vpop.f32.mrf.mxu0 }
 0x59f   :  { %v6764_v48 = vmul.f32 %v9087_v52, %v6763_v29  ;;  %v4039_v21 = vadd.f32 %v13485_v3, %v13520_v14  ;;  %v13613_v6 = vor.u32 1.1754944e-38, %v6892_v36  ;;  %vm6901_vm10 = vweird.f32 %v13577_v33  ;;  %vm6768_vm11 = vmor %vm6766_vm6, %vm6767_vm9 }
 0x5a0   :  { %v9091_v27 = vpop.eup %9090  ;;  %v6883_v41 = vsub.f32 1.0, %v6882_v57  ;;  %v8297_v22 = vmul.f32 -1.442695, %v3990_v61  ;;  %v6905_v12 = vand.u32 2147483647, %v13577_v33  ;;  %v6907_v2 = vand.u32 2147483648, %v13577_v33  ;;  %4140 = vmatmul.bf16.gmra.mxu0 %v10432_v15  ;;  %v13635_v15 = vpop.f32.mrf.mxu1 }
 0x5a1   :  { %v9093_v28 = vpop.eup %9092  ;;  %v6765_v18 = vadd.f32 %v9087_v52, %v6764_v48  ;;  %v13618_v20 = vadd.f32 1.0, %v9091_v27  ;;  %vm13627_vm12 = vcmp.eq.f32.partialorder %v6890_v46, 8.507059e+37  ;;  %v4895_v26 = vand.u32 2147483647, %v13585_v16 }
 0x5a2   :  { %v13621_v3 = vpop.eup %9094  ;;  %v6884_v19 = vmul.f32 %v13597_v10, %v6883_v41  ;;  %v6897_v17 = vmul.f32 %v9093_v28, %v13577_v33  ;;  %v4897_v44 = vand.u32 2147483648, %v13585_v16  ;;  %4189 = vmatmul.bf16.gmra.mxu1 %v10439_v39  ;;  %vm6887_vm13 = vweird.f32 %v13597_v10 }
 0x5a3   :  { %v9097_v43 = vpop.eup %9096  ;;  %v6769_v35 = vsel %vm6768_vm11, %v9087_v52, %v6765_v18  ;;  %v4887_v8 = vmul.f32 %v13621_v3, %v13585_v16  ;;  %vm4891_vm14 = vweird.f32 %v13585_v16  ;;  %9100 = vrcp.f32 %v13618_v20  ;;  %v13649_v51 = vpop.f32.mrf.mxu3  ;;  %vm13661_vm1 = vmor %vm6886_vm8, %vm6887_vm13 }
 0x5a4   :  { %v6774_v63 = vsel %vm13601_vm7, %v6773_v37, %v6769_v35  ;;  %v6885_v62 = vadd.f32 %v13597_v10, %v6884_v19  ;;  %v6898_v4 = vsub.f32 1.0, %v6897_v17  ;;  %9102 = vpow2.f32 %v8297_v22  ;;  %v9099_v39 = vpop.eup %9098 }
 0x5a5   :  { %v7028_v49 = vpack.c.bf16 %v6774_v63, %v6759_v50  ;;  %vm13645_vm15 = vcmp.eq.f32.partialorder %v6905_v12, 8.507059e+37  ;;  %v6908_v0 = vor.u32 1.1754944e-38, %v6907_v2  ;;  %v4888_v31 = vsub.f32 1.0, %v4887_v8  ;;  %v13685_v12 = vpop.f32.mrf.mxu2 }
 0x5a6   :  { %v6899_v36 = vmul.f32 %v9093_v28, %v6898_v4  ;;  %vm6902_vm0 = vweird.f32 %v9093_v28  ;;  %v13653_v61 = vadd.f32 1.0, %v9097_v43  ;;  %v13655_v29 = vadd.f32 1.0, %v9099_v39 }
 0x5a7   :  { %7108 = vst [vmem:[#allocation11 + $0x208] sm:$0xff] %v7028_v49  ;;  %v4889_v42 = vmul.f32 %v13621_v3, %v4888_v31  ;;  %vm13666_vm2 = vcmp.eq.f32.partialorder %v4895_v26, 8.507059e+37  ;;  %v4898_v57 = vor.u32 1.1754944e-38, %v4897_v44  ;;  %v4910_v46 = vand.u32 2147483647, %v13618_v20  ;;  %vm6903_vm3 = vmor %vm6901_vm10, %vm6902_vm0 }
 0x5a8   :  { %v3943_v48 = vadd.f32 %v13471_v25, %v13478_v13  ;;  %v6889_v53 = vsel %vm13661_vm1, %v13597_v10, %v6885_v62  ;;  %v6900_v27 = vadd.f32 %v9093_v28, %v6899_v36  ;;  %v4912_v41 = vand.u32 2147483648, %v13618_v20  ;;  %v13709_v9 = vpop.f32.mrf.mxu1 }
 0x5a9   :  { %9104 = vrcp.f32 %v13653_v61  ;;  %v9101_v22 = vpop.eup %9100  ;;  %v4890_v18 = vadd.f32 %v13621_v3, %v4889_v42  ;;  %vm4892_vm4 = vweird.f32 %v13621_v3  ;;  %v4088_v25 = vadd.f32 %v13541_v45, %v4039_v21 }
 0x5aa   :  { %9106 = vrcp.f32 %v13655_v29  ;;  %v9103_v10 = vpop.eup %9102  ;;  %v6904_v2 = vsel %vm6903_vm3, %v9093_v28, %v6900_v27  ;;  %v4902_v19 = vmul.f32 %v9101_v22, %v13618_v20  ;;  %v4041_v17 = vadd.f32 %v13554_v60, %v13520_v14  ;;  %vm13704_vm7 = vmor %vm4891_vm14, %vm4892_vm4 }
 0x5ab   :  { %v3946_v33 = vadd.f32 %v13535_v38, %v13478_v13  ;;  %v6894_v26 = vsel %vm13627_vm12, %v13613_v6, %v6889_v53  ;;  %v6909_v44 = vsel %vm13645_vm15, %v6908_v0, %v6904_v2  ;;  %vm4906_vm5 = vweird.f32 %v13618_v20  ;;  %v13724_v0 = vpop.f32.mrf.mxu3 }
 0x5ac   :  { %vm13698_vm6 = vcmp.eq.f32.partialorder %v4910_v46, 8.507059e+37  ;;  %v7033_v21 = vpack.c.bf16 %v6909_v44, %v6894_v26  ;;  %v4903_v38 = vsub.f32 1.0, %v4902_v19  ;;  %v4913_v28 = vor.u32 1.1754944e-38, %v4912_v41 }
 0x5ad   :  { %v5030_v6 = vand.u32 2147483647, %v13653_v61  ;;  %v4894_v43 = vsel %vm13704_vm7, %v13621_v3, %v4890_v18  ;;  %vm5026_vm8 = vweird.f32 %v13653_v61  ;;  %v13715_v35 = vadd.f32 1.0, %v9103_v10  ;;  %v13739_v20 = vpop.f32.mrf.mxu2 }
 0x5ae   :  { %v8298_v8 = vmul.f32 -1.442695, %v4088_v25  ;;  %v3992_v16 = vadd.f32 %v13510_v34, %v3943_v48  ;;  %7113 = vst [vmem:[#allocation11 + $0x22c] sm:$0xff] %v7033_v21  ;;  %v4904_v62 = vmul.f32 %v9101_v22, %v4903_v38  ;;  %vm4907_vm9 = vweird.f32 %v9101_v22  ;;  %v13726_v34 = vpop.f32.mrf.mxu0 }
 0x5af   :  { %v9105_v63 = vpop.eup %9104  ;;  %v5032_v4 = vand.u32 2147483648, %v13653_v61  ;;  %v4090_v39 = vadd.f32 %v13589_v59, %v4041_v17  ;;  %vm5041_vm10 = vweird.f32 %v13655_v29  ;;  %v5045_v3 = vand.u32 2147483647, %v13655_v29  ;;  %vm4908_vm11 = vmor %vm4906_vm5, %vm4907_vm9 }
 0x5b0   :  { %v9107_v49 = vpop.eup %9106  ;;  %v5022_v52 = vmul.f32 %v9105_v63, %v13653_v61  ;;  %9108 = vrcp.f32 %v13715_v35  ;;  %v4899_v31 = vsel %vm13666_vm2, %v4898_v57, %v4894_v43  ;;  %v4905_v36 = vadd.f32 %v9101_v22, %v4904_v62  ;;  %4145 = vmatmul.bf16.gmra.mxu0 %v10448_v1 }
 0x5b1   :  { %v5037_v50 = vmul.f32 %v9107_v49, %v13655_v29  ;;  %v3995_v59 = vadd.f32 %v13568_v47, %v3946_v33  ;;  %v5047_v46 = vand.u32 2147483648, %v13655_v29  ;;  %9110 = vpow2.f32 %v8298_v8 }
 0x5b2   :  { %v5023_v42 = vsub.f32 1.0, %v5022_v52  ;;  %v8306_v48 = vmul.f32 -1.442695, %v3992_v16  ;;  %v4909_v53 = vsel %vm4908_vm11, %v9101_v22, %v4905_v36  ;;  %vm5027_vm12 = vweird.f32 %v9105_v63  ;;  %4194 = vmatmul.bf16.gmra.mxu1 %v10455_v24 }
 0x5b3   :  { %v5038_v27 = vsub.f32 1.0, %v5037_v50  ;;  %v8307_v37 = vmul.f32 -1.442695, %v4090_v39  ;;  %v4914_v57 = vsel %vm13698_vm6, %v4913_v28, %v4909_v53  ;;  %vm5042_vm13 = vweird.f32 %v9107_v49  ;;  %vm13752_vm15 = vmor %vm5026_vm8, %vm5027_vm12  ;;  %v13780_v62 = vpop.f32.mrf.mxu3 }
 0x5b4   :  { %v5024_v47 = vmul.f32 %v9105_v63, %v5023_v42  ;;  %9112 = vpow2.f32 %v8306_v48  ;;  %v6959_v41 = vpack.c.bf16 %v4914_v57, %v4899_v31  ;;  %v8315_v25 = vmul.f32 -1.442695, %v3995_v59  ;;  %vm5043_vm1 = vmor %vm5041_vm10, %vm5042_vm13 }
 0x5b5   :  { %v5039_v18 = vmul.f32 %v9107_v49, %v5038_v27  ;;  %9114 = vpow2.f32 %v8307_v37  ;;  %vm13743_vm14 = vcmp.eq.f32.partialorder %v5030_v6, 8.507059e+37  ;;  %v5033_v24 = vor.u32 1.1754944e-38, %v5032_v4  ;;  %v13801_v53 = vpop.f32.mrf.mxu2 }
 0x5b6   :  { %v13741_v10 = vpop.eup %9108  ;;  %v5025_v1 = vadd.f32 %v9105_v63, %v5024_v47  ;;  %v4044_v2 = vadd.f32 %v13611_v7, %v13520_v14  ;;  %7039 = vst [vmem:[#allocation11 + $0x18] sm:$0xff] %v6959_v41  ;;  %vm13756_vm0 = vcmp.eq.f32.partialorder %v5045_v3, 8.507059e+37  ;;  %v3948_v44 = vadd.f32 %v13591_v56, %v13478_v13  ;;  %v13764_v7 = vpop.f32.mrf.mxu1 }
 0x5b7   :  { %v5040_v17 = vadd.f32 %v9107_v49, %v5039_v18  ;;  %v5157_v26 = vmul.f32 %v13741_v10, %v13715_v35  ;;  %v9111_v45 = vpop.eup %9110  ;;  %v5048_v21 = vor.u32 1.1754944e-38, %v5047_v46  ;;  %9116 = vpow2.f32 %v8315_v25  ;;  %v13782_v4 = vpop.f32.mrf.mxu0 }
 0x5b8   :  { %v5029_v61 = vsel %vm13752_vm15, %v9105_v63, %v5025_v1  ;;  %v4093_v60 = vadd.f32 %v13649_v51, %v4044_v2  ;;  %v13772_v6 = vadd.f32 1.0, %v9111_v45  ;;  %v3997_v56 = vadd.f32 %v13635_v15, %v3948_v44 }
 0x5b9   :  { %v5044_v38 = vsel %vm5043_vm1, %v9107_v49, %v5040_v17  ;;  %v5158_v28 = vsub.f32 1.0, %v5157_v26  ;;  %v5034_v8 = vsel %vm13743_vm14, %v5033_v24, %v5029_v61  ;;  %v5165_v29 = vand.u32 2147483647, %v13715_v35 }
 0x5ba   :  { %v9113_v43 = vpop.eup %9112  ;;  %v5049_v16 = vsel %vm13756_vm0, %v5048_v21, %v5044_v38  ;;  %v8316_v63 = vmul.f32 -1.442695, %v4093_v60  ;;  %9118 = vrcp.f32 %v13772_v6  ;;  %v4046_v15 = vadd.f32 %v13685_v12, %v13520_v14 }
 0x5bb   :  { %v9115_v51 = vpop.eup %9114  ;;  %v6964_v39 = vpack.c.bf16 %v5049_v16, %v5034_v8  ;;  %v5159_v49 = vmul.f32 %v13741_v10, %v5158_v28  ;;  %vm5162_vm2 = vweird.f32 %v13741_v10  ;;  %v5167_v52 = vand.u32 2147483648, %v13715_v35  ;;  %v13843_v45 = vpop.f32.mrf.mxu3 }
 0x5bc   :  { %v13790_v3 = vadd.f32 1.0, %v9113_v43  ;;  %v13792_v31 = vadd.f32 1.0, %v9115_v51  ;;  %9120 = vpow2.f32 %v8316_v63  ;;  %v8324_v36 = vmul.f32 -1.442695, %v3997_v56 }
 0x5bd   :  { %7044 = vst [vmem:[#allocation11 + $0x3c] sm:$0xff] %v6964_v39  ;;  %v3951_v50 = vadd.f32 %v13651_v23, %v13478_v13  ;;  %v4095_v59 = vadd.f32 %v13724_v0, %v4046_v15  ;;  %v9117_v42 = vpop.eup %9116  ;;  %v5160_v46 = vadd.f32 %v13741_v10, %v5159_v49  ;;  %v5180_v12 = vand.u32 2147483647, %v13772_v6  ;;  %v13862_v49 = vpop.f32.mrf.mxu2 }
 0x5be   :  { %v5182_v48 = vand.u32 2147483648, %v13772_v6  ;;  %9122 = vrcp.f32 %v13790_v3  ;;  %vm5161_vm3 = vweird.f32 %v13715_v35  ;;  %vm13805_vm4 = vcmp.eq.f32.partialorder %v5165_v29, 8.507059e+37  ;;  %v13810_v37 = vpop.f32.mrf.mxu1 }
 0x5bf   :  { %9124 = vrcp.f32 %v13792_v31  ;;  %v5168_v23 = vor.u32 1.1754944e-38, %v5167_v52  ;;  %v4000_v0 = vadd.f32 %v13709_v9, %v3951_v50  ;;  %vm13814_vm5 = vmor %vm5161_vm3, %vm5162_vm2  ;;  %vm5176_vm6 = vweird.f32 %v13772_v6  ;;  %v13831_v24 = vpop.f32.mrf.mxu0 }
 0x5c0   :  { %v9119_v57 = vpop.eup %9118  ;;  %v13819_v41 = vadd.f32 1.0, %v9117_v42  ;;  %9126 = vpow2.f32 %v8324_v36  ;;  %v8325_v35 = vmul.f32 -1.442695, %v4095_v59  ;;  %v5164_v18 = vsel %vm13814_vm5, %v13741_v10, %v5160_v46  ;;  %4150 = vmatmul.bf16.gmra.mxu0 %v10464_v30 }
 0x5c1   :  { %v5172_v9 = vmul.f32 %v9119_v57, %v13772_v6  ;;  %vm13825_vm7 = vcmp.eq.f32.partialorder %v5180_v12, 8.507059e+37  ;;  %v5183_v1 = vor.u32 1.1754944e-38, %v5182_v48  ;;  %v5300_v22 = vand.u32 2147483647, %v13790_v3 }
 0x5c2   :  { %v9121_v2 = vpop.eup %9120  ;;  %v5302_v19 = vand.u32 2147483648, %v13790_v3  ;;  %v5315_v17 = vand.u32 2147483647, %v13792_v31  ;;  %v5317_v10 = vand.u32 2147483648, %v13792_v31  ;;  %9128 = vrcp.f32 %v13819_v41  ;;  %4199 = vmatmul.bf16.gmra.mxu1 %v10471_v11 }
 0x5c3   :  { %v5173_v26 = vsub.f32 1.0, %v5172_v9  ;;  %vm5296_vm8 = vweird.f32 %v13790_v3  ;;  %v13841_v44 = vadd.f32 1.0, %v9121_v2  ;;  %v8333_v30 = vmul.f32 -1.442695, %v4000_v0 }
 0x5c4   :  { %v13838_v33 = vpop.eup %9122  ;;  %v5169_v21 = vsel %vm13805_vm4, %v5168_v23, %v5164_v18  ;;  %vm5311_vm9 = vweird.f32 %v13792_v31  ;;  %9130 = vpow2.f32 %v8325_v35  ;;  %vm5177_vm10 = vweird.f32 %v9119_v57 }
 0x5c5   :  { %v9125_v61 = vpop.eup %9124  ;;  %v5292_v60 = vmul.f32 %v13838_v33, %v13790_v3  ;;  %v5174_v11 = vmul.f32 %v9119_v57, %v5173_v26  ;;  %vm13850_vm11 = vcmp.eq.f32.partialorder %v5300_v22, 8.507059e+37  ;;  %9132 = vrcp.f32 %v13841_v44  ;;  %vm5178_vm13 = vmor %vm5176_vm6, %vm5177_vm10 }
 0x5c6   :  { %v5307_v28 = vmul.f32 %v9125_v61, %v13792_v31  ;;  %v9127_v56 = vpop.eup %9126  ;;  %v5303_v8 = vor.u32 1.1754944e-38, %v5302_v19  ;;  %vm13856_vm12 = vcmp.eq.f32.partialorder %v5315_v17, 8.507059e+37  ;;  %v5318_v29 = vor.u32 1.1754944e-38, %v5317_v10  ;;  %v13864_v15 = vpop.f32.mrf.mxu1 }
 0x5c7   :  { %v5293_v43 = vsub.f32 1.0, %v5292_v60  ;;  %v5175_v63 = vadd.f32 %v9119_v57, %v5174_v11  ;;  %v13860_v39 = vadd.f32 1.0, %v9127_v56  ;;  %9134 = vpow2.f32 %v8333_v30  ;;  %v13882_v23 = vpop.f32.mrf.mxu0  ;;  %v13908_v31 = vpop.f32.mrf.mxu3 }
 0x5c8   :  { %v5308_v51 = vsub.f32 1.0, %v5307_v28  ;;  %v13866_v52 = vpop.eup %9128  ;;  %vm5297_vm14 = vweird.f32 %v13838_v33  ;;  %v5435_v50 = vand.u32 2147483647, %v13819_v41  ;;  %v5437_v59 = vand.u32 2147483648, %v13819_v41 }
 0x5c9   :  { %v5294_v36 = vmul.f32 %v13838_v33, %v5293_v43  ;;  %v5179_v42 = vsel %vm5178_vm13, %v9119_v57, %v5175_v63  ;;  %vm5312_vm15 = vweird.f32 %v9125_v61  ;;  %v5427_v12 = vmul.f32 %v13866_v52, %v13819_v41  ;;  %vm13888_vm1 = vmor %vm5296_vm8, %vm5297_vm14 }
 0x5ca   :  { %v5309_v46 = vmul.f32 %v9125_v61, %v5308_v51  ;;  %v9131_v48 = vpop.eup %9130  ;;  %v5184_v27 = vsel %vm13825_vm7, %v5183_v1, %v5179_v42  ;;  %vm5431_vm0 = vweird.f32 %v13819_v41  ;;  %9136 = vrcp.f32 %v13860_v39  ;;  %vm5313_vm2 = vmor %vm5311_vm9, %vm5312_vm15 }
 0x5cb   :  { %v5295_v6 = vadd.f32 %v13838_v33, %v5294_v36  ;;  %v9133_v0 = vpop.eup %9132  ;;  %v6969_v47 = vpack.c.bf16 %v5184_v27, %v5169_v21  ;;  %v5428_v18 = vsub.f32 1.0, %v5427_v12  ;;  %v5450_v9 = vand.u32 2147483647, %v13841_v44  ;;  %v4055_v36 = vpop.f32.mrf.mxu2 }
 0x5cc   :  { %v5310_v35 = vadd.f32 %v9125_v61, %v5309_v46  ;;  %vm13899_vm3 = vcmp.eq.f32.partialorder %v5435_v50, 8.507059e+37  ;;  %v5438_v3 = vor.u32 1.1754944e-38, %v5437_v59  ;;  %v5442_v22 = vmul.f32 %v9133_v0, %v13841_v44 }
 0x5cd   :  { %v5299_v25 = vsel %vm13888_vm1, %v13838_v33, %v5295_v6  ;;  %vm5446_vm4 = vweird.f32 %v13841_v44  ;;  %v9135_v2 = vpop.eup %9134  ;;  %7049 = vst [vmem:[#allocation11 + $0x60] sm:$0xff] %v6969_v47  ;;  %v5429_v17 = vmul.f32 %v13866_v52, %v5428_v18  ;;  %vm5432_vm5 = vweird.f32 %v13866_v52 }
 0x5ce   :  { %v5314_v19 = vsel %vm5313_vm2, %v9125_v61, %v5310_v35  ;;  %v5452_v10 = vand.u32 2147483648, %v13841_v44  ;;  %v5304_v33 = vsel %vm13850_vm11, %v5303_v8, %v5299_v25  ;;  %v5443_v30 = vsub.f32 1.0, %v5442_v22  ;;  %vm13931_vm8 = vmor %vm5431_vm0, %vm5432_vm5  ;;  %v13941_v50 = vpop.f32.mrf.mxu1 }
 0x5cf   :  { %v5319_v26 = vsel %vm13856_vm12, %v5318_v29, %v5314_v19  ;;  %v13914_v21 = vadd.f32 1.0, %v9131_v48  ;;  %v5430_v61 = vadd.f32 %v13866_v52, %v5429_v17  ;;  %vm13917_vm6 = vcmp.eq.f32.partialorder %v5450_v9, 8.507059e+37 }
 0x5d0   :  { %v6974_v60 = vpack.c.bf16 %v5319_v26, %v5304_v33  ;;  %v13921_v28 = vadd.f32 1.0, %v9135_v2  ;;  %v13923_v56 = vpop.eup %9136  ;;  %v5444_v43 = vmul.f32 %v9133_v0, %v5443_v30  ;;  %vm5447_vm7 = vweird.f32 %v9133_v0  ;;  %4155 = vmatmul.bf16.gmra.mxu0 %v10480_v55 }
 0x5d1   :  { %v5572_v38 = vand.u32 2147483648, %v13860_v39  ;;  %9138 = vrcp.f32 %v13914_v21  ;;  %v5453_v16 = vor.u32 1.1754944e-38, %v5452_v10  ;;  %v5562_v29 = vmul.f32 %v13923_v56, %v13860_v39  ;;  %vm5448_vm9 = vmor %vm5446_vm4, %vm5447_vm7 }
 0x5d2   :  { %7054 = vst [vmem:[#allocation11 + $0x84] sm:$0xff] %v6974_v60  ;;  %v5570_v63 = vand.u32 2147483647, %v13860_v39  ;;  %v4049_v51 = vadd.f32 %v13739_v20, %v13520_v14  ;;  %v5434_v41 = vsel %vm13931_vm8, %v13866_v52, %v5430_v61  ;;  %v5445_v59 = vadd.f32 %v9133_v0, %v5444_v43  ;;  %4204 = vmatmul.bf16.gmra.mxu1 %v14945_v58 }
 0x5d3   :  { %9140 = vrcp.f32 %v13921_v28  ;;  %v3953_v42 = vadd.f32 %v13726_v34, %v13478_v13  ;;  %v5563_v20 = vsub.f32 1.0, %v5562_v29  ;;  %vm5566_vm10 = vweird.f32 %v13860_v39  ;;  %v13958_v34 = vpop.f32.mrf.mxu0 }
 0x5d4   :  { %v5585_v55 = vand.u32 2147483647, %v13914_v21  ;;  %v5587_v46 = vand.u32 2147483648, %v13914_v21  ;;  %v5449_v52 = vsel %vm5448_vm9, %v9133_v0, %v5445_v59  ;;  %v5573_v12 = vor.u32 1.1754944e-38, %v5572_v38 }
 0x5d5   :  { %v4098_v48 = vadd.f32 %v13780_v62, %v4049_v51  ;;  %v4002_v27 = vadd.f32 %v13764_v7, %v3953_v42  ;;  %v5439_v58 = vsel %vm13899_vm3, %v5438_v3, %v5434_v41  ;;  %v5454_v44 = vsel %vm13917_vm6, %v5453_v16, %v5449_v52  ;;  %v4104_v3 = vpop.f32.mrf.mxu3 }
 0x5d6   :  { %v5564_v6 = vmul.f32 %v13923_v56, %v5563_v20  ;;  %vm5567_vm11 = vweird.f32 %v13923_v56  ;;  %vm5581_vm12 = vweird.f32 %v13914_v21  ;;  %v6979_v47 = vpack.c.bf16 %v5454_v44, %v5439_v58  ;;  %v14002_v43 = vpop.f32.mrf.mxu1 }
 0x5d7   :  { %v9139_v0 = vpop.eup %9138  ;;  %vm13967_vm13 = vcmp.eq.f32.partialorder %v5570_v63, 8.507059e+37  ;;  %v8334_v7 = vmul.f32 -1.442695, %v4098_v48  ;;  %v8342_v57 = vmul.f32 -1.442695, %v4002_v27  ;;  %v4051_v35 = vadd.f32 %v13801_v53, %v13520_v14  ;;  %vm13996_vm0 = vmor %vm5566_vm10, %vm5567_vm11 }
 0x5d8   :  { %v5577_v18 = vmul.f32 %v9139_v0, %v13914_v21  ;;  %vm13974_vm14 = vcmp.eq.f32.partialorder %v5585_v55, 8.507059e+37  ;;  %v5588_v25 = vor.u32 1.1754944e-38, %v5587_v46  ;;  %v5705_v1 = vand.u32 2147483647, %v13921_v28  ;;  %7059 = vst [vmem:[#allocation11 + $0xa8] sm:$0xff] %v6979_v47 }
 0x5d9   :  { %v13979_v22 = vpop.eup %9140  ;;  %v5565_v2 = vadd.f32 %v13923_v56, %v5564_v6  ;;  %9142 = vpow2.f32 %v8334_v7  ;;  %v3956_v19 = vadd.f32 %v13782_v4, %v13478_v13  ;;  %v4100_v53 = vadd.f32 %v13843_v45, %v4051_v35 }
 0x5da   :  { %v5578_v17 = vsub.f32 1.0, %v5577_v18  ;;  %v5697_v10 = vmul.f32 %v13979_v22, %v13921_v28  ;;  %v4054_v33 = vadd.f32 %v13862_v49, %v13520_v14  ;;  %v3958_v26 = vadd.f32 %v13831_v24, %v13478_v13  ;;  %v4058_v24 = vpop.f32.mrf.mxu2 }
 0x5db   :  { %vm5582_vm15 = vweird.f32 %v9139_v0  ;;  %9144 = vpow2.f32 %v8342_v57  ;;  %v8343_v30 = vmul.f32 -1.442695, %v4100_v53  ;;  %v4005_v60 = vadd.f32 %v13810_v37, %v3956_v19 }
 0x5dc   :  { %v5579_v45 = vmul.f32 %v9139_v0, %v5578_v17  ;;  %v5698_v61 = vsub.f32 1.0, %v5697_v10  ;;  %v4103_v49 = vadd.f32 %v13908_v31, %v4054_v33  ;;  %v4007_v11 = vadd.f32 %v13864_v15, %v3958_v26  ;;  %vm5583_vm1 = vmor %vm5581_vm12, %vm5582_vm15 }
 0x5dd   :  { %v5569_v37 = vsel %vm13996_vm0, %v13923_v56, %v5565_v2  ;;  %9146 = vpow2.f32 %v8343_v30  ;;  %v8351_v38 = vmul.f32 -1.442695, %v4005_v60  ;;  %v4056_v39 = vadd.f32 %v4055_v36, %v13520_v14  ;;  %v14015_v56 = vpop.f32.mrf.mxu0  ;;  %v4107_v52 = vpop.f32.mrf.mxu3 }
 0x5de   :  { %v5580_v8 = vadd.f32 %v9139_v0, %v5579_v45  ;;  %v5699_v16 = vmul.f32 %v13979_v22, %v5698_v61  ;;  %v8352_v29 = vmul.f32 -1.442695, %v4103_v49  ;;  %v8360_v63 = vmul.f32 -1.442695, %v4007_v11 }
 0x5df   :  { %v9143_v51 = vpop.eup %9142  ;;  %vm5702_vm2 = vweird.f32 %v13979_v22  ;;  %9148 = vpow2.f32 %v8351_v38  ;;  %v3961_v15 = vadd.f32 %v13882_v23, %v13478_v13  ;;  %v4105_v31 = vadd.f32 %v4104_v3, %v4056_v39 }
 0x5e0   :  { %v5574_v36 = vsel %vm13967_vm13, %v5573_v12, %v5569_v37  ;;  %v5584_v41 = vsel %vm5583_vm1, %v9139_v0, %v5580_v8  ;;  %v14019_v59 = vadd.f32 1.0, %v9143_v51  ;;  %9150 = vpow2.f32 %v8352_v29  ;;  %4160 = vmatmul.bf16.gmra.mxu0 %v14954_v32  ;;  %v14050_v0 = vpop.f32.mrf.mxu1 }
 0x5e1   :  { %v9145_v42 = vpop.eup %9144  ;;  %v5589_v21 = vsel %vm13974_vm14, %v5588_v25, %v5584_v41  ;;  %v5700_v20 = vadd.f32 %v13979_v22, %v5699_v16  ;;  %9152 = vpow2.f32 %v8360_v63  ;;  %v4010_v55 = vadd.f32 %v13941_v50, %v3961_v15 }
 0x5e2   :  { %v6984_v23 = vpack.c.bf16 %v5589_v21, %v5574_v36  ;;  %v5707_v46 = vand.u32 2147483648, %v13921_v28  ;;  %9154 = vrcp.f32 %v14019_v59  ;;  %vm5701_vm3 = vweird.f32 %v13921_v28  ;;  %4209 = vmatmul.bf16.gmra.mxu1 %v14957_v5  ;;  %v14055_v35 = vpop.f32.mrf.mxu2 }
 0x5e3   :  { %v9147_v12 = vpop.eup %9146  ;;  %v14029_v48 = vadd.f32 1.0, %v9145_v42  ;;  %v8361_v27 = vmul.f32 -1.442695, %v4105_v31  ;;  %vm14034_vm4 = vmor %vm5701_vm3, %vm5702_vm2  ;;  %vm14045_vm5 = vcmp.eq.f32.partialorder %v5705_v1, 8.507059e+37  ;;  %v8369_v5 = vmul.f32 -1.442695, %v4010_v55 }
 0x5e4   :  { %7064 = vst [vmem:[#allocation11 + $0xcc] sm:$0xff] %v6984_v23  ;;  %v14038_v58 = vadd.f32 1.0, %v9147_v12  ;;  %v5704_v32 = vsel %vm14034_vm4, %v13979_v22, %v5700_v20  ;;  %v5708_v62 = vor.u32 1.1754944e-38, %v5707_v46  ;;  %v5720_v7 = vand.u32 2147483647, %v14019_v59 }
 0x5e5   :  { %v9149_v44 = vpop.eup %9148  ;;  %9156 = vrcp.f32 %v14029_v48  ;;  %v4059_v57 = vadd.f32 %v4058_v24, %v13520_v14  ;;  %v5722_v18 = vand.u32 2147483648, %v14019_v59  ;;  %v14062_v1 = vpop.f32.mrf.mxu0  ;;  %vm5716_vm6 = vweird.f32 %v14019_v59 }
 0x5e6   :  { %v9151_v47 = vpop.eup %9150  ;;  %9158 = vrcp.f32 %v14038_v58  ;;  %v14058_v9 = vadd.f32 1.0, %v9149_v44  ;;  %v14066_v22 = vsel %vm14045_vm5, %v5708_v62, %v5704_v32  ;;  %v5842_v2 = vand.u32 2147483648, %v14029_v48  ;;  %v14096_v24 = vpop.f32.mrf.mxu3 }
 0x5e7   :  { %v9153_v28 = vpop.eup %9152  ;;  %v14060_v25 = vadd.f32 1.0, %v9151_v47  ;;  %9160 = vpow2.f32 %v8361_v27  ;;  %v14072_v19 = vadd.f32 %v13958_v34, %v13478_v13  ;;  %v5840_v17 = vand.u32 2147483647, %v14029_v48 }
 0x5e8   :  { %v9155_v3 = vpop.eup %9154  ;;  %v5855_v10 = vand.u32 2147483647, %v14038_v58  ;;  %9162 = vpow2.f32 %v8369_v5  ;;  %v5857_v33 = vand.u32 2147483648, %v14038_v58  ;;  %v14079_v26 = vadd.f32 1.0, %v9153_v28  ;;  %v14108_v29 = vpop.f32.mrf.mxu1 }
 0x5e9   :  { %v5712_v53 = vmul.f32 %v9155_v3, %v14019_v59  ;;  %9164 = vrcp.f32 %v14058_v9  ;;  %v14081_v30 = vadd.f32 %v4107_v52, %v4059_v57  ;;  %vm14085_vm7 = vcmp.eq.f32.partialorder %v5720_v7, 8.507059e+37 }
 0x5ea   :  { %v5723_v45 = vor.u32 1.1754944e-38, %v5722_v18  ;;  %9166 = vrcp.f32 %v14060_v25  ;;  %vm5836_vm8 = vweird.f32 %v14029_v48  ;;  %v5843_v11 = vor.u32 1.1754944e-38, %v5842_v2  ;;  %v14128_v52 = vpop.f32.mrf.mxu2 }
 0x5eb   :  { %v14083_v60 = vpop.eup %9156  ;;  %v5713_v4 = vsub.f32 1.0, %v5712_v53  ;;  %vm5851_vm9 = vweird.f32 %v14038_v58  ;;  %vm5717_vm10 = vweird.f32 %v9155_v3  ;;  %vm14098_vm11 = vcmp.eq.f32.partialorder %v5840_v17, 8.507059e+37 }
 0x5ec   :  { %v14090_v61 = vpop.eup %9158  ;;  %v5832_v49 = vmul.f32 %v14083_v60, %v14029_v48  ;;  %vm14104_vm12 = vcmp.eq.f32.partialorder %v5855_v10, 8.507059e+37  ;;  %v5858_v51 = vor.u32 1.1754944e-38, %v5857_v33  ;;  %v5975_v15 = vand.u32 2147483647, %v14058_v9  ;;  %vm5718_vm14 = vmor %vm5716_vm6, %vm5717_vm10 }
 0x5ed   :  { %v9161_v37 = vpop.eup %9160  ;;  %v5714_v38 = vmul.f32 %v9155_v3, %v5713_v4  ;;  %v5847_v8 = vmul.f32 %v14090_v61, %v14038_v58  ;;  %9168 = vrcp.f32 %v14079_v26  ;;  %vm5971_vm13 = vweird.f32 %v14058_v9  ;;  %v14115_v20 = vpop.f32.mrf.mxu0 }
 0x5ee   :  { %v5833_v63 = vsub.f32 1.0, %v5832_v49  ;;  %v9163_v31 = vpop.eup %9162  ;;  %v5977_v42 = vand.u32 2147483648, %v14058_v9  ;;  %v5990_v21 = vand.u32 2147483647, %v14060_v25  ;;  %vm5837_vm15 = vweird.f32 %v14083_v60  ;;  %v4112_v4 = vpop.f32.mrf.mxu3 }
 0x5ef   :  { %v5715_v36 = vadd.f32 %v9155_v3, %v5714_v38  ;;  %v5848_v41 = vsub.f32 1.0, %v5847_v8  ;;  %v14117_v55 = vpop.eup %9164  ;;  %vm5852_vm0 = vweird.f32 %v14090_v61  ;;  %vm5986_vm1 = vweird.f32 %v14060_v25  ;;  %vm14149_vm3 = vmor %vm5836_vm8, %vm5837_vm15 }
 0x5f0   :  { %v5834_v23 = vmul.f32 %v14083_v60, %v5833_v63  ;;  %v14126_v46 = vadd.f32 1.0, %v9161_v37  ;;  %v9167_v12 = vpop.eup %9166  ;;  %v5967_v59 = vmul.f32 %v14117_v55, %v14058_v9  ;;  %v5992_v44 = vand.u32 2147483648, %v14060_v25  ;;  %4165 = vmatmul.bf16.gmra.mxu0 %v14968_v54  ;;  %vm5853_vm4 = vmor %vm5851_vm9, %vm5852_vm0  ;;  %v14173_v10 = vpop.f32.mrf.mxu1 }
 0x5f1   :  { %v5719_v27 = vsel %vm5718_vm14, %v9155_v3, %v5715_v36  ;;  %v5849_v50 = vmul.f32 %v14090_v61, %v5848_v41  ;;  %vm14137_vm2 = vcmp.eq.f32.partialorder %v5975_v15, 8.507059e+37  ;;  %v5982_v47 = vmul.f32 %v9167_v12, %v14060_v25 }
 0x5f2   :  { %v5724_v32 = vsel %vm14085_vm7, %v5723_v45, %v5719_v27  ;;  %v5835_v6 = vadd.f32 %v14083_v60, %v5834_v23  ;;  %v6110_v62 = vand.u32 2147483647, %v14079_v26  ;;  %v5968_v18 = vsub.f32 1.0, %v5967_v59  ;;  %4214 = vmatmul.bf16.gmra.mxu1 %v14973_v40  ;;  %v4065_v41 = vpop.f32.mrf.mxu2 }
 0x5f3   :  { %v6989_v7 = vpack.c.bf16 %v5724_v32, %v14066_v22  ;;  %v5850_v28 = vadd.f32 %v14090_v61, %v5849_v50  ;;  %v6112_v3 = vand.u32 2147483648, %v14079_v26  ;;  %v14156_v2 = vpop.eup %9168  ;;  %v5983_v48 = vsub.f32 1.0, %v5982_v47 }
 0x5f4   :  { %v5839_v54 = vsel %vm14149_vm3, %v14083_v60, %v5835_v6  ;;  %9170 = vrcp.f32 %v14126_v46  ;;  %v14166_v22 = vadd.f32 1.0, %v9163_v31  ;;  %v5969_v40 = vmul.f32 %v14117_v55, %v5968_v18 }
 0x5f5   :  { %7069 = vst [vmem:[#allocation11 + $0xf0] sm:$0xff] %v6989_v7  ;;  %v5854_v53 = vsel %vm5853_vm4, %v14090_v61, %v5850_v28  ;;  %vm5972_vm5 = vweird.f32 %v14117_v55  ;;  %v6102_v17 = vmul.f32 %v14156_v2, %v14079_v26  ;;  %v5844_v58 = vsel %vm14098_vm11, %v5843_v11, %v5839_v54  ;;  %v14180_v37 = vpop.f32.mrf.mxu0 }
 0x5f6   :  { %v5859_v33 = vsel %vm14104_vm12, %v5858_v51, %v5854_v53  ;;  %v5984_v60 = vmul.f32 %v9167_v12, %v5983_v48  ;;  %vm5987_vm6 = vweird.f32 %v9167_v12  ;;  %v5970_v45 = vadd.f32 %v14117_v55, %v5969_v40  ;;  %vm14184_vm7 = vmor %vm5971_vm13, %vm5972_vm5  ;;  %v4114_v18 = vpop.f32.mrf.mxu3 }
 0x5f7   :  { %v6994_v34 = vpack.c.bf16 %v5859_v33, %v5844_v58  ;;  %v5978_v61 = vor.u32 1.1754944e-38, %v5977_v42  ;;  %v6103_v49 = vsub.f32 1.0, %v6102_v17  ;;  %vm14188_vm8 = vcmp.eq.f32.partialorder %v5990_v21, 8.507059e+37  ;;  %vm5988_vm10 = vmor %vm5986_vm1, %vm5987_vm6 }
 0x5f8   :  { %v5985_v11 = vadd.f32 %v9167_v12, %v5984_v60  ;;  %vm6106_vm9 = vweird.f32 %v14079_v26  ;;  %9172 = vrcp.f32 %v14166_v22  ;;  %v5974_v8 = vsel %vm14184_vm7, %v14117_v55, %v5970_v45  ;;  %v14217_v32 = vpop.f32.mrf.mxu1 }
 0x5f9   :  { %7074 = vst [vmem:[#allocation11 + $0x114] sm:$0xff] %v6994_v34  ;;  %v5993_v9 = vor.u32 1.1754944e-38, %v5992_v44  ;;  %v6104_v16 = vmul.f32 %v14156_v2, %v6103_v49  ;;  %v6127_v63 = vand.u32 2147483648, %v14126_v46  ;;  %vm6107_vm11 = vweird.f32 %v14156_v2 }
 0x5fa   :  { %v9171_v51 = vpop.eup %9170  ;;  %v5989_v15 = vsel %vm5988_vm10, %v9167_v12, %v5985_v11  ;;  %vm14202_vm12 = vcmp.eq.f32.partialorder %v6110_v62, 8.507059e+37  ;;  %v6113_v36 = vor.u32 1.1754944e-38, %v6112_v3  ;;  %v5979_v42 = vsel %vm14137_vm2, %v5978_v61, %v5974_v8  ;;  %vm14225_vm15 = vmor %vm6106_vm9, %vm6107_vm11  ;;  %v4068_v34 = vpop.f32.mrf.mxu2 }
 0x5fb   :  { %v5994_v25 = vsel %vm14188_vm8, %v5993_v9, %v5989_v15  ;;  %v6105_v21 = vadd.f32 %v14156_v2, %v6104_v16  ;;  %v6117_v55 = vmul.f32 %v9171_v51, %v14126_v46  ;;  %vm6121_vm13 = vweird.f32 %v14126_v46 }
 0x5fc   :  { %v6999_v23 = vpack.c.bf16 %v5994_v25, %v5979_v42  ;;  %v6125_v12 = vand.u32 2147483647, %v14126_v46  ;;  %v8370_v27 = vmul.f32 -1.442695, %v14081_v30  ;;  %vm6122_vm14 = vweird.f32 %v9171_v51 }
 0x5fd   :  { %v6118_v50 = vsub.f32 1.0, %v6117_v55  ;;  %v6128_v59 = vor.u32 1.1754944e-38, %v6127_v63  ;;  %v4012_v44 = vadd.f32 %v14002_v43, %v14072_v19  ;;  %v4061_v30 = vadd.f32 %v14055_v35, %v13520_v14  ;;  %vm6123_vm0 = vmor %vm6121_vm13, %vm6122_vm14 }
 0x5fe   :  { %v14219_v6 = vpop.eup %9172  ;;  %7079 = vst [vmem:[#allocation11 + $0x138] sm:$0xff] %v6999_v23  ;;  %9174 = vpow2.f32 %v8370_v27  ;;  %v3966_v43 = vadd.f32 %v14015_v56, %v13478_v13  ;;  %v4064_v19 = vadd.f32 %v14128_v52, %v13520_v14  ;;  %v6109_v47 = vsel %vm14225_vm15, %v14156_v2, %v6105_v21  ;;  %v14245_v2 = vpop.f32.mrf.mxu0 }
 0x5ff   :  { %v6119_v62 = vmul.f32 %v9171_v51, %v6118_v50  ;;  %v6237_v26 = vmul.f32 %v14219_v6, %v14166_v22  ;;  %v8378_v7 = vmul.f32 -1.442695, %v4012_v44  ;;  %v4110_v57 = vadd.f32 %v14096_v24, %v4061_v30  ;;  %v4117_v31 = vpop.f32.mrf.mxu3 }
 0x600   :  { %v4015_v28 = vadd.f32 %v14050_v0, %v3966_v43  ;;  %v3968_v35 = vadd.f32 %v14062_v1, %v13478_v13  ;;  %v4113_v56 = vadd.f32 %v4112_v4, %v4064_v19  ;;  %v4066_v54 = vadd.f32 %v4065_v41, %v13520_v14  ;;  %v14263_v39 = vpop.f32.mrf.mxu1 }
 0x601   :  { %v6120_v3 = vadd.f32 %v9171_v51, %v6119_v62  ;;  %v6238_v52 = vsub.f32 1.0, %v6237_v26  ;;  %9176 = vpow2.f32 %v8378_v7  ;;  %v8379_v48 = vmul.f32 -1.442695, %v4110_v57 }
 0x602   :  { %v8387_v24 = vmul.f32 -1.442695, %v4015_v28  ;;  %v8388_v53 = vmul.f32 -1.442695, %v4113_v56  ;;  %v4017_v0 = vadd.f32 %v14108_v29, %v3968_v35  ;;  %v6114_v1 = vsel %vm14202_vm12, %v6113_v36, %v6109_v47  ;;  %v4070_v30 = vpop.f32.mrf.mxu2 }
 0x603   :  { %v6124_v40 = vsel %vm6123_vm0, %v9171_v51, %v6120_v3  ;;  %vm6126_vm1 = vcmp.eq.f32.partialorder %v6125_v12, 8.507059e+37  ;;  %v6239_v17 = vmul.f32 %v14219_v6, %v6238_v52  ;;  %9178 = vpow2.f32 %v8379_v48 }
 0x604   :  { %v9175_v58 = vpop.eup %9174  ;;  %v6129_v33 = vsel %vm6126_vm1, %v6128_v59, %v6124_v40  ;;  %v8396_v60 = vmul.f32 -1.442695, %v4017_v0  ;;  %v4115_v4 = vadd.f32 %v4114_v18, %v4066_v54  ;;  %9180 = vpow2.f32 %v8387_v24 }
 0x605   :  { %v7004_v46 = vpack.c.bf16 %v6129_v33, %v6114_v1  ;;  %v14254_v45 = vadd.f32 1.0, %v9175_v58  ;;  %v3971_v29 = vadd.f32 %v14115_v20, %v13478_v13  ;;  %v6245_v61 = vand.u32 2147483647, %v14166_v22 }
 0x606   :  { %9182 = vpow2.f32 %v8388_v53  ;;  %v6240_v38 = vadd.f32 %v14219_v6, %v6239_v17  ;;  %vm6242_vm2 = vweird.f32 %v14219_v6  ;;  %v6247_v8 = vand.u32 2147483648, %v14166_v22  ;;  %v14269_v16 = vpop.f32.mrf.mxu0 }
 0x607   :  { %v9177_v49 = vpop.eup %9176  ;;  %7084 = vst [vmem:[#allocation11 + $0x15c] sm:$0xff] %v7004_v46  ;;  %9184 = vrcp.f32 %v14254_v45  ;;  %v4020_v11 = vadd.f32 %v14173_v10, %v3971_v29  ;;  %v8397_v20 = vmul.f32 -1.442695, %v4115_v4  ;;  %vm6241_vm3 = vweird.f32 %v14166_v22 }
 0x608   :  { %v14266_v9 = vadd.f32 1.0, %v9177_v49  ;;  %9186 = vpow2.f32 %v8396_v60  ;;  %vm14271_vm4 = vmor %vm6241_vm3, %vm6242_vm2  ;;  %v6260_v15 = vand.u32 2147483647, %v14254_v45  ;;  %v4069_v10 = vadd.f32 %v4068_v34, %v13520_v14 }
 0x609   :  { %v9179_v63 = vpop.eup %9178  ;;  %v6244_v41 = vsel %vm14271_vm4, %v14219_v6, %v6240_v38  ;;  %v6262_v22 = vand.u32 2147483648, %v14254_v45  ;;  %v8405_v25 = vmul.f32 -1.442695, %v4020_v11  ;;  %vm6246_vm5 = vcmp.eq.f32.partialorder %v6245_v61, 8.507059e+37 }
 0x60a   :  { %9188 = vrcp.f32 %v14266_v9  ;;  %v9181_v36 = vpop.eup %9180  ;;  %v14282_v42 = vadd.f32 1.0, %v9179_v63  ;;  %v6248_v55 = vor.u32 1.1754944e-38, %v6247_v8  ;;  %vm6256_vm6 = vweird.f32 %v14254_v45 }
 0x60b   :  { %v14284_v23 = vadd.f32 1.0, %v9181_v36  ;;  %9190 = vpow2.f32 %v8397_v20  ;;  %v3973_v27 = vadd.f32 %v14180_v37, %v13478_v13  ;;  %v4118_v50 = vadd.f32 %v4117_v31, %v4069_v10  ;;  %v14300_v13 = vpop.f32.mrf.mxu1 }
 0x60c   :  { %v9183_v21 = vpop.eup %9182  ;;  %9192 = vrcp.f32 %v14282_v42  ;;  %v14290_v44 = vsel %vm6246_vm5, %v6248_v55, %v6244_v41  ;;  %vm14293_vm7 = vcmp.eq.f32.partialorder %v6260_v15, 8.507059e+37  ;;  %v6263_v43 = vor.u32 1.1754944e-38, %v6262_v22 }
 0x60d   :  { %v9185_v12 = vpop.eup %9184  ;;  %9194 = vrcp.f32 %v14284_v23  ;;  %v6380_v19 = vand.u32 2147483647, %v14266_v9  ;;  %v6382_v47 = vand.u32 2147483648, %v14266_v9  ;;  %vm6376_vm8 = vweird.f32 %v14266_v9 }
 0x60e   :  { %v9187_v59 = vpop.eup %9186  ;;  %v6252_v6 = vmul.f32 %v9185_v12, %v14254_v45  ;;  %9196 = vpow2.f32 %v8405_v25  ;;  %v6395_v26 = vand.u32 2147483647, %v14282_v42  ;;  %v14306_v7 = vadd.f32 1.0, %v9183_v21  ;;  %v14320_v3 = vpop.f32.mrf.mxu0 }
 0x60f   :  { %v14308_v57 = vadd.f32 1.0, %v9187_v59  ;;  %v14312_v35 = vmul.f32 -1.442695, %v4118_v50  ;;  %v14315_v56 = vadd.f32 %v14217_v32, %v3973_v27  ;;  %v14318_v18 = vadd.f32 %v4070_v30, %v13520_v14 }
 0x610   :  { %v14302_v37 = vpop.eup %9188  ;;  %v6253_v62 = vsub.f32 1.0, %v6252_v6  ;;  %vm6257_vm9 = vweird.f32 %v9185_v12  ;;  %v6397_v48 = vand.u32 2147483648, %v14282_v42  ;;  %9198 = vrcp.f32 %v14306_v7 }
 0x611   :  { %v6372_v28 = vmul.f32 %v14302_v37, %v14266_v9  ;;  %v9191_v52 = vpop.eup %9190  ;;  %v6383_v0 = vor.u32 1.1754944e-38, %v6382_v47  ;;  %vm6391_vm10 = vweird.f32 %v14282_v42  ;;  %9200 = vrcp.f32 %v14308_v57  ;;  %vm6258_vm13 = vmor %vm6256_vm6, %vm6257_vm9 }
 0x612   :  { %v6254_v54 = vmul.f32 %v9185_v12, %v6253_v62  ;;  %v9193_v24 = vpop.eup %9192  ;;  %vm14328_vm11 = vcmp.eq.f32.partialorder %v6380_v19, 8.507059e+37  ;;  %vm14333_vm12 = vcmp.eq.f32.partialorder %v6395_v26, 8.507059e+37  ;;  %v6517_v58 = vand.u32 2147483648, %v14284_v23 }
 0x613   :  { %v6373_v53 = vsub.f32 1.0, %v6372_v28  ;;  %v14326_v32 = vpop.eup %9194  ;;  %v6387_v40 = vmul.f32 %v9193_v24, %v14282_v42  ;;  %vm6511_vm14 = vweird.f32 %v14284_v23  ;;  %v6515_v34 = vand.u32 2147483647, %v14284_v23  ;;  %v14352_v8 = vpop.f32.mrf.mxu1 }
 0x614   :  { %v6255_v14 = vadd.f32 %v9185_v12, %v6254_v54  ;;  %v9197_v33 = vpop.eup %9196  ;;  %v6507_v4 = vmul.f32 %v14326_v32, %v14284_v23  ;;  %vm6377_vm15 = vweird.f32 %v14302_v37  ;;  %v6398_v61 = vor.u32 1.1754944e-38, %v6397_v48  ;;  %v4119_v54 = vpop.f32.mrf.mxu3 }
 0x615   :  { %v6374_v60 = vmul.f32 %v14302_v37, %v6373_v53  ;;  %v6388_v29 = vsub.f32 1.0, %v6387_v40  ;;  %v14350_v11 = vadd.f32 1.0, %v9191_v52  ;;  %vm6392_vm0 = vweird.f32 %v9193_v24  ;;  %vm14359_vm1 = vmor %vm6376_vm8, %vm6377_vm15  ;;  %v14407_v52 = vld [vmem:[%s14706_s12 + $0x8] ss:$0 sm:$0xff]  ;;  %s9446_s12 = smov [#allocation11]  }
 0x616   :  { %v6259_v46 = vsel %vm6258_vm13, %v9185_v12, %v6255_v14  ;;  %v6508_v38 = vsub.f32 1.0, %v6507_v4  ;;  %v9199_v20 = vpop.eup %9198  ;;  %v6518_v15 = vor.u32 1.1754944e-38, %v6517_v58  ;;  %vm14364_vm2 = vcmp.eq.f32.partialorder %v6515_v34, 8.507059e+37  ;;  %v14371_v21 = vpop.f32.mrf.mxu0  ;;  %vm6393_vm4 = vmor %vm6391_vm10, %vm6392_vm0  ;;  %s7120_s1 = sshll.u32 %s9446_s12, 4  ;;  %s7121_s1 = int_to_ptr.vmem [resolvable:$true] %s7120_s1 }
 0x617   :  { %v6264_v49 = vsel %vm14293_vm7, %v6263_v43, %v6259_v46  ;;  %v6375_v45 = vadd.f32 %v14302_v37, %v6374_v60  ;;  %v6389_v51 = vmul.f32 %v9193_v24, %v6388_v29  ;;  %v14355_v10 = vpop.eup %9200  ;;  %v6522_v22 = vmul.f32 %v9199_v20, %v14306_v7 }
 0x618   :  { %v7009_v63 = vpack.c.bf16 %v6264_v49, %v14290_v44  ;;  %v6509_v36 = vmul.f32 %v14326_v32, %v6508_v38  ;;  %vm6526_vm3 = vweird.f32 %v14306_v7  ;;  %v6530_v25 = vand.u32 2147483647, %v14306_v7 }
 0x619   :  { %v6379_v9 = vsel %vm14359_vm1, %v14302_v37, %v6375_v45  ;;  %v6390_v55 = vadd.f32 %v9193_v24, %v6389_v51  ;;  %v6532_v12 = vand.u32 2147483648, %v14306_v7  ;;  %v6642_v27 = vmul.f32 %v14355_v10, %v14308_v57 }
 0x61a   :  { %7089 = vst [vmem:[#allocation11 + $0x180] sm:$0xff] %v7009_v63  ;;  %v6510_v50 = vadd.f32 %v14326_v32, %v6509_v36  ;;  %vm6512_vm5 = vweird.f32 %v14326_v32  ;;  %v6523_v59 = vsub.f32 1.0, %v6522_v22  ;;  %vm6646_vm6 = vweird.f32 %v14308_v57 }
 0x61b   :  { %9202 = vrcp.f32 %v14350_v11  ;;  %v6394_v44 = vsel %vm6393_vm4, %v9193_v24, %v6390_v55  ;;  %vm6527_vm7 = vweird.f32 %v9199_v20  ;;  %v6643_v6 = vsub.f32 1.0, %v6642_v27  ;;  %vm14395_vm8 = vmor %vm6511_vm14, %vm6512_vm5  ;;  %v4187_v53 = vpop.f32.mrf.mxu1 }
 0x61c   :  { %v6650_v5 = vand.u32 2147483647, %v14308_v57  ;;  %v6384_v30 = vsel %vm14328_vm11, %v6383_v0, %v6379_v9  ;;  %v6399_v42 = vsel %vm14333_vm12, %v6398_v61, %v6394_v44  ;;  %v6524_v43 = vmul.f32 %v9199_v20, %v6523_v59  ;;  %vm6528_vm10 = vmor %vm6526_vm3, %vm6527_vm7 }
 0x61d   :  { %v14391_v19 = vadd.f32 1.0, %v9197_v33  ;;  %v7014_v47 = vpack.c.bf16 %v6399_v42, %v6384_v30  ;;  %vm14399_vm9 = vcmp.eq.f32.partialorder %v6530_v25, 8.507059e+37  ;;  %v6533_v26 = vor.u32 1.1754944e-38, %v6532_v12 }
 0x61e   :  { %v6644_v28 = vmul.f32 %v14355_v10, %v6643_v6  ;;  %v6514_v23 = vsel %vm14395_vm8, %v14326_v32, %v6510_v50  ;;  %v6525_v48 = vadd.f32 %v9199_v20, %v6524_v43  ;;  %v6652_v24 = vand.u32 2147483648, %v14308_v57  ;;  %v4141_v7 = vpop.f32.mrf.mxu0 }
 0x61f   :  { %9204 = vrcp.f32 %v14391_v19  ;;  %7094 = vst [vmem:[#allocation11 + $0x1a4] sm:$0xff] %v7014_v47  ;;  %vm6647_vm11 = vweird.f32 %v14355_v10  ;;  %vm14418_vm12 = vcmp.eq.f32.partialorder %v6650_v5, 8.507059e+37  ;;  %v6665_v14 = vand.u32 2147483647, %v14350_v11 }
 0x620   :  { %9206 = vpow2.f32 %v14312_v35  ;;  %v6529_v1 = vsel %vm6528_vm10, %v9199_v20, %v6525_v48  ;;  %v6645_v40 = vadd.f32 %v14355_v10, %v6644_v28  ;;  %v8414_v17 = vmul.f32 -1.442695, %v14315_v56  ;;  %vm14440_vm14 = vmor %vm6646_vm6, %vm6647_vm11 }
 0x621   :  { %v9203_v32 = vpop.eup %9202  ;;  %v4120_v58 = vadd.f32 %v4119_v54, %v14318_v18  ;;  %v6519_v33 = vsel %vm14364_vm2, %v6518_v15, %v6514_v23  ;;  %v6534_v60 = vsel %vm14399_vm9, %v6533_v26, %v6529_v1  ;;  %v4132_v35 = vadd.f32 %v14407_v52, %v14245_v2 }
 0x622   :  { %v6657_v4 = vmul.f32 %v9203_v32, %v14350_v11  ;;  %v7019_v34 = vpack.c.bf16 %v6534_v60, %v6519_v33  ;;  %v6653_v46 = vor.u32 1.1754944e-38, %v6652_v24  ;;  %vm6661_vm13 = vweird.f32 %v14350_v11 }
 0x623   :  { %v6667_v56 = vand.u32 2147483648, %v14350_v11  ;;  %9208 = vpow2.f32 %v8414_v17  ;;  %v8415_v61 = vmul.f32 -1.442695, %v4120_v58  ;;  %v4181_v49 = vadd.f32 %v14263_v39, %v4132_v35  ;;  %v4190_v41 = vpop.f32.mrf.mxu1 }
 0x624   :  { %v6658_v29 = vsub.f32 1.0, %v6657_v4  ;;  %7099 = vst [vmem:[#allocation11 + $0x1c8] sm:$0xff] %v7019_v34  ;;  %v6649_v45 = vsel %vm14440_vm14, %v14355_v10, %v6645_v40  ;;  %vm6662_vm15 = vweird.f32 %v9203_v32  ;;  %vm14450_vm0 = vcmp.eq.f32.partialorder %v6665_v14, 8.507059e+37 }
 0x625   :  { %v14445_v2 = vpop.eup %9204  ;;  %v4134_v57 = vadd.f32 %v14407_v52, %v14269_v16  ;;  %9210 = vpow2.f32 %v8415_v61  ;;  %v4137_v51 = vadd.f32 %v14407_v52, %v14320_v3  ;;  %v6668_v15 = vor.u32 1.1754944e-38, %v6667_v56  ;;  %vm6663_vm1 = vmor %vm6661_vm13, %vm6662_vm15 }
 0x626   :  { %v9207_v20 = vpop.eup %9206  ;;  %v6659_v63 = vmul.f32 %v9203_v32, %v6658_v29  ;;  %v6777_v39 = vmul.f32 %v14445_v2, %v14391_v19  ;;  %v8281_v10 = vmul.f32 -1.442695, %v4181_v49  ;;  %v6785_v16 = vand.u32 2147483647, %v14391_v19  ;;  %v14474_v12 = vpop.f32.mrf.mxu0 }
 0x627   :  { %v14460_v31 = vadd.f32 1.0, %v9207_v20  ;;  %v4183_v36 = vadd.f32 %v14300_v13, %v4134_v57  ;;  %v4186_v9 = vadd.f32 %v14352_v8, %v4137_v51  ;;  %v6654_v55 = vsel %vm14418_vm12, %v6653_v46, %v6649_v45 }
 0x628   :  { %v6660_v22 = vadd.f32 %v9203_v32, %v6659_v63  ;;  %v6778_v25 = vsub.f32 1.0, %v6777_v39  ;;  %v4139_v3 = vadd.f32 %v14407_v52, %v14371_v21  ;;  %v4142_v13 = vadd.f32 %v14407_v52, %v4141_v7 }
 0x629   :  { %9212 = vrcp.f32 %v14460_v31  ;;  %v9209_v27 = vpop.eup %9208  ;;  %v8290_v59 = vmul.f32 -1.442695, %v4183_v36  ;;  %vm6782_vm2 = vweird.f32 %v14445_v2  ;;  %v8299_v42 = vmul.f32 -1.442695, %v4186_v9 }
 0x62a   :  { %v6664_v50 = vsel %vm6663_vm1, %v9203_v32, %v6660_v22  ;;  %v6779_v8 = vmul.f32 %v14445_v2, %v6778_v25  ;;  %9214 = vpow2.f32 %v8281_v10  ;;  %v14480_v11 = vadd.f32 1.0, %v9209_v27 }
 0x62b   :  { %v6669_v44 = vsel %vm14450_vm0, %v6668_v15, %v6664_v50  ;;  %v4188_v6 = vadd.f32 %v4187_v53, %v4139_v3  ;;  %v9211_v5 = vpop.eup %9210  ;;  %9216 = vpow2.f32 %v8290_v59  ;;  %vm6781_vm3 = vweird.f32 %v14391_v19  ;;  %v14501_v48 = vpop.f32.mrf.mxu1 }
 0x62c   :  { %v7024_v21 = vpack.c.bf16 %v6669_v44, %v6654_v55  ;;  %v6780_v30 = vadd.f32 %v14445_v2, %v6779_v8  ;;  %v6787_v43 = vand.u32 2147483648, %v14391_v19  ;;  %9218 = vrcp.f32 %v14480_v11  ;;  %vm14492_vm4 = vmor %vm6781_vm3, %vm6782_vm2 }
 0x62d   :  { %v4191_v47 = vadd.f32 %v4190_v41, %v4142_v13  ;;  %v6800_v37 = vand.u32 2147483647, %v14460_v31  ;;  %v6802_v62 = vand.u32 2147483648, %v14460_v31  ;;  %v14488_v26 = vadd.f32 1.0, %v9211_v5 }
 0x62e   :  { %7104 = vst [vmem:[#allocation11 + $0x1ec] sm:$0xff] %v7024_v21  ;;  %9220 = vpow2.f32 %v8299_v42  ;;  %vm14496_vm5 = vcmp.eq.f32.partialorder %v6785_v16, 8.507059e+37  ;;  %v6922_v23 = vand.u32 2147483648, %v14480_v11  ;;  %v6784_v53 = vsel %vm14492_vm4, %v14445_v2, %v6780_v30  ;;  %v4146_v17 = vpop.f32.mrf.mxu0 }
 0x62f   :  { %v9213_v28 = vpop.eup %9212  ;;  %9222 = vrcp.f32 %v14488_v26  ;;  %v8308_v14 = vmul.f32 -1.442695, %v4188_v6  ;;  %v6788_v32 = vor.u32 1.1754944e-38, %v6787_v43  ;;  %vm6796_vm6 = vweird.f32 %v14460_v31 }
 0x630   :  { %v9215_v24 = vpop.eup %9214  ;;  %v6792_v0 = vmul.f32 %v9213_v28, %v14460_v31  ;;  %v8317_v40 = vmul.f32 -1.442695, %v4191_v47  ;;  %vm14511_vm7 = vcmp.eq.f32.partialorder %v6800_v37, 8.507059e+37  ;;  %v6803_v60 = vor.u32 1.1754944e-38, %v6802_v62 }
 0x631   :  { %v14509_v1 = vadd.f32 1.0, %v9215_v24  ;;  %v9217_v58 = vpop.eup %9216  ;;  %v6920_v4 = vand.u32 2147483647, %v14480_v11  ;;  %v6789_v34 = vsel %vm14496_vm5, %v6788_v32, %v6784_v53  ;;  %vm6916_vm8 = vweird.f32 %v14480_v11 }
 0x632   :  { %v6793_v7 = vsub.f32 1.0, %v6792_v0  ;;  %v14516_v35 = vpop.eup %9218  ;;  %v6923_v46 = vor.u32 1.1754944e-38, %v6922_v23  ;;  %vm6797_vm9 = vweird.f32 %v9213_v28  ;;  %vm6931_vm10 = vweird.f32 %v14488_v26 }
 0x633   :  { %9224 = vrcp.f32 %v14509_v1  ;;  %v6912_v29 = vmul.f32 %v14516_v35, %v14480_v11  ;;  %v6935_v61 = vand.u32 2147483647, %v14488_v26  ;;  %v14526_v49 = vadd.f32 1.0, %v9217_v58  ;;  %vm6798_vm12 = vmor %vm6796_vm6, %vm6797_vm9  ;;  %v14545_v10 = vpop.f32.mrf.mxu1 }
 0x634   :  { %v9221_v56 = vpop.eup %9220  ;;  %v6794_v18 = vmul.f32 %v9213_v28, %v6793_v7  ;;  %9226 = vpow2.f32 %v8308_v14  ;;  %vm14530_vm11 = vcmp.eq.f32.partialorder %v6920_v4, 8.507059e+37  ;;  %v6937_v63 = vand.u32 2147483648, %v14488_v26 }
 0x635   :  { %v14528_v2 = vadd.f32 1.0, %v9221_v56  ;;  %9228 = vpow2.f32 %v8317_v40  ;;  %v9223_v45 = vpop.eup %9222  ;;  %v6913_v57 = vsub.f32 1.0, %v6912_v29  ;;  %v4144_v39 = vadd.f32 %v14407_v52, %v14474_v12 }
 0x636   :  { %v6795_v38 = vadd.f32 %v9213_v28, %v6794_v18  ;;  %vm6917_vm13 = vweird.f32 %v14516_v35  ;;  %v6927_v51 = vmul.f32 %v9223_v45, %v14488_v26  ;;  %9230 = vrcp.f32 %v14526_v49  ;;  %v14557_v3 = vpop.f32.mrf.mxu0 }
 0x637   :  { %v14543_v15 = vadd.f32 %v14407_v52, %v4146_v17  ;;  %v6914_v41 = vmul.f32 %v14516_v35, %v6913_v57  ;;  %v4925_v22 = vand.u32 2147483647, %v14509_v1  ;;  %v4927_v25 = vand.u32 2147483648, %v14509_v1  ;;  %vm14565_vm15 = vmor %vm6916_vm8, %vm6917_vm13 }
 0x638   :  { %v6799_v36 = vsel %vm6798_vm12, %v9213_v28, %v6795_v38  ;;  %v6928_v9 = vsub.f32 1.0, %v6927_v51  ;;  %vm14552_vm14 = vcmp.eq.f32.partialorder %v6935_v61, 8.507059e+37  ;;  %9232 = vrcp.f32 %v14528_v2 }
 0x639   :  { %v9225_v31 = vpop.eup %9224  ;;  %v6804_v16 = vsel %vm14511_vm7, %v6803_v60, %v6799_v36  ;;  %v6915_v27 = vadd.f32 %v14516_v35, %v6914_v41  ;;  %v6938_v50 = vor.u32 1.1754944e-38, %v6937_v63  ;;  %vm6932_vm0 = vweird.f32 %v9223_v45 }
 0x63a   :  { %v9227_v13 = vpop.eup %9226  ;;  %v7029_v12 = vpack.c.bf16 %v6804_v16, %v6789_v34  ;;  %v4917_v8 = vmul.f32 %v9225_v31, %v14509_v1  ;;  %v6929_v6 = vmul.f32 %v9223_v45, %v6928_v9  ;;  %vm4921_vm1 = vweird.f32 %v14509_v1  ;;  %vm6933_vm4 = vmor %vm6931_vm10, %vm6932_vm0 }
 0x63b   :  { %v9229_v59 = vpop.eup %9228  ;;  %v4193_v5 = vadd.f32 %v14501_v48, %v4144_v39  ;;  %v6919_v21 = vsel %vm14565_vm15, %v14516_v35, %v6915_v27  ;;  %vm14574_vm2 = vcmp.eq.f32.partialorder %v4925_v22, 8.507059e+37  ;;  %v4928_v11 = vor.u32 1.1754944e-38, %v4927_v25  ;;  %v4197_v0 = vpop.f32.mrf.mxu1 }
 0x63c   :  { %7109 = vst [vmem:[#allocation11 + $0x210] sm:$0xff] %v7029_v12  ;;  %v4918_v30 = vsub.f32 1.0, %v4917_v8  ;;  %v9231_v43 = vpop.eup %9230  ;;  %v6930_v47 = vadd.f32 %v9223_v45, %v6929_v6  ;;  %vm5056_vm3 = vweird.f32 %v14526_v49  ;;  %v5060_v37 = vand.u32 2147483647, %v14526_v49 }
 0x63d   :  { %v14580_v62 = vadd.f32 1.0, %v9227_v13  ;;  %vm4922_vm5 = vweird.f32 %v9225_v31  ;;  %v5052_v54 = vmul.f32 %v9231_v43, %v14526_v49  ;;  %v14585_v19 = vadd.f32 1.0, %v9229_v59 }
 0x63e   :  { %v4919_v28 = vmul.f32 %v9225_v31, %v4918_v30  ;;  %v9233_v23 = vpop.eup %9232  ;;  %v6924_v48 = vsel %vm14530_vm11, %v6923_v46, %v6919_v21  ;;  %v6934_v24 = vsel %vm6933_vm4, %v9223_v45, %v6930_v47  ;;  %v5062_v53 = vand.u32 2147483648, %v14526_v49  ;;  %vm4923_vm6 = vmor %vm4921_vm1, %vm4922_vm5  ;;  %v4151_v33 = vpop.f32.mrf.mxu0 }
 0x63f   :  { %9234 = vrcp.f32 %v14580_v62  ;;  %v6939_v26 = vsel %vm14552_vm14, %v6938_v50, %v6934_v24  ;;  %v5053_v32 = vsub.f32 1.0, %v5052_v54  ;;  %v5187_v40 = vmul.f32 %v9233_v23, %v14528_v2 }
 0x640   :  { %v4920_v14 = vadd.f32 %v9225_v31, %v4919_v28  ;;  %v7034_v17 = vpack.c.bf16 %v6939_v26, %v6924_v48  ;;  %vm5057_vm7 = vweird.f32 %v9231_v43  ;;  %v5195_v58 = vand.u32 2147483647, %v14528_v2 }
 0x641   :  { %v5197_v7 = vand.u32 2147483648, %v14528_v2  ;;  %v5054_v4 = vmul.f32 %v9231_v43, %v5053_v32  ;;  %v5188_v35 = vsub.f32 1.0, %v5187_v40  ;;  %9236 = vrcp.f32 %v14585_v19  ;;  %vm5058_vm11 = vmor %vm5056_vm3, %vm5057_vm7 }
 0x642   :  { %v4924_v60 = vsel %vm4923_vm6, %v9225_v31, %v4920_v14  ;;  %7114 = vst [vmem:[#allocation11 + $0x234] sm:$0xff] %v7034_v17  ;;  %vm14601_vm8 = vcmp.eq.f32.partialorder %v5060_v37, 8.507059e+37  ;;  %v5063_v1 = vor.u32 1.1754944e-38, %v5062_v53  ;;  %vm5191_vm9 = vweird.f32 %v14528_v2 }
 0x643   :  { %v4929_v34 = vsel %vm14574_vm2, %v4928_v11, %v4924_v60  ;;  %v5055_v18 = vadd.f32 %v9231_v43, %v5054_v4  ;;  %v5189_v29 = vmul.f32 %v9233_v23, %v5188_v35  ;;  %vm5192_vm10 = vweird.f32 %v9233_v23 }
 0x644   :  { %v6960_v56 = vpack.c.bf16 %v4929_v34, %v4929_v34  ;;  %vm14609_vm12 = vcmp.eq.f32.partialorder %v5195_v58, 8.507059e+37  ;;  %v5198_v38 = vor.u32 1.1754944e-38, %v5197_v7  ;;  %v8326_v57 = vmul.f32 -1.442695, %v4193_v5  ;;  %vm5193_vm13 = vmor %vm5191_vm9, %vm5192_vm10 }
 0x645   :  { %v9235_v61 = vpop.eup %9234  ;;  %v4196_v20 = vadd.f32 %v14545_v10, %v14543_v15  ;;  %v5059_v63 = vsel %vm5058_vm11, %v9231_v43, %v5055_v18  ;;  %v5190_v39 = vadd.f32 %v9233_v23, %v5189_v29  ;;  %v5330_v36 = vand.u32 2147483647, %v14580_v62  ;;  %v4200_v15 = vpop.f32.mrf.mxu1 }
 0x646   :  { %7040 = vst [vmem:[#allocation11 + $0x20] sm:$0xf] %v6960_v56  ;;  %v5322_v51 = vmul.f32 %v9235_v61, %v14580_v62  ;;  %v5064_v49 = vsel %vm14601_vm8, %v5063_v1, %v5059_v63  ;;  %v5332_v41 = vand.u32 2147483648, %v14580_v62  ;;  %9238 = vpow2.f32 %v8326_v57  ;;  %v4153_v12 = vpop.f32.mrf.mxu0 }
 0x647   :  { %v4149_v22 = vadd.f32 %v14407_v52, %v14557_v3  ;;  %v9237_v10 = vpop.eup %9236  ;;  %v6965_v25 = vpack.c.bf16 %v5064_v49, %v5064_v49  ;;  %v5194_v31 = vsel %vm5193_vm13, %v9233_v23, %v5190_v39  ;;  %v8335_v9 = vmul.f32 -1.442695, %v4196_v20 }
 0x648   :  { %v5323_v16 = vsub.f32 1.0, %v5322_v51  ;;  %v5199_v55 = vsel %vm14609_vm12, %v5198_v38, %v5194_v31  ;;  %vm5327_vm14 = vweird.f32 %v9235_v61  ;;  %v5457_v13 = vmul.f32 %v9237_v10, %v14585_v19 }
 0x649   :  { %v4198_v2 = vadd.f32 %v4197_v0, %v4149_v22  ;;  %7045 = vst [vmem:[#allocation11 + $0x44] sm:$0xf] %v6965_v25  ;;  %v6970_v27 = vpack.c.bf16 %v5199_v55, %v5199_v55  ;;  %9240 = vpow2.f32 %v8335_v9  ;;  %v4152_v3 = vadd.f32 %v14407_v52, %v4151_v33 }
 0x64a   :  { %v5324_v50 = vmul.f32 %v9235_v61, %v5323_v16  ;;  %vm5326_vm15 = vweird.f32 %v14580_v62  ;;  %v5458_v8 = vsub.f32 1.0, %v5457_v13  ;;  %v5333_v6 = vor.u32 1.1754944e-38, %v5332_v41 }
 0x64b   :  { %v8344_v59 = vmul.f32 -1.442695, %v4198_v2  ;;  %7050 = vst [vmem:[#allocation11 + $0x68] sm:$0xf] %v6970_v27  ;;  %v5467_v5 = vand.u32 2147483648, %v14585_v19  ;;  %v4201_v21 = vadd.f32 %v4200_v15, %v4152_v3  ;;  %vm5328_vm0 = vmor %vm5326_vm15, %vm5327_vm14  ;;  %vm5462_vm1 = vweird.f32 %v9237_v10 }
 0x64c   :  { %v5325_v44 = vadd.f32 %v9235_v61, %v5324_v50  ;;  %v9239_v30 = vpop.eup %9238  ;;  %v5459_v42 = vmul.f32 %v9237_v10, %v5458_v8  ;;  %v5465_v11 = vand.u32 2147483647, %v14585_v19  ;;  %vm5331_vm2 = vcmp.eq.f32.partialorder %v5330_v36, 8.507059e+37 }
 0x64d   :  { %9242 = vpow2.f32 %v8344_v59  ;;  %v4705_v47 = vadd.f32 1.0, %v9239_v30  ;;  %v8353_v37 = vmul.f32 -1.442695, %v4201_v21  ;;  %vm5461_vm3 = vweird.f32 %v14585_v19  ;;  %v4202_v54 = vpop.f32.mrf.mxu1 }
 0x64e   :  { %v5329_v43 = vsel %vm5328_vm0, %v9235_v61, %v5325_v44  ;;  %v5460_v28 = vadd.f32 %v9237_v10, %v5459_v42  ;;  %vm5463_vm4 = vmor %vm5461_vm3, %vm5462_vm1  ;;  %v5468_v24 = vor.u32 1.1754944e-38, %v5467_v5  ;;  %v4154_v53 = vadd.f32 %v14407_v52, %v4153_v12  ;;  %v4156_v14 = vpop.f32.mrf.mxu0 }
 0x64f   :  { %v5334_v62 = vsel %vm5331_vm2, %v5333_v6, %v5329_v43  ;;  %v9241_v23 = vpop.eup %9240  ;;  %9244 = vrcp.f32 %v4705_v47  ;;  %vm5466_vm5 = vcmp.eq.f32.partialorder %v5465_v11, 8.507059e+37  ;;  %v4157_v60 = vadd.f32 %v14407_v52, %v4156_v14 }
 0x650   :  { %v6975_v48 = vpack.c.bf16 %v5334_v62, %v5334_v62  ;;  %v5464_v0 = vsel %vm5463_vm4, %v9237_v10, %v5460_v28  ;;  %v4714_v26 = vadd.f32 1.0, %v9241_v23  ;;  %9246 = vpow2.f32 %v8353_v37 }
 0x651   :  { %v5469_v32 = vsel %vm5466_vm5, %v5468_v24, %v5464_v0  ;;  %v4203_v40 = vadd.f32 %v4202_v54, %v4154_v53  ;;  %v5600_v34 = vand.u32 2147483647, %v4705_v47  ;;  %v5602_v1 = vand.u32 2147483648, %v4705_v47 }
 0x652   :  { %7055 = vst [vmem:[#allocation11 + $0x8c] sm:$0xf] %v6975_v48  ;;  %v6980_v58 = vpack.c.bf16 %v5469_v32, %v5469_v32  ;;  %9248 = vrcp.f32 %v4714_v26  ;;  %v5735_v45 = vand.u32 2147483647, %v4714_v26  ;;  %vm5596_vm6 = vweird.f32 %v4705_v47 }
 0x653   :  { %v9243_v17 = vpop.eup %9242  ;;  %v8362_v7 = vmul.f32 -1.442695, %v4203_v40  ;;  %vm14641_vm8 = vcmp.eq.f32.partialorder %v5600_v34, 8.507059e+37  ;;  %v5603_v36 = vor.u32 1.1754944e-38, %v5602_v1  ;;  %vm5731_vm9 = vweird.f32 %v4714_v26 }
 0x654   :  { %v14634_v19 = vadd.f32 1.0, %v9243_v17  ;;  %7060 = vst [vmem:[#allocation11 + $0xb0] sm:$0xf] %v6980_v58  ;;  %v5737_v41 = vand.u32 2147483648, %v4714_v26  ;;  %vm14645_vm10 = vcmp.eq.f32.partialorder %v5735_v45, 8.507059e+37 }
 0x655   :  { %v9245_v33 = vpop.eup %9244  ;;  %v4205_v46 = vpop.f32.mrf.mxu1 }
 0x656   :  { %9250 = vrcp.f32 %v14634_v19  ;;  %v9247_v4 = vpop.eup %9246  ;;  %v5592_v35 = vmul.f32 %v9245_v33, %v4705_v47  ;;  %v4206_v18 = vadd.f32 %v4205_v46, %v4157_v60  ;;  %v4158_v38 = vpop.f32.mrf.mxu0  ;;  %vm5597_vm7 = vweird.f32 %v9245_v33 }
 0x657   :  { %v14638_v56 = vadd.f32 1.0, %v9247_v4  ;;  %9252 = vpow2.f32 %v8362_v7  ;;  %v5870_v25 = vand.u32 2147483647, %v14634_v19  ;;  %vm5598_vm11 = vmor %vm5596_vm6, %vm5597_vm7  ;;  %v4159_v9 = vadd.f32 %v14407_v52, %v4158_v38 }
 0x658   :  { %v9249_v29 = vpop.eup %9248  ;;  %v5593_v61 = vsub.f32 1.0, %v5592_v35  ;;  %v8371_v39 = vmul.f32 -1.442695, %v4206_v18  ;;  %v5872_v2 = vand.u32 2147483648, %v14634_v19  ;;  %v5738_v59 = vor.u32 1.1754944e-38, %v5737_v41 }
 0x659   :  { %v5727_v57 = vmul.f32 %v9249_v29, %v4714_v26  ;;  %9254 = vrcp.f32 %v14638_v56  ;;  %vm5732_vm12 = vweird.f32 %v9249_v29  ;;  %vm5866_vm15 = vweird.f32 %v14634_v19 }
 0x65a   :  { %v5594_v20 = vmul.f32 %v9245_v33, %v5593_v61  ;;  %9256 = vpow2.f32 %v8371_v39  ;;  %vm5733_vm13 = vmor %vm5731_vm9, %vm5732_vm12  ;;  %vm14661_vm0 = vcmp.eq.f32.partialorder %v5870_v25, 8.507059e+37  ;;  %v5873_v37 = vor.u32 1.1754944e-38, %v5872_v2 }
 0x65b   :  { %v5728_v49 = vsub.f32 1.0, %v5727_v57  ;;  %v6005_v23 = vand.u32 2147483647, %v14638_v56  ;;  %v6007_v48 = vand.u32 2147483648, %v14638_v56  ;;  %vm6001_vm3 = vweird.f32 %v14638_v56 }
 0x65c   :  { %v9251_v51 = vpop.eup %9250  ;;  %v5595_v22 = vadd.f32 %v9245_v33, %v5594_v20 }
 0x65d   :  { %v5862_v10 = vmul.f32 %v9251_v51, %v14634_v19  ;;  %v9253_v31 = vpop.eup %9252  ;;  %v5729_v16 = vmul.f32 %v9249_v29, %v5728_v49  ;;  %v4207_v27 = vpop.f32.mrf.mxu1  ;;  %vm5867_vm14 = vweird.f32 %v9251_v51  ;;  %v6008_v7 = vor.u32 1.1754944e-38, %v6007_v48 }
 0x65e   :  { %v5599_v55 = vsel %vm5598_vm11, %v9245_v33, %v5595_v22  ;;  %v14654_v12 = vadd.f32 1.0, %v9253_v31  ;;  %v4208_v44 = vadd.f32 %v4207_v27, %v4159_v9  ;;  %v4161_v30 = vpop.f32.mrf.mxu0  ;;  %vm5868_vm1 = vmor %vm5866_vm15, %vm5867_vm14  ;;  %vm6006_vm5 = vcmp.eq.f32.partialorder %v6005_v23, 8.507059e+37 }
 0x65f   :  { %v5863_v13 = vsub.f32 1.0, %v5862_v10  ;;  %v9255_v50 = vpop.eup %9254  ;;  %v5604_v3 = vsel %vm14641_vm8, %v5603_v36, %v5599_v55  ;;  %v5730_v8 = vadd.f32 %v9249_v29, %v5729_v16  ;;  %v4162_v32 = vadd.f32 %v14407_v52, %v4161_v30 }
 0x660   :  { %v6985_v6 = vpack.c.bf16 %v5604_v3, %v5604_v3  ;;  %v5997_v21 = vmul.f32 %v9255_v50, %v14638_v56  ;;  %9258 = vrcp.f32 %v14654_v12  ;;  %v9257_v28 = vpop.eup %9256  ;;  %v8380_v24 = vmul.f32 -1.442695, %v4208_v44 }
 0x661   :  { %v5864_v5 = vmul.f32 %v9251_v51, %v5863_v13  ;;  %v5734_v42 = vsel %vm5733_vm13, %v9249_v29, %v5730_v8  ;;  %vm6002_vm2 = vweird.f32 %v9255_v50  ;;  %v14670_v26 = vadd.f32 1.0, %v9257_v28 }
 0x662   :  { %7065 = vst [vmem:[#allocation11 + $0xd4] sm:$0xf] %v6985_v6  ;;  %v5739_v43 = vsel %vm14645_vm10, %v5738_v59, %v5734_v42  ;;  %v5998_v62 = vsub.f32 1.0, %v5997_v21  ;;  %9260 = vpow2.f32 %v8380_v24  ;;  %vm6003_vm4 = vmor %vm6001_vm3, %vm6002_vm2  ;;  %v6142_v56 = vand.u32 2147483648, %v14654_v12 }
 0x663   :  { %v5865_v47 = vadd.f32 %v9251_v51, %v5864_v5  ;;  %v6990_v54 = vpack.c.bf16 %v5739_v43, %v5739_v43  ;;  %9262 = vrcp.f32 %v14670_v26  ;;  %v6140_v38 = vand.u32 2147483647, %v14654_v12 }
 0x664   :  { %v5999_v0 = vmul.f32 %v9255_v50, %v5998_v62  ;;  %vm6136_vm7 = vweird.f32 %v14654_v12  ;;  %v6143_v36 = vor.u32 1.1754944e-38, %v6142_v56  ;;  %v6275_v15 = vand.u32 2147483647, %v14670_v26 }
 0x665   :  { %v5869_v53 = vsel %vm5868_vm1, %v9251_v51, %v5865_v47  ;;  %7070 = vst [vmem:[#allocation11 + $0xf8] sm:$0xf] %v6990_v54  ;;  %v4210_v58 = vpop.f32.mrf.mxu1  ;;  %vm6141_vm9 = vcmp.eq.f32.partialorder %v6140_v38, 8.507059e+37  ;;  %v6277_v10 = vand.u32 2147483648, %v14670_v26  ;;  %vm6271_vm11 = vweird.f32 %v14670_v26 }
 0x666   :  { %v5874_v14 = vsel %vm14661_vm0, %v5873_v37, %v5869_v53  ;;  %v6000_v17 = vadd.f32 %v9255_v50, %v5999_v0  ;;  %v9259_v19 = vpop.eup %9258  ;;  %v4211_v33 = vadd.f32 %v4210_v58, %v4162_v32  ;;  %v4163_v35 = vpop.f32.mrf.mxu0  ;;  %vm6276_vm13 = vcmp.eq.f32.partialorder %v6275_v15, 8.507059e+37 }
 0x667   :  { %v6995_v40 = vpack.c.bf16 %v5874_v14, %v5874_v14  ;;  %v6132_v4 = vmul.f32 %v9259_v19, %v14654_v12  ;;  %vm6137_vm6 = vweird.f32 %v9259_v19  ;;  %v4164_v63 = vadd.f32 %v14407_v52, %v4163_v35 }
 0x668   :  { %v6004_v60 = vsel %vm6003_vm4, %v9255_v50, %v6000_v17  ;;  %v8389_v46 = vmul.f32 -1.442695, %v4211_v33  ;;  %v9261_v29 = vpop.eup %9260  ;;  %vm6138_vm8 = vmor %vm6136_vm7, %vm6137_vm6  ;;  %v6278_v50 = vor.u32 1.1754944e-38, %v6277_v10 }
 0x669   :  { %7075 = vst [vmem:[#allocation11 + $0x11c] sm:$0xf] %v6995_v40  ;;  %v6009_v34 = vsel %vm6006_vm5, %v6008_v7, %v6004_v60  ;;  %v6133_v18 = vsub.f32 1.0, %v6132_v4  ;;  %v9263_v61 = vpop.eup %9262  ;;  %v4759_v57 = vadd.f32 1.0, %v9261_v29 }
 0x66a   :  { %v7000_v1 = vpack.c.bf16 %v6009_v34, %v6009_v34  ;;  %9264 = vpow2.f32 %v8389_v46  ;;  %v6267_v20 = vmul.f32 %v9263_v61, %v14670_v26  ;;  %vm6272_vm10 = vweird.f32 %v9263_v61 }
 0x66b   :  { %v6134_v45 = vmul.f32 %v9259_v19, %v6133_v18  ;;  %9266 = vrcp.f32 %v4759_v57  ;;  %vm6273_vm12 = vmor %vm6271_vm11, %vm6272_vm10  ;;  %v6412_v42 = vand.u32 2147483648, %v4759_v57  ;;  %v6410_v47 = vand.u32 2147483647, %v4759_v57 }
 0x66c   :  { %7080 = vst [vmem:[#allocation11 + $0x140] sm:$0xf] %v7000_v1  ;;  %v6268_v49 = vsub.f32 1.0, %v6267_v20  ;;  %vm6406_vm15 = vweird.f32 %v4759_v57 }
 0x66d   :  { %v6135_v39 = vadd.f32 %v9259_v19, %v6134_v45  ;;  %v4212_v51 = vpop.f32.mrf.mxu1  ;;  %v6413_v24 = vor.u32 1.1754944e-38, %v6412_v42  ;;  %vm6411_vm1 = vcmp.eq.f32.partialorder %v6410_v47, 8.507059e+37 }
 0x66e   :  { %v4213_v41 = vadd.f32 %v4212_v51, %v4164_v63  ;;  %v4166_v25 = vpop.f32.mrf.mxu0  ;;  %v6269_v9 = vmul.f32 %v9263_v61, %v6268_v49 }
 0x66f   :  { %v6139_v22 = vsel %vm6138_vm8, %v9259_v19, %v6135_v39  ;;  %v4167_v59 = vadd.f32 %v14407_v52, %v4166_v25 }
 0x670   :  { %v9265_v31 = vpop.eup %9264  ;;  %v6144_v16 = vsel %vm6141_vm9, %v6143_v36, %v6139_v22  ;;  %v8398_v55 = vmul.f32 -1.442695, %v4213_v41  ;;  %v6270_v12 = vadd.f32 %v9263_v61, %v6269_v9 }
 0x671   :  { %v7005_v13 = vpack.c.bf16 %v6144_v16, %v6144_v16  ;;  %v4768_v2 = vadd.f32 1.0, %v9265_v31  ;;  %v9267_v27 = vpop.eup %9266 }
 0x672   :  { %9268 = vpow2.f32 %v8398_v55  ;;  %v6274_v3 = vsel %vm6273_vm12, %v9263_v61, %v6270_v12  ;;  %v6402_v8 = vmul.f32 %v9267_v27, %v4759_v57  ;;  %vm6407_vm14 = vweird.f32 %v9267_v27 }
 0x673   :  { %7085 = vst [vmem:[#allocation11 + $0x164] sm:$0xf] %v7005_v13  ;;  %9270 = vrcp.f32 %v4768_v2  ;;  %v6279_v44 = vsel %vm6276_vm13, %v6278_v50, %v6274_v3  ;;  %vm6408_vm0 = vmor %vm6406_vm15, %vm6407_vm14  ;;  %v6545_v32 = vand.u32 2147483647, %v4768_v2  ;;  %v6547_v40 = vand.u32 2147483648, %v4768_v2 }
 0x674   :  { %v7010_v5 = vpack.c.bf16 %v6279_v44, %v6279_v44  ;;  %v6403_v21 = vsub.f32 1.0, %v6402_v8  ;;  %vm6541_vm3 = vweird.f32 %v4768_v2 }
 0x675   :  { %v4215_v6 = vpop.f32.mrf.mxu1  ;;  %v6548_v34 = vor.u32 1.1754944e-38, %v6547_v40  ;;  %vm6546_vm5 = vcmp.eq.f32.partialorder %v6545_v32, 8.507059e+37 }
 0x676   :  { %v4216_v30 = vadd.f32 %v4215_v6, %v4167_v59  ;;  %7090 = vst [vmem:[#allocation11 + $0x188] sm:$0xf] %v7010_v5  ;;  %v6404_v43 = vmul.f32 %v9267_v27, %v6403_v21  ;;  %v4168_v54 = vpop.f32.mrf.mxu0 }
 0x677   :  { %v4169_v26 = vadd.f32 %v14407_v52, %v4168_v54 }
 0x678   :  { %v9269_v11 = vpop.eup %9268  ;;  %v8407_v37 = vmul.f32 -1.442695, %v4216_v30  ;;  %v6405_v23 = vadd.f32 %v9267_v27, %v6404_v43 }
 0x679   :  { %v9271_v62 = vpop.eup %9270  ;;  %v4777_v28 = vadd.f32 1.0, %v9269_v11 }
 0x67a   :  { %v6537_v48 = vmul.f32 %v9271_v62, %v4768_v2  ;;  %9272 = vpow2.f32 %v8407_v37  ;;  %v6409_v53 = vsel %vm6408_vm0, %v9267_v27, %v6405_v23  ;;  %vm6542_vm2 = vweird.f32 %v9271_v62 }
 0x67b   :  { %9274 = vrcp.f32 %v4777_v28  ;;  %v6414_v14 = vsel %vm6411_vm1, %v6413_v24, %v6409_v53  ;;  %vm6543_vm4 = vmor %vm6541_vm3, %vm6542_vm2  ;;  %v6682_v61 = vand.u32 2147483648, %v4777_v28  ;;  %v6680_v38 = vand.u32 2147483647, %v4777_v28 }
 0x67c   :  { %v6538_v0 = vsub.f32 1.0, %v6537_v48  ;;  %v7015_v58 = vpack.c.bf16 %v6414_v14, %v6414_v14  ;;  %vm6676_vm7 = vweird.f32 %v4777_v28 }
 0x67d   :  { %v4217_v17 = vpop.f32.mrf.mxu1  ;;  %v6683_v39 = vor.u32 1.1754944e-38, %v6682_v61  ;;  %vm6681_vm9 = vcmp.eq.f32.partialorder %v6680_v38, 8.507059e+37 }
 0x67e   :  { %v6539_v19 = vmul.f32 %v9271_v62, %v6538_v0  ;;  %v4218_v7 = vadd.f32 %v4217_v17, %v4169_v26  ;;  %7095 = vst [vmem:[#allocation11 + $0x1ac] sm:$0xf] %v7015_v58 }
 0x680   :  { %v9273_v33 = vpop.eup %9272  ;;  %v6540_v60 = vadd.f32 %v9271_v62, %v6539_v19  ;;  %v8416_v4 = vmul.f32 -1.442695, %v4218_v7 }
 0x681   :  { %v9275_v35 = vpop.eup %9274  ;;  %v4786_v46 = vadd.f32 1.0, %v9273_v33 }
 0x682   :  { %v6544_v1 = vsel %vm6543_vm4, %v9271_v62, %v6540_v60  ;;  %v6672_v52 = vmul.f32 %v9275_v35, %v4777_v28  ;;  %9276 = vpow2.f32 %v8416_v4  ;;  %vm6677_vm6 = vweird.f32 %v9275_v35 }
 0x683   :  { %v6549_v18 = vsel %vm6546_vm5, %v6548_v34, %v6544_v1  ;;  %9278 = vrcp.f32 %v4786_v46  ;;  %vm6678_vm8 = vmor %vm6676_vm7, %vm6677_vm6  ;;  %v6817_v10 = vand.u32 2147483648, %v4786_v46  ;;  %v6815_v31 = vand.u32 2147483647, %v4786_v46 }
 0x684   :  { %v7020_v29 = vpack.c.bf16 %v6549_v18, %v6549_v18  ;;  %v6673_v56 = vsub.f32 1.0, %v6672_v52  ;;  %vm6811_vm11 = vweird.f32 %v4786_v46 }
 0x685   :  { %v6818_v55 = vor.u32 1.1754944e-38, %v6817_v10  ;;  %vm6816_vm13 = vcmp.eq.f32.partialorder %v6815_v31, 8.507059e+37 }
 0x686   :  { %7100 = vst [vmem:[#allocation11 + $0x1d0] sm:$0xf] %v7020_v29  ;;  %v6674_v45 = vmul.f32 %v9275_v35, %v6673_v56 }
 0x688   :  { %v9277_v57 = vpop.eup %9276  ;;  %v6675_v20 = vadd.f32 %v9275_v35, %v6674_v45 }
 0x689   :  { %v9279_v63 = vpop.eup %9278  ;;  %v4795_v51 = vadd.f32 1.0, %v9277_v57 }
 0x68a   :  { %v6679_v36 = vsel %vm6678_vm8, %v9275_v35, %v6675_v20  ;;  %v6807_v49 = vmul.f32 %v9279_v63, %v4786_v46  ;;  %vm6812_vm10 = vweird.f32 %v9279_v63 }
 0x68b   :  { %v6684_v41 = vsel %vm6681_vm9, %v6683_v39, %v6679_v36  ;;  %9280 = vrcp.f32 %v4795_v51  ;;  %vm6813_vm12 = vmor %vm6811_vm11, %vm6812_vm10  ;;  %v6952_v3 = vand.u32 2147483648, %v4795_v51  ;;  %v6950_v59 = vand.u32 2147483647, %v4795_v51 }
 0x68c   :  { %v7025_v22 = vpack.c.bf16 %v6684_v41, %v6684_v41  ;;  %v6808_v15 = vsub.f32 1.0, %v6807_v49  ;;  %vm6946_vm15 = vweird.f32 %v4795_v51 }
 0x68d   :  { %v6953_v6 = vor.u32 1.1754944e-38, %v6952_v3  ;;  %vm6951_vm1 = vcmp.eq.f32.partialorder %v6950_v59, 8.507059e+37 }
 0x68e   :  { %7105 = vst [vmem:[#allocation11 + $0x1f4] sm:$0xf] %v7025_v22  ;;  %v6809_v25 = vmul.f32 %v9279_v63, %v6808_v15 }
 0x690   :  { %v6810_v16 = vadd.f32 %v9279_v63, %v6809_v25 }
 0x691   :  { %v9281_v9 = vpop.eup %9280 }
 0x692   :  { %v6814_v13 = vsel %vm6813_vm12, %v9279_v63, %v6810_v16  ;;  %v6942_v2 = vmul.f32 %v9281_v9, %v4795_v51  ;;  %vm6947_vm14 = vweird.f32 %v9281_v9 }
 0x693   :  { %v6819_v12 = vsel %vm6816_vm13, %v6818_v55, %v6814_v13  ;;  %vm6948_vm0 = vmor %vm6946_vm15, %vm6947_vm14 }
 0x694   :  { %v7030_v27 = vpack.c.bf16 %v6819_v12, %v6819_v12  ;;  %v6943_v50 = vsub.f32 1.0, %v6942_v2 }
 0x696   :  { %7110 = vst [vmem:[#allocation11 + $0x218] sm:$0xf] %v7030_v27  ;;  %v6944_v8 = vmul.f32 %v9281_v9, %v6943_v50 }
 0x698   :  { %v6945_v44 = vadd.f32 %v9281_v9, %v6944_v8 }
 0x69a   :  { %v6949_v5 = vsel %vm6948_vm0, %v9281_v9, %v6945_v44 }
 0x69b   :  { %v6954_v21 = vsel %vm6951_vm1, %v6953_v6, %v6949_v5 }
 0x69c   :  { %v7035_v30 = vpack.c.bf16 %v6954_v21, %v6954_v21 }
 0x69e   :  { %7115 = vst [vmem:[#allocation11 + $0x23c] sm:$0xf] %v7035_v30 }
 0x69f   :  { %7128 = dma.vmem_to_hbm [thread:$0]  %s7121_s1, 9216, %s7123_s16, [#allocation4], %s9444_s15, %s9444_s15, %s9445_s18  }
 0x6a0   :  { %9435 = dma.done.wait [#allocation4], 9216  }
 0x6a1   :  { %9436 = vsyncadd [#allocation4], 4294958080 }
 0x6a2   :  { %7133 = vsyncpa [#allocation3], 1 }
 0x6a3   :  { %7134 = vsyncpa [#allocation6], 1 }
 0x6a4   :  { %7135 = vsyncpa [#allocation9], 1 }
 0x6a5   :  { %7136 = vsyncpa [#allocation4], 1 }

</bundles_post_ra>
